<compile_context>
chip_gen: v7x
topology: tpu7x:2x2x1
jax: 0.10.0
libtpu: 0.0.40
codegen_flags: <defaults>
</compile_context>

<pallas_src>
import functools
import math

import numpy as np
import jax
import jax.numpy as jnp
from jax.experimental import pallas as pl
from jax.experimental.pallas import tpu as pltpu

_LN_EPS = 0.1                                   # nn.LayerNorm(hidden_dim, eps=0.1)
_MIX_W = (3.0 / 20.0, 3.0 / 4.0, 1.0 / 10.0)    # CompositePrior mixture weights

# Closed-form constants for the two fixed CompositePrior mixture components.
_VAR0 = math.exp(0.0) + 1e-08                   # standard N(0, 1)
_VAR2 = math.exp(10.0) + 1e-08                  # wide N(0, e^10)
_C0A = -0.5 / _VAR0
_C0B = -0.5 * math.log(2.0 * math.pi * _VAR0) + math.log(_MIX_W[0])
_C2A = -0.5 / _VAR2
_C2B = -0.5 * math.log(2.0 * math.pi * _VAR2) + math.log(_MIX_W[2])
_LOGW1 = math.log(_MIX_W[1])


# ------------------------- shared math (kernel + reference) ---------------------

def _swish(x):
    return x * jax.nn.sigmoid(x)


def _ln(x, g, b):
    m = jnp.mean(x, axis=-1, keepdims=True)
    v = jnp.mean((x - m) ** 2, axis=-1, keepdims=True)
    return (x - m) * jax.lax.rsqrt(v + _LN_EPS) * g + b


def _log_norm_pdf(x, mu, logvar):
    var = jnp.exp(logvar) + 1e-08
    log_scale = 0.5 * jnp.log(2.0 * math.pi * var)
    return -0.5 * (x - mu) ** 2 / var - log_scale


def _bdot(a, w):
    # bf16-in / f32-accumulate matmul (native single-pass MXU mode).
    return jnp.dot(a.astype(jnp.bfloat16), w.astype(jnp.bfloat16),
                   preferred_element_type=jnp.float32)


# ------------------------------------- Pallas kernel ----------------------------

def _vae_kernel(x_ref,
                w1s_ref, whs_ref, bs_ref, lgs_ref, lbs_ref, wheads_ref, bheads_ref,
                dw_ref, db_ref,
                out_ref, *, batch_total):
    step = pl.program_id(0)
    last = pl.num_programs(0) - 1
    L = wheads_ref.shape[2] // 2   # latent_dim

    x = x_ref[...].astype(jnp.float32)
    # row-wise L2 normalization (eval mode: dropout is identity); EUP reciprocal
    norm = jnp.sqrt(jnp.sum(x * x, axis=-1, keepdims=True)) + 1e-06
    xn16 = (x * pl.reciprocal(norm, approx=True)).astype(jnp.bfloat16)

    def encode(e):
        # one encoder stream e in {0: self.encoder, 1: prior.encoder_old}
        h = _ln(_swish(jnp.dot(xn16, w1s_ref[e], preferred_element_type=jnp.float32)
                       + bs_ref[e, 0:1, :]),
                lgs_ref[e, 0:1, :], lbs_ref[e, 0:1, :])
        hsum = h
        for k in range(1, 5):      # fc2..fc5 with growing residual sums
            pre = (jnp.dot(h.astype(jnp.bfloat16), whs_ref[e, k - 1],
                           preferred_element_type=jnp.float32)
                   + bs_ref[e, k:k + 1, :] + hsum)
            h = _ln(_swish(pre), lgs_ref[e, k:k + 1, :], lbs_ref[e, k:k + 1, :])
            hsum = hsum + h
        # fused mu|logvar head: one (B,H) @ (H,2L) dot, lane-aligned slices after
        heads = (jnp.dot(h.astype(jnp.bfloat16), wheads_ref[e],
                         preferred_element_type=jnp.float32)
                 + bheads_ref[e:e + 1, :])
        mu = heads[:, :L]
        logvar = jnp.clip(heads[:, L:], -6.0, 6.0)
        return mu, logvar

    mu, logvar = encode(0)
    post_mu, post_logvar = encode(1)   # prior's extra [-10,10] clamp is a no-op

    z = mu                             # eval-mode reparameterize
    x_pred = (jnp.dot(z.astype(jnp.bfloat16), dw_ref[...],
                      preferred_element_type=jnp.float32) + db_ref[...])

    # mll partial sum without materializing log_softmax:
    #   sum(log_softmax(x_pred) * x) = sum(x * x_pred) - sum(lse * row_sum(x))
    m = jnp.max(x_pred, axis=-1, keepdims=True)
    lse = m + jnp.log(jnp.sum(jnp.exp(x_pred - m), axis=-1, keepdims=True))
    row_x = jnp.sum(x, axis=-1, keepdims=True)                 # (BB, 1)
    mll_p = jnp.sum(x * x_pred) - jnp.sum(lse * row_x)

    # CompositePrior: constant-parameter Gaussians in closed form
    z2 = z * z
    g0 = _C0A * z2 + _C0B
    g2 = _C2A * z2 + _C2B
    g1 = _log_norm_pdf(z, post_mu, post_logvar) + _LOGW1
    gm = jnp.maximum(jnp.maximum(g0, g1), g2)
    prior_lp = gm + jnp.log(jnp.exp(g0 - gm) + jnp.exp(g1 - gm) + jnp.exp(g2 - gm))

    post_lp = _log_norm_pdf(z, mu, logvar)
    kld_p = jnp.sum(jnp.sum(post_lp - prior_lp, axis=-1, keepdims=True) * row_x)

    # lane-dense (8,128) accumulator block: lane0 = mll sum, lane1 = kld sum
    lane = jax.lax.broadcasted_iota(jnp.int32, out_ref.shape, 1)
    zeros = jnp.zeros(out_ref.shape, jnp.float32)

    @pl.when(step == 0)
    def _():
        out_ref[...] = jnp.zeros_like(out_ref)

    out_ref[...] += (jnp.where(lane == 0, mll_p, zeros)
                     + jnp.where(lane == 1, kld_p, zeros))

    @pl.when(step == last)
    def _():
        acc = out_ref[...]
        # each sum is replicated over the 8 sublanes of its lane -> /8
        inv = 1.0 / (8.0 * batch_total)
        mll = jnp.sum(jnp.where(lane == 0, acc, zeros)) * inv
        kld = jnp.sum(jnp.where(lane == 1, acc, zeros)) * inv
        out_ref[...] = (jnp.where(lane == 0, mll, zeros)
                        + jnp.where(lane == 1, kld, zeros)
                        + jnp.where(lane == 2, -(mll - kld), zeros))


@functools.partial(jax.jit, static_argnames=("batch_block",))
def vae_forward_pallas(x, fused_params, *, batch_block=None):
    """Full VAE.forward(..., calculate_loss=True) in eval mode -> [mll, kld, -elbo].

    By default the whole batch is one grid step (single TensorCore is the common
    case); larger batches can be tiled by setting batch_block, in which case the
    partial sums accumulate into the resident (8,128) output block across an
    'arbitrary' grid axis and are finalized on the last step.
    """
    B, d_in = x.shape
    bb = B if batch_block is None else min(batch_block, B)
    assert B % bb == 0 and bb % 8 == 0, "batch must tile into multiples of 8"
    nblk = B // bb

    # TODO(synk): for realistic MultVAE item counts (~10k-50k items) fc1 and the
    # decoder no longer fit whole-array in VMEM (especially v7x's 64 MiB); add an
    # item-axis grid dimension with <=8-16 MiB weight tiles and an online LSE for
    # the streamed decoder log-softmax.

    def full_spec(a):
        nd = a.ndim
        return pl.BlockSpec(a.shape, lambda i: (0,) * nd)

    kernel = functools.partial(_vae_kernel, batch_total=B)
    out = pl.pallas_call(
        kernel,
        out_shape=jax.ShapeDtypeStruct((8, 128), jnp.float32),
        grid=(nblk,),
        in_specs=[pl.BlockSpec((bb, d_in), lambda i: (i, 0))]
                 + [full_spec(a) for a in fused_params],
        out_specs=pl.BlockSpec((8, 128), lambda i: (0, 0)),
        compiler_params=pltpu.CompilerParams(dimension_semantics=("arbitrary",)),
    )(x, *fused_params)

    return out[0, :3]   # [mll, kld, negative_elbo]


# ------------------------------------- parameter fusion -------------------------

def fuse_params(params):
    """Stack the two encoders along a leading axis; store matmul weights in bf16."""
    enc, enc_old = params[0:9], params[9:18]
    dec_w, dec_b = params[18], params[19]

    def pack(p):
        w1, wh, b, lg, lb, wmu, bmu, wlv, blv = p
        whead = jnp.concatenate([wmu, wlv], axis=1)       # (H, 2L)
        bhead = jnp.concatenate([bmu, blv], axis=1)       # (1, 2L)
        return w1, wh, b, lg, lb, whead, bhead

    e, o = pack(enc), pack(enc_old)
    w1s = jnp.stack([e[0], o[0]]).astype(jnp.bfloat16)     # (2, Din, H)
    whs = jnp.stack([e[1], o[1]]).astype(jnp.bfloat16)     # (2, 4, H, H)
    bs = jnp.stack([e[2], o[2]])                           # (2, 5, H)  f32
    lgs = jnp.stack([e[3], o[3]])                          # (2, 5, H)  f32
    lbs = jnp.stack([e[4], o[4]])                          # (2, 5, H)  f32
    wheads = jnp.stack([e[5], o[5]]).astype(jnp.bfloat16)  # (2, H, 2L)
    bheads = jnp.concatenate([e[6], o[6]], axis=0)         # (2, 2L)    f32
    dec_wb = dec_w.astype(jnp.bfloat16)                    # (L, Din)
    return (w1s, whs, bs, lgs, lbs, wheads, bheads, dec_wb, dec_b)


# ------------------------------------- pure-JAX reference -----------------------
# Same math as the PyTorch module; dots use the same bf16-in/f32-acc precision as
# the kernel so the correctness check is apples-to-apples.

def _encode_ref(xn, w1, wh, b, lg, lb, wmu, bmu, wlv, blv):
    h = _ln(_swish(_bdot(xn, w1) + b[0:1, :]), lg[0:1, :], lb[0:1, :])
    hsum = h
    for k in range(1, 5):
        pre = _bdot(h, wh[k - 1]) + b[k:k + 1, :] + hsum
        h = _ln(_swish(pre), lg[k:k + 1, :], lb[k:k + 1, :])
        hsum = hsum + h
    mu = _bdot(h, wmu) + bmu
    logvar = _bdot(h, wlv) + blv
    return mu, jnp.clip(logvar, -6.0, 6.0)


def _vae_forward_ref(x, enc, enc_old, dec_w, dec_b, gamma=1.0):
    x = x.astype(jnp.float32)
    bsz = x.shape[0]
    xn = x / (jnp.sqrt(jnp.sum(x * x, axis=-1, keepdims=True)) + 1e-06)

    mu, logvar = _encode_ref(xn, *enc)
    z = mu
    x_pred = _bdot(z, dec_w) + dec_b

    m = jnp.max(x_pred, axis=-1, keepdims=True)
    lse = m + jnp.log(jnp.sum(jnp.exp(x_pred - m), axis=-1, keepdims=True))
    log_sm = x_pred - lse
    mll = jnp.sum(jnp.sum(log_sm * x, axis=-1, keepdims=True)) / bsz

    post_mu, post_logvar = _encode_ref(xn, *enc_old)
    post_logvar = jnp.clip(post_logvar, -10.0, 10.0)
    g0 = _log_norm_pdf(z, 0.0, 0.0) + math.log(_MIX_W[0])
    g1 = _log_norm_pdf(z, post_mu, post_logvar) + math.log(_MIX_W[1])
    g2 = _log_norm_pdf(z, 0.0, 10.0) + math.log(_MIX_W[2])
    gm = jnp.maximum(jnp.maximum(g0, g1), g2)
    prior_lp = gm + jnp.log(jnp.exp(g0 - gm) + jnp.exp(g1 - gm) + jnp.exp(g2 - gm))

    post_lp = _log_norm_pdf(z, mu, logvar)
    kl_weight = gamma * jnp.sum(x, axis=-1, keepdims=True)
    kld = jnp.sum(jnp.sum(post_lp - prior_lp, axis=-1, keepdims=True) * kl_weight) / bsz
    return mll, kld, -(mll - kld)


# ------------------------------------- parameter init ---------------------------

def _encoder_params(keys, input_dim, hidden_dim, latent_dim):
    def lin(k, fan_in, shape):
        return (jax.random.normal(k, shape, jnp.float32) / np.sqrt(fan_in)).astype(jnp.float32)

    w1 = lin(keys[0], input_dim, (input_dim, hidden_dim))                       # fc1
    wh = lin(keys[1], hidden_dim, (4, hidden_dim, hidden_dim))                  # fc2..fc5
    b = 0.01 * jax.random.normal(keys[2], (5, hidden_dim), jnp.float32)         # b1..b5
    lg = 1.0 + 0.05 * jax.random.normal(keys[3], (5, hidden_dim), jnp.float32)  # ln gamma
    lb = 0.05 * jax.random.normal(keys[4], (5, hidden_dim), jnp.float32)        # ln beta
    wmu = lin(keys[5], hidden_dim, (hidden_dim, latent_dim))
    bmu = 0.01 * jax.random.normal(keys[6], (1, latent_dim), jnp.float32)
    wlv = lin(keys[7], hidden_dim, (hidden_dim, latent_dim))
    blv = 0.01 * jax.random.normal(keys[8], (1, latent_dim), jnp.float32)
    return (w1, wh, b, lg, lb, wmu, bmu, wlv, blv)


def init_params(key, input_dim, hidden_dim, latent_dim):
    ks = jax.random.split(key, 20)
    enc = _encoder_params(ks[0:9], input_dim, hidden_dim, latent_dim)       # self.encoder
    enc_old = _encoder_params(ks[9:18], input_dim, hidden_dim, latent_dim)  # encoder_old
    dec_w = (jax.random.normal(ks[18], (latent_dim, input_dim), jnp.float32)
             / np.sqrt(latent_dim)).astype(jnp.float32)                     # decoder
    dec_b = 0.01 * jax.random.normal(ks[19], (1, input_dim), jnp.float32)
    return enc + enc_old + (dec_w, dec_b)


# ------------------------------------------ main --------------------------------

if __name__ == "__main__":
    BATCH, INPUT_DIM, HIDDEN_DIM, LATENT_DIM = 64, 256, 128, 128

    key = jax.random.PRNGKey(0)
    kx, kp = jax.random.split(key)

    # user_ratings: implicit-feedback style binary interaction matrix [batch, items]
    user_ratings = (jax.random.uniform(kx, (BATCH, INPUT_DIM)) < 0.2).astype(jnp.float32)
    params = init_params(kp, INPUT_DIM, HIDDEN_DIM, LATENT_DIM)
    fused = fuse_params(params)

    out = jax.block_until_ready(vae_forward_pallas(user_ratings, fused))

    # pure-JAX reference of the same math (unfused weights, same dot precision)
    enc, enc_old = params[0:9], params[9:18]
    dec_w, dec_b = params[18], params[19]
    ref = jnp.stack(_vae_forward_ref(user_ratings, enc, enc_old, dec_w, dec_b))
    np.testing.assert_allclose(np.asarray(out), np.asarray(ref), rtol=5e-3, atol=5e-2)

    print("KERNEL_OK")
</pallas_src>

<mosaic_0001>
module attributes {stable_mosaic.version = 11 : i64} {
  func.func @_vae_kernel(%arg0: i32, %arg1: memref<64x256xf32, #tpu.memory_space<vmem>>, %arg2: memref<2x256x128xbf16, #tpu.memory_space<vmem>>, %arg3: memref<2x4x128x128xbf16, #tpu.memory_space<vmem>>, %arg4: memref<2x5x128xf32, #tpu.memory_space<vmem>>, %arg5: memref<2x5x128xf32, #tpu.memory_space<vmem>>, %arg6: memref<2x5x128xf32, #tpu.memory_space<vmem>>, %arg7: memref<2x128x256xbf16, #tpu.memory_space<vmem>>, %arg8: memref<2x256xf32, #tpu.memory_space<vmem>>, %arg9: memref<128x256xbf16, #tpu.memory_space<vmem>>, %arg10: memref<1x256xf32, #tpu.memory_space<vmem>>, %arg11: memref<8x128xf32, #tpu.memory_space<vmem>>) attributes {dimension_semantics = [#tpu.dimension_semantics<arbitrary>], iteration_bounds = array<i64: 1>, scalar_prefetch = 0 : i64, scratch_operands = 0 : i64, tpu.core_type = #tpu.core_type<tc>, window_params = [{transform_indices = @transform_0, window_bounds = array<i64: 64, 256>}, {pipeline_mode = #tpu.pipeline_mode<synchronous>, transform_indices = @transform_1, window_bounds = array<i64: 2, 256, 128>}, {pipeline_mode = #tpu.pipeline_mode<synchronous>, transform_indices = @transform_2, window_bounds = array<i64: 2, 4, 128, 128>}, {pipeline_mode = #tpu.pipeline_mode<synchronous>, transform_indices = @transform_3, window_bounds = array<i64: 2, 5, 128>}, {pipeline_mode = #tpu.pipeline_mode<synchronous>, transform_indices = @transform_4, window_bounds = array<i64: 2, 5, 128>}, {pipeline_mode = #tpu.pipeline_mode<synchronous>, transform_indices = @transform_5, window_bounds = array<i64: 2, 5, 128>}, {pipeline_mode = #tpu.pipeline_mode<synchronous>, transform_indices = @transform_6, window_bounds = array<i64: 2, 128, 256>}, {pipeline_mode = #tpu.pipeline_mode<synchronous>, transform_indices = @transform_7, window_bounds = array<i64: 2, 256>}, {pipeline_mode = #tpu.pipeline_mode<synchronous>, transform_indices = @transform_8, window_bounds = array<i64: 128, 256>}, {pipeline_mode = #tpu.pipeline_mode<synchronous>, transform_indices = @transform_9, window_bounds = array<i64: 1, 256>}, {pipeline_mode = #tpu.pipeline_mode<synchronous>, transform_indices = @transform_10, window_bounds = array<i64: 8, 128>}]} {
    %c0 = arith.constant 0 : index
    %c0_0 = arith.constant 0 : index
    %0 = vector.load %arg1[%c0, %c0_0] : memref<64x256xf32, #tpu.memory_space<vmem>>, vector<64x256xf32>
    %1 = arith.mulf %0, %0 : vector<64x256xf32>
    %cst = arith.constant dense<0.000000e+00> : vector<64xf32>
    %2 = vector.multi_reduction <add>, %1, %cst [1] : vector<64x256xf32> to vector<64xf32>
    %3 = vector.shape_cast %2 : vector<64xf32> to vector<64x1xf32>
    %4 = math.sqrt %3 : vector<64x1xf32>
    %cst_1 = arith.constant 9.99999997E-7 : f32
    %5 = vector.broadcast %cst_1 : f32 to vector<64x1xf32>
    %6 = arith.addf %4, %5 : vector<64x1xf32>
    %7 = tpu.reciprocal %6 {approx = true} : vector<64x1xf32> -> vector<64x1xf32>
    %8 = vector.broadcast %7 : vector<64x1xf32> to vector<64x256xf32>
    %9 = arith.mulf %0, %8 : vector<64x256xf32>
    %10 = arith.truncf %9 : vector<64x256xf32> to vector<64x256xbf16>
    %c0_2 = arith.constant 0 : index
    %c0_3 = arith.constant 0 : index
    %c0_4 = arith.constant 0 : index
    %11 = vector.load %arg2[%c0_2, %c0_3, %c0_4] : memref<2x256x128xbf16, #tpu.memory_space<vmem>>, vector<1x256x128xbf16>
    %12 = vector.shape_cast %11 : vector<1x256x128xbf16> to vector<256x128xbf16>
    %cst_5 = arith.constant dense<0.000000e+00> : vector<64x128xf32>
    %13 = tpu.matmul %10, %12, %cst_5 {dimension_numbers = #tpu.dot_dimension_numbers<[1], [0], [0], [1], [0, 0, 1, 1], [], []>} : vector<64x256xbf16>, vector<256x128xbf16>, vector<64x128xf32> -> vector<64x128xf32>
    %c0_6 = arith.constant 0 : index
    %c0_7 = arith.constant 0 : index
    %c0_8 = arith.constant 0 : index
    %14 = vector.load %arg4[%c0_6, %c0_7, %c0_8] : memref<2x5x128xf32, #tpu.memory_space<vmem>>, vector<1x1x128xf32>
    %15 = vector.shape_cast %14 : vector<1x1x128xf32> to vector<1x128xf32>
    %16 = vector.broadcast %15 : vector<1x128xf32> to vector<64x128xf32>
    %17 = arith.addf %13, %16 : vector<64x128xf32>
    %18 = arith.negf %17 : vector<64x128xf32>
    %19 = math.exp %18 : vector<64x128xf32>
    %cst_9 = arith.constant 1.000000e+00 : f32
    %20 = vector.broadcast %cst_9 : f32 to vector<64x128xf32>
    %21 = arith.addf %20, %19 : vector<64x128xf32>
    %22 = arith.divf %20, %21 : vector<64x128xf32>
    %23 = arith.mulf %17, %22 : vector<64x128xf32>
    %c0_10 = arith.constant 0 : index
    %c0_11 = arith.constant 0 : index
    %c0_12 = arith.constant 0 : index
    %24 = vector.load %arg5[%c0_10, %c0_11, %c0_12] : memref<2x5x128xf32, #tpu.memory_space<vmem>>, vector<1x1x128xf32>
    %25 = vector.shape_cast %24 : vector<1x1x128xf32> to vector<1x128xf32>
    %c0_13 = arith.constant 0 : index
    %c0_14 = arith.constant 0 : index
    %c0_15 = arith.constant 0 : index
    %26 = vector.load %arg6[%c0_13, %c0_14, %c0_15] : memref<2x5x128xf32, #tpu.memory_space<vmem>>, vector<1x1x128xf32>
    %27 = vector.shape_cast %26 : vector<1x1x128xf32> to vector<1x128xf32>
    %cst_16 = arith.constant dense<0.000000e+00> : vector<64xf32>
    %28 = vector.multi_reduction <add>, %23, %cst_16 [1] : vector<64x128xf32> to vector<64xf32>
    %29 = vector.shape_cast %28 : vector<64xf32> to vector<64x1xf32>
    %cst_17 = arith.constant 1.280000e+02 : f32
    %30 = vector.broadcast %cst_17 : f32 to vector<64x1xf32>
    %31 = arith.divf %29, %30 : vector<64x1xf32>
    %32 = vector.broadcast %31 : vector<64x1xf32> to vector<64x128xf32>
    %33 = arith.subf %23, %32 : vector<64x128xf32>
    %34 = arith.mulf %33, %33 : vector<64x128xf32>
    %cst_18 = arith.constant dense<0.000000e+00> : vector<64xf32>
    %35 = vector.multi_reduction <add>, %34, %cst_18 [1] : vector<64x128xf32> to vector<64xf32>
    %36 = vector.shape_cast %35 : vector<64xf32> to vector<64x1xf32>
    %cst_19 = arith.constant 1.280000e+02 : f32
    %37 = vector.broadcast %cst_19 : f32 to vector<64x1xf32>
    %38 = arith.divf %36, %37 : vector<64x1xf32>
    %39 = vector.broadcast %31 : vector<64x1xf32> to vector<64x128xf32>
    %40 = arith.subf %23, %39 : vector<64x128xf32>
    %cst_20 = arith.constant 1.000000e-01 : f32
    %41 = vector.broadcast %cst_20 : f32 to vector<64x1xf32>
    %42 = arith.addf %38, %41 : vector<64x1xf32>
    %43 = math.rsqrt %42 : vector<64x1xf32>
    %44 = vector.broadcast %43 : vector<64x1xf32> to vector<64x128xf32>
    %45 = arith.mulf %40, %44 : vector<64x128xf32>
    %46 = vector.broadcast %25 : vector<1x128xf32> to vector<64x128xf32>
    %47 = arith.mulf %45, %46 : vector<64x128xf32>
    %48 = vector.broadcast %27 : vector<1x128xf32> to vector<64x128xf32>
    %49 = arith.addf %47, %48 : vector<64x128xf32>
    %50 = arith.truncf %49 : vector<64x128xf32> to vector<64x128xbf16>
    %c0_21 = arith.constant 0 : index
    %c0_22 = arith.constant 0 : index
    %c0_23 = arith.constant 0 : index
    %c0_24 = arith.constant 0 : index
    %51 = vector.load %arg3[%c0_21, %c0_22, %c0_23, %c0_24] : memref<2x4x128x128xbf16, #tpu.memory_space<vmem>>, vector<1x1x128x128xbf16>
    %52 = vector.shape_cast %51 : vector<1x1x128x128xbf16> to vector<128x128xbf16>
    %cst_25 = arith.constant dense<0.000000e+00> : vector<64x128xf32>
    %53 = tpu.matmul %50, %52, %cst_25 {dimension_numbers = #tpu.dot_dimension_numbers<[1], [0], [0], [1], [0, 0, 1, 1], [], []>} : vector<64x128xbf16>, vector<128x128xbf16>, vector<64x128xf32> -> vector<64x128xf32>
    %c0_26 = arith.constant 0 : index
    %c1 = arith.constant 1 : index
    %c0_27 = arith.constant 0 : index
    %54 = vector.load %arg4[%c0_26, %c1, %c0_27] : memref<2x5x128xf32, #tpu.memory_space<vmem>>, vector<1x1x128xf32>
    %55 = vector.shape_cast %54 : vector<1x1x128xf32> to vector<1x128xf32>
    %56 = vector.broadcast %55 : vector<1x128xf32> to vector<64x128xf32>
    %57 = arith.addf %53, %56 : vector<64x128xf32>
    %58 = arith.addf %57, %49 : vector<64x128xf32>
    %59 = arith.negf %58 : vector<64x128xf32>
    %60 = math.exp %59 : vector<64x128xf32>
    %cst_28 = arith.constant 1.000000e+00 : f32
    %61 = vector.broadcast %cst_28 : f32 to vector<64x128xf32>
    %62 = arith.addf %61, %60 : vector<64x128xf32>
    %63 = arith.divf %61, %62 : vector<64x128xf32>
    %64 = arith.mulf %58, %63 : vector<64x128xf32>
    %c0_29 = arith.constant 0 : index
    %c1_30 = arith.constant 1 : index
    %c0_31 = arith.constant 0 : index
    %65 = vector.load %arg5[%c0_29, %c1_30, %c0_31] : memref<2x5x128xf32, #tpu.memory_space<vmem>>, vector<1x1x128xf32>
    %66 = vector.shape_cast %65 : vector<1x1x128xf32> to vector<1x128xf32>
    %c0_32 = arith.constant 0 : index
    %c1_33 = arith.constant 1 : index
    %c0_34 = arith.constant 0 : index
    %67 = vector.load %arg6[%c0_32, %c1_33, %c0_34] : memref<2x5x128xf32, #tpu.memory_space<vmem>>, vector<1x1x128xf32>
    %68 = vector.shape_cast %67 : vector<1x1x128xf32> to vector<1x128xf32>
    %cst_35 = arith.constant dense<0.000000e+00> : vector<64xf32>
    %69 = vector.multi_reduction <add>, %64, %cst_35 [1] : vector<64x128xf32> to vector<64xf32>
    %70 = vector.shape_cast %69 : vector<64xf32> to vector<64x1xf32>
    %cst_36 = arith.constant 1.280000e+02 : f32
    %71 = vector.broadcast %cst_36 : f32 to vector<64x1xf32>
    %72 = arith.divf %70, %71 : vector<64x1xf32>
    %73 = vector.broadcast %72 : vector<64x1xf32> to vector<64x128xf32>
    %74 = arith.subf %64, %73 : vector<64x128xf32>
    %75 = arith.mulf %74, %74 : vector<64x128xf32>
    %cst_37 = arith.constant dense<0.000000e+00> : vector<64xf32>
    %76 = vector.multi_reduction <add>, %75, %cst_37 [1] : vector<64x128xf32> to vector<64xf32>
    %77 = vector.shape_cast %76 : vector<64xf32> to vector<64x1xf32>
    %cst_38 = arith.constant 1.280000e+02 : f32
    %78 = vector.broadcast %cst_38 : f32 to vector<64x1xf32>
    %79 = arith.divf %77, %78 : vector<64x1xf32>
    %80 = vector.broadcast %72 : vector<64x1xf32> to vector<64x128xf32>
    %81 = arith.subf %64, %80 : vector<64x128xf32>
    %cst_39 = arith.constant 1.000000e-01 : f32
    %82 = vector.broadcast %cst_39 : f32 to vector<64x1xf32>
    %83 = arith.addf %79, %82 : vector<64x1xf32>
    %84 = math.rsqrt %83 : vector<64x1xf32>
    %85 = vector.broadcast %84 : vector<64x1xf32> to vector<64x128xf32>
    %86 = arith.mulf %81, %85 : vector<64x128xf32>
    %87 = vector.broadcast %66 : vector<1x128xf32> to vector<64x128xf32>
    %88 = arith.mulf %86, %87 : vector<64x128xf32>
    %89 = vector.broadcast %68 : vector<1x128xf32> to vector<64x128xf32>
    %90 = arith.addf %88, %89 : vector<64x128xf32>
    %91 = arith.addf %49, %90 : vector<64x128xf32>
    %92 = arith.truncf %90 : vector<64x128xf32> to vector<64x128xbf16>
    %c0_40 = arith.constant 0 : index
    %c1_41 = arith.constant 1 : index
    %c0_42 = arith.constant 0 : index
    %c0_43 = arith.constant 0 : index
    %93 = vector.load %arg3[%c0_40, %c1_41, %c0_42, %c0_43] : memref<2x4x128x128xbf16, #tpu.memory_space<vmem>>, vector<1x1x128x128xbf16>
    %94 = vector.shape_cast %93 : vector<1x1x128x128xbf16> to vector<128x128xbf16>
    %cst_44 = arith.constant dense<0.000000e+00> : vector<64x128xf32>
    %95 = tpu.matmul %92, %94, %cst_44 {dimension_numbers = #tpu.dot_dimension_numbers<[1], [0], [0], [1], [0, 0, 1, 1], [], []>} : vector<64x128xbf16>, vector<128x128xbf16>, vector<64x128xf32> -> vector<64x128xf32>
    %c0_45 = arith.constant 0 : index
    %c2 = arith.constant 2 : index
    %c0_46 = arith.constant 0 : index
    %96 = vector.load %arg4[%c0_45, %c2, %c0_46] : memref<2x5x128xf32, #tpu.memory_space<vmem>>, vector<1x1x128xf32>
    %97 = vector.shape_cast %96 : vector<1x1x128xf32> to vector<1x128xf32>
    %98 = vector.broadcast %97 : vector<1x128xf32> to vector<64x128xf32>
    %99 = arith.addf %95, %98 : vector<64x128xf32>
    %100 = arith.addf %99, %91 : vector<64x128xf32>
    %101 = arith.negf %100 : vector<64x128xf32>
    %102 = math.exp %101 : vector<64x128xf32>
    %cst_47 = arith.constant 1.000000e+00 : f32
    %103 = vector.broadcast %cst_47 : f32 to vector<64x128xf32>
    %104 = arith.addf %103, %102 : vector<64x128xf32>
    %105 = arith.divf %103, %104 : vector<64x128xf32>
    %106 = arith.mulf %100, %105 : vector<64x128xf32>
    %c0_48 = arith.constant 0 : index
    %c2_49 = arith.constant 2 : index
    %c0_50 = arith.constant 0 : index
    %107 = vector.load %arg5[%c0_48, %c2_49, %c0_50] : memref<2x5x128xf32, #tpu.memory_space<vmem>>, vector<1x1x128xf32>
    %108 = vector.shape_cast %107 : vector<1x1x128xf32> to vector<1x128xf32>
    %c0_51 = arith.constant 0 : index
    %c2_52 = arith.constant 2 : index
    %c0_53 = arith.constant 0 : index
    %109 = vector.load %arg6[%c0_51, %c2_52, %c0_53] : memref<2x5x128xf32, #tpu.memory_space<vmem>>, vector<1x1x128xf32>
    %110 = vector.shape_cast %109 : vector<1x1x128xf32> to vector<1x128xf32>
    %cst_54 = arith.constant dense<0.000000e+00> : vector<64xf32>
    %111 = vector.multi_reduction <add>, %106, %cst_54 [1] : vector<64x128xf32> to vector<64xf32>
    %112 = vector.shape_cast %111 : vector<64xf32> to vector<64x1xf32>
    %cst_55 = arith.constant 1.280000e+02 : f32
    %113 = vector.broadcast %cst_55 : f32 to vector<64x1xf32>
    %114 = arith.divf %112, %113 : vector<64x1xf32>
    %115 = vector.broadcast %114 : vector<64x1xf32> to vector<64x128xf32>
    %116 = arith.subf %106, %115 : vector<64x128xf32>
    %117 = arith.mulf %116, %116 : vector<64x128xf32>
    %cst_56 = arith.constant dense<0.000000e+00> : vector<64xf32>
    %118 = vector.multi_reduction <add>, %117, %cst_56 [1] : vector<64x128xf32> to vector<64xf32>
    %119 = vector.shape_cast %118 : vector<64xf32> to vector<64x1xf32>
    %cst_57 = arith.constant 1.280000e+02 : f32
    %120 = vector.broadcast %cst_57 : f32 to vector<64x1xf32>
    %121 = arith.divf %119, %120 : vector<64x1xf32>
    %122 = vector.broadcast %114 : vector<64x1xf32> to vector<64x128xf32>
    %123 = arith.subf %106, %122 : vector<64x128xf32>
    %cst_58 = arith.constant 1.000000e-01 : f32
    %124 = vector.broadcast %cst_58 : f32 to vector<64x1xf32>
    %125 = arith.addf %121, %124 : vector<64x1xf32>
    %126 = math.rsqrt %125 : vector<64x1xf32>
    %127 = vector.broadcast %126 : vector<64x1xf32> to vector<64x128xf32>
    %128 = arith.mulf %123, %127 : vector<64x128xf32>
    %129 = vector.broadcast %108 : vector<1x128xf32> to vector<64x128xf32>
    %130 = arith.mulf %128, %129 : vector<64x128xf32>
    %131 = vector.broadcast %110 : vector<1x128xf32> to vector<64x128xf32>
    %132 = arith.addf %130, %131 : vector<64x128xf32>
    %133 = arith.addf %91, %132 : vector<64x128xf32>
    %134 = arith.truncf %132 : vector<64x128xf32> to vector<64x128xbf16>
    %c0_59 = arith.constant 0 : index
    %c2_60 = arith.constant 2 : index
    %c0_61 = arith.constant 0 : index
    %c0_62 = arith.constant 0 : index
    %135 = vector.load %arg3[%c0_59, %c2_60, %c0_61, %c0_62] : memref<2x4x128x128xbf16, #tpu.memory_space<vmem>>, vector<1x1x128x128xbf16>
    %136 = vector.shape_cast %135 : vector<1x1x128x128xbf16> to vector<128x128xbf16>
    %cst_63 = arith.constant dense<0.000000e+00> : vector<64x128xf32>
    %137 = tpu.matmul %134, %136, %cst_63 {dimension_numbers = #tpu.dot_dimension_numbers<[1], [0], [0], [1], [0, 0, 1, 1], [], []>} : vector<64x128xbf16>, vector<128x128xbf16>, vector<64x128xf32> -> vector<64x128xf32>
    %c0_64 = arith.constant 0 : index
    %c3 = arith.constant 3 : index
    %c0_65 = arith.constant 0 : index
    %138 = vector.load %arg4[%c0_64, %c3, %c0_65] : memref<2x5x128xf32, #tpu.memory_space<vmem>>, vector<1x1x128xf32>
    %139 = vector.shape_cast %138 : vector<1x1x128xf32> to vector<1x128xf32>
    %140 = vector.broadcast %139 : vector<1x128xf32> to vector<64x128xf32>
    %141 = arith.addf %137, %140 : vector<64x128xf32>
    %142 = arith.addf %141, %133 : vector<64x128xf32>
    %143 = arith.negf %142 : vector<64x128xf32>
    %144 = math.exp %143 : vector<64x128xf32>
    %cst_66 = arith.constant 1.000000e+00 : f32
    %145 = vector.broadcast %cst_66 : f32 to vector<64x128xf32>
    %146 = arith.addf %145, %144 : vector<64x128xf32>
    %147 = arith.divf %145, %146 : vector<64x128xf32>
    %148 = arith.mulf %142, %147 : vector<64x128xf32>
    %c0_67 = arith.constant 0 : index
    %c3_68 = arith.constant 3 : index
    %c0_69 = arith.constant 0 : index
    %149 = vector.load %arg5[%c0_67, %c3_68, %c0_69] : memref<2x5x128xf32, #tpu.memory_space<vmem>>, vector<1x1x128xf32>
    %150 = vector.shape_cast %149 : vector<1x1x128xf32> to vector<1x128xf32>
    %c0_70 = arith.constant 0 : index
    %c3_71 = arith.constant 3 : index
    %c0_72 = arith.constant 0 : index
    %151 = vector.load %arg6[%c0_70, %c3_71, %c0_72] : memref<2x5x128xf32, #tpu.memory_space<vmem>>, vector<1x1x128xf32>
    %152 = vector.shape_cast %151 : vector<1x1x128xf32> to vector<1x128xf32>
    %cst_73 = arith.constant dense<0.000000e+00> : vector<64xf32>
    %153 = vector.multi_reduction <add>, %148, %cst_73 [1] : vector<64x128xf32> to vector<64xf32>
    %154 = vector.shape_cast %153 : vector<64xf32> to vector<64x1xf32>
    %cst_74 = arith.constant 1.280000e+02 : f32
    %155 = vector.broadcast %cst_74 : f32 to vector<64x1xf32>
    %156 = arith.divf %154, %155 : vector<64x1xf32>
    %157 = vector.broadcast %156 : vector<64x1xf32> to vector<64x128xf32>
    %158 = arith.subf %148, %157 : vector<64x128xf32>
    %159 = arith.mulf %158, %158 : vector<64x128xf32>
    %cst_75 = arith.constant dense<0.000000e+00> : vector<64xf32>
    %160 = vector.multi_reduction <add>, %159, %cst_75 [1] : vector<64x128xf32> to vector<64xf32>
    %161 = vector.shape_cast %160 : vector<64xf32> to vector<64x1xf32>
    %cst_76 = arith.constant 1.280000e+02 : f32
    %162 = vector.broadcast %cst_76 : f32 to vector<64x1xf32>
    %163 = arith.divf %161, %162 : vector<64x1xf32>
    %164 = vector.broadcast %156 : vector<64x1xf32> to vector<64x128xf32>
    %165 = arith.subf %148, %164 : vector<64x128xf32>
    %cst_77 = arith.constant 1.000000e-01 : f32
    %166 = vector.broadcast %cst_77 : f32 to vector<64x1xf32>
    %167 = arith.addf %163, %166 : vector<64x1xf32>
    %168 = math.rsqrt %167 : vector<64x1xf32>
    %169 = vector.broadcast %168 : vector<64x1xf32> to vector<64x128xf32>
    %170 = arith.mulf %165, %169 : vector<64x128xf32>
    %171 = vector.broadcast %150 : vector<1x128xf32> to vector<64x128xf32>
    %172 = arith.mulf %170, %171 : vector<64x128xf32>
    %173 = vector.broadcast %152 : vector<1x128xf32> to vector<64x128xf32>
    %174 = arith.addf %172, %173 : vector<64x128xf32>
    %175 = arith.addf %133, %174 : vector<64x128xf32>
    %176 = arith.truncf %174 : vector<64x128xf32> to vector<64x128xbf16>
    %c0_78 = arith.constant 0 : index
    %c3_79 = arith.constant 3 : index
    %c0_80 = arith.constant 0 : index
    %c0_81 = arith.constant 0 : index
    %177 = vector.load %arg3[%c0_78, %c3_79, %c0_80, %c0_81] : memref<2x4x128x128xbf16, #tpu.memory_space<vmem>>, vector<1x1x128x128xbf16>
    %178 = vector.shape_cast %177 : vector<1x1x128x128xbf16> to vector<128x128xbf16>
    %cst_82 = arith.constant dense<0.000000e+00> : vector<64x128xf32>
    %179 = tpu.matmul %176, %178, %cst_82 {dimension_numbers = #tpu.dot_dimension_numbers<[1], [0], [0], [1], [0, 0, 1, 1], [], []>} : vector<64x128xbf16>, vector<128x128xbf16>, vector<64x128xf32> -> vector<64x128xf32>
    %c0_83 = arith.constant 0 : index
    %c4 = arith.constant 4 : index
    %c0_84 = arith.constant 0 : index
    %180 = vector.load %arg4[%c0_83, %c4, %c0_84] : memref<2x5x128xf32, #tpu.memory_space<vmem>>, vector<1x1x128xf32>
    %181 = vector.shape_cast %180 : vector<1x1x128xf32> to vector<1x128xf32>
    %182 = vector.broadcast %181 : vector<1x128xf32> to vector<64x128xf32>
    %183 = arith.addf %179, %182 : vector<64x128xf32>
    %184 = arith.addf %183, %175 : vector<64x128xf32>
    %185 = arith.negf %184 : vector<64x128xf32>
    %186 = math.exp %185 : vector<64x128xf32>
    %cst_85 = arith.constant 1.000000e+00 : f32
    %187 = vector.broadcast %cst_85 : f32 to vector<64x128xf32>
    %188 = arith.addf %187, %186 : vector<64x128xf32>
    %189 = arith.divf %187, %188 : vector<64x128xf32>
    %190 = arith.mulf %184, %189 : vector<64x128xf32>
    %c0_86 = arith.constant 0 : index
    %c4_87 = arith.constant 4 : index
    %c0_88 = arith.constant 0 : index
    %191 = vector.load %arg5[%c0_86, %c4_87, %c0_88] : memref<2x5x128xf32, #tpu.memory_space<vmem>>, vector<1x1x128xf32>
    %192 = vector.shape_cast %191 : vector<1x1x128xf32> to vector<1x128xf32>
    %c0_89 = arith.constant 0 : index
    %c4_90 = arith.constant 4 : index
    %c0_91 = arith.constant 0 : index
    %193 = vector.load %arg6[%c0_89, %c4_90, %c0_91] : memref<2x5x128xf32, #tpu.memory_space<vmem>>, vector<1x1x128xf32>
    %194 = vector.shape_cast %193 : vector<1x1x128xf32> to vector<1x128xf32>
    %cst_92 = arith.constant dense<0.000000e+00> : vector<64xf32>
    %195 = vector.multi_reduction <add>, %190, %cst_92 [1] : vector<64x128xf32> to vector<64xf32>
    %196 = vector.shape_cast %195 : vector<64xf32> to vector<64x1xf32>
    %cst_93 = arith.constant 1.280000e+02 : f32
    %197 = vector.broadcast %cst_93 : f32 to vector<64x1xf32>
    %198 = arith.divf %196, %197 : vector<64x1xf32>
    %199 = vector.broadcast %198 : vector<64x1xf32> to vector<64x128xf32>
    %200 = arith.subf %190, %199 : vector<64x128xf32>
    %201 = arith.mulf %200, %200 : vector<64x128xf32>
    %cst_94 = arith.constant dense<0.000000e+00> : vector<64xf32>
    %202 = vector.multi_reduction <add>, %201, %cst_94 [1] : vector<64x128xf32> to vector<64xf32>
    %203 = vector.shape_cast %202 : vector<64xf32> to vector<64x1xf32>
    %cst_95 = arith.constant 1.280000e+02 : f32
    %204 = vector.broadcast %cst_95 : f32 to vector<64x1xf32>
    %205 = arith.divf %203, %204 : vector<64x1xf32>
    %206 = vector.broadcast %198 : vector<64x1xf32> to vector<64x128xf32>
    %207 = arith.subf %190, %206 : vector<64x128xf32>
    %cst_96 = arith.constant 1.000000e-01 : f32
    %208 = vector.broadcast %cst_96 : f32 to vector<64x1xf32>
    %209 = arith.addf %205, %208 : vector<64x1xf32>
    %210 = math.rsqrt %209 : vector<64x1xf32>
    %211 = vector.broadcast %210 : vector<64x1xf32> to vector<64x128xf32>
    %212 = arith.mulf %207, %211 : vector<64x128xf32>
    %213 = vector.broadcast %192 : vector<1x128xf32> to vector<64x128xf32>
    %214 = arith.mulf %212, %213 : vector<64x128xf32>
    %215 = vector.broadcast %194 : vector<1x128xf32> to vector<64x128xf32>
    %216 = arith.addf %214, %215 : vector<64x128xf32>
    %217 = arith.truncf %216 : vector<64x128xf32> to vector<64x128xbf16>
    %c0_97 = arith.constant 0 : index
    %c0_98 = arith.constant 0 : index
    %c0_99 = arith.constant 0 : index
    %218 = vector.load %arg7[%c0_97, %c0_98, %c0_99] : memref<2x128x256xbf16, #tpu.memory_space<vmem>>, vector<1x128x256xbf16>
    %219 = vector.shape_cast %218 : vector<1x128x256xbf16> to vector<128x256xbf16>
    %cst_100 = arith.constant dense<0.000000e+00> : vector<64x256xf32>
    %220 = tpu.matmul %217, %219, %cst_100 {dimension_numbers = #tpu.dot_dimension_numbers<[1], [0], [0], [1], [0, 0, 1, 1], [], []>} : vector<64x128xbf16>, vector<128x256xbf16>, vector<64x256xf32> -> vector<64x256xf32>
    %c0_101 = arith.constant 0 : index
    %c0_102 = arith.constant 0 : index
    %221 = vector.load %arg8[%c0_101, %c0_102] : memref<2x256xf32, #tpu.memory_space<vmem>>, vector<1x256xf32>
    %222 = vector.broadcast %221 : vector<1x256xf32> to vector<64x256xf32>
    %223 = arith.addf %220, %222 : vector<64x256xf32>
    %224 = vector.extract_strided_slice %223 {offsets = [0, 0], sizes = [64, 128], strides = [1, 1]} : vector<64x256xf32> to vector<64x128xf32>
    %225 = vector.extract_strided_slice %223 {offsets = [0, 128], sizes = [64, 128], strides = [1, 1]} : vector<64x256xf32> to vector<64x128xf32>
    %cst_103 = arith.constant -6.000000e+00 : f32
    %cst_104 = arith.constant 6.000000e+00 : f32
    %226 = vector.broadcast %cst_103 : f32 to vector<64x128xf32>
    %227 = arith.maximumf %226, %225 : vector<64x128xf32>
    %228 = vector.broadcast %cst_104 : f32 to vector<64x128xf32>
    %229 = arith.minimumf %228, %227 : vector<64x128xf32>
    %c1_105 = arith.constant 1 : index
    %c0_106 = arith.constant 0 : index
    %c0_107 = arith.constant 0 : index
    %230 = vector.load %arg2[%c1_105, %c0_106, %c0_107] : memref<2x256x128xbf16, #tpu.memory_space<vmem>>, vector<1x256x128xbf16>
    %231 = vector.shape_cast %230 : vector<1x256x128xbf16> to vector<256x128xbf16>
    %cst_108 = arith.constant dense<0.000000e+00> : vector<64x128xf32>
    %232 = tpu.matmul %10, %231, %cst_108 {dimension_numbers = #tpu.dot_dimension_numbers<[1], [0], [0], [1], [0, 0, 1, 1], [], []>} : vector<64x256xbf16>, vector<256x128xbf16>, vector<64x128xf32> -> vector<64x128xf32>
    %c1_109 = arith.constant 1 : index
    %c0_110 = arith.constant 0 : index
    %c0_111 = arith.constant 0 : index
    %233 = vector.load %arg4[%c1_109, %c0_110, %c0_111] : memref<2x5x128xf32, #tpu.memory_space<vmem>>, vector<1x1x128xf32>
    %234 = vector.shape_cast %233 : vector<1x1x128xf32> to vector<1x128xf32>
    %235 = vector.broadcast %234 : vector<1x128xf32> to vector<64x128xf32>
    %236 = arith.addf %232, %235 : vector<64x128xf32>
    %237 = arith.negf %236 : vector<64x128xf32>
    %238 = math.exp %237 : vector<64x128xf32>
    %cst_112 = arith.constant 1.000000e+00 : f32
    %239 = vector.broadcast %cst_112 : f32 to vector<64x128xf32>
    %240 = arith.addf %239, %238 : vector<64x128xf32>
    %241 = arith.divf %239, %240 : vector<64x128xf32>
    %242 = arith.mulf %236, %241 : vector<64x128xf32>
    %c1_113 = arith.constant 1 : index
    %c0_114 = arith.constant 0 : index
    %c0_115 = arith.constant 0 : index
    %243 = vector.load %arg5[%c1_113, %c0_114, %c0_115] : memref<2x5x128xf32, #tpu.memory_space<vmem>>, vector<1x1x128xf32>
    %244 = vector.shape_cast %243 : vector<1x1x128xf32> to vector<1x128xf32>
    %c1_116 = arith.constant 1 : index
    %c0_117 = arith.constant 0 : index
    %c0_118 = arith.constant 0 : index
    %245 = vector.load %arg6[%c1_116, %c0_117, %c0_118] : memref<2x5x128xf32, #tpu.memory_space<vmem>>, vector<1x1x128xf32>
    %246 = vector.shape_cast %245 : vector<1x1x128xf32> to vector<1x128xf32>
    %cst_119 = arith.constant dense<0.000000e+00> : vector<64xf32>
    %247 = vector.multi_reduction <add>, %242, %cst_119 [1] : vector<64x128xf32> to vector<64xf32>
    %248 = vector.shape_cast %247 : vector<64xf32> to vector<64x1xf32>
    %cst_120 = arith.constant 1.280000e+02 : f32
    %249 = vector.broadcast %cst_120 : f32 to vector<64x1xf32>
    %250 = arith.divf %248, %249 : vector<64x1xf32>
    %251 = vector.broadcast %250 : vector<64x1xf32> to vector<64x128xf32>
    %252 = arith.subf %242, %251 : vector<64x128xf32>
    %253 = arith.mulf %252, %252 : vector<64x128xf32>
    %cst_121 = arith.constant dense<0.000000e+00> : vector<64xf32>
    %254 = vector.multi_reduction <add>, %253, %cst_121 [1] : vector<64x128xf32> to vector<64xf32>
    %255 = vector.shape_cast %254 : vector<64xf32> to vector<64x1xf32>
    %cst_122 = arith.constant 1.280000e+02 : f32
    %256 = vector.broadcast %cst_122 : f32 to vector<64x1xf32>
    %257 = arith.divf %255, %256 : vector<64x1xf32>
    %258 = vector.broadcast %250 : vector<64x1xf32> to vector<64x128xf32>
    %259 = arith.subf %242, %258 : vector<64x128xf32>
    %cst_123 = arith.constant 1.000000e-01 : f32
    %260 = vector.broadcast %cst_123 : f32 to vector<64x1xf32>
    %261 = arith.addf %257, %260 : vector<64x1xf32>
    %262 = math.rsqrt %261 : vector<64x1xf32>
    %263 = vector.broadcast %262 : vector<64x1xf32> to vector<64x128xf32>
    %264 = arith.mulf %259, %263 : vector<64x128xf32>
    %265 = vector.broadcast %244 : vector<1x128xf32> to vector<64x128xf32>
    %266 = arith.mulf %264, %265 : vector<64x128xf32>
    %267 = vector.broadcast %246 : vector<1x128xf32> to vector<64x128xf32>
    %268 = arith.addf %266, %267 : vector<64x128xf32>
    %269 = arith.truncf %268 : vector<64x128xf32> to vector<64x128xbf16>
    %c1_124 = arith.constant 1 : index
    %c0_125 = arith.constant 0 : index
    %c0_126 = arith.constant 0 : index
    %c0_127 = arith.constant 0 : index
    %270 = vector.load %arg3[%c1_124, %c0_125, %c0_126, %c0_127] : memref<2x4x128x128xbf16, #tpu.memory_space<vmem>>, vector<1x1x128x128xbf16>
    %271 = vector.shape_cast %270 : vector<1x1x128x128xbf16> to vector<128x128xbf16>
    %cst_128 = arith.constant dense<0.000000e+00> : vector<64x128xf32>
    %272 = tpu.matmul %269, %271, %cst_128 {dimension_numbers = #tpu.dot_dimension_numbers<[1], [0], [0], [1], [0, 0, 1, 1], [], []>} : vector<64x128xbf16>, vector<128x128xbf16>, vector<64x128xf32> -> vector<64x128xf32>
    %c1_129 = arith.constant 1 : index
    %c1_130 = arith.constant 1 : index
    %c0_131 = arith.constant 0 : index
    %273 = vector.load %arg4[%c1_129, %c1_130, %c0_131] : memref<2x5x128xf32, #tpu.memory_space<vmem>>, vector<1x1x128xf32>
    %274 = vector.shape_cast %273 : vector<1x1x128xf32> to vector<1x128xf32>
    %275 = vector.broadcast %274 : vector<1x128xf32> to vector<64x128xf32>
    %276 = arith.addf %272, %275 : vector<64x128xf32>
    %277 = arith.addf %276, %268 : vector<64x128xf32>
    %278 = arith.negf %277 : vector<64x128xf32>
    %279 = math.exp %278 : vector<64x128xf32>
    %cst_132 = arith.constant 1.000000e+00 : f32
    %280 = vector.broadcast %cst_132 : f32 to vector<64x128xf32>
    %281 = arith.addf %280, %279 : vector<64x128xf32>
    %282 = arith.divf %280, %281 : vector<64x128xf32>
    %283 = arith.mulf %277, %282 : vector<64x128xf32>
    %c1_133 = arith.constant 1 : index
    %c1_134 = arith.constant 1 : index
    %c0_135 = arith.constant 0 : index
    %284 = vector.load %arg5[%c1_133, %c1_134, %c0_135] : memref<2x5x128xf32, #tpu.memory_space<vmem>>, vector<1x1x128xf32>
    %285 = vector.shape_cast %284 : vector<1x1x128xf32> to vector<1x128xf32>
    %c1_136 = arith.constant 1 : index
    %c1_137 = arith.constant 1 : index
    %c0_138 = arith.constant 0 : index
    %286 = vector.load %arg6[%c1_136, %c1_137, %c0_138] : memref<2x5x128xf32, #tpu.memory_space<vmem>>, vector<1x1x128xf32>
    %287 = vector.shape_cast %286 : vector<1x1x128xf32> to vector<1x128xf32>
    %cst_139 = arith.constant dense<0.000000e+00> : vector<64xf32>
    %288 = vector.multi_reduction <add>, %283, %cst_139 [1] : vector<64x128xf32> to vector<64xf32>
    %289 = vector.shape_cast %288 : vector<64xf32> to vector<64x1xf32>
    %cst_140 = arith.constant 1.280000e+02 : f32
    %290 = vector.broadcast %cst_140 : f32 to vector<64x1xf32>
    %291 = arith.divf %289, %290 : vector<64x1xf32>
    %292 = vector.broadcast %291 : vector<64x1xf32> to vector<64x128xf32>
    %293 = arith.subf %283, %292 : vector<64x128xf32>
    %294 = arith.mulf %293, %293 : vector<64x128xf32>
    %cst_141 = arith.constant dense<0.000000e+00> : vector<64xf32>
    %295 = vector.multi_reduction <add>, %294, %cst_141 [1] : vector<64x128xf32> to vector<64xf32>
    %296 = vector.shape_cast %295 : vector<64xf32> to vector<64x1xf32>
    %cst_142 = arith.constant 1.280000e+02 : f32
    %297 = vector.broadcast %cst_142 : f32 to vector<64x1xf32>
    %298 = arith.divf %296, %297 : vector<64x1xf32>
    %299 = vector.broadcast %291 : vector<64x1xf32> to vector<64x128xf32>
    %300 = arith.subf %283, %299 : vector<64x128xf32>
    %cst_143 = arith.constant 1.000000e-01 : f32
    %301 = vector.broadcast %cst_143 : f32 to vector<64x1xf32>
    %302 = arith.addf %298, %301 : vector<64x1xf32>
    %303 = math.rsqrt %302 : vector<64x1xf32>
    %304 = vector.broadcast %303 : vector<64x1xf32> to vector<64x128xf32>
    %305 = arith.mulf %300, %304 : vector<64x128xf32>
    %306 = vector.broadcast %285 : vector<1x128xf32> to vector<64x128xf32>
    %307 = arith.mulf %305, %306 : vector<64x128xf32>
    %308 = vector.broadcast %287 : vector<1x128xf32> to vector<64x128xf32>
    %309 = arith.addf %307, %308 : vector<64x128xf32>
    %310 = arith.addf %268, %309 : vector<64x128xf32>
    %311 = arith.truncf %309 : vector<64x128xf32> to vector<64x128xbf16>
    %c1_144 = arith.constant 1 : index
    %c1_145 = arith.constant 1 : index
    %c0_146 = arith.constant 0 : index
    %c0_147 = arith.constant 0 : index
    %312 = vector.load %arg3[%c1_144, %c1_145, %c0_146, %c0_147] : memref<2x4x128x128xbf16, #tpu.memory_space<vmem>>, vector<1x1x128x128xbf16>
    %313 = vector.shape_cast %312 : vector<1x1x128x128xbf16> to vector<128x128xbf16>
    %cst_148 = arith.constant dense<0.000000e+00> : vector<64x128xf32>
    %314 = tpu.matmul %311, %313, %cst_148 {dimension_numbers = #tpu.dot_dimension_numbers<[1], [0], [0], [1], [0, 0, 1, 1], [], []>} : vector<64x128xbf16>, vector<128x128xbf16>, vector<64x128xf32> -> vector<64x128xf32>
    %c1_149 = arith.constant 1 : index
    %c2_150 = arith.constant 2 : index
    %c0_151 = arith.constant 0 : index
    %315 = vector.load %arg4[%c1_149, %c2_150, %c0_151] : memref<2x5x128xf32, #tpu.memory_space<vmem>>, vector<1x1x128xf32>
    %316 = vector.shape_cast %315 : vector<1x1x128xf32> to vector<1x128xf32>
    %317 = vector.broadcast %316 : vector<1x128xf32> to vector<64x128xf32>
    %318 = arith.addf %314, %317 : vector<64x128xf32>
    %319 = arith.addf %318, %310 : vector<64x128xf32>
    %320 = arith.negf %319 : vector<64x128xf32>
    %321 = math.exp %320 : vector<64x128xf32>
    %cst_152 = arith.constant 1.000000e+00 : f32
    %322 = vector.broadcast %cst_152 : f32 to vector<64x128xf32>
    %323 = arith.addf %322, %321 : vector<64x128xf32>
    %324 = arith.divf %322, %323 : vector<64x128xf32>
    %325 = arith.mulf %319, %324 : vector<64x128xf32>
    %c1_153 = arith.constant 1 : index
    %c2_154 = arith.constant 2 : index
    %c0_155 = arith.constant 0 : index
    %326 = vector.load %arg5[%c1_153, %c2_154, %c0_155] : memref<2x5x128xf32, #tpu.memory_space<vmem>>, vector<1x1x128xf32>
    %327 = vector.shape_cast %326 : vector<1x1x128xf32> to vector<1x128xf32>
    %c1_156 = arith.constant 1 : index
    %c2_157 = arith.constant 2 : index
    %c0_158 = arith.constant 0 : index
    %328 = vector.load %arg6[%c1_156, %c2_157, %c0_158] : memref<2x5x128xf32, #tpu.memory_space<vmem>>, vector<1x1x128xf32>
    %329 = vector.shape_cast %328 : vector<1x1x128xf32> to vector<1x128xf32>
    %cst_159 = arith.constant dense<0.000000e+00> : vector<64xf32>
    %330 = vector.multi_reduction <add>, %325, %cst_159 [1] : vector<64x128xf32> to vector<64xf32>
    %331 = vector.shape_cast %330 : vector<64xf32> to vector<64x1xf32>
    %cst_160 = arith.constant 1.280000e+02 : f32
    %332 = vector.broadcast %cst_160 : f32 to vector<64x1xf32>
    %333 = arith.divf %331, %332 : vector<64x1xf32>
    %334 = vector.broadcast %333 : vector<64x1xf32> to vector<64x128xf32>
    %335 = arith.subf %325, %334 : vector<64x128xf32>
    %336 = arith.mulf %335, %335 : vector<64x128xf32>
    %cst_161 = arith.constant dense<0.000000e+00> : vector<64xf32>
    %337 = vector.multi_reduction <add>, %336, %cst_161 [1] : vector<64x128xf32> to vector<64xf32>
    %338 = vector.shape_cast %337 : vector<64xf32> to vector<64x1xf32>
    %cst_162 = arith.constant 1.280000e+02 : f32
    %339 = vector.broadcast %cst_162 : f32 to vector<64x1xf32>
    %340 = arith.divf %338, %339 : vector<64x1xf32>
    %341 = vector.broadcast %333 : vector<64x1xf32> to vector<64x128xf32>
    %342 = arith.subf %325, %341 : vector<64x128xf32>
    %cst_163 = arith.constant 1.000000e-01 : f32
    %343 = vector.broadcast %cst_163 : f32 to vector<64x1xf32>
    %344 = arith.addf %340, %343 : vector<64x1xf32>
    %345 = math.rsqrt %344 : vector<64x1xf32>
    %346 = vector.broadcast %345 : vector<64x1xf32> to vector<64x128xf32>
    %347 = arith.mulf %342, %346 : vector<64x128xf32>
    %348 = vector.broadcast %327 : vector<1x128xf32> to vector<64x128xf32>
    %349 = arith.mulf %347, %348 : vector<64x128xf32>
    %350 = vector.broadcast %329 : vector<1x128xf32> to vector<64x128xf32>
    %351 = arith.addf %349, %350 : vector<64x128xf32>
    %352 = arith.addf %310, %351 : vector<64x128xf32>
    %353 = arith.truncf %351 : vector<64x128xf32> to vector<64x128xbf16>
    %c1_164 = arith.constant 1 : index
    %c2_165 = arith.constant 2 : index
    %c0_166 = arith.constant 0 : index
    %c0_167 = arith.constant 0 : index
    %354 = vector.load %arg3[%c1_164, %c2_165, %c0_166, %c0_167] : memref<2x4x128x128xbf16, #tpu.memory_space<vmem>>, vector<1x1x128x128xbf16>
    %355 = vector.shape_cast %354 : vector<1x1x128x128xbf16> to vector<128x128xbf16>
    %cst_168 = arith.constant dense<0.000000e+00> : vector<64x128xf32>
    %356 = tpu.matmul %353, %355, %cst_168 {dimension_numbers = #tpu.dot_dimension_numbers<[1], [0], [0], [1], [0, 0, 1, 1], [], []>} : vector<64x128xbf16>, vector<128x128xbf16>, vector<64x128xf32> -> vector<64x128xf32>
    %c1_169 = arith.constant 1 : index
    %c3_170 = arith.constant 3 : index
    %c0_171 = arith.constant 0 : index
    %357 = vector.load %arg4[%c1_169, %c3_170, %c0_171] : memref<2x5x128xf32, #tpu.memory_space<vmem>>, vector<1x1x128xf32>
    %358 = vector.shape_cast %357 : vector<1x1x128xf32> to vector<1x128xf32>
    %359 = vector.broadcast %358 : vector<1x128xf32> to vector<64x128xf32>
    %360 = arith.addf %356, %359 : vector<64x128xf32>
    %361 = arith.addf %360, %352 : vector<64x128xf32>
    %362 = arith.negf %361 : vector<64x128xf32>
    %363 = math.exp %362 : vector<64x128xf32>
    %cst_172 = arith.constant 1.000000e+00 : f32
    %364 = vector.broadcast %cst_172 : f32 to vector<64x128xf32>
    %365 = arith.addf %364, %363 : vector<64x128xf32>
    %366 = arith.divf %364, %365 : vector<64x128xf32>
    %367 = arith.mulf %361, %366 : vector<64x128xf32>
    %c1_173 = arith.constant 1 : index
    %c3_174 = arith.constant 3 : index
    %c0_175 = arith.constant 0 : index
    %368 = vector.load %arg5[%c1_173, %c3_174, %c0_175] : memref<2x5x128xf32, #tpu.memory_space<vmem>>, vector<1x1x128xf32>
    %369 = vector.shape_cast %368 : vector<1x1x128xf32> to vector<1x128xf32>
    %c1_176 = arith.constant 1 : index
    %c3_177 = arith.constant 3 : index
    %c0_178 = arith.constant 0 : index
    %370 = vector.load %arg6[%c1_176, %c3_177, %c0_178] : memref<2x5x128xf32, #tpu.memory_space<vmem>>, vector<1x1x128xf32>
    %371 = vector.shape_cast %370 : vector<1x1x128xf32> to vector<1x128xf32>
    %cst_179 = arith.constant dense<0.000000e+00> : vector<64xf32>
    %372 = vector.multi_reduction <add>, %367, %cst_179 [1] : vector<64x128xf32> to vector<64xf32>
    %373 = vector.shape_cast %372 : vector<64xf32> to vector<64x1xf32>
    %cst_180 = arith.constant 1.280000e+02 : f32
    %374 = vector.broadcast %cst_180 : f32 to vector<64x1xf32>
    %375 = arith.divf %373, %374 : vector<64x1xf32>
    %376 = vector.broadcast %375 : vector<64x1xf32> to vector<64x128xf32>
    %377 = arith.subf %367, %376 : vector<64x128xf32>
    %378 = arith.mulf %377, %377 : vector<64x128xf32>
    %cst_181 = arith.constant dense<0.000000e+00> : vector<64xf32>
    %379 = vector.multi_reduction <add>, %378, %cst_181 [1] : vector<64x128xf32> to vector<64xf32>
    %380 = vector.shape_cast %379 : vector<64xf32> to vector<64x1xf32>
    %cst_182 = arith.constant 1.280000e+02 : f32
    %381 = vector.broadcast %cst_182 : f32 to vector<64x1xf32>
    %382 = arith.divf %380, %381 : vector<64x1xf32>
    %383 = vector.broadcast %375 : vector<64x1xf32> to vector<64x128xf32>
    %384 = arith.subf %367, %383 : vector<64x128xf32>
    %cst_183 = arith.constant 1.000000e-01 : f32
    %385 = vector.broadcast %cst_183 : f32 to vector<64x1xf32>
    %386 = arith.addf %382, %385 : vector<64x1xf32>
    %387 = math.rsqrt %386 : vector<64x1xf32>
    %388 = vector.broadcast %387 : vector<64x1xf32> to vector<64x128xf32>
    %389 = arith.mulf %384, %388 : vector<64x128xf32>
    %390 = vector.broadcast %369 : vector<1x128xf32> to vector<64x128xf32>
    %391 = arith.mulf %389, %390 : vector<64x128xf32>
    %392 = vector.broadcast %371 : vector<1x128xf32> to vector<64x128xf32>
    %393 = arith.addf %391, %392 : vector<64x128xf32>
    %394 = arith.addf %352, %393 : vector<64x128xf32>
    %395 = arith.truncf %393 : vector<64x128xf32> to vector<64x128xbf16>
    %c1_184 = arith.constant 1 : index
    %c3_185 = arith.constant 3 : index
    %c0_186 = arith.constant 0 : index
    %c0_187 = arith.constant 0 : index
    %396 = vector.load %arg3[%c1_184, %c3_185, %c0_186, %c0_187] : memref<2x4x128x128xbf16, #tpu.memory_space<vmem>>, vector<1x1x128x128xbf16>
    %397 = vector.shape_cast %396 : vector<1x1x128x128xbf16> to vector<128x128xbf16>
    %cst_188 = arith.constant dense<0.000000e+00> : vector<64x128xf32>
    %398 = tpu.matmul %395, %397, %cst_188 {dimension_numbers = #tpu.dot_dimension_numbers<[1], [0], [0], [1], [0, 0, 1, 1], [], []>} : vector<64x128xbf16>, vector<128x128xbf16>, vector<64x128xf32> -> vector<64x128xf32>
    %c1_189 = arith.constant 1 : index
    %c4_190 = arith.constant 4 : index
    %c0_191 = arith.constant 0 : index
    %399 = vector.load %arg4[%c1_189, %c4_190, %c0_191] : memref<2x5x128xf32, #tpu.memory_space<vmem>>, vector<1x1x128xf32>
    %400 = vector.shape_cast %399 : vector<1x1x128xf32> to vector<1x128xf32>
    %401 = vector.broadcast %400 : vector<1x128xf32> to vector<64x128xf32>
    %402 = arith.addf %398, %401 : vector<64x128xf32>
    %403 = arith.addf %402, %394 : vector<64x128xf32>
    %404 = arith.negf %403 : vector<64x128xf32>
    %405 = math.exp %404 : vector<64x128xf32>
    %cst_192 = arith.constant 1.000000e+00 : f32
    %406 = vector.broadcast %cst_192 : f32 to vector<64x128xf32>
    %407 = arith.addf %406, %405 : vector<64x128xf32>
    %408 = arith.divf %406, %407 : vector<64x128xf32>
    %409 = arith.mulf %403, %408 : vector<64x128xf32>
    %c1_193 = arith.constant 1 : index
    %c4_194 = arith.constant 4 : index
    %c0_195 = arith.constant 0 : index
    %410 = vector.load %arg5[%c1_193, %c4_194, %c0_195] : memref<2x5x128xf32, #tpu.memory_space<vmem>>, vector<1x1x128xf32>
    %411 = vector.shape_cast %410 : vector<1x1x128xf32> to vector<1x128xf32>
    %c1_196 = arith.constant 1 : index
    %c4_197 = arith.constant 4 : index
    %c0_198 = arith.constant 0 : index
    %412 = vector.load %arg6[%c1_196, %c4_197, %c0_198] : memref<2x5x128xf32, #tpu.memory_space<vmem>>, vector<1x1x128xf32>
    %413 = vector.shape_cast %412 : vector<1x1x128xf32> to vector<1x128xf32>
    %cst_199 = arith.constant dense<0.000000e+00> : vector<64xf32>
    %414 = vector.multi_reduction <add>, %409, %cst_199 [1] : vector<64x128xf32> to vector<64xf32>
    %415 = vector.shape_cast %414 : vector<64xf32> to vector<64x1xf32>
    %cst_200 = arith.constant 1.280000e+02 : f32
    %416 = vector.broadcast %cst_200 : f32 to vector<64x1xf32>
    %417 = arith.divf %415, %416 : vector<64x1xf32>
    %418 = vector.broadcast %417 : vector<64x1xf32> to vector<64x128xf32>
    %419 = arith.subf %409, %418 : vector<64x128xf32>
    %420 = arith.mulf %419, %419 : vector<64x128xf32>
    %cst_201 = arith.constant dense<0.000000e+00> : vector<64xf32>
    %421 = vector.multi_reduction <add>, %420, %cst_201 [1] : vector<64x128xf32> to vector<64xf32>
    %422 = vector.shape_cast %421 : vector<64xf32> to vector<64x1xf32>
    %cst_202 = arith.constant 1.280000e+02 : f32
    %423 = vector.broadcast %cst_202 : f32 to vector<64x1xf32>
    %424 = arith.divf %422, %423 : vector<64x1xf32>
    %425 = vector.broadcast %417 : vector<64x1xf32> to vector<64x128xf32>
    %426 = arith.subf %409, %425 : vector<64x128xf32>
    %cst_203 = arith.constant 1.000000e-01 : f32
    %427 = vector.broadcast %cst_203 : f32 to vector<64x1xf32>
    %428 = arith.addf %424, %427 : vector<64x1xf32>
    %429 = math.rsqrt %428 : vector<64x1xf32>
    %430 = vector.broadcast %429 : vector<64x1xf32> to vector<64x128xf32>
    %431 = arith.mulf %426, %430 : vector<64x128xf32>
    %432 = vector.broadcast %411 : vector<1x128xf32> to vector<64x128xf32>
    %433 = arith.mulf %431, %432 : vector<64x128xf32>
    %434 = vector.broadcast %413 : vector<1x128xf32> to vector<64x128xf32>
    %435 = arith.addf %433, %434 : vector<64x128xf32>
    %436 = arith.truncf %435 : vector<64x128xf32> to vector<64x128xbf16>
    %c1_204 = arith.constant 1 : index
    %c0_205 = arith.constant 0 : index
    %c0_206 = arith.constant 0 : index
    %437 = vector.load %arg7[%c1_204, %c0_205, %c0_206] : memref<2x128x256xbf16, #tpu.memory_space<vmem>>, vector<1x128x256xbf16>
    %438 = vector.shape_cast %437 : vector<1x128x256xbf16> to vector<128x256xbf16>
    %cst_207 = arith.constant dense<0.000000e+00> : vector<64x256xf32>
    %439 = tpu.matmul %436, %438, %cst_207 {dimension_numbers = #tpu.dot_dimension_numbers<[1], [0], [0], [1], [0, 0, 1, 1], [], []>} : vector<64x128xbf16>, vector<128x256xbf16>, vector<64x256xf32> -> vector<64x256xf32>
    %c1_208 = arith.constant 1 : index
    %c0_209 = arith.constant 0 : index
    %440 = vector.load %arg8[%c1_208, %c0_209] : memref<2x256xf32, #tpu.memory_space<vmem>>, vector<1x256xf32>
    %441 = vector.broadcast %440 : vector<1x256xf32> to vector<64x256xf32>
    %442 = arith.addf %439, %441 : vector<64x256xf32>
    %443 = vector.extract_strided_slice %442 {offsets = [0, 0], sizes = [64, 128], strides = [1, 1]} : vector<64x256xf32> to vector<64x128xf32>
    %444 = vector.extract_strided_slice %442 {offsets = [0, 128], sizes = [64, 128], strides = [1, 1]} : vector<64x256xf32> to vector<64x128xf32>
    %cst_210 = arith.constant -6.000000e+00 : f32
    %cst_211 = arith.constant 6.000000e+00 : f32
    %445 = vector.broadcast %cst_210 : f32 to vector<64x128xf32>
    %446 = arith.maximumf %445, %444 : vector<64x128xf32>
    %447 = vector.broadcast %cst_211 : f32 to vector<64x128xf32>
    %448 = arith.minimumf %447, %446 : vector<64x128xf32>
    %449 = arith.truncf %224 : vector<64x128xf32> to vector<64x128xbf16>
    %c0_212 = arith.constant 0 : index
    %c0_213 = arith.constant 0 : index
    %450 = vector.load %arg9[%c0_212, %c0_213] : memref<128x256xbf16, #tpu.memory_space<vmem>>, vector<128x256xbf16>
    %cst_214 = arith.constant dense<0.000000e+00> : vector<64x256xf32>
    %451 = tpu.matmul %449, %450, %cst_214 {dimension_numbers = #tpu.dot_dimension_numbers<[1], [0], [0], [1], [0, 0, 1, 1], [], []>} : vector<64x128xbf16>, vector<128x256xbf16>, vector<64x256xf32> -> vector<64x256xf32>
    %c0_215 = arith.constant 0 : index
    %c0_216 = arith.constant 0 : index
    %452 = vector.load %arg10[%c0_215, %c0_216] : memref<1x256xf32, #tpu.memory_space<vmem>>, vector<1x256xf32>
    %453 = vector.broadcast %452 : vector<1x256xf32> to vector<64x256xf32>
    %454 = arith.addf %451, %453 : vector<64x256xf32>
    %cst_217 = arith.constant dense<0xFF800000> : vector<64xf32>
    %455 = vector.multi_reduction <maximumf>, %454, %cst_217 [1] : vector<64x256xf32> to vector<64xf32>
    %456 = vector.shape_cast %455 : vector<64xf32> to vector<64x1xf32>
    %457 = vector.broadcast %456 : vector<64x1xf32> to vector<64x256xf32>
    %458 = arith.subf %454, %457 : vector<64x256xf32>
    %459 = math.exp %458 : vector<64x256xf32>
    %cst_218 = arith.constant dense<0.000000e+00> : vector<64xf32>
    %460 = vector.multi_reduction <add>, %459, %cst_218 [1] : vector<64x256xf32> to vector<64xf32>
    %461 = vector.shape_cast %460 : vector<64xf32> to vector<64x1xf32>
    %462 = math.log %461 : vector<64x1xf32>
    %463 = arith.addf %456, %462 : vector<64x1xf32>
    %cst_219 = arith.constant dense<0.000000e+00> : vector<64xf32>
    %464 = vector.multi_reduction <add>, %0, %cst_219 [1] : vector<64x256xf32> to vector<64xf32>
    %465 = vector.shape_cast %464 : vector<64xf32> to vector<64x1xf32>
    %466 = arith.mulf %0, %454 : vector<64x256xf32>
    %467 = vector.shape_cast %466 : vector<64x256xf32> to vector<1x64x256xf32>
    %cst_220 = arith.constant dense<0.000000e+00> : vector<1xf32>
    %468 = vector.multi_reduction <add>, %467, %cst_220 [1, 2] : vector<1x64x256xf32> to vector<1xf32>
    %469 = vector.shape_cast %468 : vector<1xf32> to vector<1x1x1xf32>
    %470 = vector.extract %469[0, 0, 0] : f32 from vector<1x1x1xf32>
    %471 = arith.mulf %463, %465 : vector<64x1xf32>
    %472 = vector.shape_cast %471 : vector<64x1xf32> to vector<1x64x1xf32>
    %cst_221 = arith.constant dense<0.000000e+00> : vector<1xf32>
    %473 = vector.multi_reduction <add>, %472, %cst_221 [1, 2] : vector<1x64x1xf32> to vector<1xf32>
    %474 = vector.shape_cast %473 : vector<1xf32> to vector<1x1x1xf32>
    %475 = vector.extract %474[0, 0, 0] : f32 from vector<1x1x1xf32>
    %476 = arith.subf %470, %475 : f32
    %477 = arith.mulf %224, %224 : vector<64x128xf32>
    %cst_222 = arith.constant -5.000000e-01 : f32
    %478 = vector.broadcast %cst_222 : f32 to vector<64x128xf32>
    %479 = arith.mulf %478, %477 : vector<64x128xf32>
    %cst_223 = arith.constant -2.81605864 : f32
    %480 = vector.broadcast %cst_223 : f32 to vector<64x128xf32>
    %481 = arith.addf %479, %480 : vector<64x128xf32>
    %cst_224 = arith.constant -2.26999655E-5 : f32
    %482 = vector.broadcast %cst_224 : f32 to vector<64x128xf32>
    %483 = arith.mulf %482, %477 : vector<64x128xf32>
    %cst_225 = arith.constant -8.22152328 : f32
    %484 = vector.broadcast %cst_225 : f32 to vector<64x128xf32>
    %485 = arith.addf %483, %484 : vector<64x128xf32>
    %486 = math.exp %448 : vector<64x128xf32>
    %cst_226 = arith.constant 9.99999993E-9 : f32
    %487 = vector.broadcast %cst_226 : f32 to vector<64x128xf32>
    %488 = arith.addf %486, %487 : vector<64x128xf32>
    %cst_227 = arith.constant 6.28318548 : f32
    %489 = vector.broadcast %cst_227 : f32 to vector<64x128xf32>
    %490 = arith.mulf %489, %488 : vector<64x128xf32>
    %491 = math.log %490 : vector<64x128xf32>
    %cst_228 = arith.constant 5.000000e-01 : f32
    %492 = vector.broadcast %cst_228 : f32 to vector<64x128xf32>
    %493 = arith.mulf %492, %491 : vector<64x128xf32>
    %494 = arith.subf %224, %443 : vector<64x128xf32>
    %495 = arith.mulf %494, %494 : vector<64x128xf32>
    %cst_229 = arith.constant -5.000000e-01 : f32
    %496 = vector.broadcast %cst_229 : f32 to vector<64x128xf32>
    %497 = arith.mulf %496, %495 : vector<64x128xf32>
    %498 = arith.divf %497, %488 : vector<64x128xf32>
    %499 = arith.subf %498, %493 : vector<64x128xf32>
    %cst_230 = arith.constant -0.287682086 : f32
    %500 = vector.broadcast %cst_230 : f32 to vector<64x128xf32>
    %501 = arith.addf %499, %500 : vector<64x128xf32>
    %502 = arith.maximumf %481, %501 : vector<64x128xf32>
    %503 = arith.maximumf %502, %485 : vector<64x128xf32>
    %504 = arith.subf %481, %503 : vector<64x128xf32>
    %505 = math.exp %504 : vector<64x128xf32>
    %506 = arith.subf %501, %503 : vector<64x128xf32>
    %507 = math.exp %506 : vector<64x128xf32>
    %508 = arith.addf %505, %507 : vector<64x128xf32>
    %509 = arith.subf %485, %503 : vector<64x128xf32>
    %510 = math.exp %509 : vector<64x128xf32>
    %511 = arith.addf %508, %510 : vector<64x128xf32>
    %512 = math.log %511 : vector<64x128xf32>
    %513 = arith.addf %503, %512 : vector<64x128xf32>
    %514 = math.exp %229 : vector<64x128xf32>
    %cst_231 = arith.constant 9.99999993E-9 : f32
    %515 = vector.broadcast %cst_231 : f32 to vector<64x128xf32>
    %516 = arith.addf %514, %515 : vector<64x128xf32>
    %cst_232 = arith.constant 6.28318548 : f32
    %517 = vector.broadcast %cst_232 : f32 to vector<64x128xf32>
    %518 = arith.mulf %517, %516 : vector<64x128xf32>
    %519 = math.log %518 : vector<64x128xf32>
    %cst_233 = arith.constant 5.000000e-01 : f32
    %520 = vector.broadcast %cst_233 : f32 to vector<64x128xf32>
    %521 = arith.mulf %520, %519 : vector<64x128xf32>
    %522 = arith.subf %224, %224 : vector<64x128xf32>
    %523 = arith.mulf %522, %522 : vector<64x128xf32>
    %cst_234 = arith.constant -5.000000e-01 : f32
    %524 = vector.broadcast %cst_234 : f32 to vector<64x128xf32>
    %525 = arith.mulf %524, %523 : vector<64x128xf32>
    %526 = arith.divf %525, %516 : vector<64x128xf32>
    %527 = arith.subf %526, %521 : vector<64x128xf32>
    %528 = arith.subf %527, %513 : vector<64x128xf32>
    %cst_235 = arith.constant dense<0.000000e+00> : vector<64xf32>
    %529 = vector.multi_reduction <add>, %528, %cst_235 [1] : vector<64x128xf32> to vector<64xf32>
    %530 = vector.shape_cast %529 : vector<64xf32> to vector<64x1xf32>
    %531 = arith.mulf %530, %465 : vector<64x1xf32>
    %532 = vector.shape_cast %531 : vector<64x1xf32> to vector<1x64x1xf32>
    %cst_236 = arith.constant dense<0.000000e+00> : vector<1xf32>
    %533 = vector.multi_reduction <add>, %532, %cst_236 [1, 2] : vector<1x64x1xf32> to vector<1xf32>
    %534 = vector.shape_cast %533 : vector<1xf32> to vector<1x1x1xf32>
    %535 = vector.extract %534[0, 0, 0] : f32 from vector<1x1x1xf32>
    %536 = tpu.iota {dimensions = array<i32: 1>} : vector<8x128xi32>
    %cst_237 = arith.constant 0.000000e+00 : f32
    %537 = vector.broadcast %cst_237 : f32 to vector<8x128xf32>
    %c0_i32 = arith.constant 0 : i32
    %538 = arith.cmpi eq, %arg0, %c0_i32 : i32
    %539 = arith.extui %538 : i1 to i32
    %c0_i32_238 = arith.constant 0 : i32
    %540 = arith.cmpi ne, %539, %c0_i32_238 : i32
    scf.if %540 {
      %cst_246 = arith.constant 0.000000e+00 : f32
      %556 = vector.broadcast %cst_246 : f32 to vector<8x128xf32>
      %c0_247 = arith.constant 0 : index
      %c0_248 = arith.constant 0 : index
      %557 = vector.load %arg11[%c0_247, %c0_248] : memref<8x128xf32, #tpu.memory_space<vmem>>, vector<8x128xf32>
      tpu.vector_store %arg11[%c0_247, %c0_248], %556 {strides = array<i32>} : memref<8x128xf32, #tpu.memory_space<vmem>>, vector<8x128xf32>,
    } else {
    }
    %c0_239 = arith.constant 0 : index
    %c0_240 = arith.constant 0 : index
    %541 = vector.load %arg11[%c0_239, %c0_240] : memref<8x128xf32, #tpu.memory_space<vmem>>, vector<8x128xf32>
    %c0_i32_241 = arith.constant 0 : i32
    %542 = vector.broadcast %c0_i32_241 : i32 to vector<8x128xi32>
    %543 = arith.cmpi eq, %536, %542 : vector<8x128xi32>
    %544 = vector.broadcast %476 : f32 to vector<8x128xf32>
    %545 = arith.select %543, %544, %537 : vector<8x128xi1>, vector<8x128xf32>
    %c1_i32 = arith.constant 1 : i32
    %546 = vector.broadcast %c1_i32 : i32 to vector<8x128xi32>
    %547 = arith.cmpi eq, %536, %546 : vector<8x128xi32>
    %548 = vector.broadcast %535 : f32 to vector<8x128xf32>
    %549 = arith.select %547, %548, %537 : vector<8x128xi1>, vector<8x128xf32>
    %550 = arith.addf %545, %549 : vector<8x128xf32>
    %551 = arith.addf %541, %550 : vector<8x128xf32>
    %c0_242 = arith.constant 0 : index
    %c0_243 = arith.constant 0 : index
    %552 = vector.load %arg11[%c0_242, %c0_243] : memref<8x128xf32, #tpu.memory_space<vmem>>, vector<8x128xf32>
    tpu.vector_store %arg11[%c0_242, %c0_243], %551 {strides = array<i32>} : memref<8x128xf32, #tpu.memory_space<vmem>>, vector<8x128xf32>,
    %c0_i32_244 = arith.constant 0 : i32
    %553 = arith.cmpi eq, %arg0, %c0_i32_244 : i32
    %554 = arith.extui %553 : i1 to i32
    %c0_i32_245 = arith.constant 0 : i32
    %555 = arith.cmpi ne, %554, %c0_i32_245 : i32
    scf.if %555 {
      %c0_246 = arith.constant 0 : index
      %c0_247 = arith.constant 0 : index
      %556 = vector.load %arg11[%c0_246, %c0_247] : memref<8x128xf32, #tpu.memory_space<vmem>>, vector<8x128xf32>
      %c0_i32_248 = arith.constant 0 : i32
      %557 = vector.broadcast %c0_i32_248 : i32 to vector<8x128xi32>
      %558 = arith.cmpi eq, %536, %557 : vector<8x128xi32>
      %559 = arith.select %558, %556, %537 : vector<8x128xi1>, vector<8x128xf32>
      %560 = vector.shape_cast %559 : vector<8x128xf32> to vector<1x8x128xf32>
      %cst_249 = arith.constant dense<0.000000e+00> : vector<1xf32>
      %561 = vector.multi_reduction <add>, %560, %cst_249 [1, 2] : vector<1x8x128xf32> to vector<1xf32>
      %562 = vector.shape_cast %561 : vector<1xf32> to vector<1x1x1xf32>
      %563 = vector.extract %562[0, 0, 0] : f32 from vector<1x1x1xf32>
      %cst_250 = arith.constant 0.001953125 : f32
      %564 = arith.mulf %563, %cst_250 : f32
      %c1_i32_251 = arith.constant 1 : i32
      %565 = vector.broadcast %c1_i32_251 : i32 to vector<8x128xi32>
      %566 = arith.cmpi eq, %536, %565 : vector<8x128xi32>
      %567 = arith.select %566, %556, %537 : vector<8x128xi1>, vector<8x128xf32>
      %568 = vector.shape_cast %567 : vector<8x128xf32> to vector<1x8x128xf32>
      %cst_252 = arith.constant dense<0.000000e+00> : vector<1xf32>
      %569 = vector.multi_reduction <add>, %568, %cst_252 [1, 2] : vector<1x8x128xf32> to vector<1xf32>
      %570 = vector.shape_cast %569 : vector<1xf32> to vector<1x1x1xf32>
      %571 = vector.extract %570[0, 0, 0] : f32 from vector<1x1x1xf32>
      %cst_253 = arith.constant 0.001953125 : f32
      %572 = arith.mulf %571, %cst_253 : f32
      %c0_i32_254 = arith.constant 0 : i32
      %573 = vector.broadcast %c0_i32_254 : i32 to vector<8x128xi32>
      %574 = arith.cmpi eq, %536, %573 : vector<8x128xi32>
      %575 = vector.broadcast %564 : f32 to vector<8x128xf32>
      %576 = arith.select %574, %575, %537 : vector<8x128xi1>, vector<8x128xf32>
      %c1_i32_255 = arith.constant 1 : i32
      %577 = vector.broadcast %c1_i32_255 : i32 to vector<8x128xi32>
      %578 = arith.cmpi eq, %536, %577 : vector<8x128xi32>
      %579 = vector.broadcast %572 : f32 to vector<8x128xf32>
      %580 = arith.select %578, %579, %537 : vector<8x128xi1>, vector<8x128xf32>
      %581 = arith.addf %576, %580 : vector<8x128xf32>
      %c2_i32 = arith.constant 2 : i32
      %582 = vector.broadcast %c2_i32 : i32 to vector<8x128xi32>
      %583 = arith.cmpi eq, %536, %582 : vector<8x128xi32>
      %584 = arith.subf %564, %572 : f32
      %cst_256 = arith.constant 0.000000e+00 : f32
      %585 = arith.subf %cst_256, %584 : f32
      %586 = vector.broadcast %585 : f32 to vector<8x128xf32>
      %587 = arith.select %583, %586, %537 : vector<8x128xi1>, vector<8x128xf32>
      %588 = arith.addf %581, %587 : vector<8x128xf32>
      %c0_257 = arith.constant 0 : index
      %c0_258 = arith.constant 0 : index
      %589 = vector.load %arg11[%c0_257, %c0_258] : memref<8x128xf32, #tpu.memory_space<vmem>>, vector<8x128xf32>
      tpu.vector_store %arg11[%c0_257, %c0_258], %588 {strides = array<i32>} : memref<8x128xf32, #tpu.memory_space<vmem>>, vector<8x128xf32>,
    } else {
    }
    return
  }
  func.func @transform_0(%arg0: i32) -> (i32, i32) {
    %c0_i32 = arith.constant 0 : i32
    %c0_i32_0 = arith.constant 0 : i32
    return %arg0, %c0_i32 : i32, i32
  }
  func.func @transform_1(%arg0: i32) -> (i32, i32, i32) {
    %c0_i32 = arith.constant 0 : i32
    %c0_i32_0 = arith.constant 0 : i32
    %c0_i32_1 = arith.constant 0 : i32
    %c0_i32_2 = arith.constant 0 : i32
    return %c0_i32, %c0_i32_0, %c0_i32_1 : i32, i32, i32
  }
  func.func @transform_2(%arg0: i32) -> (i32, i32, i32, i32) {
    %c0_i32 = arith.constant 0 : i32
    %c0_i32_0 = arith.constant 0 : i32
    %c0_i32_1 = arith.constant 0 : i32
    %c0_i32_2 = arith.constant 0 : i32
    %c0_i32_3 = arith.constant 0 : i32
    return %c0_i32, %c0_i32_0, %c0_i32_1, %c0_i32_2 : i32, i32, i32, i32
  }
  func.func @transform_3(%arg0: i32) -> (i32, i32, i32) {
    %c0_i32 = arith.constant 0 : i32
    %c0_i32_0 = arith.constant 0 : i32
    %c0_i32_1 = arith.constant 0 : i32
    %c0_i32_2 = arith.constant 0 : i32
    return %c0_i32, %c0_i32_0, %c0_i32_1 : i32, i32, i32
  }
  func.func @transform_4(%arg0: i32) -> (i32, i32, i32) {
    %c0_i32 = arith.constant 0 : i32
    %c0_i32_0 = arith.constant 0 : i32
    %c0_i32_1 = arith.constant 0 : i32
    %c0_i32_2 = arith.constant 0 : i32
    return %c0_i32, %c0_i32_0, %c0_i32_1 : i32, i32, i32
  }
  func.func @transform_5(%arg0: i32) -> (i32, i32, i32) {
    %c0_i32 = arith.constant 0 : i32
    %c0_i32_0 = arith.constant 0 : i32
    %c0_i32_1 = arith.constant 0 : i32
    %c0_i32_2 = arith.constant 0 : i32
    return %c0_i32, %c0_i32_0, %c0_i32_1 : i32, i32, i32
  }
  func.func @transform_6(%arg0: i32) -> (i32, i32, i32) {
    %c0_i32 = arith.constant 0 : i32
    %c0_i32_0 = arith.constant 0 : i32
    %c0_i32_1 = arith.constant 0 : i32
    %c0_i32_2 = arith.constant 0 : i32
    return %c0_i32, %c0_i32_0, %c0_i32_1 : i32, i32, i32
  }
  func.func @transform_7(%arg0: i32) -> (i32, i32) {
    %c0_i32 = arith.constant 0 : i32
    %c0_i32_0 = arith.constant 0 : i32
    %c0_i32_1 = arith.constant 0 : i32
    return %c0_i32, %c0_i32_0 : i32, i32
  }
  func.func @transform_8(%arg0: i32) -> (i32, i32) {
    %c0_i32 = arith.constant 0 : i32
    %c0_i32_0 = arith.constant 0 : i32
    %c0_i32_1 = arith.constant 0 : i32
    return %c0_i32, %c0_i32_0 : i32, i32
  }
  func.func @transform_9(%arg0: i32) -> (i32, i32) {
    %c0_i32 = arith.constant 0 : i32
    %c0_i32_0 = arith.constant 0 : i32
    %c0_i32_1 = arith.constant 0 : i32
    return %c0_i32, %c0_i32_0 : i32, i32
  }
  func.func @transform_10(%arg0: i32) -> (i32, i32) {
    %c0_i32 = arith.constant 0 : i32
    %c0_i32_0 = arith.constant 0 : i32
    %c0_i32_1 = arith.constant 0 : i32
    return %c0_i32, %c0_i32_0 : i32, i32
  }
}

</mosaic_0001>

<bundles_post_ra>
// kernel: vae_forward_pallas.1
= control target key start
LH: loop header
LB: loop body
LE: loop exit
PB: predicated region body
PF: predicated region fallthrough
CT: control target
= control target key end

     0   :  { %15 = vsyncpa [#allocation3], 0  ;;  %s8560_s0 = inlined_call_operand.hbm [shape: f32[64,256], index: 0, kind: input, shape index: {}]   ;;  %s8561_s1 = inlined_call_operand.hbm [shape: bf16[2,256,128], index: 1, kind: input, shape index: {}]   ;;  %s8562_s2 = inlined_call_operand.hbm [shape: bf16[2,4,128,128], index: 2, kind: input, shape index: {}]   ;;  %s8563_s3 = inlined_call_operand.vmem [shape: f32[2,5,128], index: 3, kind: input, shape index: {}]   ;;  %s8564_s4 = inlined_call_operand.vmem [shape: f32[2,5,128], index: 4, kind: input, shape index: {}]   ;;  %s8565_s5 = inlined_call_operand.vmem [shape: f32[2,5,128], index: 5, kind: input, shape index: {}]   ;;  %s8566_s6 = inlined_call_operand.hbm [shape: bf16[2,128,256], index: 6, kind: input, shape index: {}]   ;;  %s8567_s7 = inlined_call_operand.vmem [shape: f32[2,256], index: 7, kind: input, shape index: {}]   ;;  %s8568_s8 = inlined_call_operand.hbm [shape: bf16[128,256], index: 8, kind: input, shape index: {}]   ;;  %s8569_s9 = inlined_call_operand.vmem [shape: f32[1,256], index: 9, kind: input, shape index: {}]   ;;  %s8570_s10 = inlined_call_operand.vmem [shape: f32[8,128], index: 10, kind: output, shape index: {}]  }
   0x1   :  { %16 = vsyncpa [#allocation5], 0 }
   0x2   :  { %17 = vsyncpa [#allocation8], 0  ;;  %s6602_s13 = smov [#allocation4]   ;;  %s6486_s17 = scalar_lea.hbm %s8561_s1, 4096 }
   0x3   :  { %s35_s14 = sshll.u32 %s6602_s13, 4  ;;  %p6487_p0 = scmp.ne.s32.totalorder %s8561_s1, %s6486_s17  ;;  %s36_s14 = int_to_ptr.vmem [resolvable:$true] %s35_s14 }
   0x4   :  { %p6490_p1 = scmp.lt.u32.totalorder %s6486_s17, %s8561_s1 }
   0x6   :  { %p6492_p2 = pnand %p6490_p1, %p6487_p0 }
   0x8   :  { %6495 = shalt.err (!%p6492_p2)
}
   0x9   :  { %s6496_s22 = scalar_lea.vmem %s36_s14, 4096  ;;  %p6501_p4 = scmp.lt.s32.totalorder %s36_s14, %s36_s14 }
   0xa   :  { %p6497_p3 = scmp.ne.s32.totalorder %s36_s14, %s6496_s22  ;;  %p6502_p5 = scmp.lt.s32.totalorder %s6496_s22, %s6496_s22 }
   0xc   :  { %p6503_p6 = por %p6502_p5, %p6501_p4 }
   0xe   :  { %p6504_p7 = pnand %p6503_p6, %p6497_p3 }
  0x10   :  { %6507 = shalt.err (!%p6504_p7)
}
  0x11   :  { %s6603_s23 = smov 64   ;;  %s6604_s24 = smov 4  }
  0x12   :  { %41 = dma.hbm_to_vmem [thread:$0]  %s8561_s1, 4096, %s36_s14, [#allocation5], %s6603_s23, %s6603_s23, %s6604_s24  }
  0x13   :  { %s6605_s27 = smov [#allocation7]   ;;  %s6508_s11 = scalar_lea.hbm %s8566_s6, 4096 }
  0x14   :  { %s65_s28 = sshll.u32 %s6605_s27, 4  ;;  %p6509_p8 = scmp.ne.s32.totalorder %s8566_s6, %s6508_s11  ;;  %s66_s28 = int_to_ptr.vmem [resolvable:$true] %s65_s28 }
  0x15   :  { %p6512_p9 = scmp.lt.u32.totalorder %s6508_s11, %s8566_s6 }
  0x17   :  { %p6514_p10 = pnand %p6512_p9, %p6509_p8 }
  0x19   :  { %6517 = shalt.err (!%p6514_p10)
}
  0x1a   :  { %s6518_s17 = scalar_lea.vmem %s66_s28, 4096  ;;  %p6523_p12 = scmp.lt.s32.totalorder %s66_s28, %s66_s28 }
  0x1b   :  { %p6519_p11 = scmp.ne.s32.totalorder %s66_s28, %s6518_s17  ;;  %p6524_p13 = scmp.lt.s32.totalorder %s6518_s17, %s6518_s17 }
  0x1d   :  { %p6525_p0 = por %p6524_p13, %p6523_p12 }
  0x1f   :  { %p6526_p1 = pnand %p6525_p0, %p6519_p11 }
  0x21   :  { %6529 = shalt.err (!%p6526_p1)
}
  0x22   :  { %s6606_s1 = smov 128   ;;  %s6607_s14 = smov 8  }
  0x23   :  { %71 = dma.hbm_to_vmem [thread:$0]  %s8566_s6, 4096, %s66_s28, [#allocation8], %s6606_s1, %s6606_s1, %s6607_s14  }
  0x24   :  { %s6608_s20 = smov [#allocation2]   ;;  %s6530_s26 = scalar_lea.hbm %s8560_s0, 2048 }
  0x25   :  { %s23_s21 = sshll.u32 %s6608_s20, 4  ;;  %p6531_p2 = scmp.ne.s32.totalorder %s8560_s0, %s6530_s26  ;;  %s24_s21 = int_to_ptr.vmem [resolvable:$true] %s23_s21 }
  0x26   :  { %p6534_p3 = scmp.lt.u32.totalorder %s6530_s26, %s8560_s0 }
  0x28   :  { %p6536_p4 = pnand %p6534_p3, %p6531_p2 }
  0x2a   :  { %6539 = shalt.err (!%p6536_p4)
}
  0x2b   :  { %s6540_s12 = scalar_lea.vmem %s24_s21, 2048  ;;  %p6545_p6 = scmp.lt.s32.totalorder %s24_s21, %s24_s21 }
  0x2c   :  { %p6541_p5 = scmp.ne.s32.totalorder %s24_s21, %s6540_s12  ;;  %p6546_p7 = scmp.lt.s32.totalorder %s6540_s12, %s6540_s12 }
  0x2e   :  { %p6547_p8 = por %p6546_p7, %p6545_p6 }
  0x30   :  { %p6548_p9 = pnand %p6547_p8, %p6541_p5 }
  0x32   :  { %6551 = shalt.err (!%p6548_p9)
}
  0x33   :  { %s6609_s6 = smov 256   ;;  %s6610_s28 = smov 16  }
  0x34   :  { %29 = dma.hbm_to_vmem [thread:$0]  %s8560_s0, 2048, %s24_s21, [#allocation3], %s6609_s6, %s6609_s6, %s6610_s28  }
  0x35   :  { %s6611_s16 = smov [#allocation6]   ;;  %s6612_s18 = smov [#allocation9]  }
  0x36   :  { %s47_s17 = sshll.u32 %s6611_s16, 4  ;;  %s79_s19 = sshll.u32 %s6612_s18, 4  ;;  %s48_s17 = int_to_ptr.vmem [resolvable:$true] %s47_s17  ;;  %s80_s19 = int_to_ptr.vmem [resolvable:$true] %s79_s19 }
  0x37   :  { %s6552_s25 = scalar_lea.hbm %s8562_s2, 8192 }
  0x38   :  { %p6553_p10 = scmp.ne.s32.totalorder %s8562_s2, %s6552_s25  ;;  %p6556_p11 = scmp.lt.u32.totalorder %s6552_s25, %s8562_s2 }
  0x3a   :  { %p6558_p12 = pnand %p6556_p11, %p6553_p10 }
  0x3c   :  { %6561 = shalt.err (!%p6558_p12)
}
  0x3d   :  { %s6562_s0 = scalar_lea.vmem %s48_s17, 8192  ;;  %p6567_p0 = scmp.lt.s32.totalorder %s48_s17, %s48_s17 }
  0x3e   :  { %p6563_p13 = scmp.ne.s32.totalorder %s48_s17, %s6562_s0  ;;  %p6568_p1 = scmp.lt.s32.totalorder %s6562_s0, %s6562_s0 }
  0x40   :  { %p6569_p2 = por %p6568_p1, %p6567_p0 }
  0x42   :  { %p6570_p3 = pnand %p6569_p2, %p6563_p13 }
  0x44   :  { %6573 = shalt.err (!%p6570_p3)
}
  0x45   :  { %53 = dma.hbm_to_vmem [thread:$0]  %s8562_s2, 8192, %s48_s17, [#allocation5], %s6603_s23, %s6603_s23, %s6604_s24  }
  0x46   :  { %s6574_s28 = scalar_lea.hbm %s8568_s8, 2048 }
  0x47   :  { %p6575_p4 = scmp.ne.s32.totalorder %s8568_s8, %s6574_s28  ;;  %p6578_p5 = scmp.lt.u32.totalorder %s6574_s28, %s8568_s8 }
  0x49   :  { %p6580_p6 = pnand %p6578_p5, %p6575_p4 }
  0x4b   :  { %6583 = shalt.err (!%p6580_p6)
}
  0x4c   :  { %s6584_s20 = scalar_lea.vmem %s80_s19, 2048  ;;  %p6589_p8 = scmp.lt.s32.totalorder %s80_s19, %s80_s19 }
  0x4d   :  { %p6585_p7 = scmp.ne.s32.totalorder %s80_s19, %s6584_s20  ;;  %p6590_p9 = scmp.lt.s32.totalorder %s6584_s20, %s6584_s20 }
  0x4f   :  { %p6591_p10 = por %p6590_p9, %p6589_p8 }
  0x51   :  { %p6592_p11 = pnand %p6591_p10, %p6585_p7 }
  0x53   :  { %6595 = shalt.err (!%p6592_p11)
}
  0x54   :  { %85 = dma.hbm_to_vmem [thread:$0]  %s8568_s8, 2048, %s80_s19, [#allocation8], %s6606_s1, %s6606_s1, %s6607_s14  }
  0x55   :  { %6596 = dma.done.wait [#allocation3], 2048  }
  0x56   :  { %6597 = vsyncadd [#allocation3], 4294965248 }
  0x57   :  { %6598 = dma.done.wait [#allocation5], 12288  }
  0x58   :  { %6599 = vsyncadd [#allocation5], 4294955008 }
  0x59   :  { %6600 = dma.done.wait [#allocation8], 6144  }
  0x5a   :  { %6601 = vsyncadd [#allocation8], 4294961152  ;;  %v6741_v0 = vld [vmem:[#allocation2 + $0x20] sm:$0xff]  ;;  %v6743_v1 = vld [vmem:[#allocation2 + $0x28] sm:$0xff] }
  0x5b   :  { %v6745_v2 = vld [vmem:[#allocation2] sm:$0xff]  ;;  %v124_v3 = vmul.f32 %v6741_v0, %v6741_v0  ;;  %v125_v4 = vmul.f32 %v6743_v1, %v6743_v1  ;;  %v6751_v5 = vld [vmem:[#allocation2 + $0x8] sm:$0xff]  ;;  %v6755_v7 = vld [vmem:[#allocation2 + $0x30] sm:$0xff] }
  0x5c   :  { %v120_v6 = vmul.f32 %v6745_v2, %v6745_v2  ;;  %v6757_v8 = vld [vmem:[#allocation2 + $0x38] sm:$0xff]  ;;  %v121_v9 = vmul.f32 %v6751_v5, %v6751_v5  ;;  %v126_v10 = vmul.f32 %v6755_v7, %v6755_v7  ;;  %v6765_v12 = vld [vmem:[#allocation2 + $0x10] sm:$0xff]  ;;  %v6777_v19 = vld [vmem:[#allocation2 + $0x40] sm:$0xff] }
  0x5d   :  { %v127_v11 = vmul.f32 %v6757_v8, %v6757_v8  ;;  %v6767_v13 = vld [vmem:[#allocation2 + $0x18] sm:$0xff]  ;;  %v6769_v14 = vld [vmem:[#allocation2 + $0x50] sm:$0xff]  ;;  %v142_v15 = vadd.f32 %v125_v4, %v124_v3  ;;  %v122_v16 = vmul.f32 %v6765_v12, %v6765_v12  ;;  %v6779_v20 = vld [vmem:[#allocation2 + $0x48] sm:$0xff]  ;;  %v128_v30 = vmul.f32 %v6777_v19, %v6777_v19 }
  0x5e   :  { %v123_v17 = vmul.f32 %v6767_v13, %v6767_v13  ;;  %v6775_v18 = vld [vmem:[#allocation2 + $0x58] sm:$0xff]  ;;  %v136_v21 = vadd.f32 %v121_v9, %v120_v6  ;;  %v6781_v22 = vld [vmem:[#allocation2 + $0x70] sm:$0xff]  ;;  %v130_v25 = vmul.f32 %v6769_v14, %v6769_v14  ;;  %v6789_v27 = vld [vmem:[#allocation2 + $0x60] sm:$0xff]  ;;  %v129_v31 = vmul.f32 %v6779_v20, %v6779_v20 }
  0x5f   :  { %v6783_v23 = vld [vmem:[#allocation2 + $0x78] sm:$0xff]  ;;  %143 = vadd.xlane.f32.xlu1 %v142_v15  ;;  %v145_v24 = vadd.f32 %v127_v11, %v126_v10  ;;  %v131_v26 = vmul.f32 %v6775_v18, %v6775_v18  ;;  %v6791_v28 = vld [vmem:[#allocation2 + $0x68] sm:$0xff]  ;;  %v134_v33 = vmul.f32 %v6781_v22, %v6781_v22  ;;  %v132_v36 = vmul.f32 %v6789_v27, %v6789_v27  ;;  %v5582_v40 = vld [vmem:[#allocation4 + $0x40] sm:$0xff]  }
  0x60   :  { %137 = vadd.xlane.f32.xlu0 %v136_v21  ;;  %v139_v29 = vadd.f32 %v123_v17, %v122_v16  ;;  %v135_v34 = vmul.f32 %v6783_v23, %v6783_v23  ;;  %v148_v35 = vadd.f32 %v129_v31, %v128_v30  ;;  %v133_v37 = vmul.f32 %v6791_v28, %v6791_v28  ;;  %v5583_v41 = vld [vmem:[#allocation4] sm:$0xff]   ;;  %v5584_v42 = vld [vmem:[#allocation4 + $0x48] sm:$0xff]   ;;  %v5586_v44 = vld [vmem:[#allocation4 + $0x50] sm:$0xff]  }
  0x61   :  { %v151_v32 = vadd.f32 %v131_v26, %v130_v25  ;;  %5175 = vmatprep.subr.bf16.mxu0 %v5582_v40  ;;  %v5585_v43 = vld [vmem:[#allocation4 + $0x8] sm:$0xff]   ;;  %v5587_v45 = vld [vmem:[#allocation4 + $0x10] sm:$0xff]   ;;  %v5588_v46 = vld [vmem:[#allocation4 + $0x58] sm:$0xff]  }
  0x62   :  { %v157_v38 = vadd.f32 %v135_v34, %v134_v33  ;;  %v154_v39 = vadd.f32 %v133_v37, %v132_v36  ;;  %5176 = vmatpush3.bf16.msra.mxu0 %v5583_v41  ;;  %v5589_v47 = vld [vmem:[#allocation4 + $0x18] sm:$0xff]   ;;  %v5590_v48 = vld [vmem:[#allocation4 + $0x60] sm:$0xff]   ;;  %v5592_v50 = vld [vmem:[#allocation4 + $0x68] sm:$0xff]  }
  0x63   :  { %146 = vadd.xlane.f32.xlu1 %v145_v24  ;;  %5177 = vmatprep.subr.bf16.mxu0 %v5584_v42  ;;  %v5591_v49 = vld [vmem:[#allocation4 + $0x20] sm:$0xff]   ;;  %v5593_v51 = vld [vmem:[#allocation4 + $0x28] sm:$0xff]   ;;  %v5594_v52 = vld [vmem:[#allocation4 + $0x70] sm:$0xff]  }
  0x64   :  { %140 = vadd.xlane.f32.xlu0 %v139_v29  ;;  %v5595_v53 = vld [vmem:[#allocation4 + $0x30] sm:$0xff]   ;;  %v5596_v54 = vld [vmem:[#allocation4 + $0x78] sm:$0xff]  }
  0x65   :  { %v5597_v55 = vld [vmem:[#allocation4 + $0x38] sm:$0xff]  }
  0x66   :  { %5178 = vmatpush3.bf16.msra.mxu0 %v5585_v43 }
  0x67   :  { %152 = vadd.xlane.f32.xlu1 %v151_v32  ;;  %5179 = vmatprep.subr.bf16.mxu0 %v5586_v44 }
  0x68   :  { %149 = vadd.xlane.f32.xlu0 %v148_v35 }
  0x6a   :  { %5180 = vmatpush3.bf16.msra.mxu0 %v5587_v45 }
  0x6b   :  { %158 = vadd.xlane.f32.xlu1 %v157_v38  ;;  %5181 = vmatprep.subr.bf16.mxu0 %v5588_v46 }
  0x6c   :  { %155 = vadd.xlane.f32.xlu0 %v154_v39 }
  0x6e   :  { %5182 = vmatpush3.bf16.msra.mxu0 %v5589_v47 }
  0x6f   :  { %5183 = vmatprep.subr.bf16.mxu0 %v5590_v48 }
  0x72   :  { %5184 = vmatpush3.bf16.msra.mxu0 %v5591_v49 }
  0x73   :  { %5185 = vmatprep.subr.bf16.mxu0 %v5592_v50 }
  0x76   :  { %5186 = vmatpush3.bf16.msra.mxu0 %v5593_v51 }
  0x77   :  { %5187 = vmatprep.subr.bf16.mxu0 %v5594_v52 }
  0x7a   :  { %5188 = vmatpush3.bf16.msra.mxu0 %v5595_v53 }
  0x7b   :  { %5189 = vmatprep.subr.bf16.mxu0 %v5596_v54 }
  0x7e   :  { %5190 = vmatpush3.bf16.msra.mxu0 %v5597_v55 }
  0xec   :  { %v144_v56 = vpop.xlane.xlu1 %143 }
  0xed   :  { %5750 = vrsqrt.f32 %v144_v56  ;;  %v138_v57 = vpop.xlane.xlu0 %137  ;;  %vm176_vm0 = vcmp.eq.f32.partialorder %v144_v56, inf  ;;  %vm178_vm1 = vcmp.eq.f32.partialorder %v144_v56, 0.0  ;;  %v179_v4 = vand.u32 2147483648, %v144_v56 }
  0xee   :  { %5752 = vrsqrt.f32 %v138_v57  ;;  %vm162_vm2 = vcmp.eq.f32.partialorder %v138_v57, inf  ;;  %vm164_vm3 = vcmp.eq.f32.partialorder %v138_v57, 0.0  ;;  %v165_v10 = vand.u32 2147483648, %v138_v57 }
  0xf0   :  { %v147_v58 = vpop.xlane.xlu1 %146 }
  0xf1   :  { %5754 = vrsqrt.f32 %v147_v58  ;;  %v141_v59 = vpop.xlane.xlu0 %140  ;;  %vm183_vm4 = vcmp.eq.f32.partialorder %v147_v58, inf  ;;  %vm185_vm5 = vcmp.eq.f32.partialorder %v147_v58, 0.0  ;;  %v186_v21 = vand.u32 2147483648, %v147_v58 }
  0xf2   :  { %5756 = vrsqrt.f32 %v141_v59  ;;  %vm169_vm6 = vcmp.eq.f32.partialorder %v141_v59, inf  ;;  %vm171_vm7 = vcmp.eq.f32.partialorder %v141_v59, 0.0  ;;  %v172_v29 = vand.u32 2147483648, %v141_v59 }
  0xf4   :  { %v6805_v60 = vpop.xlane.xlu1 %152 }
  0xf5   :  { %5758 = vrsqrt.f32 %v6805_v60  ;;  %v6808_v61 = vpop.xlane.xlu0 %149  ;;  %vm197_vm8 = vcmp.eq.f32.partialorder %v6805_v60, inf  ;;  %vm199_vm9 = vcmp.eq.f32.partialorder %v6805_v60, 0.0  ;;  %v200_v35 = vand.u32 2147483648, %v6805_v60 }
  0xf6   :  { %5760 = vrsqrt.f32 %v6808_v61  ;;  %vm190_vm10 = vcmp.eq.f32.partialorder %v6808_v61, inf  ;;  %vm192_vm11 = vcmp.eq.f32.partialorder %v6808_v61, 0.0  ;;  %v193_v38 = vand.u32 2147483648, %v6808_v61 }
  0xf7   :  { %v5751_v62 = vpop.eup %5750 }
  0xf8   :  { %v5753_v63 = vpop.eup %5752  ;;  %v175_v3 = vmul.f32 %v5751_v62, %v144_v56  ;;  %v6811_v6 = vpop.xlane.xlu1 %158 }
  0xf9   :  { %v161_v9 = vmul.f32 %v5753_v63, %v138_v57  ;;  %5762 = vrsqrt.f32 %v6811_v6  ;;  %v156_v11 = vpop.xlane.xlu0 %155  ;;  %vm211_vm12 = vcmp.eq.f32.partialorder %v6811_v6, inf  ;;  %vm213_vm13 = vcmp.eq.f32.partialorder %v6811_v6, 0.0 }
  0xfa   :  { %v177_v15 = vsel %vm176_vm0, %v144_v56, %v175_v3  ;;  %5764 = vrsqrt.f32 %v156_v11  ;;  %v214_v47 = vand.u32 2147483648, %v6811_v6  ;;  %vm204_vm14 = vcmp.eq.f32.partialorder %v156_v11, inf }
  0xfb   :  { %v5755_v16 = vpop.eup %5754  ;;  %v163_v17 = vsel %vm162_vm2, %v138_v57, %v161_v9  ;;  %v180_v24 = vsel %vm178_vm1, %v179_v4, %v177_v15  ;;  %v207_v53 = vand.u32 2147483648, %v156_v11  ;;  %vm206_vm15 = vcmp.eq.f32.partialorder %v156_v11, 0.0 }
  0xfc   :  { %v5757_v25 = vpop.eup %5756  ;;  %v182_v26 = vmul.f32 %v5755_v16, %v147_v58  ;;  %v166_v30 = vsel %vm164_vm3, %v165_v10, %v163_v17  ;;  %v218_v33 = vadd.f32 1e-06, %v180_v24  ;;  %vm4361_vm0 = vcmask 7168  }
  0xfd   :  { %v168_v31 = vmul.f32 %v5757_v25, %v141_v59  ;;  %v216_v32 = vadd.f32 1e-06, %v166_v30 }
  0xfe   :  { %v184_v34 = vsel %vm183_vm4, %v147_v58, %v182_v26 }
  0xff   :  { %v5759_v36 = vpop.eup %5758  ;;  %v170_v37 = vsel %vm169_vm6, %v141_v59, %v168_v31  ;;  %v187_v39 = vsel %vm185_vm5, %v186_v21, %v184_v34  ;;  %5766 = vrcp.f32 %v216_v32 }
 0x100   :  { %v5761_v40 = vpop.eup %5760  ;;  %v196_v41 = vmul.f32 %v5759_v36, %v6805_v60  ;;  %v173_v42 = vsel %vm171_vm7, %v172_v29, %v170_v37  ;;  %v219_v43 = vadd.f32 1e-06, %v187_v39  ;;  %5768 = vrcp.f32 %v218_v33 }
 0x101   :  { %v189_v44 = vmul.f32 %v5761_v40, %v6808_v61  ;;  %v217_v45 = vadd.f32 1e-06, %v173_v42 }
 0x102   :  { %v198_v46 = vsel %vm197_vm8, %v6805_v60, %v196_v41  ;;  %5770 = vrcp.f32 %v219_v43 }
 0x103   :  { %v5763_v48 = vpop.eup %5762  ;;  %v191_v49 = vsel %vm190_vm10, %v6808_v61, %v189_v44  ;;  %5772 = vrcp.f32 %v217_v45  ;;  %v201_v50 = vsel %vm199_vm9, %v200_v35, %v198_v46 }
 0x104   :  { %v5765_v51 = vpop.eup %5764  ;;  %v210_v52 = vmul.f32 %v5763_v48, %v6811_v6  ;;  %v194_v54 = vsel %vm192_vm11, %v193_v38, %v191_v49  ;;  %v221_v55 = vadd.f32 1e-06, %v201_v50 }
 0x105   :  { %v203_v56 = vmul.f32 %v5765_v51, %v156_v11  ;;  %v220_v57 = vadd.f32 1e-06, %v194_v54 }
 0x106   :  { %v212_v58 = vsel %vm211_vm12, %v6811_v6, %v210_v52  ;;  %5774 = vrcp.f32 %v221_v55 }
 0x107   :  { %v205_v59 = vsel %vm204_vm14, %v156_v11, %v203_v56  ;;  %5776 = vrcp.f32 %v220_v57  ;;  %v215_v60 = vsel %vm213_vm13, %v214_v47, %v212_v58 }
 0x108   :  { %v208_v62 = vsel %vm206_vm15, %v207_v53, %v205_v59  ;;  %v223_v3 = vadd.f32 1e-06, %v215_v60 }
 0x109   :  { %v5767_v63 = vpop.eup %5766  ;;  %v222_v61 = vadd.f32 1e-06, %v208_v62 }
 0x10a   :  { %v5769_v4 = vpop.eup %5768  ;;  %v233_v15 = vmul.f32 %v5767_v63, %v6751_v5  ;;  %v232_v16 = vmul.f32 %v5767_v63, %v6745_v2  ;;  %5778 = vrcp.f32 %v223_v3 }
 0x10b   :  { %5780 = vrcp.f32 %v222_v61  ;;  %v237_v26 = vmul.f32 %v5769_v4, %v6743_v1 }
 0x10c   :  { %v5771_v9 = vpop.eup %5770 }
 0x10d   :  { %v5773_v10 = vpop.eup %5772  ;;  %v239_v11 = vmul.f32 %v5771_v9, %v6757_v8 }
 0x10e   :  { %v235_v17 = vmul.f32 %v5773_v10, %v6767_v13  ;;  %v234_v21 = vmul.f32 %v5773_v10, %v6765_v12  ;;  %v238_v12 = vmul.f32 %v5771_v9, %v6755_v7  ;;  %v236_v13 = vmul.f32 %v5769_v4, %v6741_v0 }
 0x10f   :  { %v6858_v5 = vpack.c.bf16 %v239_v11, %v237_v26 }
 0x110   :  { %v5775_v6 = vpop.eup %5774  ;;  %v6852_v24 = vpack.c.bf16 %v235_v17, %v233_v15  ;;  %v6854_v25 = vpack.c.bf16 %v234_v21, %v232_v16  ;;  %v6868_v32 = vpack.c.bf16 %v238_v12, %v236_v13 }
 0x111   :  { %v5777_v29 = vpop.eup %5776  ;;  %v243_v8 = vmul.f32 %v5775_v6, %v6775_v18  ;;  %v242_v7 = vmul.f32 %v5775_v6, %v6769_v14  ;;  %v4889_v14 = vld [vmem:[%s8563_s3] ss:$0 sm:$0xff] }
 0x112   :  { %421 = vmatprep.mubr.bf16.mxu0 %v6852_v24  ;;  %v241_v2 = vmul.f32 %v5777_v29, %v6779_v20  ;;  %v240_v18 = vmul.f32 %v5777_v29, %v6777_v19 }
 0x113   :  { %422 = vmatmul.mubr.bf16.vlgmr.msra.gmra.mrb[0].mxu0 %v6854_v25 }
 0x114   :  { %429 = vmatprep.mubr.bf16.mxu0 %v6858_v5  ;;  %v5779_v30 = vpop.eup %5778  ;;  %v6866_v31 = vpack.c.bf16 %v243_v8, %v241_v2  ;;  %v6878_v0 = vpack.c.bf16 %v242_v7, %v240_v18 }
 0x115   :  { %v5781_v1 = vpop.eup %5780  ;;  %v247_v20 = vmul.f32 %v5779_v30, %v6783_v23  ;;  %v246_v36 = vmul.f32 %v5779_v30, %v6781_v22 }
 0x116   :  { %v245_v33 = vmul.f32 %v5781_v1, %v6791_v28  ;;  %v244_v35 = vmul.f32 %v5781_v1, %v6789_v27 }
 0x118   :  { %v6876_v34 = vpack.c.bf16 %v247_v20, %v245_v33  ;;  %v6884_v37 = vpack.c.bf16 %v246_v36, %v244_v35 }
 0x11b   :  { %430 = vmatmul.mubr.bf16.gmra.mrb[4].mxu0 %v6868_v32 }
 0x11c   :  { %437 = vmatprep.mubr.bf16.mxu0 %v6866_v31 }
 0x123   :  { %438 = vmatmul.mubr.bf16.gmra.mrb[8].mxu0 %v6878_v0 }
 0x124   :  { %445 = vmatprep.mubr.bf16.mxu0 %v6876_v34 }
 0x12b   :  { %446 = vmatmul.mubr.bf16.gmra.mrb[12].mxu0 %v6884_v37 }
 0x1e6   :  { %v5191_v23 = vpop.f32.mrb[0].mxu0 }
 0x1e7   :  { %v5192_v19 = vpop.f32.mrb[1].mxu0 }
 0x1e8   :  { %v5193_v28 = vadd.f32 %v5192_v19, %v5191_v23  ;;  %v5194_v38 = vpop.f32.mrb[2].mxu0 }
 0x1e9   :  { %v5195_v39 = vpop.f32.mrb[3].mxu0 }
 0x1ea   :  { %v424_v40 = vadd.f32 %v5193_v28, %v4889_v14  ;;  %v5196_v41 = vadd.f32 %v5195_v39, %v5194_v38 }
 0x1ec   :  { %v4906_v42 = vmul.f32 -1.442695, %v424_v40  ;;  %v427_v43 = vadd.f32 %v5196_v41, %v4889_v14 }
 0x1ee   :  { %5782 = vpow2.f32 %v4906_v42  ;;  %v4907_v27 = vmul.f32 -1.442695, %v427_v43  ;;  %v5197_v22 = vpop.f32.mrb[4].mxu0 }
 0x1ef   :  { %v5198_v44 = vpop.f32.mrb[5].mxu0 }
 0x1f0   :  { %5784 = vpow2.f32 %v4907_v27  ;;  %v5199_v45 = vadd.f32 %v5198_v44, %v5197_v22  ;;  %v5200_v46 = vpop.f32.mrb[6].mxu0 }
 0x1f1   :  { %v5201_v47 = vpop.f32.mrb[7].mxu0 }
 0x1f2   :  { %v432_v48 = vadd.f32 %v5199_v45, %v4889_v14  ;;  %v5202_v49 = vadd.f32 %v5201_v47, %v5200_v46 }
 0x1f4   :  { %v4908_v50 = vmul.f32 -1.442695, %v432_v48  ;;  %v435_v51 = vadd.f32 %v5202_v49, %v4889_v14 }
 0x1f6   :  { %5786 = vpow2.f32 %v4908_v50  ;;  %v4909_v52 = vmul.f32 -1.442695, %v435_v51  ;;  %v5203_v53 = vpop.f32.mrb[8].mxu0 }
 0x1f7   :  { %v5204_v54 = vpop.f32.mrb[9].mxu0 }
 0x1f8   :  { %v5783_v55 = vpop.eup %5782  ;;  %5788 = vpow2.f32 %v4909_v52  ;;  %v5205_v56 = vadd.f32 %v5204_v54, %v5203_v53  ;;  %v5206_v57 = vpop.f32.mrb[10].mxu0 }
 0x1f9   :  { %v478_v58 = vadd.f32 1.0, %v5783_v55  ;;  %v5207_v59 = vpop.f32.mrb[11].mxu0 }
 0x1fa   :  { %v5785_v60 = vpop.eup %5784  ;;  %v440_v62 = vadd.f32 %v5205_v56, %v4889_v14  ;;  %v5208_v63 = vadd.f32 %v5207_v59, %v5206_v57 }
 0x1fb   :  { %5790 = vrcp.f32 %v478_v58  ;;  %v479_v3 = vadd.f32 1.0, %v5785_v60 }
 0x1fc   :  { %v4910_v4 = vmul.f32 -1.442695, %v440_v62  ;;  %v443_v61 = vadd.f32 %v5208_v63, %v4889_v14 }
 0x1fd   :  { %5792 = vrcp.f32 %v479_v3 }
 0x1fe   :  { %5794 = vpow2.f32 %v4910_v4  ;;  %v4911_v9 = vmul.f32 -1.442695, %v443_v61  ;;  %v5209_v10 = vpop.f32.mrb[12].mxu0 }
 0x1ff   :  { %v5210_v15 = vpop.f32.mrb[13].mxu0 }
 0x200   :  { %v5787_v16 = vpop.eup %5786  ;;  %5796 = vpow2.f32 %v4911_v9  ;;  %v5211_v17 = vadd.f32 %v5210_v15, %v5209_v10  ;;  %v5212_v21 = vpop.f32.mrb[14].mxu0 }
 0x201   :  { %v480_v11 = vadd.f32 1.0, %v5787_v16  ;;  %v5213_v6 = vpop.f32.mrb[15].mxu0 }
 0x202   :  { %v5789_v26 = vpop.eup %5788  ;;  %v448_v29 = vadd.f32 %v5211_v17, %v4889_v14  ;;  %v5214_v2 = vadd.f32 %v5213_v6, %v5212_v21  ;;  %v5598_v17 = vld [vmem:[#allocation6] sm:$0xff]  }
 0x203   :  { %5798 = vrcp.f32 %v480_v11  ;;  %v481_v8 = vadd.f32 1.0, %v5789_v26  ;;  %5351 = vmatprep.subr.bf16.mxu1 %v5598_v17 }
 0x204   :  { %v4912_v12 = vmul.f32 -1.442695, %v448_v29  ;;  %v451_v13 = vadd.f32 %v5214_v2, %v4889_v14  ;;  %5352 = vmatpush3.bf16.msra.mxu1 %v5598_v17 }
 0x205   :  { %v5791_v30 = vpop.eup %5790  ;;  %5800 = vrcp.f32 %v481_v8 }
 0x206   :  { %5802 = vpow2.f32 %v4912_v12  ;;  %v4913_v1 = vmul.f32 -1.442695, %v451_v13  ;;  %v502_v33 = vmul.f32 %v5791_v30, %v424_v40  ;;  %v5600_v30 = vld [vmem:[#allocation6 + $0x10] sm:$0xff]  }
 0x207   :  { %v5793_v20 = vpop.eup %5792 }
 0x208   :  { %v5795_v18 = vpop.eup %5794  ;;  %5804 = vpow2.f32 %v4913_v1  ;;  %512 = vadd.xlane.f32.xlu0 %v502_v33  ;;  %v503_v7 = vmul.f32 %v5793_v20, %v427_v43 }
 0x209   :  { %v482_v35 = vadd.f32 1.0, %v5795_v18  ;;  %v5601_v18 = vld [vmem:[#allocation6 + $0x18] sm:$0xff]  }
 0x20a   :  { %v5797_v36 = vpop.eup %5796  ;;  %514 = vadd.xlane.f32.xlu1 %v503_v7 }
 0x20b   :  { %5806 = vrcp.f32 %v482_v35  ;;  %v483_v23 = vadd.f32 1.0, %v5797_v36  ;;  %v5603_v35 = vld [vmem:[#allocation6 + $0x28] sm:$0xff]   ;;  %v5604_v36 = vld [vmem:[#allocation6 + $0x30] sm:$0xff]  }
 0x20d   :  { %v5799_v19 = vpop.eup %5798  ;;  %5808 = vrcp.f32 %v483_v23  ;;  %v5605_v23 = vld [vmem:[#allocation6 + $0x38] sm:$0xff]  }
 0x20e   :  { %v504_v28 = vmul.f32 %v5799_v19, %v432_v48 }
 0x20f   :  { %v5801_v38 = vpop.eup %5800 }
 0x210   :  { %v5803_v14 = vpop.eup %5802  ;;  %516 = vadd.xlane.f32.xlu0 %v504_v28  ;;  %v505_v39 = vmul.f32 %v5801_v38, %v435_v51 }
 0x211   :  { %v484_v41 = vadd.f32 1.0, %v5803_v14 }
 0x212   :  { %v5805_v42 = vpop.eup %5804  ;;  %518 = vadd.xlane.f32.xlu1 %v505_v39 }
 0x213   :  { %5810 = vrcp.f32 %v484_v41  ;;  %v485_v40 = vadd.f32 1.0, %v5805_v42 }
 0x215   :  { %v5807_v27 = vpop.eup %5806  ;;  %5812 = vrcp.f32 %v485_v40 }
 0x216   :  { %v506_v43 = vmul.f32 %v5807_v27, %v440_v62 }
 0x217   :  { %v5809_v22 = vpop.eup %5808 }
 0x218   :  { %520 = vadd.xlane.f32.xlu0 %v506_v43  ;;  %v507_v44 = vmul.f32 %v5809_v22, %v443_v61 }
 0x21a   :  { %522 = vadd.xlane.f32.xlu1 %v507_v44 }
 0x21d   :  { %v5811_v45 = vpop.eup %5810 }
 0x21e   :  { %v508_v46 = vmul.f32 %v5811_v45, %v448_v29  ;;  %v5599_v29 = vld [vmem:[#allocation6 + $0x8] sm:$0xff]  }
 0x21f   :  { %v5813_v47 = vpop.eup %5812  ;;  %5353 = vmatprep.subr.bf16.mxu1 %v5599_v29 }
 0x220   :  { %524 = vadd.xlane.f32.xlu0 %v508_v46  ;;  %v509_v48 = vmul.f32 %v5813_v47, %v451_v13  ;;  %5354 = vmatpush3.bf16.msra.mxu1 %v5599_v29 }
 0x221   :  { %5355 = vmatprep.subr.bf16.mxu1 %v5600_v30 }
 0x222   :  { %526 = vadd.xlane.f32.xlu1 %v509_v48 }
 0x224   :  { %5356 = vmatpush3.bf16.msra.mxu1 %v5600_v30 }
 0x225   :  { %5357 = vmatprep.subr.bf16.mxu1 %v5601_v18 }
 0x228   :  { %5358 = vmatpush3.bf16.msra.mxu1 %v5601_v18 }
 0x295   :  { %v513_v49 = vpop.xlane.xlu0 %512 }
 0x296   :  { %v529_v50 = vmul.f32 0.0078125, %v513_v49 }
 0x297   :  { %v515_v51 = vpop.xlane.xlu1 %514 }
 0x298   :  { %v530_v52 = vmul.f32 0.0078125, %v515_v51  ;;  %v6890_v53 = vsub.f32 %v502_v33, %v529_v50 }
 0x29a   :  { %v545_v54 = vmul.f32 %v6890_v53, %v6890_v53  ;;  %v6894_v55 = vsub.f32 %v503_v7, %v530_v52  ;;  %v5602_v7 = vld [vmem:[#allocation6 + $0x20] sm:$0xff]  }
 0x29b   :  { %5359 = vmatprep.subr.bf16.mxu1 %v5602_v7 }
 0x29c   :  { %553 = vadd.xlane.f32.xlu0 %v545_v54  ;;  %v546_v56 = vmul.f32 %v6894_v55, %v6894_v55  ;;  %5360 = vmatpush3.bf16.msra.mxu1 %v5602_v7 }
 0x29d   :  { %v517_v57 = vpop.xlane.xlu0 %516  ;;  %5361 = vmatprep.subr.bf16.mxu1 %v5603_v35 }
 0x29e   :  { %v531_v58 = vmul.f32 0.0078125, %v517_v57  ;;  %555 = vadd.xlane.f32.xlu1 %v546_v56 }
 0x29f   :  { %v519_v59 = vpop.xlane.xlu1 %518 }
 0x2a0   :  { %v532_v60 = vmul.f32 0.0078125, %v519_v59  ;;  %v6898_v62 = vsub.f32 %v504_v28, %v531_v58  ;;  %5362 = vmatpush3.bf16.msra.mxu1 %v5603_v35  ;;  %v4915_v58 = vld [vmem:[%s8565_s5] ss:$0 sm:$0xff] }
 0x2a1   :  { %5363 = vmatprep.subr.bf16.mxu1 %v5604_v36 }
 0x2a2   :  { %v547_v63 = vmul.f32 %v6898_v62, %v6898_v62  ;;  %v6902_v3 = vsub.f32 %v505_v39, %v532_v60 }
 0x2a4   :  { %557 = vadd.xlane.f32.xlu0 %v547_v63  ;;  %v548_v4 = vmul.f32 %v6902_v3, %v6902_v3  ;;  %5364 = vmatpush3.bf16.msra.mxu1 %v5604_v36 }
 0x2a5   :  { %v521_v61 = vpop.xlane.xlu0 %520  ;;  %5365 = vmatprep.subr.bf16.mxu1 %v5605_v23 }
 0x2a6   :  { %v533_v9 = vmul.f32 0.0078125, %v521_v61  ;;  %559 = vadd.xlane.f32.xlu1 %v548_v4 }
 0x2a7   :  { %v523_v10 = vpop.xlane.xlu1 %522 }
 0x2a8   :  { %v534_v15 = vmul.f32 0.0078125, %v523_v10  ;;  %v6906_v16 = vsub.f32 %v506_v43, %v533_v9  ;;  %5366 = vmatpush3.bf16.msra.mxu1 %v5605_v23 }
 0x2aa   :  { %v549_v21 = vmul.f32 %v6906_v16, %v6906_v16  ;;  %v6910_v11 = vsub.f32 %v507_v44, %v534_v15 }
 0x2ac   :  { %561 = vadd.xlane.f32.xlu0 %v549_v21  ;;  %v550_v6 = vmul.f32 %v6910_v11, %v6910_v11 }
 0x2ad   :  { %v525_v26 = vpop.xlane.xlu0 %524 }
 0x2ae   :  { %v535_v2 = vmul.f32 0.0078125, %v525_v26  ;;  %563 = vadd.xlane.f32.xlu1 %v550_v6 }
 0x2af   :  { %v527_v8 = vpop.xlane.xlu1 %526 }
 0x2b0   :  { %v536_v12 = vmul.f32 0.0078125, %v527_v8  ;;  %v6914_v13 = vsub.f32 %v508_v46, %v535_v2  ;;  %v4914_v46 = vld [vmem:[%s8564_s4] ss:$0 sm:$0xff] }
 0x2b2   :  { %v551_v1 = vmul.f32 %v6914_v13, %v6914_v13  ;;  %v6918_v33 = vsub.f32 %v509_v48, %v536_v12 }
 0x2b4   :  { %565 = vadd.xlane.f32.xlu0 %v551_v1  ;;  %v552_v20 = vmul.f32 %v6918_v33, %v6918_v33 }
 0x2b6   :  { %567 = vadd.xlane.f32.xlu1 %v552_v20 }
 0x329   :  { %v554_v19 = vpop.xlane.xlu0 %553 }
 0x32a   :  { %v569_v28 = vmul.f32 0.0078125, %v554_v19 }
 0x32b   :  { %v556_v38 = vpop.xlane.xlu1 %555 }
 0x32c   :  { %v577_v14 = vadd.f32 0.1, %v569_v28  ;;  %v570_v39 = vmul.f32 0.0078125, %v556_v38 }
 0x32e   :  { %5814 = vrsqrt.f32 %v577_v14  ;;  %v578_v41 = vadd.f32 0.1, %v570_v39 }
 0x330   :  { %5816 = vrsqrt.f32 %v578_v41 }
 0x331   :  { %v558_v42 = vpop.xlane.xlu0 %557 }
 0x332   :  { %v571_v40 = vmul.f32 0.0078125, %v558_v42 }
 0x333   :  { %v560_v27 = vpop.xlane.xlu1 %559 }
 0x334   :  { %v579_v43 = vadd.f32 0.1, %v571_v40  ;;  %v572_v22 = vmul.f32 0.0078125, %v560_v27  ;;  %v4916_v27 = vld [vmem:[%s8563_s3 + $0x1] ss:$0 sm:$0xff] }
 0x336   :  { %5818 = vrsqrt.f32 %v579_v43  ;;  %v580_v44 = vadd.f32 0.1, %v572_v22 }
 0x338   :  { %v5815_v45 = vpop.eup %5814  ;;  %5820 = vrsqrt.f32 %v580_v44 }
 0x339   :  { %v562_v47 = vpop.xlane.xlu0 %561  ;;  %v593_v48 = vmul.f32 %v5815_v45, %v6890_v53 }
 0x33a   :  { %v5817_v49 = vpop.eup %5816  ;;  %v573_v50 = vmul.f32 0.0078125, %v562_v47 }
 0x33b   :  { %v564_v51 = vpop.xlane.xlu1 %563  ;;  %v594_v52 = vmul.f32 %v5817_v49, %v6894_v55  ;;  %v605_v54 = vmul.f32 %v4914_v46, %v593_v48 }
 0x33c   :  { %v581_v56 = vadd.f32 0.1, %v573_v50  ;;  %v574_v57 = vmul.f32 0.0078125, %v564_v51 }
 0x33d   :  { %v606_v59 = vmul.f32 %v4914_v46, %v594_v52  ;;  %v6930_v63 = vadd.f32 %v4915_v58, %v605_v54 }
 0x33e   :  { %5822 = vrsqrt.f32 %v581_v56  ;;  %v582_v60 = vadd.f32 0.1, %v574_v57 }
 0x33f   :  { %v6932_v4 = vadd.f32 %v4915_v58, %v606_v59 }
 0x340   :  { %v5819_v53 = vpop.eup %5818  ;;  %5824 = vrsqrt.f32 %v582_v60 }
 0x341   :  { %v566_v61 = vpop.xlane.xlu0 %565  ;;  %v625_v55 = vpack.c.bf16 %v6932_v4, %v6930_v63  ;;  %v595_v9 = vmul.f32 %v5819_v53, %v6898_v62 }
 0x342   :  { %v5821_v10 = vpop.eup %5820  ;;  %v575_v15 = vmul.f32 0.0078125, %v566_v61 }
 0x343   :  { %v568_v17 = vpop.xlane.xlu1 %567  ;;  %5367 = vmatprep.mubr.bf16.mxu1 %v625_v55  ;;  %v596_v21 = vmul.f32 %v5821_v10, %v6902_v3  ;;  %v607_v6 = vmul.f32 %v4914_v46, %v595_v9 }
 0x344   :  { %v583_v26 = vadd.f32 0.1, %v575_v15  ;;  %v576_v29 = vmul.f32 0.0078125, %v568_v17 }
 0x345   :  { %v608_v2 = vmul.f32 %v4914_v46, %v596_v21  ;;  %v6938_v12 = vadd.f32 %v4915_v58, %v607_v6 }
 0x346   :  { %5826 = vrsqrt.f32 %v583_v26  ;;  %v584_v8 = vadd.f32 0.1, %v576_v29 }
 0x347   :  { %v6940_v30 = vadd.f32 %v4915_v58, %v608_v2 }
 0x348   :  { %v5823_v1 = vpop.eup %5822  ;;  %5828 = vrsqrt.f32 %v584_v8 }
 0x349   :  { %v626_v62 = vpack.c.bf16 %v6940_v30, %v6938_v12  ;;  %v597_v20 = vmul.f32 %v5823_v1, %v6906_v16 }
 0x34a   :  { %v5825_v18 = vpop.eup %5824 }
 0x34b   :  { %5368 = vmatmul.mubr.bf16.vlgmr.msra.gmra.mrb[0].mxu1 %v626_v62  ;;  %v598_v3 = vmul.f32 %v5825_v18, %v6910_v11  ;;  %v609_v7 = vmul.f32 %v4914_v46, %v597_v20 }
 0x34d   :  { %v610_v35 = vmul.f32 %v4914_v46, %v598_v3  ;;  %v6946_v36 = vadd.f32 %v4915_v58, %v609_v7 }
 0x34f   :  { %v6948_v23 = vadd.f32 %v4915_v58, %v610_v35 }
 0x350   :  { %v5827_v19 = vpop.eup %5826 }
 0x351   :  { %v627_v28 = vpack.c.bf16 %v6948_v23, %v6946_v36  ;;  %v599_v38 = vmul.f32 %v5827_v19, %v6914_v13 }
 0x352   :  { %v5829_v14 = vpop.eup %5828 }
 0x353   :  { %5371 = vmatprep.mubr.bf16.mxu1 %v627_v28  ;;  %v600_v16 = vmul.f32 %v5829_v14, %v6918_v33  ;;  %v611_v39 = vmul.f32 %v4914_v46, %v599_v38 }
 0x355   :  { %v612_v41 = vmul.f32 %v4914_v46, %v600_v16  ;;  %v6954_v42 = vadd.f32 %v4915_v58, %v611_v39 }
 0x357   :  { %v6956_v11 = vadd.f32 %v4915_v58, %v612_v41 }
 0x359   :  { %v628_v40 = vpack.c.bf16 %v6956_v11, %v6954_v42 }
 0x35b   :  { %5372 = vmatmul.mubr.bf16.gmra.mrb[4].mxu1 %v628_v40 }
 0x41e   :  { %v5369_v43 = vpop.f32.mrb[0].mxu1 }
 0x41f   :  { %v741_v13 = vadd.f32 %v5369_v43, %v4916_v27  ;;  %v732_v22 = vpop.f32.mrb[1].mxu1 }
 0x420   :  { %v733_v44 = vadd.f32 %v4916_v27, %v732_v22  ;;  %v5370_v45 = vpop.f32.mrb[2].mxu1 }
 0x421   :  { %v765_v33 = vadd.f32 %v741_v13, %v6938_v12  ;;  %v744_v46 = vadd.f32 %v5370_v45, %v4916_v27  ;;  %v735_v47 = vpop.f32.mrb[3].mxu1 }
 0x422   :  { %v763_v48 = vadd.f32 %v733_v44, %v6930_v63  ;;  %v736_v49 = vadd.f32 %v4916_v27, %v735_v47 }
 0x423   :  { %v4927_v50 = vmul.f32 -1.442695, %v765_v33  ;;  %v766_v51 = vadd.f32 %v744_v46, %v6940_v30 }
 0x424   :  { %v4925_v52 = vmul.f32 -1.442695, %v763_v48  ;;  %v764_v54 = vadd.f32 %v736_v49, %v6932_v4 }
 0x425   :  { %5830 = vpow2.f32 %v4927_v50  ;;  %v4928_v56 = vmul.f32 -1.442695, %v766_v51 }
 0x426   :  { %5832 = vpow2.f32 %v4925_v52  ;;  %v4926_v57 = vmul.f32 -1.442695, %v764_v54 }
 0x427   :  { %5834 = vpow2.f32 %v4928_v56 }
 0x428   :  { %5836 = vpow2.f32 %v4926_v57 }
 0x42e   :  { %v5373_v58 = vpop.f32.mrb[4].mxu1 }
 0x42f   :  { %v5831_v59 = vpop.eup %5830  ;;  %v757_v60 = vadd.f32 %v5373_v58, %v4916_v27  ;;  %v748_v53 = vpop.f32.mrb[5].mxu1 }
 0x430   :  { %v5833_v61 = vpop.eup %5832  ;;  %v797_v55 = vadd.f32 1.0, %v5831_v59  ;;  %v749_v9 = vadd.f32 %v4916_v27, %v748_v53  ;;  %v5374_v10 = vpop.f32.mrb[6].mxu1  ;;  %v5606_v59 = vld [vmem:[#allocation6 + $0x40] sm:$0xff]  }
 0x431   :  { %v5835_v15 = vpop.eup %5834  ;;  %v795_v17 = vadd.f32 1.0, %v5833_v61  ;;  %v769_v21 = vadd.f32 %v757_v60, %v6954_v42  ;;  %v760_v6 = vadd.f32 %v5374_v10, %v4916_v27  ;;  %v751_v26 = vpop.f32.mrb[7].mxu1  ;;  %5375 = vmatprep.subr.bf16.mxu0 %v5606_v59 }
 0x432   :  { %v5837_v29 = vpop.eup %5836  ;;  %5838 = vrcp.f32 %v797_v55  ;;  %v798_v2 = vadd.f32 1.0, %v5835_v15  ;;  %v767_v8 = vadd.f32 %v749_v9, %v6946_v36  ;;  %v752_v1 = vadd.f32 %v4916_v27, %v751_v26  ;;  %5376 = vmatpush3.bf16.msra.mxu0 %v5606_v59 }
 0x433   :  { %5840 = vrcp.f32 %v795_v17  ;;  %v796_v62 = vadd.f32 1.0, %v5837_v29  ;;  %v4931_v20 = vmul.f32 -1.442695, %v769_v21  ;;  %v770_v18 = vadd.f32 %v760_v6, %v6956_v11 }
 0x434   :  { %5842 = vrcp.f32 %v798_v2  ;;  %v4929_v3 = vmul.f32 -1.442695, %v767_v8  ;;  %v768_v7 = vadd.f32 %v752_v1, %v6948_v23 }
 0x435   :  { %5844 = vrcp.f32 %v796_v62  ;;  %v4932_v35 = vmul.f32 -1.442695, %v770_v18 }
 0x436   :  { %5846 = vpow2.f32 %v4931_v20  ;;  %v4930_v19 = vmul.f32 -1.442695, %v768_v7 }
 0x437   :  { %5848 = vpow2.f32 %v4929_v3 }
 0x438   :  { %5850 = vpow2.f32 %v4932_v35 }
 0x439   :  { %5852 = vpow2.f32 %v4930_v19  ;;  %v5607_v19 = vld [vmem:[#allocation6 + $0x48] sm:$0xff]  }
 0x43a   :  { %5377 = vmatprep.subr.bf16.mxu0 %v5607_v19 }
 0x43b   :  { %5378 = vmatpush3.bf16.msra.mxu0 %v5607_v19 }
 0x43c   :  { %v5839_v28 = vpop.eup %5838 }
 0x43d   :  { %v5841_v38 = vpop.eup %5840  ;;  %v821_v44 = vmul.f32 %v5839_v28, %v765_v33 }
 0x43e   :  { %v5843_v14 = vpop.eup %5842  ;;  %v819_v16 = vmul.f32 %v5841_v38, %v763_v48 }
 0x43f   :  { %v5845_v39 = vpop.eup %5844  ;;  %v822_v49 = vmul.f32 %v5843_v14, %v766_v51 }
 0x440   :  { %v5847_v41 = vpop.eup %5846  ;;  %829 = vadd.xlane.f32.xlu0 %v819_v16  ;;  %v820_v40 = vmul.f32 %v5845_v39, %v764_v54 }
 0x441   :  { %v5849_v27 = vpop.eup %5848  ;;  %v801_v43 = vadd.f32 1.0, %v5847_v41 }
 0x442   :  { %v5851_v13 = vpop.eup %5850  ;;  %v799_v22 = vadd.f32 1.0, %v5849_v27  ;;  %831 = vadd.xlane.f32.xlu1 %v820_v40  ;;  %v5608_v27 = vld [vmem:[#allocation6 + $0x50] sm:$0xff]  }
 0x443   :  { %v5853_v45 = vpop.eup %5852  ;;  %v802_v46 = vadd.f32 1.0, %v5851_v13  ;;  %5379 = vmatprep.subr.bf16.mxu0 %v5608_v27 }
 0x444   :  { %5854 = vrcp.f32 %v799_v22  ;;  %v800_v47 = vadd.f32 1.0, %v5853_v45  ;;  %833 = vadd.xlane.f32.xlu0 %v821_v44  ;;  %5380 = vmatpush3.bf16.msra.mxu0 %v5608_v27  ;;  %v5610_v45 = vld [vmem:[#allocation6 + $0x60] sm:$0xff]  }
 0x445   :  { %5856 = vrcp.f32 %v801_v43 }
 0x446   :  { %5858 = vrcp.f32 %v800_v47  ;;  %835 = vadd.xlane.f32.xlu1 %v822_v49  ;;  %v5612_v47 = vld [vmem:[#allocation6 + $0x70] sm:$0xff]  }
 0x447   :  { %5860 = vrcp.f32 %v802_v46  ;;  %v5611_v46 = vld [vmem:[#allocation6 + $0x68] sm:$0xff]  }
 0x44e   :  { %v5855_v48 = vpop.eup %5854 }
 0x44f   :  { %v5857_v50 = vpop.eup %5856  ;;  %v823_v52 = vmul.f32 %v5855_v48, %v767_v8 }
 0x450   :  { %v5859_v54 = vpop.eup %5858  ;;  %v825_v58 = vmul.f32 %v5857_v50, %v769_v21 }
 0x451   :  { %837 = vadd.xlane.f32.xlu0 %v823_v52  ;;  %v824_v56 = vmul.f32 %v5859_v54, %v768_v7  ;;  %v5861_v57 = vpop.eup %5860 }
 0x452   :  { %v826_v33 = vmul.f32 %v5861_v57, %v770_v18 }
 0x453   :  { %839 = vadd.xlane.f32.xlu1 %v824_v56 }
 0x455   :  { %841 = vadd.xlane.f32.xlu0 %v825_v58 }
 0x457   :  { %843 = vadd.xlane.f32.xlu1 %v826_v33 }
 0x4cd   :  { %v830_v51 = vpop.xlane.xlu0 %829 }
 0x4ce   :  { %v845_v60 = vmul.f32 0.0078125, %v830_v51 }
 0x4cf   :  { %v832_v53 = vpop.xlane.xlu1 %831 }
 0x4d0   :  { %v846_v61 = vmul.f32 0.0078125, %v832_v53  ;;  %v6971_v55 = vsub.f32 %v819_v16, %v845_v60 }
 0x4d1   :  { %v834_v9 = vpop.xlane.xlu0 %833 }
 0x4d2   :  { %v847_v10 = vmul.f32 0.0078125, %v834_v9  ;;  %v861_v15 = vmul.f32 %v6971_v55, %v6971_v55  ;;  %v6975_v17 = vsub.f32 %v820_v40, %v846_v61  ;;  %v4933_v9 = vld [vmem:[%s8564_s4 + $0x1] ss:$0 sm:$0xff] }
 0x4d3   :  { %v836_v21 = vpop.xlane.xlu1 %835 }
 0x4d4   :  { %v848_v6 = vmul.f32 0.0078125, %v836_v21  ;;  %869 = vadd.xlane.f32.xlu0 %v861_v15  ;;  %v862_v26 = vmul.f32 %v6975_v17, %v6975_v17  ;;  %v6979_v29 = vsub.f32 %v821_v44, %v847_v10  ;;  %v5609_v44 = vld [vmem:[#allocation6 + $0x58] sm:$0xff]  }
 0x4d5   :  { %5381 = vmatprep.subr.bf16.mxu0 %v5609_v44 }
 0x4d6   :  { %871 = vadd.xlane.f32.xlu1 %v862_v26  ;;  %v863_v2 = vmul.f32 %v6979_v29, %v6979_v29  ;;  %v6983_v8 = vsub.f32 %v822_v49, %v848_v6  ;;  %5382 = vmatpush3.bf16.msra.mxu0 %v5609_v44  ;;  %v5613_v49 = vld [vmem:[#allocation6 + $0x78] sm:$0xff]  }
 0x4d7   :  { %5383 = vmatprep.subr.bf16.mxu0 %v5610_v45 }
 0x4d8   :  { %873 = vadd.xlane.f32.xlu0 %v863_v2  ;;  %v864_v1 = vmul.f32 %v6983_v8, %v6983_v8 }
 0x4da   :  { %875 = vadd.xlane.f32.xlu1 %v864_v1  ;;  %5384 = vmatpush3.bf16.msra.mxu0 %v5610_v45 }
 0x4db   :  { %5385 = vmatprep.subr.bf16.mxu0 %v5611_v46 }
 0x4de   :  { %v838_v62 = vpop.xlane.xlu0 %837  ;;  %5386 = vmatpush3.bf16.msra.mxu0 %v5611_v46 }
 0x4df   :  { %v849_v20 = vmul.f32 0.0078125, %v838_v62  ;;  %5387 = vmatprep.subr.bf16.mxu0 %v5612_v47 }
 0x4e0   :  { %v840_v18 = vpop.xlane.xlu1 %839 }
 0x4e1   :  { %v850_v3 = vmul.f32 0.0078125, %v840_v18  ;;  %v6987_v7 = vsub.f32 %v823_v52, %v849_v20 }
 0x4e2   :  { %v842_v35 = vpop.xlane.xlu0 %841  ;;  %5388 = vmatpush3.bf16.msra.mxu0 %v5612_v47 }
 0x4e3   :  { %v851_v28 = vmul.f32 0.0078125, %v842_v35  ;;  %v865_v38 = vmul.f32 %v6987_v7, %v6987_v7  ;;  %v6991_v14 = vsub.f32 %v824_v56, %v850_v3  ;;  %5389 = vmatprep.subr.bf16.mxu0 %v5613_v49  ;;  %v4934_v35 = vld [vmem:[%s8565_s5 + $0x1] ss:$0 sm:$0xff] }
 0x4e4   :  { %v844_v16 = vpop.xlane.xlu1 %843 }
 0x4e5   :  { %v852_v39 = vmul.f32 0.0078125, %v844_v16  ;;  %877 = vadd.xlane.f32.xlu0 %v865_v38  ;;  %v866_v41 = vmul.f32 %v6991_v14, %v6991_v14  ;;  %v6995_v40 = vsub.f32 %v825_v58, %v851_v28 }
 0x4e6   :  { %5390 = vmatpush3.bf16.msra.mxu0 %v5613_v49 }
 0x4e7   :  { %879 = vadd.xlane.f32.xlu1 %v866_v41  ;;  %v867_v43 = vmul.f32 %v6995_v40, %v6995_v40  ;;  %v6999_v13 = vsub.f32 %v826_v33, %v852_v39 }
 0x4e9   :  { %881 = vadd.xlane.f32.xlu0 %v867_v43  ;;  %v868_v22 = vmul.f32 %v6999_v13, %v6999_v13 }
 0x4eb   :  { %883 = vadd.xlane.f32.xlu1 %v868_v22 }
 0x561   :  { %v870_v48 = vpop.xlane.xlu0 %869 }
 0x562   :  { %v885_v50 = vmul.f32 0.0078125, %v870_v48 }
 0x563   :  { %v872_v52 = vpop.xlane.xlu1 %871 }
 0x564   :  { %v893_v54 = vadd.f32 0.1, %v885_v50  ;;  %v886_v56 = vmul.f32 0.0078125, %v872_v52 }
 0x565   :  { %v874_v57 = vpop.xlane.xlu0 %873 }
 0x566   :  { %5862 = vrsqrt.f32 %v893_v54  ;;  %v894_v58 = vadd.f32 0.1, %v886_v56  ;;  %v887_v33 = vmul.f32 0.0078125, %v874_v57 }
 0x567   :  { %v876_v59 = vpop.xlane.xlu1 %875 }
 0x568   :  { %5864 = vrsqrt.f32 %v894_v58  ;;  %v895_v51 = vadd.f32 0.1, %v887_v33  ;;  %v888_v60 = vmul.f32 0.0078125, %v876_v59 }
 0x56a   :  { %5866 = vrsqrt.f32 %v895_v51  ;;  %v896_v53 = vadd.f32 0.1, %v888_v60 }
 0x56c   :  { %5868 = vrsqrt.f32 %v896_v53 }
 0x570   :  { %v5863_v61 = vpop.eup %5862 }
 0x571   :  { %v909_v10 = vmul.f32 %v5863_v61, %v6971_v55 }
 0x572   :  { %v5865_v15 = vpop.eup %5864  ;;  %v878_v21 = vpop.xlane.xlu0 %877 }
 0x573   :  { %v889_v6 = vmul.f32 0.0078125, %v878_v21  ;;  %v910_v26 = vmul.f32 %v5865_v15, %v6975_v17  ;;  %v921_v62 = vmul.f32 %v4933_v9, %v909_v10 }
 0x574   :  { %v5867_v2 = vpop.eup %5866  ;;  %v880_v1 = vpop.xlane.xlu1 %879 }
 0x575   :  { %v911_v20 = vmul.f32 %v5867_v2, %v6979_v29  ;;  %v897_v18 = vadd.f32 0.1, %v889_v6  ;;  %v890_v3 = vmul.f32 0.0078125, %v880_v1  ;;  %v922_v19 = vmul.f32 %v4933_v9, %v910_v26 }
 0x576   :  { %v5869_v28 = vpop.eup %5868  ;;  %v882_v38 = vpop.xlane.xlu0 %881  ;;  %v933_v27 = vadd.f32 %v4934_v35, %v921_v62 }
 0x577   :  { %v923_v55 = vmul.f32 %v4933_v9, %v911_v20  ;;  %v912_v16 = vmul.f32 %v5869_v28, %v6983_v8  ;;  %5870 = vrsqrt.f32 %v897_v18  ;;  %v898_v39 = vadd.f32 0.1, %v890_v3 }
 0x578   :  { %v891_v17 = vmul.f32 0.0078125, %v882_v38  ;;  %v884_v41 = vpop.xlane.xlu1 %883  ;;  %v934_v43 = vadd.f32 %v4934_v35, %v922_v19 }
 0x579   :  { %v924_v22 = vmul.f32 %v4933_v9, %v912_v16  ;;  %5872 = vrsqrt.f32 %v898_v39  ;;  %v892_v29 = vmul.f32 0.0078125, %v884_v41  ;;  %v935_v47 = vadd.f32 %v4934_v35, %v923_v55 }
 0x57a   :  { %v899_v44 = vadd.f32 0.1, %v891_v17  ;;  %v949_v45 = vpack.c.bf16 %v934_v43, %v933_v27 }
 0x57b   :  { %v900_v46 = vadd.f32 0.1, %v892_v29  ;;  %v936_v49 = vadd.f32 %v4934_v35, %v924_v22  ;;  %v7021_v2 = vadd.f32 %v935_v47, %v6938_v12  ;;  %v7034_v12 = vadd.f32 %v934_v43, %v6932_v4 }
 0x57c   :  { %5874 = vrsqrt.f32 %v899_v44  ;;  %5391 = vmatprep.mubr.bf16.mxu0 %v949_v45 }
 0x57d   :  { %5876 = vrsqrt.f32 %v900_v46  ;;  %v950_v48 = vpack.c.bf16 %v936_v49, %v935_v47  ;;  %v7030_v18 = vadd.f32 %v936_v49, %v6940_v30 }
 0x57f   :  { %5392 = vmatmul.mubr.bf16.vlgmr.msra.gmra.mrb[16].mxu0 %v950_v48 }
 0x581   :  { %v5871_v8 = vpop.eup %5870 }
 0x582   :  { %v913_v50 = vmul.f32 %v5871_v8, %v6987_v7 }
 0x583   :  { %v5873_v52 = vpop.eup %5872 }
 0x584   :  { %v914_v54 = vmul.f32 %v5873_v52, %v6991_v14  ;;  %v925_v56 = vmul.f32 %v4933_v9, %v913_v50  ;;  %v4935_v14 = vld [vmem:[%s8563_s3 + $0x2] ss:$0 sm:$0xff] }
 0x586   :  { %v5875_v57 = vpop.eup %5874  ;;  %v926_v58 = vmul.f32 %v4933_v9, %v914_v54  ;;  %v937_v51 = vadd.f32 %v4934_v35, %v925_v56 }
 0x587   :  { %v5877_v33 = vpop.eup %5876  ;;  %v915_v59 = vmul.f32 %v5875_v57, %v6995_v40 }
 0x588   :  { %v938_v60 = vadd.f32 %v4934_v35, %v926_v58  ;;  %v916_v53 = vmul.f32 %v5877_v33, %v6999_v13  ;;  %v7024_v13 = vadd.f32 %v933_v27, %v6930_v63  ;;  %v7046_v29 = vadd.f32 %v937_v51, %v6946_v36 }
 0x589   :  { %v927_v61 = vmul.f32 %v4933_v9, %v915_v59 }
 0x58a   :  { %v951_v10 = vpack.c.bf16 %v938_v60, %v937_v51  ;;  %v928_v15 = vmul.f32 %v4933_v9, %v916_v53  ;;  %v7052_v8 = vadd.f32 %v938_v60, %v6948_v23 }
 0x58b   :  { %v939_v21 = vadd.f32 %v4934_v35, %v927_v61 }
 0x58c   :  { %5395 = vmatprep.mubr.bf16.mxu0 %v951_v10  ;;  %v940_v6 = vadd.f32 %v4934_v35, %v928_v15 }
 0x58d   :  { %v7043_v43 = vadd.f32 %v939_v21, %v6954_v42 }
 0x58e   :  { %v952_v7 = vpack.c.bf16 %v940_v6, %v939_v21  ;;  %v7049_v49 = vadd.f32 %v940_v6, %v6956_v11 }
 0x590   :  { %5396 = vmatmul.mubr.bf16.gmra.mrb[20].mxu0 %v952_v7 }
 0x652   :  { %v5393_v26 = vpop.f32.mrb[16].mxu0 }
 0x653   :  { %v1066_v40 = vadd.f32 %v5393_v26, %v4935_v14  ;;  %v1057_v1 = vpop.f32.mrb[17].mxu0 }
 0x654   :  { %v1058_v62 = vadd.f32 %v4935_v14, %v1057_v1  ;;  %v5394_v9 = vpop.f32.mrb[18].mxu0 }
 0x655   :  { %v7027_v20 = vadd.f32 %v1066_v40, %v7021_v2  ;;  %v1069_v3 = vadd.f32 %v5394_v9, %v4935_v14  ;;  %v1060_v35 = vpop.f32.mrb[19].mxu0 }
 0x656   :  { %v1088_v19 = vadd.f32 %v1058_v62, %v7024_v13  ;;  %v1061_v28 = vadd.f32 %v4935_v14, %v1060_v35 }
 0x657   :  { %v4946_v38 = vmul.f32 -1.442695, %v7027_v20  ;;  %v7038_v63 = vadd.f32 %v1069_v3, %v7030_v18 }
 0x658   :  { %v4944_v55 = vmul.f32 -1.442695, %v1088_v19  ;;  %v1089_v16 = vadd.f32 %v1061_v28, %v7034_v12 }
 0x659   :  { %5878 = vpow2.f32 %v4946_v38  ;;  %v4947_v30 = vmul.f32 -1.442695, %v7038_v63 }
 0x65a   :  { %5880 = vpow2.f32 %v4944_v55  ;;  %v4945_v39 = vmul.f32 -1.442695, %v1089_v16 }
 0x65b   :  { %5882 = vpow2.f32 %v4947_v30 }
 0x65c   :  { %5884 = vpow2.f32 %v4945_v39 }
 0x663   :  { %v5879_v17 = vpop.eup %5878  ;;  %v5397_v41 = vpop.f32.mrb[20].mxu0 }
 0x664   :  { %v5881_v4 = vpop.eup %5880  ;;  %v1122_v27 = vadd.f32 1.0, %v5879_v17  ;;  %v1082_v22 = vadd.f32 %v5397_v41, %v4935_v14  ;;  %v1073_v44 = vpop.f32.mrb[21].mxu0  ;;  %v5614_v41 = vld [vmem:[#allocation6 + $0x80] sm:$0xff]  }
 0x665   :  { %v5883_v45 = vpop.eup %5882  ;;  %v1120_v46 = vadd.f32 1.0, %v5881_v4  ;;  %v1074_v47 = vadd.f32 %v4935_v14, %v1073_v44  ;;  %v5398_v48 = vpop.f32.mrb[22].mxu0  ;;  %5399 = vmatprep.subr.bf16.mxu1 %v5614_v41 }
 0x666   :  { %v5885_v50 = vpop.eup %5884  ;;  %5886 = vrcp.f32 %v1122_v27  ;;  %v1123_v52 = vadd.f32 1.0, %v5883_v45  ;;  %v1094_v42 = vadd.f32 %v1082_v22, %v7043_v43  ;;  %v1085_v54 = vadd.f32 %v5398_v48, %v4935_v14  ;;  %v1076_v56 = vpop.f32.mrb[23].mxu0  ;;  %5400 = vmatpush3.bf16.msra.mxu1 %v5614_v41 }
 0x667   :  { %5888 = vrcp.f32 %v1120_v46  ;;  %v1121_v36 = vadd.f32 1.0, %v5885_v50  ;;  %v1092_v57 = vadd.f32 %v1074_v47, %v7046_v29  ;;  %v1077_v58 = vadd.f32 %v4935_v14, %v1076_v56 }
 0x668   :  { %5890 = vrcp.f32 %v1123_v52  ;;  %v4950_v33 = vmul.f32 -1.442695, %v1094_v42  ;;  %v1095_v11 = vadd.f32 %v1085_v54, %v7049_v49 }
 0x669   :  { %5892 = vrcp.f32 %v1121_v36  ;;  %v4948_v59 = vmul.f32 -1.442695, %v1092_v57  ;;  %v1093_v23 = vadd.f32 %v1077_v58, %v7052_v8 }
 0x66a   :  { %5894 = vpow2.f32 %v4950_v33  ;;  %v4951_v51 = vmul.f32 -1.442695, %v1095_v11 }
 0x66b   :  { %5896 = vpow2.f32 %v4948_v59  ;;  %v4949_v60 = vmul.f32 -1.442695, %v1093_v23 }
 0x66c   :  { %5898 = vpow2.f32 %v4951_v51 }
 0x66d   :  { %5900 = vpow2.f32 %v4949_v60 }
 0x670   :  { %v5887_v53 = vpop.eup %5886 }
 0x671   :  { %v5889_v61 = vpop.eup %5888  ;;  %v1146_v62 = vmul.f32 %v5887_v53, %v7027_v20 }
 0x672   :  { %v5891_v10 = vpop.eup %5890  ;;  %v1144_v15 = vmul.f32 %v5889_v61, %v1088_v19 }
 0x673   :  { %v5893_v21 = vpop.eup %5892  ;;  %v1147_v28 = vmul.f32 %v5891_v10, %v7038_v63  ;;  %v5615_v10 = vld [vmem:[#allocation6 + $0x88] sm:$0xff]  }
 0x674   :  { %v5895_v6 = vpop.eup %5894  ;;  %1154 = vadd.xlane.f32.xlu0 %v1144_v15  ;;  %v1145_v7 = vmul.f32 %v5893_v21, %v1089_v16  ;;  %5401 = vmatprep.subr.bf16.mxu1 %v5615_v10 }
 0x675   :  { %v5897_v14 = vpop.eup %5896  ;;  %v1126_v26 = vadd.f32 1.0, %v5895_v6  ;;  %5402 = vmatpush3.bf16.msra.mxu1 %v5615_v10 }
 0x676   :  { %v5899_v40 = vpop.eup %5898  ;;  %v1124_v1 = vadd.f32 1.0, %v5897_v14  ;;  %1156 = vadd.xlane.f32.xlu1 %v1145_v7 }
 0x677   :  { %v5901_v9 = vpop.eup %5900  ;;  %v1127_v3 = vadd.f32 1.0, %v5899_v40  ;;  %v5616_v40 = vld [vmem:[#allocation6 + $0x90] sm:$0xff]  }
 0x678   :  { %5902 = vrcp.f32 %v1124_v1  ;;  %v1125_v35 = vadd.f32 1.0, %v5901_v9  ;;  %1158 = vadd.xlane.f32.xlu0 %v1146_v62  ;;  %5403 = vmatprep.subr.bf16.mxu1 %v5616_v40  ;;  %v5618_v9 = vld [vmem:[#allocation6 + $0xa0] sm:$0xff]  }
 0x679   :  { %5904 = vrcp.f32 %v1126_v26  ;;  %5404 = vmatpush3.bf16.msra.mxu1 %v5616_v40 }
 0x67a   :  { %5906 = vrcp.f32 %v1125_v35  ;;  %1160 = vadd.xlane.f32.xlu1 %v1147_v28  ;;  %v5620_v35 = vld [vmem:[#allocation6 + $0xb0] sm:$0xff]  }
 0x67b   :  { %5908 = vrcp.f32 %v1127_v3  ;;  %v5619_v3 = vld [vmem:[#allocation6 + $0xa8] sm:$0xff]  }
 0x682   :  { %v5903_v19 = vpop.eup %5902 }
 0x683   :  { %v5905_v38 = vpop.eup %5904  ;;  %v1148_v55 = vmul.f32 %v5903_v19, %v1092_v57 }
 0x684   :  { %v5907_v16 = vpop.eup %5906  ;;  %v1150_v20 = vmul.f32 %v5905_v38, %v1094_v42 }
 0x685   :  { %1162 = vadd.xlane.f32.xlu0 %v1148_v55  ;;  %v1149_v30 = vmul.f32 %v5907_v16, %v1093_v23  ;;  %v5909_v39 = vpop.eup %5908 }
 0x686   :  { %v1151_v17 = vmul.f32 %v5909_v39, %v1095_v11 }
 0x687   :  { %1164 = vadd.xlane.f32.xlu1 %v1149_v30 }
 0x689   :  { %1166 = vadd.xlane.f32.xlu0 %v1150_v20 }
 0x68b   :  { %1168 = vadd.xlane.f32.xlu1 %v1151_v17 }
 0x701   :  { %v1155_v63 = vpop.xlane.xlu0 %1154 }
 0x702   :  { %v1170_v4 = vmul.f32 0.0078125, %v1155_v63 }
 0x703   :  { %v1157_v27 = vpop.xlane.xlu1 %1156 }
 0x704   :  { %v1171_v22 = vmul.f32 0.0078125, %v1157_v27  ;;  %v7060_v44 = vsub.f32 %v1144_v15, %v1170_v4 }
 0x705   :  { %v1159_v45 = vpop.xlane.xlu0 %1158 }
 0x706   :  { %v1172_v46 = vmul.f32 0.0078125, %v1159_v45  ;;  %v1186_v47 = vmul.f32 %v7060_v44, %v7060_v44  ;;  %v7064_v48 = vsub.f32 %v1145_v7, %v1171_v22  ;;  %v4952_v45 = vld [vmem:[%s8564_s4 + $0x2] ss:$0 sm:$0xff] }
 0x707   :  { %v1161_v50 = vpop.xlane.xlu1 %1160 }
 0x708   :  { %v1173_v52 = vmul.f32 0.0078125, %v1161_v50  ;;  %1194 = vadd.xlane.f32.xlu0 %v1186_v47  ;;  %v1187_v42 = vmul.f32 %v7064_v48, %v7064_v48  ;;  %v7068_v54 = vsub.f32 %v1146_v62, %v1172_v46  ;;  %v5617_v62 = vld [vmem:[#allocation6 + $0x98] sm:$0xff]  }
 0x709   :  { %5405 = vmatprep.subr.bf16.mxu1 %v5617_v62 }
 0x70a   :  { %1196 = vadd.xlane.f32.xlu1 %v1187_v42  ;;  %v1188_v56 = vmul.f32 %v7068_v54, %v7068_v54  ;;  %v7072_v36 = vsub.f32 %v1147_v28, %v1173_v52  ;;  %5406 = vmatpush3.bf16.msra.mxu1 %v5617_v62  ;;  %v5621_v28 = vld [vmem:[#allocation6 + $0xb8] sm:$0xff]  }
 0x70b   :  { %5407 = vmatprep.subr.bf16.mxu1 %v5618_v9 }
 0x70c   :  { %1198 = vadd.xlane.f32.xlu0 %v1188_v56  ;;  %v1189_v57 = vmul.f32 %v7072_v36, %v7072_v36 }
 0x70e   :  { %1200 = vadd.xlane.f32.xlu1 %v1189_v57  ;;  %5408 = vmatpush3.bf16.msra.mxu1 %v5618_v9 }
 0x70f   :  { %5409 = vmatprep.subr.bf16.mxu1 %v5619_v3 }
 0x712   :  { %v1163_v58 = vpop.xlane.xlu0 %1162  ;;  %5410 = vmatpush3.bf16.msra.mxu1 %v5619_v3 }
 0x713   :  { %v1174_v33 = vmul.f32 0.0078125, %v1163_v58  ;;  %5411 = vmatprep.subr.bf16.mxu1 %v5620_v35 }
 0x714   :  { %v1165_v11 = vpop.xlane.xlu1 %1164 }
 0x715   :  { %v1175_v59 = vmul.f32 0.0078125, %v1165_v11  ;;  %v7076_v23 = vsub.f32 %v1148_v55, %v1174_v33 }
 0x716   :  { %v1167_v51 = vpop.xlane.xlu0 %1166  ;;  %5412 = vmatpush3.bf16.msra.mxu1 %v5620_v35 }
 0x717   :  { %v1176_v60 = vmul.f32 0.0078125, %v1167_v51  ;;  %v1190_v53 = vmul.f32 %v7076_v23, %v7076_v23  ;;  %v7080_v61 = vsub.f32 %v1149_v30, %v1175_v59  ;;  %5413 = vmatprep.subr.bf16.mxu1 %v5621_v28  ;;  %v4953_v51 = vld [vmem:[%s8565_s5 + $0x2] ss:$0 sm:$0xff] }
 0x718   :  { %v1169_v15 = vpop.xlane.xlu1 %1168 }
 0x719   :  { %v1177_v21 = vmul.f32 0.0078125, %v1169_v15  ;;  %1202 = vadd.xlane.f32.xlu0 %v1190_v53  ;;  %v1191_v6 = vmul.f32 %v7080_v61, %v7080_v61  ;;  %v7084_v7 = vsub.f32 %v1150_v20, %v1176_v60 }
 0x71a   :  { %5414 = vmatpush3.bf16.msra.mxu1 %v5621_v28 }
 0x71b   :  { %1204 = vadd.xlane.f32.xlu1 %v1191_v6  ;;  %v1192_v14 = vmul.f32 %v7084_v7, %v7084_v7  ;;  %v7088_v26 = vsub.f32 %v1151_v17, %v1177_v21 }
 0x71d   :  { %1206 = vadd.xlane.f32.xlu0 %v1192_v14  ;;  %v1193_v1 = vmul.f32 %v7088_v26, %v7088_v26 }
 0x71f   :  { %1208 = vadd.xlane.f32.xlu1 %v1193_v1 }
 0x795   :  { %v1195_v19 = vpop.xlane.xlu0 %1194 }
 0x796   :  { %v1210_v38 = vmul.f32 0.0078125, %v1195_v19 }
 0x797   :  { %v1197_v55 = vpop.xlane.xlu1 %1196 }
 0x798   :  { %v1218_v16 = vadd.f32 0.1, %v1210_v38  ;;  %v1211_v30 = vmul.f32 0.0078125, %v1197_v55 }
 0x799   :  { %v1199_v39 = vpop.xlane.xlu0 %1198 }
 0x79a   :  { %5910 = vrsqrt.f32 %v1218_v16  ;;  %v1219_v20 = vadd.f32 0.1, %v1211_v30  ;;  %v1212_v17 = vmul.f32 0.0078125, %v1199_v39 }
 0x79b   :  { %v1201_v41 = vpop.xlane.xlu1 %1200 }
 0x79c   :  { %5912 = vrsqrt.f32 %v1219_v20  ;;  %v1220_v63 = vadd.f32 0.1, %v1212_v17  ;;  %v1213_v4 = vmul.f32 0.0078125, %v1201_v41 }
 0x79e   :  { %5914 = vrsqrt.f32 %v1220_v63  ;;  %v1221_v27 = vadd.f32 0.1, %v1213_v4 }
 0x7a0   :  { %5916 = vrsqrt.f32 %v1221_v27 }
 0x7a4   :  { %v5911_v22 = vpop.eup %5910 }
 0x7a5   :  { %v1234_v46 = vmul.f32 %v5911_v22, %v7060_v44 }
 0x7a6   :  { %v5913_v47 = vpop.eup %5912  ;;  %v1203_v50 = vpop.xlane.xlu0 %1202 }
 0x7a7   :  { %v1214_v52 = vmul.f32 0.0078125, %v1203_v50  ;;  %v1235_v42 = vmul.f32 %v5913_v47, %v7064_v48  ;;  %v1246_v58 = vmul.f32 %v4952_v45, %v1234_v46 }
 0x7a8   :  { %v5915_v56 = vpop.eup %5914  ;;  %v1205_v57 = vpop.xlane.xlu1 %1204 }
 0x7a9   :  { %v1236_v33 = vmul.f32 %v5915_v56, %v7068_v54  ;;  %v1222_v11 = vadd.f32 0.1, %v1214_v52  ;;  %v1215_v59 = vmul.f32 0.0078125, %v1205_v57  ;;  %v1247_v60 = vmul.f32 %v4952_v45, %v1235_v42 }
 0x7aa   :  { %v5917_v53 = vpop.eup %5916  ;;  %v1207_v10 = vpop.xlane.xlu0 %1206  ;;  %v1258_v14 = vadd.f32 %v4953_v51, %v1246_v58 }
 0x7ab   :  { %v1248_v44 = vmul.f32 %v4952_v45, %v1236_v33  ;;  %v1237_v15 = vmul.f32 %v5917_v53, %v7072_v36  ;;  %5918 = vrsqrt.f32 %v1222_v11  ;;  %v1223_v21 = vadd.f32 0.1, %v1215_v59 }
 0x7ac   :  { %v1216_v48 = vmul.f32 0.0078125, %v1207_v10  ;;  %v1209_v6 = vpop.xlane.xlu1 %1208  ;;  %v1259_v40 = vadd.f32 %v4953_v51, %v1247_v60 }
 0x7ad   :  { %v1249_v1 = vmul.f32 %v4952_v45, %v1237_v15  ;;  %5920 = vrsqrt.f32 %v1223_v21  ;;  %v1217_v54 = vmul.f32 0.0078125, %v1209_v6  ;;  %v1260_v35 = vadd.f32 %v4953_v51, %v1248_v44 }
 0x7ae   :  { %v1224_v62 = vadd.f32 0.1, %v1216_v48  ;;  %v1274_v9 = vpack.c.bf16 %v1259_v40, %v1258_v14 }
 0x7af   :  { %v1225_v3 = vadd.f32 0.1, %v1217_v54  ;;  %v1261_v28 = vadd.f32 %v4953_v51, %v1249_v1  ;;  %v7110_v56 = vadd.f32 %v1260_v35, %v7021_v2  ;;  %v7123_v2 = vadd.f32 %v1259_v40, %v7034_v12 }
 0x7b0   :  { %5922 = vrsqrt.f32 %v1224_v62  ;;  %5415 = vmatprep.mubr.bf16.mxu1 %v1274_v9 }
 0x7b1   :  { %5924 = vrsqrt.f32 %v1225_v3  ;;  %v1275_v19 = vpack.c.bf16 %v1261_v28, %v1260_v35  ;;  %v7119_v11 = vadd.f32 %v1261_v28, %v7030_v18 }
 0x7b3   :  { %5416 = vmatmul.mubr.bf16.vlgmr.msra.gmra.mrb[8].mxu1 %v1275_v19 }
 0x7b5   :  { %v5919_v36 = vpop.eup %5918 }
 0x7b6   :  { %v1238_v38 = vmul.f32 %v5919_v36, %v7076_v23 }
 0x7b7   :  { %v5921_v55 = vpop.eup %5920 }
 0x7b8   :  { %v1239_v16 = vmul.f32 %v5921_v55, %v7080_v61  ;;  %v1250_v30 = vmul.f32 %v4952_v45, %v1238_v38  ;;  %v4954_v61 = vld [vmem:[%s8563_s3 + $0x3] ss:$0 sm:$0xff] }
 0x7ba   :  { %v5923_v39 = vpop.eup %5922  ;;  %v1251_v20 = vmul.f32 %v4952_v45, %v1239_v16  ;;  %v1262_v63 = vadd.f32 %v4953_v51, %v1250_v30 }
 0x7bb   :  { %v5925_v17 = vpop.eup %5924  ;;  %v1240_v41 = vmul.f32 %v5923_v39, %v7084_v7 }
 0x7bc   :  { %v1263_v4 = vadd.f32 %v4953_v51, %v1251_v20  ;;  %v1241_v27 = vmul.f32 %v5925_v17, %v7088_v26  ;;  %v7113_v26 = vadd.f32 %v1258_v14, %v7024_v13  ;;  %v7135_v54 = vadd.f32 %v1262_v63, %v7046_v29 }
 0x7bd   :  { %v1252_v22 = vmul.f32 %v4952_v45, %v1240_v41 }
 0x7be   :  { %v1276_v46 = vpack.c.bf16 %v1263_v4, %v1262_v63  ;;  %v1253_v47 = vmul.f32 %v4952_v45, %v1241_v27  ;;  %v7141_v36 = vadd.f32 %v1263_v4, %v7052_v8 }
 0x7bf   :  { %v1264_v50 = vadd.f32 %v4953_v51, %v1252_v22 }
 0x7c0   :  { %5419 = vmatprep.mubr.bf16.mxu1 %v1276_v46  ;;  %v1265_v52 = vadd.f32 %v4953_v51, %v1253_v47 }
 0x7c1   :  { %v7132_v40 = vadd.f32 %v1264_v50, %v7043_v43 }
 0x7c2   :  { %v1277_v23 = vpack.c.bf16 %v1265_v52, %v1264_v50  ;;  %v7138_v28 = vadd.f32 %v1265_v52, %v7049_v49 }
 0x7c4   :  { %5420 = vmatmul.mubr.bf16.gmra.mrb[12].mxu1 %v1277_v23 }
 0x886   :  { %v5417_v42 = vpop.f32.mrb[8].mxu1 }
 0x887   :  { %v1391_v7 = vadd.f32 %v5417_v42, %v4954_v61  ;;  %v1382_v57 = vpop.f32.mrb[9].mxu1 }
 0x888   :  { %v1383_v58 = vadd.f32 %v4954_v61, %v1382_v57  ;;  %v5418_v45 = vpop.f32.mrb[10].mxu1 }
 0x889   :  { %v7116_v33 = vadd.f32 %v1391_v7, %v7110_v56  ;;  %v1394_v59 = vadd.f32 %v5418_v45, %v4954_v61  ;;  %v1385_v51 = vpop.f32.mrb[11].mxu1 }
 0x88a   :  { %v1413_v60 = vadd.f32 %v1383_v58, %v7113_v26  ;;  %v1386_v53 = vadd.f32 %v4954_v61, %v1385_v51 }
 0x88b   :  { %v4965_v10 = vmul.f32 -1.442695, %v7116_v33  ;;  %v7127_v13 = vadd.f32 %v1394_v59, %v7119_v11 }
 0x88c   :  { %v4963_v44 = vmul.f32 -1.442695, %v1413_v60  ;;  %v1414_v15 = vadd.f32 %v1386_v53, %v7123_v2 }
 0x88d   :  { %5926 = vpow2.f32 %v4965_v10  ;;  %v4966_v18 = vmul.f32 -1.442695, %v7127_v13 }
 0x88e   :  { %5928 = vpow2.f32 %v4963_v44  ;;  %v4964_v21 = vmul.f32 -1.442695, %v1414_v15 }
 0x88f   :  { %5930 = vpow2.f32 %v4966_v18 }
 0x890   :  { %5932 = vpow2.f32 %v4964_v21 }
 0x897   :  { %v5927_v48 = vpop.eup %5926  ;;  %v5421_v6 = vpop.f32.mrb[12].mxu1 }
 0x898   :  { %v5929_v12 = vpop.eup %5928  ;;  %v1447_v14 = vadd.f32 1.0, %v5927_v48  ;;  %v1407_v1 = vadd.f32 %v5421_v6, %v4954_v61  ;;  %v1398_v62 = vpop.f32.mrb[13].mxu1  ;;  %v5622_v6 = vld [vmem:[#allocation6 + $0xc0] sm:$0xff]  }
 0x899   :  { %v5931_v9 = vpop.eup %5930  ;;  %v1445_v3 = vadd.f32 1.0, %v5929_v12  ;;  %v1399_v35 = vadd.f32 %v4954_v61, %v1398_v62  ;;  %v5422_v19 = vpop.f32.mrb[14].mxu1  ;;  %5423 = vmatprep.subr.bf16.mxu0 %v5622_v6 }
 0x89a   :  { %v5933_v38 = vpop.eup %5932  ;;  %5934 = vrcp.f32 %v1447_v14  ;;  %v1448_v55 = vadd.f32 1.0, %v5931_v9  ;;  %v1419_v43 = vadd.f32 %v1407_v1, %v7132_v40  ;;  %v1410_v16 = vadd.f32 %v5422_v19, %v4954_v61  ;;  %v1401_v30 = vpop.f32.mrb[15].mxu1  ;;  %5424 = vmatpush3.bf16.msra.mxu0 %v5622_v6 }
 0x89b   :  { %5936 = vrcp.f32 %v1445_v3  ;;  %v1446_v29 = vadd.f32 1.0, %v5933_v38  ;;  %v1417_v39 = vadd.f32 %v1399_v35, %v7135_v54  ;;  %v1402_v20 = vadd.f32 %v4954_v61, %v1401_v30 }
 0x89c   :  { %5938 = vrcp.f32 %v1448_v55  ;;  %v4969_v17 = vmul.f32 -1.442695, %v1419_v43  ;;  %v1420_v49 = vadd.f32 %v1410_v16, %v7138_v28 }
 0x89d   :  { %5940 = vrcp.f32 %v1446_v29  ;;  %v4967_v41 = vmul.f32 -1.442695, %v1417_v39  ;;  %v1418_v8 = vadd.f32 %v1402_v20, %v7141_v36 }
 0x89e   :  { %5942 = vpow2.f32 %v4969_v17  ;;  %v4970_v63 = vmul.f32 -1.442695, %v1420_v49 }
 0x89f   :  { %5944 = vpow2.f32 %v4967_v41  ;;  %v4968_v4 = vmul.f32 -1.442695, %v1418_v8 }
 0x8a0   :  { %5946 = vpow2.f32 %v4970_v63 }
 0x8a1   :  { %5948 = vpow2.f32 %v4968_v4  ;;  %v5623_v4 = vld [vmem:[#allocation6 + $0xc8] sm:$0xff]  }
 0x8a2   :  { %5425 = vmatprep.subr.bf16.mxu0 %v5623_v4 }
 0x8a3   :  { %5426 = vmatpush3.bf16.msra.mxu0 %v5623_v4  ;;  %v4972_v4 = vld [vmem:[%s8565_s5 + $0x3] ss:$0 sm:$0xff] }
 0x8a4   :  { %v5935_v27 = vpop.eup %5934 }
 0x8a5   :  { %v5937_v22 = vpop.eup %5936  ;;  %v1471_v58 = vmul.f32 %v5935_v27, %v7116_v33 }
 0x8a6   :  { %v5939_v46 = vpop.eup %5938  ;;  %v1469_v47 = vmul.f32 %v5937_v22, %v1413_v60 }
 0x8a7   :  { %v5941_v50 = vpop.eup %5940  ;;  %v1472_v53 = vmul.f32 %v5939_v46, %v7127_v13 }
 0x8a8   :  { %v5943_v52 = vpop.eup %5942  ;;  %1479 = vadd.xlane.f32.xlu0 %v1469_v47  ;;  %v1470_v23 = vmul.f32 %v5941_v50, %v1414_v15 }
 0x8a9   :  { %v5945_v61 = vpop.eup %5944  ;;  %v1451_v42 = vadd.f32 1.0, %v5943_v52 }
 0x8aa   :  { %v5947_v7 = vpop.eup %5946  ;;  %v1449_v57 = vadd.f32 1.0, %v5945_v61  ;;  %1481 = vadd.xlane.f32.xlu1 %v1470_v23  ;;  %v5624_v61 = vld [vmem:[#allocation6 + $0xd0] sm:$0xff]  }
 0x8ab   :  { %v5949_v45 = vpop.eup %5948  ;;  %v1452_v59 = vadd.f32 1.0, %v5947_v7  ;;  %5427 = vmatprep.subr.bf16.mxu0 %v5624_v61 }
 0x8ac   :  { %5950 = vrcp.f32 %v1449_v57  ;;  %v1450_v51 = vadd.f32 1.0, %v5949_v45  ;;  %1483 = vadd.xlane.f32.xlu0 %v1471_v58  ;;  %5428 = vmatpush3.bf16.msra.mxu0 %v5624_v61  ;;  %v5626_v45 = vld [vmem:[#allocation6 + $0xe0] sm:$0xff]  }
 0x8ad   :  { %5952 = vrcp.f32 %v1451_v42 }
 0x8ae   :  { %5954 = vrcp.f32 %v1450_v51  ;;  %1485 = vadd.xlane.f32.xlu1 %v1472_v53  ;;  %v5628_v51 = vld [vmem:[#allocation6 + $0xf0] sm:$0xff]  }
 0x8af   :  { %5956 = vrcp.f32 %v1452_v59  ;;  %v5627_v59 = vld [vmem:[#allocation6 + $0xe8] sm:$0xff]  }
 0x8b6   :  { %v5951_v60 = vpop.eup %5950 }
 0x8b7   :  { %v5953_v10 = vpop.eup %5952  ;;  %v1473_v44 = vmul.f32 %v5951_v60, %v1417_v39  ;;  %v5630_v60 = vld [vmem:[#allocation4 + $0xc0] sm:$0xff]  }
 0x8b8   :  { %v5955_v15 = vpop.eup %5954  ;;  %v1475_v33 = vmul.f32 %v5953_v10, %v1419_v43 }
 0x8b9   :  { %1487 = vadd.xlane.f32.xlu0 %v1473_v44  ;;  %v1474_v18 = vmul.f32 %v5955_v15, %v1418_v8  ;;  %v5957_v21 = vpop.eup %5956 }
 0x8ba   :  { %v1476_v48 = vmul.f32 %v5957_v21, %v1420_v49 }
 0x8bb   :  { %1489 = vadd.xlane.f32.xlu1 %v1474_v18 }
 0x8bd   :  { %1491 = vadd.xlane.f32.xlu0 %v1475_v33 }
 0x8bf   :  { %1493 = vadd.xlane.f32.xlu1 %v1476_v48 }
 0x935   :  { %v1480_v13 = vpop.xlane.xlu0 %1479 }
 0x936   :  { %v1495_v12 = vmul.f32 0.0078125, %v1480_v13 }
 0x937   :  { %v1482_v14 = vpop.xlane.xlu1 %1481 }
 0x938   :  { %v1496_v1 = vmul.f32 0.0078125, %v1482_v14  ;;  %v7149_v62 = vsub.f32 %v1469_v47, %v1495_v12 }
 0x939   :  { %v1484_v9 = vpop.xlane.xlu0 %1483 }
 0x93a   :  { %v1497_v3 = vmul.f32 0.0078125, %v1484_v9  ;;  %v1511_v35 = vmul.f32 %v7149_v62, %v7149_v62  ;;  %v7153_v19 = vsub.f32 %v1470_v23, %v1496_v1 }
 0x93b   :  { %v1486_v38 = vpop.xlane.xlu1 %1485 }
 0x93c   :  { %v1498_v55 = vmul.f32 0.0078125, %v1486_v38  ;;  %1519 = vadd.xlane.f32.xlu0 %v1511_v35  ;;  %v1512_v43 = vmul.f32 %v7153_v19, %v7153_v19  ;;  %v7157_v16 = vsub.f32 %v1471_v58, %v1497_v3  ;;  %v5625_v58 = vld [vmem:[#allocation6 + $0xd8] sm:$0xff]   ;;  %v7184_v3 = vld [vmem:[%s8564_s4 + $0x3] ss:$0 sm:$0xff] }
 0x93d   :  { %5429 = vmatprep.subr.bf16.mxu0 %v5625_v58 }
 0x93e   :  { %1521 = vadd.xlane.f32.xlu1 %v1512_v43  ;;  %v1513_v30 = vmul.f32 %v7157_v16, %v7157_v16  ;;  %v7161_v29 = vsub.f32 %v1472_v53, %v1498_v55  ;;  %5430 = vmatpush3.bf16.msra.mxu0 %v5625_v58  ;;  %v5629_v53 = vld [vmem:[#allocation6 + $0xf8] sm:$0xff]  }
 0x93f   :  { %5431 = vmatprep.subr.bf16.mxu0 %v5626_v45 }
 0x940   :  { %1523 = vadd.xlane.f32.xlu0 %v1513_v30  ;;  %v1514_v39 = vmul.f32 %v7161_v29, %v7161_v29 }
 0x942   :  { %1525 = vadd.xlane.f32.xlu1 %v1514_v39  ;;  %5432 = vmatpush3.bf16.msra.mxu0 %v5626_v45 }
 0x943   :  { %5433 = vmatprep.subr.bf16.mxu0 %v5627_v59 }
 0x946   :  { %v1488_v20 = vpop.xlane.xlu0 %1487  ;;  %5434 = vmatpush3.bf16.msra.mxu0 %v5627_v59 }
 0x947   :  { %v1499_v17 = vmul.f32 0.0078125, %v1488_v20  ;;  %5435 = vmatprep.subr.bf16.mxu0 %v5628_v51 }
 0x948   :  { %v1490_v49 = vpop.xlane.xlu1 %1489 }
 0x949   :  { %v1500_v41 = vmul.f32 0.0078125, %v1490_v49  ;;  %v7165_v8 = vsub.f32 %v1473_v44, %v1499_v17 }
 0x94a   :  { %v1492_v63 = vpop.xlane.xlu0 %1491  ;;  %5436 = vmatpush3.bf16.msra.mxu0 %v5628_v51 }
 0x94b   :  { %v1501_v27 = vmul.f32 0.0078125, %v1492_v63  ;;  %v1515_v22 = vmul.f32 %v7165_v8, %v7165_v8  ;;  %v7169_v46 = vsub.f32 %v1474_v18, %v1500_v41  ;;  %5437 = vmatprep.subr.bf16.mxu0 %v5629_v53 }
 0x94c   :  { %v1494_v47 = vpop.xlane.xlu1 %1493 }
 0x94d   :  { %v1502_v50 = vmul.f32 0.0078125, %v1494_v47  ;;  %1527 = vadd.xlane.f32.xlu0 %v1515_v22  ;;  %v1516_v52 = vmul.f32 %v7169_v46, %v7169_v46  ;;  %v7173_v23 = vsub.f32 %v1475_v33, %v1501_v27 }
 0x94e   :  { %5438 = vmatpush3.bf16.msra.mxu0 %v5629_v53 }
 0x94f   :  { %1529 = vadd.xlane.f32.xlu1 %v1516_v52  ;;  %v1517_v42 = vmul.f32 %v7173_v23, %v7173_v23  ;;  %v7177_v7 = vsub.f32 %v1476_v48, %v1502_v50  ;;  %5263 = vmatprep.subr.bf16.mxu0 %v5630_v60  ;;  %v5631_v60 = vld [vmem:[#allocation4 + $0x80] sm:$0xff]  }
 0x951   :  { %1531 = vadd.xlane.f32.xlu0 %v1517_v42  ;;  %v1518_v57 = vmul.f32 %v7177_v7, %v7177_v7 }
 0x953   :  { %1533 = vadd.xlane.f32.xlu1 %v1518_v57 }
 0x9c9   :  { %v1520_v10 = vpop.xlane.xlu0 %1519 }
 0x9ca   :  { %v1535_v44 = vmul.f32 0.0078125, %v1520_v10 }
 0x9cb   :  { %v1522_v15 = vpop.xlane.xlu1 %1521 }
 0x9cc   :  { %v1543_v18 = vadd.f32 0.1, %v1535_v44  ;;  %v1536_v21 = vmul.f32 0.0078125, %v1522_v15  ;;  %v5632_v44 = vld [vmem:[#allocation4 + $0xc8] sm:$0xff]  }
 0x9cd   :  { %v1524_v33 = vpop.xlane.xlu0 %1523  ;;  %v5633_v15 = vld [vmem:[#allocation4 + $0x88] sm:$0xff]  }
 0x9ce   :  { %5958 = vrsqrt.f32 %v1543_v18  ;;  %v1544_v48 = vadd.f32 0.1, %v1536_v21  ;;  %v1537_v6 = vmul.f32 0.0078125, %v1524_v33  ;;  %v5634_v21 = vld [vmem:[#allocation4 + $0xd0] sm:$0xff]  }
 0x9cf   :  { %v1526_v13 = vpop.xlane.xlu1 %1525 }
 0x9d0   :  { %5960 = vrsqrt.f32 %v1544_v48  ;;  %v1545_v12 = vadd.f32 0.1, %v1537_v6  ;;  %v1538_v14 = vmul.f32 0.0078125, %v1526_v13  ;;  %v5635_v6 = vld [vmem:[#allocation4 + $0x90] sm:$0xff]  }
 0x9d2   :  { %5962 = vrsqrt.f32 %v1545_v12  ;;  %v1546_v1 = vadd.f32 0.1, %v1538_v14  ;;  %v5636_v14 = vld [vmem:[#allocation4 + $0xd8] sm:$0xff]  }
 0x9d4   :  { %5964 = vrsqrt.f32 %v1546_v1 }
 0x9d8   :  { %v5959_v9 = vpop.eup %5958 }
 0x9d9   :  { %v1559_v35 = vmul.f32 %v5959_v9, %v7149_v62 }
 0x9da   :  { %v5961_v38 = vpop.eup %5960  ;;  %v1528_v55 = vpop.xlane.xlu0 %1527 }
 0x9db   :  { %v1539_v43 = vmul.f32 0.0078125, %v1528_v55  ;;  %v1560_v30 = vmul.f32 %v5961_v38, %v7153_v19  ;;  %v1571_v17 = vmul.f32 %v7184_v3, %v1559_v35 }
 0x9dc   :  { %v5963_v39 = vpop.eup %5962  ;;  %v1530_v20 = vpop.xlane.xlu1 %1529 }
 0x9dd   :  { %v1561_v49 = vmul.f32 %v5963_v39, %v7157_v16  ;;  %v1547_v41 = vadd.f32 0.1, %v1539_v43  ;;  %v1540_v63 = vmul.f32 0.0078125, %v1530_v20  ;;  %v1572_v27 = vmul.f32 %v7184_v3, %v1560_v30 }
 0x9de   :  { %v5965_v62 = vpop.eup %5964  ;;  %v1532_v22 = vpop.xlane.xlu0 %1531  ;;  %v7196_v42 = vadd.f32 %v4972_v4, %v1571_v17 }
 0x9df   :  { %v1573_v47 = vmul.f32 %v7184_v3, %v1561_v49  ;;  %v1562_v19 = vmul.f32 %v5965_v62, %v7161_v29  ;;  %5966 = vrsqrt.f32 %v1547_v41  ;;  %v1548_v50 = vadd.f32 0.1, %v1540_v63  ;;  %v5639_v41 = vld [vmem:[#allocation4 + $0xa0] sm:$0xff]   ;;  %v5642_v62 = vld [vmem:[#allocation4 + $0xf0] sm:$0xff]  }
 0x9e0   :  { %v1541_v52 = vmul.f32 0.0078125, %v1532_v22  ;;  %v1534_v61 = vpop.xlane.xlu1 %1533  ;;  %v7198_v16 = vadd.f32 %v4972_v4, %v1572_v27  ;;  %v5640_v27 = vld [vmem:[#allocation4 + $0xe8] sm:$0xff]   ;;  %v5643_v22 = vld [vmem:[#allocation4 + $0xb0] sm:$0xff]  }
 0x9e1   :  { %v1574_v57 = vmul.f32 %v7184_v3, %v1562_v19  ;;  %5968 = vrsqrt.f32 %v1548_v50  ;;  %v1542_v58 = vmul.f32 0.0078125, %v1534_v61  ;;  %v7203_v53 = vadd.f32 %v4972_v4, %v1573_v47  ;;  %v5644_v47 = vld [vmem:[#allocation4 + $0xf8] sm:$0xff]  }
 0x9e2   :  { %v1549_v45 = vadd.f32 0.1, %v1541_v52  ;;  %v1599_v59 = vpack.c.bf16 %v7198_v16, %v7196_v42 }
 0x9e3   :  { %v1550_v51 = vadd.f32 0.1, %v1542_v58  ;;  %v7205_v29 = vadd.f32 %v4972_v4, %v1574_v57  ;;  %v1592_v57 = vadd.f32 %v7198_v16, %v7123_v2 }
 0x9e4   :  { %5970 = vrsqrt.f32 %v1549_v45  ;;  %5439 = vmatprep.mubr.bf16.mxu0 %v1599_v59 }
 0x9e5   :  { %5972 = vrsqrt.f32 %v1550_v51  ;;  %v1600_v10 = vpack.c.bf16 %v7205_v29, %v7203_v53 }
 0x9e7   :  { %5440 = vmatmul.mubr.bf16.vlgmr.msra.gmra.mrb[24].mxu0 %v1600_v10 }
 0x9e8   :  { %5264 = vmatpush3.bf16.msra.mxu0 %v5631_v60 }
 0x9e9   :  { %v5967_v18 = vpop.eup %5966  ;;  %5265 = vmatprep.subr.bf16.mxu0 %v5632_v44 }
 0x9ea   :  { %v1563_v33 = vmul.f32 %v5967_v18, %v7165_v8  ;;  %v5637_v8 = vld [vmem:[#allocation4 + $0x98] sm:$0xff]  }
 0x9eb   :  { %v5969_v48 = vpop.eup %5968 }
 0x9ec   :  { %5266 = vmatpush3.bf16.msra.mxu0 %v5633_v15  ;;  %v1564_v13 = vmul.f32 %v5969_v48, %v7169_v46  ;;  %v1575_v12 = vmul.f32 %v7184_v3, %v1563_v33  ;;  %v5638_v46 = vld [vmem:[#allocation4 + $0xe0] sm:$0xff]  }
 0x9ed   :  { %5267 = vmatprep.subr.bf16.mxu0 %v5634_v21 }
 0x9ee   :  { %v5971_v1 = vpop.eup %5970  ;;  %v1576_v9 = vmul.f32 %v7184_v3, %v1564_v13  ;;  %v7214_v55 = vadd.f32 %v4972_v4, %v1575_v12 }
 0x9ef   :  { %v5973_v35 = vpop.eup %5972  ;;  %v1565_v38 = vmul.f32 %v5971_v1, %v7173_v23 }
 0x9f0   :  { %5268 = vmatpush3.bf16.msra.mxu0 %v5635_v6  ;;  %v7216_v43 = vadd.f32 %v4972_v4, %v1576_v9  ;;  %v1566_v30 = vmul.f32 %v5973_v35, %v7177_v7  ;;  %v5641_v7 = vld [vmem:[#allocation4 + $0xa8] sm:$0xff]   ;;  %v1595_v10 = vadd.f32 %v7214_v55, %v7135_v54 }
 0x9f1   :  { %5269 = vmatprep.subr.bf16.mxu0 %v5636_v14  ;;  %v1577_v39 = vmul.f32 %v7184_v3, %v1565_v38 }
 0x9f2   :  { %v1601_v20 = vpack.c.bf16 %v7216_v43, %v7214_v55  ;;  %v1578_v17 = vmul.f32 %v7184_v3, %v1566_v30  ;;  %v5645_v3 = vld [vmem:[#allocation4 + $0xb8] sm:$0xff]   ;;  %v1596_v6 = vadd.f32 %v7216_v43, %v7141_v36 }
 0x9f3   :  { %v1589_v23 = vadd.f32 %v4972_v4, %v1577_v39 }
 0x9f4   :  { %5443 = vmatprep.mubr.bf16.mxu0 %v1601_v20  ;;  %5270 = vmatpush3.bf16.msra.mxu0 %v5637_v8  ;;  %v1590_v49 = vadd.f32 %v4972_v4, %v1578_v17 }
 0x9f5   :  { %5271 = vmatprep.subr.bf16.mxu0 %v5638_v46  ;;  %v1597_v2 = vadd.f32 %v1589_v23, %v7132_v40 }
 0x9f6   :  { %v1602_v63 = vpack.c.bf16 %v1590_v49, %v1589_v23  ;;  %v1598_v33 = vadd.f32 %v1590_v49, %v7138_v28 }
 0x9f8   :  { %5444 = vmatmul.mubr.bf16.gmra.mrb[28].mxu0 %v1602_v63 }
 0x9f9   :  { %5272 = vmatpush3.bf16.msra.mxu0 %v5639_v41  ;;  %2284 = vmatprep.mubr.bf16.mxu0 %v6852_v24  ;;  %v4973_v24 = vld [vmem:[%s8563_s3 + $0x4] ss:$0 sm:$0xff]  ;;  %v7271_v41 = vld [vmem:[%s8563_s3 + $0x8] ss:$0 sm:$0xff] }
 0x9fa   :  { %5273 = vmatprep.subr.bf16.mxu0 %v5640_v27 }
 0x9fd   :  { %5274 = vmatpush3.bf16.msra.mxu0 %v5641_v7 }
 0x9fe   :  { %5275 = vmatprep.subr.bf16.mxu0 %v5642_v62 }
 0xa01   :  { %5276 = vmatpush3.bf16.msra.mxu0 %v5643_v22 }
 0xa02   :  { %5277 = vmatprep.subr.bf16.mxu0 %v5644_v47 }
 0xa05   :  { %5278 = vmatpush3.bf16.msra.mxu0 %v5645_v3 }
 0xa08   :  { %2285 = vmatmul.mubr.bf16.vlgmr.msra.gmra.mrb[32].mxu0 %v6854_v25  ;;  %v1593_v25 = vadd.f32 %v7203_v53, %v7110_v56 }
 0xa09   :  { %2292 = vmatprep.mubr.bf16.mxu0 %v6858_v5 }
 0xa10   :  { %2293 = vmatmul.mubr.bf16.gmra.mrb[36].mxu0 %v6868_v32  ;;  %v1591_v32 = vadd.f32 %v7196_v42, %v7113_v26 }
 0xa11   :  { %2300 = vmatprep.mubr.bf16.mxu0 %v6866_v31 }
 0xa18   :  { %2301 = vmatmul.mubr.bf16.gmra.mrb[40].mxu0 %v6878_v0 }
 0xa19   :  { %2308 = vmatprep.mubr.bf16.mxu0 %v6876_v34  ;;  %v1594_v34 = vadd.f32 %v7205_v29, %v7119_v11 }
 0xa20   :  { %2309 = vmatmul.mubr.bf16.gmra.mrb[44].mxu0 %v6884_v37 }
 0xaba   :  { %v5441_v4 = vpop.f32.mrb[24].mxu0 }
 0xabb   :  { %v1716_v19 = vadd.f32 %v5441_v4, %v4973_v24  ;;  %v1707_v5 = vpop.f32.mrb[25].mxu0 }
 0xabc   :  { %v1708_v31 = vadd.f32 %v4973_v24, %v1707_v5  ;;  %v5442_v50 = vpop.f32.mrb[26].mxu0 }
 0xabd   :  { %v7238_v0 = vadd.f32 %v1716_v19, %v1593_v25  ;;  %v1719_v37 = vadd.f32 %v5442_v50, %v4973_v24  ;;  %v1710_v52 = vpop.f32.mrb[27].mxu0 }
 0xabe   :  { %v1738_v61 = vadd.f32 %v1708_v31, %v1591_v32  ;;  %v1711_v58 = vadd.f32 %v4973_v24, %v1710_v52 }
 0xabf   :  { %v4984_v56 = vmul.f32 -1.442695, %v7238_v0  ;;  %v7245_v45 = vadd.f32 %v1719_v37, %v1594_v34 }
 0xac0   :  { %v4982_v59 = vmul.f32 -1.442695, %v1738_v61  ;;  %v1739_v26 = vadd.f32 %v1711_v58, %v1592_v57 }
 0xac1   :  { %5974 = vpow2.f32 %v4984_v56  ;;  %v4985_v42 = vmul.f32 -1.442695, %v7245_v45 }
 0xac2   :  { %5976 = vpow2.f32 %v4982_v59  ;;  %v4983_v51 = vmul.f32 -1.442695, %v1739_v26 }
 0xac3   :  { %5978 = vpow2.f32 %v4985_v42 }
 0xac4   :  { %5980 = vpow2.f32 %v4983_v51 }
 0xacb   :  { %v5975_v11 = vpop.eup %5974  ;;  %v5445_v53 = vpop.f32.mrb[28].mxu0 }
 0xacc   :  { %v5977_v29 = vpop.eup %5976  ;;  %v1772_v60 = vadd.f32 1.0, %v5975_v11  ;;  %v1732_v16 = vadd.f32 %v5445_v53, %v4973_v24  ;;  %v1723_v44 = vpop.f32.mrb[29].mxu0 }
 0xacd   :  { %v5979_v15 = vpop.eup %5978  ;;  %v1770_v18 = vadd.f32 1.0, %v5977_v29  ;;  %v1724_v21 = vadd.f32 %v4973_v24, %v1723_v44  ;;  %v5446_v48 = vpop.f32.mrb[30].mxu0 }
 0xace   :  { %v5981_v13 = vpop.eup %5980  ;;  %5982 = vrcp.f32 %v1772_v60  ;;  %v1773_v12 = vadd.f32 1.0, %v5979_v15  ;;  %v7254_v14 = vadd.f32 %v1732_v16, %v1597_v2  ;;  %v1735_v40 = vadd.f32 %v5446_v48, %v4973_v24  ;;  %v1726_v1 = vpop.f32.mrb[31].mxu0 }
 0xacf   :  { %5984 = vrcp.f32 %v1770_v18  ;;  %v1771_v9 = vadd.f32 1.0, %v5981_v13  ;;  %v7256_v54 = vadd.f32 %v1724_v21, %v1595_v10  ;;  %v1727_v35 = vadd.f32 %v4973_v24, %v1726_v1 }
 0xad0   :  { %5986 = vrcp.f32 %v1773_v12  ;;  %v4988_v38 = vmul.f32 -1.442695, %v7254_v14  ;;  %v7259_v28 = vadd.f32 %v1735_v40, %v1598_v33 }
 0xad1   :  { %5988 = vrcp.f32 %v1771_v9  ;;  %v4986_v36 = vmul.f32 -1.442695, %v7256_v54  ;;  %v7262_v55 = vadd.f32 %v1727_v35, %v1596_v6 }
 0xad2   :  { %5990 = vpow2.f32 %v4988_v38  ;;  %v4989_v43 = vmul.f32 -1.442695, %v7259_v28 }
 0xad3   :  { %5992 = vpow2.f32 %v4986_v36  ;;  %v4987_v8 = vmul.f32 -1.442695, %v7262_v55 }
 0xad4   :  { %5994 = vpow2.f32 %v4989_v43 }
 0xad5   :  { %5996 = vpow2.f32 %v4987_v8 }
 0xad8   :  { %v5983_v30 = vpop.eup %5982 }
 0xad9   :  { %v5985_v46 = vpop.eup %5984  ;;  %v7278_v25 = vmul.f32 %v5983_v30, %v7238_v0 }
 0xada   :  { %v5987_v39 = vpop.eup %5986  ;;  %v7266_v20 = vmul.f32 %v5985_v46, %v1738_v61 }
 0xadb   :  { %v5989_v17 = vpop.eup %5988  ;;  %v5279_v23 = vpop.f32.mrb[32].mxu0  ;;  %v7285_v34 = vmul.f32 %v5987_v39, %v7245_v45 }
 0xadc   :  { %v5991_v49 = vpop.eup %5990  ;;  %v5280_v63 = vpop.f32.mrb[33].mxu0  ;;  %1804 = vadd.xlane.f32.xlu0 %v7266_v20  ;;  %v7274_v27 = vmul.f32 %v5989_v17, %v1739_v26 }
 0xadd   :  { %v5993_v7 = vpop.eup %5992  ;;  %v1776_v62 = vadd.f32 1.0, %v5991_v49  ;;  %v5281_v22 = vadd.f32 %v5280_v63, %v5279_v23  ;;  %v5282_v47 = vpop.f32.mrb[34].mxu0 }
 0xade   :  { %v5995_v3 = vpop.eup %5994  ;;  %v1774_v24 = vadd.f32 1.0, %v5993_v7  ;;  %v5283_v4 = vpop.f32.mrb[35].mxu0  ;;  %1806 = vadd.xlane.f32.xlu1 %v7274_v27 }
 0xadf   :  { %v5997_v19 = vpop.eup %5996  ;;  %v7281_v5 = vadd.f32 %v5281_v22, %v7271_v41  ;;  %v5284_v32 = vadd.f32 %v5283_v4, %v5282_v47  ;;  %v1777_v31 = vadd.f32 1.0, %v5995_v3 }
 0xae0   :  { %5998 = vrcp.f32 %v1774_v24  ;;  %v1775_v50 = vadd.f32 1.0, %v5997_v19  ;;  %1808 = vadd.xlane.f32.xlu0 %v7278_v25 }
 0xae1   :  { %6000 = vrcp.f32 %v1776_v62  ;;  %v5034_v37 = vmul.f32 -1.442695, %v7281_v5  ;;  %v7289_v52 = vadd.f32 %v5284_v32, %v7271_v41 }
 0xae2   :  { %6002 = vrcp.f32 %v1775_v50  ;;  %1810 = vadd.xlane.f32.xlu1 %v7285_v34 }
 0xae3   :  { %6004 = vpow2.f32 %v5034_v37  ;;  %v5035_v0 = vmul.f32 -1.442695, %v7289_v52  ;;  %v5285_v61 = vpop.f32.mrb[36].mxu0 }
 0xae4   :  { %6006 = vrcp.f32 %v1777_v31  ;;  %v5286_v57 = vpop.f32.mrb[37].mxu0 }
 0xae5   :  { %6008 = vpow2.f32 %v5035_v0  ;;  %v5287_v58 = vadd.f32 %v5286_v57, %v5285_v61  ;;  %v5288_v56 = vpop.f32.mrb[38].mxu0 }
 0xae6   :  { %v5289_v45 = vpop.f32.mrb[39].mxu0 }
 0xae7   :  { %v7294_v59 = vadd.f32 %v5287_v58, %v7271_v41  ;;  %v5290_v26 = vadd.f32 %v5289_v45, %v5288_v56 }
 0xae9   :  { %v5036_v42 = vmul.f32 -1.442695, %v7294_v59  ;;  %v7298_v51 = vadd.f32 %v5290_v26, %v7271_v41 }
 0xaea   :  { %v5999_v11 = vpop.eup %5998 }
 0xaeb   :  { %v6001_v53 = vpop.eup %6000  ;;  %6010 = vpow2.f32 %v5036_v42  ;;  %v5037_v29 = vmul.f32 -1.442695, %v7298_v51  ;;  %v5291_v60 = vpop.f32.mrb[40].mxu0  ;;  %v7302_v2 = vmul.f32 %v5999_v11, %v7256_v54 }
 0xaec   :  { %v6003_v16 = vpop.eup %6002  ;;  %v5292_v10 = vpop.f32.mrb[41].mxu0  ;;  %v7311_v1 = vmul.f32 %v6001_v53, %v7254_v14  ;;  %v5646_v53 = vld [vmem:[#allocation7] ss:$8 sps:$4 sm:$0xff]  }
 0xaed   :  { %v6005_v44 = vpop.eup %6004  ;;  %6012 = vpow2.f32 %v5037_v29  ;;  %v5293_v15 = vadd.f32 %v5292_v10, %v5291_v60  ;;  %v5294_v18 = vpop.f32.mrb[42].mxu0  ;;  %1812 = vadd.xlane.f32.xlu0 %v7302_v2  ;;  %v7306_v21 = vmul.f32 %v6003_v16, %v7262_v55  ;;  %v5648_v29 = vld [vmem:[#allocation7 + $0x4] ss:$8 sps:$4 sm:$0xff]   ;;  %v5651_v60 = vld [vmem:[#allocation7 + $0x14] ss:$8 sps:$4 sm:$0xff]  }
 0xaee   :  { %v6007_v33 = vpop.eup %6006  ;;  %v2341_v48 = vadd.f32 1.0, %v6005_v44  ;;  %v5295_v6 = vpop.f32.mrb[43].mxu0  ;;  %2028 = vmatprep.subr.bf16.mxu1 %v5648_v29  ;;  %v5649_v16 = vld [vmem:[#allocation7 + $0x10] ss:$8 sps:$4 sm:$0xff]  }
 0xaef   :  { %v6009_v13 = vpop.eup %6008  ;;  %v2303_v12 = vadd.f32 %v5293_v15, %v7271_v41  ;;  %v5296_v40 = vadd.f32 %v5295_v6, %v5294_v18  ;;  %1814 = vadd.xlane.f32.xlu1 %v7306_v21  ;;  %v7316_v38 = vmul.f32 %v6007_v33, %v7259_v28  ;;  %2029 = vmatpush1.bf16.msra.mxu1 %v5646_v53  ;;  %v5667_v29 = vld [vmem:[#allocation7 + $0x70] ss:$8 sps:$4 sm:$0xff]  }
 0xaf0   :  { %6014 = vrcp.f32 %v2341_v48  ;;  %v2342_v9 = vadd.f32 1.0, %v6009_v13  ;;  %2030 = vmatprep.subr.bf16.mxu1 %v5651_v60 }
 0xaf1   :  { %v5038_v54 = vmul.f32 -1.442695, %v2303_v12  ;;  %v2306_v35 = vadd.f32 %v5296_v40, %v7271_v41  ;;  %1816 = vadd.xlane.f32.xlu0 %v7311_v1 }
 0xaf2   :  { %6016 = vrcp.f32 %v2342_v9 }
 0xaf3   :  { %6018 = vpow2.f32 %v5038_v54  ;;  %v5039_v36 = vmul.f32 -1.442695, %v2306_v35  ;;  %v5297_v55 = vpop.f32.mrb[44].mxu0  ;;  %1818 = vadd.xlane.f32.xlu1 %v7316_v38  ;;  %2031 = vmatpush1.bf16.msra.mxu1 %v5649_v16 }
 0xaf4   :  { %v5298_v43 = vpop.f32.mrb[45].mxu0 }
 0xaf5   :  { %v6011_v8 = vpop.eup %6010  ;;  %6020 = vpow2.f32 %v5039_v36  ;;  %v5299_v14 = vadd.f32 %v5298_v43, %v5297_v55  ;;  %v5300_v30 = vpop.f32.mrb[46].mxu0 }
 0xaf6   :  { %v2343_v46 = vadd.f32 1.0, %v6011_v8  ;;  %v5301_v39 = vpop.f32.mrb[47].mxu0 }
 0xaf7   :  { %v6013_v17 = vpop.eup %6012  ;;  %v2311_v23 = vadd.f32 %v5299_v14, %v7271_v41  ;;  %v5302_v49 = vadd.f32 %v5301_v39, %v5300_v30 }
 0xaf8   :  { %6022 = vrcp.f32 %v2343_v46  ;;  %v2344_v28 = vadd.f32 1.0, %v6013_v17  ;;  %v5654_v17 = vld [vmem:[#allocation7 + $0x24] ss:$8 sps:$4 sm:$0xff]  }
 0xaf9   :  { %v5040_v63 = vmul.f32 -1.442695, %v2311_v23  ;;  %v2314_v7 = vadd.f32 %v5302_v49, %v7271_v41  ;;  %v5652_v49 = vld [vmem:[#allocation7 + $0x20] ss:$8 sps:$4 sm:$0xff]   ;;  %2032 = vmatprep.subr.bf16.mxu1 %v5654_v17 }
 0xafa   :  { %v6015_v62 = vpop.eup %6014  ;;  %6024 = vrcp.f32 %v2344_v28  ;;  %2033 = vmatpush1.bf16.msra.mxu1 %v5652_v49 }
 0xafb   :  { %6026 = vpow2.f32 %v5040_v63  ;;  %v5041_v22 = vmul.f32 -1.442695, %v2314_v7  ;;  %v7322_v47 = vmul.f32 %v6015_v62, %v7281_v5  ;;  %v5657_v62 = vld [vmem:[#allocation7 + $0x34] ss:$8 sps:$4 sm:$0xff]  }
 0xafc   :  { %v6017_v3 = vpop.eup %6016  ;;  %2034 = vmatprep.subr.bf16.mxu1 %v5657_v62 }
 0xafd   :  { %v6019_v24 = vpop.eup %6018  ;;  %6028 = vpow2.f32 %v5041_v22  ;;  %2377 = vadd.xlane.f32.xlu0 %v7322_v47  ;;  %v7326_v4 = vmul.f32 %v6017_v3, %v7289_v52  ;;  %v5655_v22 = vld [vmem:[#allocation7 + $0x30] ss:$8 sps:$4 sm:$0xff]  }
 0xafe   :  { %v2345_v19 = vadd.f32 1.0, %v6019_v24  ;;  %2035 = vmatpush1.bf16.msra.mxu1 %v5655_v22  ;;  %v5658_v24 = vld [vmem:[#allocation7 + $0x40] ss:$8 sps:$4 sm:$0xff]  }
 0xaff   :  { %v6021_v32 = vpop.eup %6020  ;;  %2379 = vadd.xlane.f32.xlu1 %v7326_v4 }
 0xb00   :  { %6030 = vrcp.f32 %v2345_v19  ;;  %v2346_v41 = vadd.f32 1.0, %v6021_v32 }
 0xb02   :  { %v6023_v31 = vpop.eup %6022  ;;  %6032 = vrcp.f32 %v2346_v41  ;;  %v5663_v41 = vld [vmem:[#allocation7 + $0x54] ss:$8 sps:$4 sm:$0xff]  }
 0xb03   :  { %v7330_v50 = vmul.f32 %v6023_v31, %v7294_v59 }
 0xb04   :  { %v6025_v5 = vpop.eup %6024 }
 0xb05   :  { %v6027_v37 = vpop.eup %6026  ;;  %2381 = vadd.xlane.f32.xlu0 %v7330_v50  ;;  %v7334_v0 = vmul.f32 %v6025_v5, %v7298_v51  ;;  %v5661_v5 = vld [vmem:[#allocation7 + $0x50] ss:$8 sps:$4 sm:$0xff]  }
 0xb06   :  { %v2347_v52 = vadd.f32 1.0, %v6027_v37 }
 0xb07   :  { %v6029_v61 = vpop.eup %6028  ;;  %2383 = vadd.xlane.f32.xlu1 %v7334_v0 }
 0xb08   :  { %6034 = vrcp.f32 %v2347_v52  ;;  %v2348_v57 = vadd.f32 1.0, %v6029_v61 }
 0xb0a   :  { %v6031_v58 = vpop.eup %6030  ;;  %6036 = vrcp.f32 %v2348_v57  ;;  %v5666_v57 = vld [vmem:[#allocation7 + $0x64] ss:$8 sps:$4 sm:$0xff]  }
 0xb0b   :  { %v7337_v56 = vmul.f32 %v6031_v58, %v2303_v12  ;;  %v5664_v58 = vld [vmem:[#allocation7 + $0x60] ss:$8 sps:$4 sm:$0xff]  }
 0xb0c   :  { %v6033_v45 = vpop.eup %6032 }
 0xb0d   :  { %2385 = vadd.xlane.f32.xlu0 %v7337_v56  ;;  %v7340_v59 = vmul.f32 %v6033_v45, %v2306_v35 }
 0xb0f   :  { %2387 = vadd.xlane.f32.xlu1 %v7340_v59 }
 0xb12   :  { %v6035_v26 = vpop.eup %6034 }
 0xb13   :  { %v7343_v42 = vmul.f32 %v6035_v26, %v2311_v23 }
 0xb14   :  { %v6037_v51 = vpop.eup %6036 }
 0xb15   :  { %2389 = vadd.xlane.f32.xlu0 %v7343_v42  ;;  %v7346_v11 = vmul.f32 %v6037_v51, %v2314_v7 }
 0xb17   :  { %2391 = vadd.xlane.f32.xlu1 %v7346_v11 }
 0xb69   :  { %v1805_v10 = vpop.xlane.xlu0 %1804 }
 0xb6a   :  { %v1820_v44 = vmul.f32 0.0078125, %v1805_v10 }
 0xb6b   :  { %v1807_v15 = vpop.xlane.xlu1 %1806 }
 0xb6c   :  { %v1821_v18 = vmul.f32 0.0078125, %v1807_v15  ;;  %v7350_v33 = vsub.f32 %v7266_v20, %v1820_v44  ;;  %v8572_v44 = vmov 0  }
 0xb6d   :  { %v1809_v48 = vpop.xlane.xlu0 %1808  ;;  %2060 = vmatprep.mubr.bf16.mxu1 %v8572_v44 }
 0xb6e   :  { %v1822_v6 = vmul.f32 0.0078125, %v1809_v48  ;;  %v1836_v13 = vmul.f32 %v7350_v33, %v7350_v33  ;;  %v7355_v12 = vsub.f32 %v7274_v27, %v1821_v18 }
 0xb6f   :  { %v1811_v40 = vpop.xlane.xlu1 %1810 }
 0xb70   :  { %v1823_v9 = vmul.f32 0.0078125, %v1811_v40  ;;  %1844 = vadd.xlane.f32.xlu0 %v1836_v13  ;;  %v1837_v54 = vmul.f32 %v7355_v12, %v7355_v12  ;;  %v7360_v35 = vsub.f32 %v7278_v25, %v1822_v6 }
 0xb72   :  { %1846 = vadd.xlane.f32.xlu1 %v1837_v54  ;;  %v1838_v20 = vmul.f32 %v7360_v35, %v7360_v35  ;;  %v7365_v36 = vsub.f32 %v7285_v34, %v1823_v9 }
 0xb74   :  { %1848 = vadd.xlane.f32.xlu0 %v1838_v20  ;;  %v1839_v27 = vmul.f32 %v7365_v36, %v7365_v36 }
 0xb76   :  { %1850 = vadd.xlane.f32.xlu1 %v1839_v27 }
 0xb7a   :  { %v1813_v55 = vpop.xlane.xlu0 %1812 }
 0xb7b   :  { %v1824_v43 = vmul.f32 0.0078125, %v1813_v55 }
 0xb7c   :  { %v1815_v8 = vpop.xlane.xlu1 %1814 }
 0xb7d   :  { %v1825_v14 = vmul.f32 0.0078125, %v1815_v8  ;;  %v7370_v30 = vsub.f32 %v7302_v2, %v1824_v43 }
 0xb7e   :  { %v1817_v25 = vpop.xlane.xlu0 %1816 }
 0xb7f   :  { %v1826_v46 = vmul.f32 0.0078125, %v1817_v25  ;;  %v1840_v39 = vmul.f32 %v7370_v30, %v7370_v30  ;;  %v7375_v34 = vsub.f32 %v7306_v21, %v1825_v14 }
 0xb80   :  { %v1819_v23 = vpop.xlane.xlu1 %1818 }
 0xb81   :  { %v1827_v28 = vmul.f32 0.0078125, %v1819_v23  ;;  %1852 = vadd.xlane.f32.xlu0 %v1840_v39  ;;  %v1841_v63 = vmul.f32 %v7375_v34, %v7375_v34  ;;  %v7380_v7 = vsub.f32 %v7311_v1, %v1826_v46  ;;  %v5660_v1 = vld [vmem:[#allocation7 + $0x44] ss:$8 sps:$4 sm:$0xff]  }
 0xb82   :  { %2036 = vmatprep.subr.bf16.mxu1 %v5660_v1 }
 0xb83   :  { %1854 = vadd.xlane.f32.xlu1 %v1841_v63  ;;  %v1842_v2 = vmul.f32 %v7380_v7, %v7380_v7  ;;  %v7385_v21 = vsub.f32 %v7316_v38, %v1827_v28  ;;  %2037 = vmatpush1.bf16.msra.mxu1 %v5658_v24 }
 0xb84   :  { %2038 = vmatprep.subr.bf16.mxu1 %v5663_v41 }
 0xb85   :  { %1856 = vadd.xlane.f32.xlu0 %v1842_v2  ;;  %v1843_v3 = vmul.f32 %v7385_v21, %v7385_v21 }
 0xb87   :  { %1858 = vadd.xlane.f32.xlu1 %v1843_v3  ;;  %2039 = vmatpush1.bf16.msra.mxu1 %v5661_v5  ;;  %v7436_v3 = vld [vmem:[%s8564_s4 + $0x4] ss:$0 sm:$0xff] }
 0xb88   :  { %2040 = vmatprep.subr.bf16.mxu1 %v5666_v57  ;;  %v7444_v5 = vld [vmem:[%s8565_s5 + $0x4] ss:$0 sm:$0xff] }
 0xb8a   :  { %v2378_v19 = vpop.xlane.xlu0 %2377 }
 0xb8b   :  { %v2393_v32 = vmul.f32 0.0078125, %v2378_v19  ;;  %2041 = vmatpush1.bf16.msra.mxu1 %v5664_v58 }
 0xb8c   :  { %v2380_v31 = vpop.xlane.xlu1 %2379 }
 0xb8d   :  { %v2394_v38 = vmul.f32 0.0078125, %v2380_v31  ;;  %v7390_v37 = vsub.f32 %v7322_v47, %v2393_v32  ;;  %v5669_v47 = vld [vmem:[#allocation7 + $0x74] ss:$8 sps:$4 sm:$0xff]  }
 0xb8e   :  { %2042 = vmatprep.subr.bf16.mxu1 %v5669_v47 }
 0xb8f   :  { %v2409_v52 = vmul.f32 %v7390_v37, %v7390_v37  ;;  %v7395_v61 = vsub.f32 %v7326_v4, %v2394_v38  ;;  %2043 = vmatpush1.bf16.msra.mxu1 %v5667_v29 }
 0xb91   :  { %2417 = vadd.xlane.f32.xlu0 %v2409_v52  ;;  %v2410_v45 = vmul.f32 %v7395_v61, %v7395_v61 }
 0xb92   :  { %v2382_v26 = vpop.xlane.xlu0 %2381 }
 0xb93   :  { %v2395_v51 = vmul.f32 0.0078125, %v2382_v26  ;;  %2419 = vadd.xlane.f32.xlu1 %v2410_v45 }
 0xb94   :  { %v2384_v53 = vpop.xlane.xlu1 %2383 }
 0xb95   :  { %v7400_v60 = vsub.f32 %v7330_v50, %v2395_v51  ;;  %v2396_v16 = vmul.f32 0.0078125, %v2384_v53 }
 0xb97   :  { %v7403_v4 = vsub.f32 %v7334_v0, %v2396_v16  ;;  %v2411_v10 = vmul.f32 %v7400_v60, %v7400_v60  ;;  %v7413_v0 = vld [vmem:[#allocation6 + $0x100] sm:$0xff]  }
 0xb98   :  { %5447 = vmatprep.subr.bf16.mxu1 %v7413_v0 }
 0xb99   :  { %2421 = vadd.xlane.f32.xlu0 %v2411_v10  ;;  %v2412_v15 = vmul.f32 %v7403_v4, %v7403_v4 }
 0xb9a   :  { %v2386_v18 = vpop.xlane.xlu0 %2385 }
 0xb9b   :  { %v2397_v48 = vmul.f32 0.0078125, %v2386_v18  ;;  %2423 = vadd.xlane.f32.xlu1 %v2412_v15 }
 0xb9c   :  { %v2388_v50 = vpop.xlane.xlu1 %2387 }
 0xb9d   :  { %v7411_v6 = vsub.f32 %v7337_v56, %v2397_v48  ;;  %v2398_v13 = vmul.f32 0.0078125, %v2388_v50  ;;  %v5671_v50 = vld [vmem:[#allocation6 + $0x108] sm:$0xff]  }
 0xb9f   :  { %v7416_v40 = vsub.f32 %v7340_v59, %v2398_v13  ;;  %v2413_v9 = vmul.f32 %v7411_v6, %v7411_v6 }
 0xba1   :  { %2425 = vadd.xlane.f32.xlu0 %v2413_v9  ;;  %v2414_v54 = vmul.f32 %v7416_v40, %v7416_v40 }
 0xba2   :  { %v2390_v20 = vpop.xlane.xlu0 %2389 }
 0xba3   :  { %v2399_v27 = vmul.f32 0.0078125, %v2390_v20  ;;  %2427 = vadd.xlane.f32.xlu1 %v2414_v54 }
 0xba4   :  { %v2392_v56 = vpop.xlane.xlu1 %2391 }
 0xba5   :  { %v7424_v55 = vsub.f32 %v7343_v42, %v2399_v27  ;;  %v2400_v43 = vmul.f32 0.0078125, %v2392_v56 }
 0xba7   :  { %v7427_v59 = vsub.f32 %v7346_v11, %v2400_v43  ;;  %v2415_v8 = vmul.f32 %v7424_v55, %v7424_v55  ;;  %v5673_v43 = vld [vmem:[#allocation6 + $0x118] sm:$0xff]  }
 0xba9   :  { %2429 = vadd.xlane.f32.xlu0 %v2415_v8  ;;  %v2416_v14 = vmul.f32 %v7427_v59, %v7427_v59 }
 0xbab   :  { %2431 = vadd.xlane.f32.xlu1 %v2416_v14 }
 0xbfd   :  { %v1845_v25 = vpop.xlane.xlu0 %1844 }
 0xbfe   :  { %v1860_v46 = vmul.f32 0.0078125, %v1845_v25 }
 0xbff   :  { %v1847_v39 = vpop.xlane.xlu1 %1846 }
 0xc00   :  { %v1868_v17 = vadd.f32 0.1, %v1860_v46  ;;  %v1861_v23 = vmul.f32 0.0078125, %v1847_v39 }
 0xc01   :  { %v1849_v49 = vpop.xlane.xlu0 %1848 }
 0xc02   :  { %6038 = vrsqrt.f32 %v1868_v17  ;;  %v1869_v42 = vadd.f32 0.1, %v1861_v23  ;;  %v1862_v28 = vmul.f32 0.0078125, %v1849_v49 }
 0xc03   :  { %v1851_v63 = vpop.xlane.xlu1 %1850 }
 0xc04   :  { %6040 = vrsqrt.f32 %v1869_v42  ;;  %v1870_v11 = vadd.f32 0.1, %v1862_v28  ;;  %v1863_v2 = vmul.f32 0.0078125, %v1851_v63  ;;  %v5674_v28 = vld [vmem:[#allocation6 + $0x120] sm:$0xff]  }
 0xc06   :  { %6042 = vrsqrt.f32 %v1870_v11  ;;  %v1871_v62 = vadd.f32 0.1, %v1863_v2 }
 0xc08   :  { %6044 = vrsqrt.f32 %v1871_v62 }
 0xc0c   :  { %v6039_v22 = vpop.eup %6038 }
 0xc0d   :  { %v1884_v1 = vmul.f32 %v6039_v22, %v7350_v33 }
 0xc0e   :  { %v6041_v24 = vpop.eup %6040  ;;  %v1853_v19 = vpop.xlane.xlu0 %1852 }
 0xc0f   :  { %v1896_v32 = vmul.f32 %v7436_v3, %v1884_v1  ;;  %v1885_v41 = vmul.f32 %v6041_v24, %v7355_v12  ;;  %v1864_v31 = vmul.f32 0.0078125, %v1853_v19 }
 0xc10   :  { %v6043_v38 = vpop.eup %6042  ;;  %v1855_v52 = vpop.xlane.xlu1 %1854 }
 0xc11   :  { %v1897_v57 = vmul.f32 %v7436_v3, %v1885_v41  ;;  %v1872_v58 = vadd.f32 0.1, %v1864_v31  ;;  %v1865_v45 = vmul.f32 0.0078125, %v1855_v52  ;;  %v1908_v51 = vadd.f32 %v7444_v5, %v1896_v32  ;;  %v5675_v32 = vld [vmem:[#allocation6 + $0x128] sm:$0xff]  }
 0xc12   :  { %v6045_v26 = vpop.eup %6044  ;;  %v1857_v33 = vpop.xlane.xlu0 %1856  ;;  %v1886_v47 = vmul.f32 %v6043_v38, %v7360_v35 }
 0xc13   :  { %6046 = vrsqrt.f32 %v1872_v58  ;;  %v1873_v12 = vadd.f32 0.1, %v1865_v45  ;;  %v1866_v53 = vmul.f32 0.0078125, %v1857_v33  ;;  %v1909_v29 = vadd.f32 %v7444_v5, %v1897_v57  ;;  %v5044_v33 = vld [vmem:[%s8564_s4 + $0x8] ss:$0 sm:$0xff] }
 0xc14   :  { %v1859_v16 = vpop.xlane.xlu1 %1858  ;;  %v1887_v10 = vmul.f32 %v6045_v26, %v7365_v36  ;;  %v1898_v35 = vmul.f32 %v7436_v3, %v1886_v47  ;;  %v5672_v36 = vld [vmem:[#allocation6 + $0x110] sm:$0xff]  }
 0xc15   :  { %6048 = vrsqrt.f32 %v1873_v12  ;;  %v1874_v15 = vadd.f32 0.1, %v1866_v53  ;;  %v1867_v18 = vmul.f32 0.0078125, %v1859_v16  ;;  %v1916_v48 = vpack.c.bf16 %v1909_v29, %v1908_v51  ;;  %v5677_v12 = vld [vmem:[#allocation6 + $0x138] sm:$0xff]  }
 0xc16   :  { %v1899_v13 = vmul.f32 %v7436_v3, %v1887_v10  ;;  %v1910_v20 = vadd.f32 %v7444_v5, %v1898_v35 }
 0xc17   :  { %6050 = vrsqrt.f32 %v1874_v15  ;;  %v1875_v9 = vadd.f32 0.1, %v1867_v18  ;;  %2061 = vmatmul.mubr.bf16.vlgmr.msra.gmra.mrb[16].mxu1 %v1916_v48  ;;  %v5045_v48 = vld [vmem:[%s8565_s5 + $0x8] ss:$0 sm:$0xff] }
 0xc18   :  { %2070 = vmatprep.mubr.bf16.mxu1 %v8572_v44  ;;  %5448 = vmatpush3.bf16.msra.mxu1 %v7413_v0  ;;  %v1911_v54 = vadd.f32 %v7444_v5, %v1899_v13 }
 0xc19   :  { %6052 = vrsqrt.f32 %v1875_v9  ;;  %5449 = vmatprep.subr.bf16.mxu1 %v5671_v50 }
 0xc1a   :  { %v1917_v56 = vpack.c.bf16 %v1911_v54, %v1910_v20 }
 0xc1c   :  { %5450 = vmatpush3.bf16.msra.mxu1 %v5671_v50 }
 0xc1d   :  { %v6047_v27 = vpop.eup %6046  ;;  %5451 = vmatprep.subr.bf16.mxu1 %v5672_v36 }
 0xc1e   :  { %v2418_v8 = vpop.xlane.xlu0 %2417  ;;  %v1888_v14 = vmul.f32 %v6047_v27, %v7370_v30 }
 0xc1f   :  { %v6049_v25 = vpop.eup %6048  ;;  %v2433_v46 = vmul.f32 0.0078125, %v2418_v8  ;;  %2071 = vmatmul.mubr.bf16.gmra.mrb[20].mxu1 %v1917_v56 }
 0xc20   :  { %v2420_v39 = vpop.xlane.xlu1 %2419  ;;  %2080 = vmatprep.mubr.bf16.mxu1 %v8572_v44  ;;  %5452 = vmatpush3.bf16.msra.mxu1 %v5672_v36  ;;  %v1889_v0 = vmul.f32 %v6049_v25, %v7375_v34  ;;  %v1900_v17 = vmul.f32 %v7436_v3, %v1888_v14 }
 0xc21   :  { %v6051_v23 = vpop.eup %6050  ;;  %v2441_v49 = vadd.f32 0.1, %v2433_v46  ;;  %v2434_v42 = vmul.f32 0.0078125, %v2420_v39  ;;  %5453 = vmatprep.subr.bf16.mxu1 %v5673_v43 }
 0xc22   :  { %v1901_v63 = vmul.f32 %v7436_v3, %v1889_v0  ;;  %v1912_v2 = vadd.f32 %v7444_v5, %v1900_v17  ;;  %v1890_v22 = vmul.f32 %v6051_v23, %v7380_v7 }
 0xc23   :  { %v6053_v11 = vpop.eup %6052  ;;  %6054 = vrsqrt.f32 %v2441_v49  ;;  %v2442_v30 = vadd.f32 0.1, %v2434_v42 }
 0xc24   :  { %v1913_v62 = vadd.f32 %v7444_v5, %v1901_v63  ;;  %5454 = vmatpush3.bf16.msra.mxu1 %v5673_v43  ;;  %v1891_v34 = vmul.f32 %v6053_v11, %v7385_v21  ;;  %v1902_v38 = vmul.f32 %v7436_v3, %v1890_v22  ;;  %v5676_v21 = vld [vmem:[#allocation6 + $0x130] sm:$0xff]  }
 0xc25   :  { %6056 = vrsqrt.f32 %v2442_v30  ;;  %5455 = vmatprep.subr.bf16.mxu1 %v5674_v28 }
 0xc26   :  { %v2422_v1 = vpop.xlane.xlu0 %2421  ;;  %v1918_v24 = vpack.c.bf16 %v1913_v62, %v1912_v2  ;;  %v1903_v19 = vmul.f32 %v7436_v3, %v1891_v34  ;;  %v1914_v45 = vadd.f32 %v7444_v5, %v1902_v38 }
 0xc27   :  { %v2435_v41 = vmul.f32 0.0078125, %v2422_v1 }
 0xc28   :  { %v2424_v31 = vpop.xlane.xlu1 %2423  ;;  %2081 = vmatmul.mubr.bf16.gmra.mrb[24].mxu1 %v1918_v24  ;;  %v1915_v7 = vadd.f32 %v7444_v5, %v1903_v19 }
 0xc29   :  { %v2443_v52 = vadd.f32 0.1, %v2435_v41  ;;  %v2436_v57 = vmul.f32 0.0078125, %v2424_v31  ;;  %2090 = vmatprep.mubr.bf16.mxu1 %v8572_v44  ;;  %5456 = vmatpush3.bf16.msra.mxu1 %v5674_v28  ;;  %v8571_v41 = vlaneseq }
 0xc2a   :  { %5457 = vmatprep.subr.bf16.mxu1 %v5675_v32  ;;  %v1919_v51 = vpack.c.bf16 %v1915_v7, %v1914_v45  ;;  %v1936_v7 = vld [vmem:[%s8567_s7] ss:$2 sm:$0x3] }
 0xc2b   :  { %6058 = vrsqrt.f32 %v2443_v52  ;;  %v2444_v58 = vadd.f32 0.1, %v2436_v57  ;;  %v1939_v31 = vshrl.u32 %v8571_v41, 7 }
 0xc2d   :  { %v6055_v26 = vpop.eup %6054  ;;  %6060 = vrsqrt.f32 %v2444_v58  ;;  %5458 = vmatpush3.bf16.msra.mxu1 %v5675_v32  ;;  %v7518_v57 = vsub.s32 1, %v1939_v31 }
 0xc2e   :  { %v2426_v3 = vpop.xlane.xlu0 %2425  ;;  %5459 = vmatprep.subr.bf16.mxu1 %v5676_v21  ;;  %v2457_v47 = vmul.f32 %v6055_v26, %v7390_v37 }
 0xc2f   :  { %v6057_v53 = vpop.eup %6056  ;;  %v2437_v29 = vmul.f32 0.0078125, %v2426_v3 }
 0xc30   :  { %v2428_v16 = vpop.xlane.xlu1 %2427  ;;  %2091 = vmatmul.mubr.bf16.gmra.mrb[28].mxu1 %v1919_v51  ;;  %v2458_v10 = vmul.f32 %v6057_v53, %v7395_v61  ;;  %v2469_v5 = vmul.f32 %v5044_v33, %v2457_v47  ;;  %v7533_v51 = vsub.s32 0, %v1939_v31 }
 0xc31   :  { %v2445_v15 = vadd.f32 0.1, %v2437_v29  ;;  %v2438_v18 = vmul.f32 0.0078125, %v2428_v16  ;;  %5460 = vmatpush3.bf16.msra.mxu1 %v5676_v21  ;;  %v7524_v21 = vrot.slane %v1936_v7, %v7518_v57 }
 0xc32   :  { %v2470_v50 = vmul.f32 %v5044_v33, %v2458_v10  ;;  %5461 = vmatprep.subr.bf16.mxu1 %v5677_v12  ;;  %v7479_v37 = vadd.f32 %v5045_v48, %v2469_v5  ;;  %8606 = vst [vmem:[#allocation13_spill] sm:$0xff] %v7533_v51 }
 0xc33   :  { %6062 = vrsqrt.f32 %v2445_v15  ;;  %v2446_v13 = vadd.f32 0.1, %v2438_v18 }
 0xc34   :  { %v7481_v9 = vadd.f32 %v5045_v48, %v2470_v50 }
 0xc35   :  { %v6059_v35 = vpop.eup %6058  ;;  %6064 = vrsqrt.f32 %v2446_v13  ;;  %5462 = vmatpush3.bf16.msra.mxu1 %v5677_v12  ;;  %v7539_v12 = vrot.slane %v1936_v7, %v7533_v51 }
 0xc36   :  { %v2459_v61 = vmul.f32 %v6059_v35, %v7400_v60  ;;  %v2430_v54 = vpop.xlane.xlu0 %2429  ;;  %v2489_v36 = vpack.c.bf16 %v7481_v9, %v7479_v37 }
 0xc37   :  { %v6061_v20 = vpop.eup %6060  ;;  %v2439_v27 = vmul.f32 0.0078125, %v2430_v54 }
 0xc38   :  { %v2471_v56 = vmul.f32 %v5044_v33, %v2459_v61  ;;  %v2460_v43 = vmul.f32 %v6061_v20, %v7403_v4  ;;  %v2432_v8 = vpop.xlane.xlu1 %2431  ;;  %5463 = vmatprep.mubr.bf16.mxu1 %v2489_v36 }
 0xc39   :  { %v2447_v14 = vadd.f32 0.1, %v2439_v27  ;;  %v2440_v25 = vmul.f32 0.0078125, %v2432_v8 }
 0xc3a   :  { %v2472_v46 = vmul.f32 %v5044_v33, %v2460_v43  ;;  %v7487_v0 = vadd.f32 %v5045_v48, %v2471_v56  ;;  %v5047_v56 = vld [vmem:[%s8563_s3 + $0x9] ss:$0 sm:$0xff] }
 0xc3b   :  { %6066 = vrsqrt.f32 %v2447_v14  ;;  %v2448_v39 = vadd.f32 0.1, %v2440_v25 }
 0xc3c   :  { %v7489_v17 = vadd.f32 %v5045_v48, %v2472_v46 }
 0xc3d   :  { %v6063_v60 = vpop.eup %6062  ;;  %6068 = vrsqrt.f32 %v2448_v39 }
 0xc3e   :  { %v2490_v23 = vpack.c.bf16 %v7489_v17, %v7487_v0  ;;  %v2461_v49 = vmul.f32 %v6063_v60, %v7411_v6 }
 0xc3f   :  { %v6065_v42 = vpop.eup %6064 }
 0xc40   :  { %5464 = vmatmul.mubr.bf16.vlgmr.msra.gmra.mrb[32].mxu1 %v2490_v23  ;;  %v2462_v4 = vmul.f32 %v6065_v42, %v7416_v40  ;;  %v2473_v28 = vmul.f32 %v5044_v33, %v2461_v49 }
 0xc42   :  { %v2474_v63 = vmul.f32 %v5044_v33, %v2462_v4  ;;  %v7495_v11 = vadd.f32 %v5045_v48, %v2473_v28 }
 0xc44   :  { %v7497_v30 = vadd.f32 %v5045_v48, %v2474_v63 }
 0xc45   :  { %v6067_v2 = vpop.eup %6066 }
 0xc46   :  { %v2491_v62 = vpack.c.bf16 %v7497_v30, %v7495_v11  ;;  %v2463_v22 = vmul.f32 %v6067_v2, %v7424_v55 }
 0xc47   :  { %v6069_v34 = vpop.eup %6068 }
 0xc48   :  { %5467 = vmatprep.mubr.bf16.mxu1 %v2491_v62  ;;  %v2464_v6 = vmul.f32 %v6069_v34, %v7427_v59  ;;  %v2475_v1 = vmul.f32 %v5044_v33, %v2463_v22 }
 0xc4a   :  { %v2476_v24 = vmul.f32 %v5044_v33, %v2464_v6  ;;  %v7503_v19 = vadd.f32 %v5045_v48, %v2475_v1 }
 0xc4c   :  { %v7505_v40 = vadd.f32 %v5045_v48, %v2476_v24 }
 0xc4e   :  { %v2492_v32 = vpack.c.bf16 %v7505_v40, %v7503_v19 }
 0xc50   :  { %5468 = vmatmul.mubr.bf16.gmra.mrb[36].mxu1 %v2492_v32 }
 0xcea   :  { %v7510_v38 = vpop.f32.mrb[16].mxu1 }
 0xceb   :  { %v7512_v55 = vpop.f32.mrb[17].mxu1 }
 0xcec   :  { %v7514_v52 = vpop.f32.mrb[18].mxu1 }
 0xced   :  { %v7516_v59 = vpop.f32.mrb[19].mxu1 }
 0xcf2   :  { %v7526_v58 = vpop.f32.mrb[20].mxu1 }
 0xcf3   :  { %v2074_v45 = vpop.f32.mrb[21].mxu1 }
 0xcf4   :  { %v7529_v26 = vadd.f32 %v2074_v45, %v7524_v21  ;;  %v7531_v33 = vpop.f32.mrb[22].mxu1 }
 0xcf5   :  { %v2078_v3 = vpop.f32.mrb[23].mxu1 }
 0xcf6   :  { %v7536_v47 = vadd.f32 %v2078_v3, %v7524_v21 }
 0xcfb   :  { %v2082_v53 = vpop.f32.mrb[24].mxu1 }
 0xcfc   :  { %v7542_v29 = vadd.f32 %v2082_v53, %v7539_v12  ;;  %v2084_v16 = vpop.f32.mrb[25].mxu1 }
 0xcfd   :  { %v7545_v10 = vadd.f32 %v2084_v16, %v7524_v21  ;;  %v2086_v5 = vpop.f32.mrb[26].mxu1 }
 0xcfe   :  { %8607 = vst [vmem:[#allocation14_spill] sm:$0xff] %v7542_v29  ;;  %v7548_v15 = vadd.f32 %v2086_v5, %v7539_v12  ;;  %v2088_v18 = vpop.f32.mrb[27].mxu1 }
 0xcff   :  { %v7551_v48 = vadd.f32 %v2088_v18, %v7524_v21 }
 0xd03   :  { %v2092_v50 = vpop.f32.mrb[28].mxu1 }
 0xd04   :  { %v7554_v13 = vadd.f32 %v2092_v50, %v7539_v12  ;;  %v2094_v35 = vpop.f32.mrb[29].mxu1 }
 0xd05   :  { %v7557_v61 = vadd.f32 %v2094_v35, %v7524_v21  ;;  %v2096_v54 = vpop.f32.mrb[30].mxu1 }
 0xd06   :  { %v2098_v36 = vpop.f32.mrb[31].mxu1  ;;  %v7560_v20 = vadd.f32 %v2096_v54, %v7539_v12 }
 0xd07   :  { %8608 = vst [vmem:[#allocation15_spill] sm:$0xff] %v7557_v61  ;;  %v7563_v27 = vadd.f32 %v2098_v36, %v7524_v21 }
 0xd09   :  { %8609 = vst [vmem:[#allocation16_spill] sm:$0xff] %v7563_v27 }
 0xd13   :  { %v5465_v43 = vpop.f32.mrb[32].mxu1 }
 0xd14   :  { %v2606_v8 = vadd.f32 %v5465_v43, %v5047_v56  ;;  %v2597_v14 = vpop.f32.mrb[33].mxu1 }
 0xd15   :  { %v2598_v25 = vadd.f32 %v5047_v56, %v2597_v14  ;;  %v5466_v46 = vpop.f32.mrb[34].mxu1 }
 0xd16   :  { %v2630_v39 = vadd.f32 %v2606_v8, %v7487_v0  ;;  %v2609_v60 = vadd.f32 %v5466_v46, %v5047_v56  ;;  %v2600_v23 = vpop.f32.mrb[35].mxu1 }
 0xd17   :  { %v2628_v49 = vadd.f32 %v2598_v25, %v7479_v37  ;;  %v2601_v42 = vadd.f32 %v5047_v56, %v2600_v23 }
 0xd18   :  { %v5058_v4 = vmul.f32 -1.442695, %v2630_v39  ;;  %v2631_v28 = vadd.f32 %v2609_v60, %v7489_v17 }
 0xd19   :  { %v5056_v63 = vmul.f32 -1.442695, %v2628_v49  ;;  %v2629_v2 = vadd.f32 %v2601_v42, %v7481_v9 }
 0xd1a   :  { %6070 = vpow2.f32 %v5058_v4  ;;  %v5059_v62 = vmul.f32 -1.442695, %v2631_v28 }
 0xd1b   :  { %v5057_v22 = vmul.f32 -1.442695, %v2629_v2  ;;  %6072 = vpow2.f32 %v5056_v63 }
 0xd1c   :  { %6074 = vpow2.f32 %v5059_v62 }
 0xd1d   :  { %6076 = vpow2.f32 %v5057_v22 }
 0xd23   :  { %v5469_v34 = vpop.f32.mrb[36].mxu1 }
 0xd24   :  { %v6071_v6 = vpop.eup %6070  ;;  %v2622_v1 = vadd.f32 %v5469_v34, %v5047_v56  ;;  %v2613_v24 = vpop.f32.mrb[37].mxu1 }
 0xd25   :  { %v2662_v32 = vadd.f32 1.0, %v6071_v6  ;;  %v2614_v31 = vadd.f32 %v5047_v56, %v2613_v24  ;;  %v5470_v7 = vpop.f32.mrb[38].mxu1  ;;  %v6073_v45 = vpop.eup %6072 }
 0xd26   :  { %v2634_v3 = vadd.f32 %v2622_v1, %v7503_v19  ;;  %v2625_v53 = vadd.f32 %v5470_v7, %v5047_v56  ;;  %v2616_v16 = vpop.f32.mrb[39].mxu1  ;;  %v6075_v5 = vpop.eup %6074  ;;  %v2660_v18 = vadd.f32 1.0, %v6073_v45 }
 0xd27   :  { %v2632_v50 = vadd.f32 %v2614_v31, %v7495_v11  ;;  %v2617_v35 = vadd.f32 %v5047_v56, %v2616_v16  ;;  %6078 = vrcp.f32 %v2662_v32  ;;  %v2663_v54 = vadd.f32 1.0, %v6075_v5  ;;  %v6077_v8 = vpop.eup %6076 }
 0xd28   :  { %v5062_v36 = vmul.f32 -1.442695, %v2634_v3  ;;  %v2635_v43 = vadd.f32 %v2625_v53, %v7505_v40  ;;  %6080 = vrcp.f32 %v2660_v18  ;;  %v2661_v46 = vadd.f32 1.0, %v6077_v8  ;;  %v5678_v8 = vld [vmem:[#allocation6 + $0x140] sm:$0xff]  }
 0xd29   :  { %v5060_v14 = vmul.f32 -1.442695, %v2632_v50  ;;  %v2633_v25 = vadd.f32 %v2617_v35, %v7497_v30  ;;  %6082 = vrcp.f32 %v2663_v54  ;;  %5471 = vmatprep.subr.bf16.mxu0 %v5678_v8 }
 0xd2a   :  { %v5063_v60 = vmul.f32 -1.442695, %v2635_v43  ;;  %6084 = vpow2.f32 %v5062_v36  ;;  %5472 = vmatpush3.bf16.msra.mxu0 %v5678_v8 }
 0xd2b   :  { %v5061_v23 = vmul.f32 -1.442695, %v2633_v25  ;;  %6086 = vrcp.f32 %v2661_v46 }
 0xd2c   :  { %6088 = vpow2.f32 %v5060_v14 }
 0xd2d   :  { %6090 = vpow2.f32 %v5063_v60 }
 0xd2e   :  { %6092 = vpow2.f32 %v5061_v23 }
 0xd31   :  { %v6079_v56 = vpop.eup %6078 }
 0xd32   :  { %v6081_v42 = vpop.eup %6080  ;;  %v2686_v31 = vmul.f32 %v6079_v56, %v2630_v39 }
 0xd33   :  { %v6083_v4 = vpop.eup %6082  ;;  %v2684_v63 = vmul.f32 %v6081_v42, %v2628_v49 }
 0xd34   :  { %v6085_v62 = vpop.eup %6084  ;;  %v2687_v16 = vmul.f32 %v6083_v4, %v2631_v28 }
 0xd35   :  { %v6087_v22 = vpop.eup %6086  ;;  %2694 = vadd.xlane.f32.xlu0 %v2684_v63  ;;  %v2666_v6 = vadd.f32 1.0, %v6085_v62 }
 0xd36   :  { %v6089_v34 = vpop.eup %6088  ;;  %v2685_v1 = vmul.f32 %v6087_v22, %v2629_v2 }
 0xd37   :  { %v6091_v24 = vpop.eup %6090  ;;  %v2664_v32 = vadd.f32 1.0, %v6089_v34 }
 0xd38   :  { %v6093_v7 = vpop.eup %6092  ;;  %2696 = vadd.xlane.f32.xlu1 %v2685_v1  ;;  %v2667_v45 = vadd.f32 1.0, %v6091_v24 }
 0xd39   :  { %6094 = vrcp.f32 %v2664_v32  ;;  %v2665_v53 = vadd.f32 1.0, %v6093_v7  ;;  %2698 = vadd.xlane.f32.xlu0 %v2686_v31 }
 0xd3a   :  { %6096 = vrcp.f32 %v2666_v6 }
 0xd3b   :  { %6098 = vrcp.f32 %v2665_v53 }
 0xd3c   :  { %2700 = vadd.xlane.f32.xlu1 %v2687_v16  ;;  %6100 = vrcp.f32 %v2667_v45 }
 0xd43   :  { %v6095_v49 = vpop.eup %6094 }
 0xd44   :  { %v6097_v5 = vpop.eup %6096  ;;  %v2688_v18 = vmul.f32 %v6095_v49, %v2632_v50 }
 0xd45   :  { %v6099_v35 = vpop.eup %6098  ;;  %v2690_v39 = vmul.f32 %v6097_v5, %v2634_v3  ;;  %v5679_v5 = vld [vmem:[#allocation6 + $0x148] sm:$0xff]  }
 0xd46   :  { %2702 = vadd.xlane.f32.xlu0 %v2688_v18  ;;  %v2689_v2 = vmul.f32 %v6099_v35, %v2633_v25  ;;  %v6101_v54 = vpop.eup %6100  ;;  %5473 = vmatprep.subr.bf16.mxu0 %v5679_v5 }
 0xd47   :  { %v2691_v36 = vmul.f32 %v6101_v54, %v2635_v43  ;;  %5474 = vmatpush3.bf16.msra.mxu0 %v5679_v5 }
 0xd48   :  { %2704 = vadd.xlane.f32.xlu1 %v2689_v2 }
 0xd4a   :  { %2706 = vadd.xlane.f32.xlu0 %v2690_v39 }
 0xd4c   :  { %2708 = vadd.xlane.f32.xlu1 %v2691_v36 }
 0xdc2   :  { %v2695_v14 = vpop.xlane.xlu0 %2694 }
 0xdc3   :  { %v2710_v28 = vmul.f32 0.0078125, %v2695_v14  ;;  %v5680_v14 = vld [vmem:[#allocation6 + $0x150] sm:$0xff]  }
 0xdc4   :  { %5475 = vmatprep.subr.bf16.mxu0 %v5680_v14 }
 0xdc5   :  { %v7576_v46 = vsub.f32 %v2684_v63, %v2710_v28  ;;  %v2697_v60 = vpop.xlane.xlu1 %2696  ;;  %5476 = vmatpush3.bf16.msra.mxu0 %v5680_v14 }
 0xdc6   :  { %v2711_v23 = vmul.f32 0.0078125, %v2697_v60  ;;  %v2699_v56 = vpop.xlane.xlu0 %2698  ;;  %v5682_v60 = vld [vmem:[#allocation6 + $0x160] sm:$0xff]  }
 0xdc7   :  { %v2712_v50 = vmul.f32 0.0078125, %v2699_v56  ;;  %v2726_v25 = vmul.f32 %v7576_v46, %v7576_v46  ;;  %v5685_v56 = vld [vmem:[#allocation6 + $0x178] sm:$0xff]  }
 0xdc8   :  { %v7580_v42 = vsub.f32 %v2685_v1, %v2711_v23  ;;  %v5684_v23 = vld [vmem:[#allocation6 + $0x170] sm:$0xff]  }
 0xdc9   :  { %v7582_v3 = vsub.f32 %v2686_v31, %v2712_v50  ;;  %v2701_v43 = vpop.xlane.xlu1 %2700  ;;  %2734 = vadd.xlane.f32.xlu0 %v2726_v25 }
 0xdca   :  { %v2713_v4 = vmul.f32 0.0078125, %v2701_v43  ;;  %v2727_v62 = vmul.f32 %v7580_v42, %v7580_v42 }
 0xdcb   :  { %v2728_v63 = vmul.f32 %v7582_v3, %v7582_v3 }
 0xdcc   :  { %v7588_v22 = vsub.f32 %v2687_v16, %v2713_v4  ;;  %2736 = vadd.xlane.f32.xlu1 %v2727_v62 }
 0xdcd   :  { %2738 = vadd.xlane.f32.xlu0 %v2728_v63 }
 0xdce   :  { %v2729_v34 = vmul.f32 %v7588_v22, %v7588_v22 }
 0xdd0   :  { %2740 = vadd.xlane.f32.xlu1 %v2729_v34 }
 0xdd3   :  { %v2703_v6 = vpop.xlane.xlu0 %2702 }
 0xdd4   :  { %v2714_v1 = vmul.f32 0.0078125, %v2703_v6 }
 0xdd5   :  { %v2705_v24 = vpop.xlane.xlu1 %2704 }
 0xdd6   :  { %v7592_v32 = vsub.f32 %v2688_v18, %v2714_v1  ;;  %v2715_v31 = vmul.f32 0.0078125, %v2705_v24 }
 0xdd7   :  { %v2707_v7 = vpop.xlane.xlu0 %2706 }
 0xdd8   :  { %v7594_v45 = vsub.f32 %v2689_v2, %v2715_v31  ;;  %v2716_v53 = vmul.f32 0.0078125, %v2707_v7  ;;  %v2730_v16 = vmul.f32 %v7592_v32, %v7592_v32 }
 0xdd9   :  { %v2709_v49 = vpop.xlane.xlu1 %2708 }
 0xdda   :  { %v7598_v35 = vsub.f32 %v2690_v39, %v2716_v53  ;;  %v2717_v54 = vmul.f32 0.0078125, %v2709_v49  ;;  %2742 = vadd.xlane.f32.xlu0 %v2730_v16  ;;  %v2731_v8 = vmul.f32 %v7594_v45, %v7594_v45  ;;  %v5681_v39 = vld [vmem:[#allocation6 + $0x158] sm:$0xff]   ;;  %v5066_v16 = vld [vmem:[%s8564_s4 + $0x9] ss:$0 sm:$0xff] }
 0xddb   :  { %5477 = vmatprep.subr.bf16.mxu0 %v5681_v39 }
 0xddc   :  { %v7602_v18 = vsub.f32 %v2691_v36, %v2717_v54  ;;  %2744 = vadd.xlane.f32.xlu1 %v2731_v8  ;;  %v2732_v2 = vmul.f32 %v7598_v35, %v7598_v35  ;;  %5478 = vmatpush3.bf16.msra.mxu0 %v5681_v39  ;;  %v5683_v36 = vld [vmem:[#allocation6 + $0x168] sm:$0xff]  }
 0xddd   :  { %5479 = vmatprep.subr.bf16.mxu0 %v5682_v60 }
 0xdde   :  { %2746 = vadd.xlane.f32.xlu0 %v2732_v2  ;;  %v2733_v28 = vmul.f32 %v7602_v18, %v7602_v18 }
 0xde0   :  { %2748 = vadd.xlane.f32.xlu1 %v2733_v28  ;;  %5480 = vmatpush3.bf16.msra.mxu0 %v5682_v60 }
 0xde1   :  { %5481 = vmatprep.subr.bf16.mxu0 %v5683_v36 }
 0xde4   :  { %5482 = vmatpush3.bf16.msra.mxu0 %v5683_v36 }
 0xde5   :  { %5483 = vmatprep.subr.bf16.mxu0 %v5684_v23 }
 0xde8   :  { %5484 = vmatpush3.bf16.msra.mxu0 %v5684_v23 }
 0xde9   :  { %5485 = vmatprep.subr.bf16.mxu0 %v5685_v56 }
 0xdec   :  { %5486 = vmatpush3.bf16.msra.mxu0 %v5685_v56  ;;  %v5067_v56 = vld [vmem:[%s8565_s5 + $0x9] ss:$0 sm:$0xff] }
 0xe56   :  { %v2735_v50 = vpop.xlane.xlu0 %2734 }
 0xe57   :  { %v2750_v25 = vmul.f32 0.0078125, %v2735_v50 }
 0xe59   :  { %v2758_v43 = vadd.f32 0.1, %v2750_v25  ;;  %v2737_v4 = vpop.xlane.xlu1 %2736 }
 0xe5a   :  { %v2751_v62 = vmul.f32 0.0078125, %v2737_v4  ;;  %v2739_v63 = vpop.xlane.xlu0 %2738 }
 0xe5b   :  { %6102 = vrsqrt.f32 %v2758_v43  ;;  %v2752_v34 = vmul.f32 0.0078125, %v2739_v63 }
 0xe5c   :  { %v2759_v6 = vadd.f32 0.1, %v2751_v62 }
 0xe5d   :  { %v2760_v1 = vadd.f32 0.1, %v2752_v34  ;;  %v2741_v24 = vpop.xlane.xlu1 %2740 }
 0xe5e   :  { %6104 = vrsqrt.f32 %v2759_v6  ;;  %v2753_v31 = vmul.f32 0.0078125, %v2741_v24 }
 0xe5f   :  { %6106 = vrsqrt.f32 %v2760_v1 }
 0xe60   :  { %v2761_v7 = vadd.f32 0.1, %v2753_v31 }
 0xe62   :  { %6108 = vrsqrt.f32 %v2761_v7 }
 0xe65   :  { %v6103_v53 = vpop.eup %6102 }
 0xe66   :  { %v2774_v49 = vmul.f32 %v6103_v53, %v7576_v46 }
 0xe67   :  { %v2743_v5 = vpop.xlane.xlu0 %2742 }
 0xe68   :  { %v6105_v54 = vpop.eup %6104  ;;  %v2754_v8 = vmul.f32 0.0078125, %v2743_v5  ;;  %v2786_v39 = vmul.f32 %v5066_v16, %v2774_v49 }
 0xe69   :  { %v6107_v2 = vpop.eup %6106  ;;  %v2745_v14 = vpop.xlane.xlu1 %2744  ;;  %v2775_v28 = vmul.f32 %v6105_v54, %v7580_v42 }
 0xe6a   :  { %v2776_v60 = vmul.f32 %v6107_v2, %v7582_v3  ;;  %v2762_v36 = vadd.f32 0.1, %v2754_v8  ;;  %v2755_v23 = vmul.f32 0.0078125, %v2745_v14  ;;  %v2798_v42 = vadd.f32 %v5067_v56, %v2786_v39 }
 0xe6b   :  { %v2747_v50 = vpop.xlane.xlu0 %2746  ;;  %v2787_v25 = vmul.f32 %v5066_v16, %v2775_v28 }
 0xe6c   :  { %v6109_v43 = vpop.eup %6108  ;;  %6110 = vrsqrt.f32 %v2762_v36  ;;  %v2763_v46 = vadd.f32 0.1, %v2755_v23  ;;  %v2756_v4 = vmul.f32 0.0078125, %v2747_v50  ;;  %v2788_v62 = vmul.f32 %v5066_v16, %v2776_v60 }
 0xe6d   :  { %v2777_v63 = vmul.f32 %v6109_v43, %v7588_v22  ;;  %v2749_v34 = vpop.xlane.xlu1 %2748  ;;  %v2799_v6 = vadd.f32 %v5067_v56, %v2787_v25 }
 0xe6e   :  { %6112 = vrsqrt.f32 %v2763_v46  ;;  %v2764_v3 = vadd.f32 0.1, %v2756_v4  ;;  %v2757_v1 = vmul.f32 0.0078125, %v2749_v34  ;;  %v2800_v53 = vadd.f32 %v5067_v56, %v2788_v62 }
 0xe6f   :  { %v2789_v24 = vmul.f32 %v5066_v16, %v2777_v63  ;;  %v2814_v31 = vpack.c.bf16 %v2799_v6, %v2798_v42 }
 0xe70   :  { %6114 = vrsqrt.f32 %v2764_v3  ;;  %v2765_v7 = vadd.f32 0.1, %v2757_v1 }
 0xe71   :  { %5487 = vmatprep.mubr.bf16.mxu0 %v2814_v31  ;;  %v2801_v49 = vadd.f32 %v5067_v56, %v2789_v24 }
 0xe72   :  { %6116 = vrsqrt.f32 %v2765_v7 }
 0xe73   :  { %v2815_v5 = vpack.c.bf16 %v2801_v49, %v2800_v53 }
 0xe75   :  { %5488 = vmatmul.mubr.bf16.vlgmr.msra.gmra.mrb[48].mxu0 %v2815_v5 }
 0xe76   :  { %v6111_v54 = vpop.eup %6110 }
 0xe77   :  { %v2778_v8 = vmul.f32 %v6111_v54, %v7592_v32 }
 0xe78   :  { %v6113_v22 = vpop.eup %6112 }
 0xe79   :  { %v2779_v2 = vmul.f32 %v6113_v22, %v7594_v45  ;;  %v2790_v14 = vmul.f32 %v5066_v16, %v2778_v8  ;;  %v5069_v45 = vld [vmem:[%s8563_s3 + $0xa] ss:$0 sm:$0xff] }
 0xe7a   :  { %v6115_v28 = vpop.eup %6114 }
 0xe7b   :  { %v2791_v39 = vmul.f32 %v5066_v16, %v2779_v2  ;;  %v2780_v60 = vmul.f32 %v6115_v28, %v7598_v35  ;;  %v2802_v23 = vadd.f32 %v5067_v56, %v2790_v14  ;;  %v7626_v35 = vadd.f32 %v2800_v53, %v7487_v0 }
 0xe7c   :  { %v6117_v36 = vpop.eup %6116  ;;  %v7639_v0 = vadd.f32 %v2799_v6, %v7481_v9 }
 0xe7d   :  { %v2803_v50 = vadd.f32 %v5067_v56, %v2791_v39  ;;  %v2781_v25 = vmul.f32 %v6117_v36, %v7602_v18  ;;  %v2792_v43 = vmul.f32 %v5066_v16, %v2780_v60  ;;  %v7629_v18 = vadd.f32 %v2798_v42, %v7479_v37 }
 0xe7e   :  { %v7651_v36 = vadd.f32 %v2802_v23, %v7495_v11 }
 0xe7f   :  { %v2816_v46 = vpack.c.bf16 %v2803_v50, %v2802_v23  ;;  %v2793_v4 = vmul.f32 %v5066_v16, %v2781_v25  ;;  %v2804_v62 = vadd.f32 %v5067_v56, %v2792_v43 }
 0xe81   :  { %5491 = vmatprep.mubr.bf16.mxu0 %v2816_v46  ;;  %v2805_v63 = vadd.f32 %v5067_v56, %v2793_v4  ;;  %v7635_v56 = vadd.f32 %v2801_v49, %v7489_v17  ;;  %v7648_v9 = vadd.f32 %v2804_v62, %v7503_v19  ;;  %v7654_v46 = vadd.f32 %v2803_v50, %v7497_v30 }
 0xe83   :  { %v2817_v32 = vpack.c.bf16 %v2805_v63, %v2804_v62 }
 0xe85   :  { %5492 = vmatmul.mubr.bf16.gmra.mrb[52].mxu0 %v2817_v32 }
 0xf48   :  { %v5489_v34 = vpop.f32.mrb[48].mxu0 }
 0xf49   :  { %v2931_v3 = vadd.f32 %v5489_v34, %v5069_v45  ;;  %v2922_v1 = vpop.f32.mrb[49].mxu0 }
 0xf4a   :  { %v2923_v24 = vadd.f32 %v5069_v45, %v2922_v1  ;;  %v5490_v16 = vpop.f32.mrb[50].mxu0 }
 0xf4b   :  { %v7632_v31 = vadd.f32 %v2931_v3, %v7626_v35  ;;  %v2934_v7 = vadd.f32 %v5490_v16, %v5069_v45  ;;  %v2925_v5 = vpop.f32.mrb[51].mxu0  ;;  %v7658_v3 = vadd.f32 %v2805_v63, %v7505_v40 }
 0xf4c   :  { %v2953_v54 = vadd.f32 %v2923_v24, %v7629_v18  ;;  %v2926_v53 = vadd.f32 %v5069_v45, %v2925_v5 }
 0xf4d   :  { %v5080_v8 = vmul.f32 -1.442695, %v7632_v31  ;;  %v7643_v37 = vadd.f32 %v2934_v7, %v7635_v56 }
 0xf4e   :  { %v5078_v42 = vmul.f32 -1.442695, %v2953_v54  ;;  %v2954_v22 = vadd.f32 %v2926_v53, %v7639_v0 }
 0xf4f   :  { %6118 = vpow2.f32 %v5080_v8  ;;  %v5081_v17 = vmul.f32 -1.442695, %v7643_v37 }
 0xf50   :  { %6120 = vpow2.f32 %v5078_v42  ;;  %v5079_v49 = vmul.f32 -1.442695, %v2954_v22 }
 0xf51   :  { %6122 = vpow2.f32 %v5081_v17 }
 0xf52   :  { %6124 = vpow2.f32 %v5079_v49 }
 0xf58   :  { %v5493_v2 = vpop.f32.mrb[52].mxu0 }
 0xf59   :  { %v6119_v14 = vpop.eup %6118  ;;  %v2947_v6 = vadd.f32 %v5493_v2, %v5069_v45  ;;  %v2938_v28 = vpop.f32.mrb[53].mxu0 }
 0xf5a   :  { %v6121_v39 = vpop.eup %6120  ;;  %v2987_v60 = vadd.f32 1.0, %v6119_v14  ;;  %v2939_v25 = vadd.f32 %v5069_v45, %v2938_v28  ;;  %v5494_v43 = vpop.f32.mrb[54].mxu0 }
 0xf5b   :  { %v6123_v4 = vpop.eup %6122  ;;  %v2985_v32 = vadd.f32 1.0, %v6121_v39  ;;  %v2959_v34 = vadd.f32 %v2947_v6, %v7648_v9  ;;  %v2950_v19 = vadd.f32 %v5494_v43, %v5069_v45  ;;  %v2941_v62 = vpop.f32.mrb[55].mxu0 }
 0xf5c   :  { %v6125_v1 = vpop.eup %6124  ;;  %6126 = vrcp.f32 %v2987_v60  ;;  %v2988_v24 = vadd.f32 1.0, %v6123_v4  ;;  %v2957_v11 = vadd.f32 %v2939_v25, %v7651_v36  ;;  %v2942_v23 = vadd.f32 %v5069_v45, %v2941_v62 }
 0xf5d   :  { %6128 = vrcp.f32 %v2985_v32  ;;  %v2986_v16 = vadd.f32 1.0, %v6125_v1  ;;  %v5084_v7 = vmul.f32 -1.442695, %v2959_v34  ;;  %v2960_v30 = vadd.f32 %v2950_v19, %v7658_v3 }
 0xf5e   :  { %6130 = vrcp.f32 %v2988_v24  ;;  %v5082_v50 = vmul.f32 -1.442695, %v2957_v11  ;;  %v2958_v5 = vadd.f32 %v2942_v23, %v7654_v46 }
 0xf5f   :  { %6132 = vrcp.f32 %v2986_v16  ;;  %v5085_v40 = vmul.f32 -1.442695, %v2960_v30  ;;  %v5686_v16 = vld [vmem:[#allocation6 + $0x180] sm:$0xff]  }
 0xf60   :  { %6134 = vpow2.f32 %v5084_v7  ;;  %v5083_v63 = vmul.f32 -1.442695, %v2958_v5  ;;  %5495 = vmatprep.subr.bf16.mxu1 %v5686_v16 }
 0xf61   :  { %6136 = vpow2.f32 %v5082_v50  ;;  %5496 = vmatpush3.bf16.msra.mxu1 %v5686_v16 }
 0xf62   :  { %6138 = vpow2.f32 %v5085_v40 }
 0xf63   :  { %6140 = vpow2.f32 %v5083_v63 }
 0xf66   :  { %v6127_v53 = vpop.eup %6126 }
 0xf67   :  { %v6129_v8 = vpop.eup %6128  ;;  %v3011_v60 = vmul.f32 %v6127_v53, %v7632_v31 }
 0xf68   :  { %v6131_v42 = vpop.eup %6130  ;;  %v3009_v45 = vmul.f32 %v6129_v8, %v2953_v54 }
 0xf69   :  { %v6133_v17 = vpop.eup %6132  ;;  %v3012_v32 = vmul.f32 %v6131_v42, %v7643_v37 }
 0xf6a   :  { %v6135_v49 = vpop.eup %6134  ;;  %3019 = vadd.xlane.f32.xlu0 %v3009_v45  ;;  %v3010_v2 = vmul.f32 %v6133_v17, %v2954_v22 }
 0xf6b   :  { %v6137_v14 = vpop.eup %6136  ;;  %v2991_v6 = vadd.f32 1.0, %v6135_v49 }
 0xf6c   :  { %v6139_v28 = vpop.eup %6138  ;;  %v2989_v39 = vadd.f32 1.0, %v6137_v14  ;;  %3021 = vadd.xlane.f32.xlu1 %v3010_v2 }
 0xf6d   :  { %v6141_v25 = vpop.eup %6140  ;;  %v2992_v43 = vadd.f32 1.0, %v6139_v28 }
 0xf6e   :  { %6142 = vrcp.f32 %v2989_v39  ;;  %v2990_v4 = vadd.f32 1.0, %v6141_v25  ;;  %3023 = vadd.xlane.f32.xlu0 %v3011_v60 }
 0xf6f   :  { %6144 = vrcp.f32 %v2991_v6 }
 0xf70   :  { %6146 = vrcp.f32 %v2990_v4  ;;  %3025 = vadd.xlane.f32.xlu1 %v3012_v32 }
 0xf71   :  { %6148 = vrcp.f32 %v2992_v43 }
 0xf78   :  { %v6143_v54 = vpop.eup %6142 }
 0xf79   :  { %v6145_v22 = vpop.eup %6144  ;;  %v3013_v19 = vmul.f32 %v6143_v54, %v2957_v11  ;;  %v5687_v54 = vld [vmem:[#allocation6 + $0x188] sm:$0xff]  }
 0xf7a   :  { %v6147_v62 = vpop.eup %6146  ;;  %v3015_v31 = vmul.f32 %v6145_v22, %v2959_v34  ;;  %5497 = vmatprep.subr.bf16.mxu1 %v5687_v54 }
 0xf7b   :  { %3027 = vadd.xlane.f32.xlu0 %v3013_v19  ;;  %v3014_v1 = vmul.f32 %v6147_v62, %v2958_v5  ;;  %v6149_v24 = vpop.eup %6148  ;;  %5498 = vmatpush3.bf16.msra.mxu1 %v5687_v54 }
 0xf7c   :  { %v3016_v23 = vmul.f32 %v6149_v24, %v2960_v30 }
 0xf7d   :  { %3029 = vadd.xlane.f32.xlu1 %v3014_v1 }
 0xf7f   :  { %3031 = vadd.xlane.f32.xlu0 %v3015_v31 }
 0xf81   :  { %3033 = vadd.xlane.f32.xlu1 %v3016_v23 }
 0xff7   :  { %v3020_v37 = vpop.xlane.xlu0 %3019 }
 0xff8   :  { %v3035_v7 = vmul.f32 0.0078125, %v3020_v37  ;;  %v5688_v37 = vld [vmem:[#allocation6 + $0x190] sm:$0xff]  }
 0xff9   :  { %v3022_v50 = vpop.xlane.xlu1 %3021  ;;  %5499 = vmatprep.subr.bf16.mxu1 %v5688_v37 }
 0xffa   :  { %v7665_v40 = vsub.f32 %v3009_v45, %v3035_v7  ;;  %v3036_v63 = vmul.f32 0.0078125, %v3022_v50  ;;  %5500 = vmatpush3.bf16.msra.mxu1 %v5688_v37  ;;  %v5690_v50 = vld [vmem:[#allocation6 + $0x1a0] sm:$0xff]  }
 0xffb   :  { %v3024_v53 = vpop.xlane.xlu0 %3023 }
 0xffc   :  { %v7667_v11 = vsub.f32 %v3010_v2, %v3036_v63  ;;  %v3037_v8 = vmul.f32 0.0078125, %v3024_v53  ;;  %v3051_v5 = vmul.f32 %v7665_v40, %v7665_v40  ;;  %v5692_v63 = vld [vmem:[#allocation6 + $0x1b0] sm:$0xff]   ;;  %v5693_v53 = vld [vmem:[#allocation6 + $0x1b8] sm:$0xff]  }
 0xffd   :  { %v3026_v34 = vpop.xlane.xlu1 %3025 }
 0xffe   :  { %v7671_v42 = vsub.f32 %v3011_v60, %v3037_v8  ;;  %v3038_v30 = vmul.f32 0.0078125, %v3026_v34  ;;  %3059 = vadd.xlane.f32.xlu0 %v3051_v5  ;;  %v3052_v17 = vmul.f32 %v7667_v11, %v7667_v11 }
0x1000   :  { %v7675_v49 = vsub.f32 %v3012_v32, %v3038_v30  ;;  %3061 = vadd.xlane.f32.xlu1 %v3052_v17  ;;  %v3053_v45 = vmul.f32 %v7671_v42, %v7671_v42 }
0x1002   :  { %3063 = vadd.xlane.f32.xlu0 %v3053_v45  ;;  %v3054_v2 = vmul.f32 %v7675_v49, %v7675_v49 }
0x1004   :  { %3065 = vadd.xlane.f32.xlu1 %v3054_v2 }
0x1008   :  { %v3028_v14 = vpop.xlane.xlu0 %3027 }
0x1009   :  { %v3039_v6 = vmul.f32 0.0078125, %v3028_v14 }
0x100a   :  { %v3030_v28 = vpop.xlane.xlu1 %3029 }
0x100b   :  { %v7681_v39 = vsub.f32 %v3013_v19, %v3039_v6  ;;  %v3040_v60 = vmul.f32 0.0078125, %v3030_v28 }
0x100c   :  { %v3032_v25 = vpop.xlane.xlu0 %3031 }
0x100d   :  { %v7683_v43 = vsub.f32 %v3014_v1, %v3040_v60  ;;  %v3041_v4 = vmul.f32 0.0078125, %v3032_v25  ;;  %v3055_v32 = vmul.f32 %v7681_v39, %v7681_v39 }
0x100e   :  { %v3034_v22 = vpop.xlane.xlu1 %3033 }
0x100f   :  { %v7687_v62 = vsub.f32 %v3015_v31, %v3041_v4  ;;  %v3042_v24 = vmul.f32 0.0078125, %v3034_v22  ;;  %3067 = vadd.xlane.f32.xlu0 %v3055_v32  ;;  %v3056_v16 = vmul.f32 %v7683_v43, %v7683_v43  ;;  %v5689_v31 = vld [vmem:[#allocation6 + $0x198] sm:$0xff]   ;;  %v5088_v32 = vld [vmem:[%s8564_s4 + $0xa] ss:$0 sm:$0xff] }
0x1010   :  { %5501 = vmatprep.subr.bf16.mxu1 %v5689_v31 }
0x1011   :  { %v7691_v19 = vsub.f32 %v3016_v23, %v3042_v24  ;;  %3069 = vadd.xlane.f32.xlu1 %v3056_v16  ;;  %v3057_v1 = vmul.f32 %v7687_v62, %v7687_v62  ;;  %5502 = vmatpush3.bf16.msra.mxu1 %v5689_v31  ;;  %v5691_v23 = vld [vmem:[#allocation6 + $0x1a8] sm:$0xff]  }
0x1012   :  { %5503 = vmatprep.subr.bf16.mxu1 %v5690_v50 }
0x1013   :  { %3071 = vadd.xlane.f32.xlu0 %v3057_v1  ;;  %v3058_v7 = vmul.f32 %v7691_v19, %v7691_v19 }
0x1015   :  { %3073 = vadd.xlane.f32.xlu1 %v3058_v7  ;;  %5504 = vmatpush3.bf16.msra.mxu1 %v5690_v50 }
0x1016   :  { %5505 = vmatprep.subr.bf16.mxu1 %v5691_v23 }
0x1019   :  { %5506 = vmatpush3.bf16.msra.mxu1 %v5691_v23 }
0x101a   :  { %5507 = vmatprep.subr.bf16.mxu1 %v5692_v63 }
0x101d   :  { %5508 = vmatpush3.bf16.msra.mxu1 %v5692_v63 }
0x101e   :  { %5509 = vmatprep.subr.bf16.mxu1 %v5693_v53 }
0x1021   :  { %5510 = vmatpush3.bf16.msra.mxu1 %v5693_v53  ;;  %v5089_v53 = vld [vmem:[%s8565_s5 + $0xa] ss:$0 sm:$0xff] }
0x108b   :  { %v3060_v8 = vpop.xlane.xlu0 %3059 }
0x108c   :  { %v3075_v5 = vmul.f32 0.0078125, %v3060_v8 }
0x108d   :  { %v3062_v34 = vpop.xlane.xlu1 %3061 }
0x108e   :  { %v3083_v30 = vadd.f32 0.1, %v3075_v5  ;;  %v3076_v17 = vmul.f32 0.0078125, %v3062_v34 }
0x108f   :  { %v3064_v45 = vpop.xlane.xlu0 %3063 }
0x1090   :  { %6150 = vrsqrt.f32 %v3083_v30  ;;  %v3084_v2 = vadd.f32 0.1, %v3076_v17  ;;  %v3077_v14 = vmul.f32 0.0078125, %v3064_v45 }
0x1091   :  { %v3066_v6 = vpop.xlane.xlu1 %3065 }
0x1092   :  { %6152 = vrsqrt.f32 %v3084_v2  ;;  %v3085_v28 = vadd.f32 0.1, %v3077_v14  ;;  %v3078_v60 = vmul.f32 0.0078125, %v3066_v6 }
0x1094   :  { %6154 = vrsqrt.f32 %v3085_v28  ;;  %v3086_v25 = vadd.f32 0.1, %v3078_v60 }
0x1096   :  { %6156 = vrsqrt.f32 %v3086_v25 }
0x109a   :  { %v6151_v4 = vpop.eup %6150 }
0x109b   :  { %v3099_v54 = vmul.f32 %v6151_v4, %v7665_v40 }
0x109c   :  { %v6153_v22 = vpop.eup %6152  ;;  %v3068_v24 = vpop.xlane.xlu0 %3067 }
0x109d   :  { %v3079_v16 = vmul.f32 0.0078125, %v3068_v24  ;;  %v3100_v1 = vmul.f32 %v6153_v22, %v7667_v11  ;;  %v3111_v31 = vmul.f32 %v5088_v32, %v3099_v54 }
0x109e   :  { %v6155_v37 = vpop.eup %6154  ;;  %v3070_v7 = vpop.xlane.xlu1 %3069 }
0x109f   :  { %v3101_v50 = vmul.f32 %v6155_v37, %v7671_v42  ;;  %v3087_v23 = vadd.f32 0.1, %v3079_v16  ;;  %v3080_v63 = vmul.f32 0.0078125, %v3070_v7  ;;  %v3112_v8 = vmul.f32 %v5088_v32, %v3100_v1 }
0x10a0   :  { %v6157_v5 = vpop.eup %6156  ;;  %v3072_v34 = vpop.xlane.xlu0 %3071  ;;  %v3123_v2 = vadd.f32 %v5089_v53, %v3111_v31 }
0x10a1   :  { %v3113_v40 = vmul.f32 %v5088_v32, %v3101_v50  ;;  %v3102_v30 = vmul.f32 %v6157_v5, %v7675_v49  ;;  %6158 = vrsqrt.f32 %v3087_v23  ;;  %v3088_v17 = vadd.f32 0.1, %v3080_v63 }
0x10a2   :  { %v3081_v11 = vmul.f32 0.0078125, %v3072_v34  ;;  %v3074_v45 = vpop.xlane.xlu1 %3073  ;;  %v3124_v14 = vadd.f32 %v5089_v53, %v3112_v8 }
0x10a3   :  { %v3114_v6 = vmul.f32 %v5088_v32, %v3102_v30  ;;  %6160 = vrsqrt.f32 %v3088_v17  ;;  %v3082_v42 = vmul.f32 0.0078125, %v3074_v45  ;;  %v3125_v4 = vadd.f32 %v5089_v53, %v3113_v40 }
0x10a4   :  { %v3089_v28 = vadd.f32 0.1, %v3081_v11  ;;  %v3139_v60 = vpack.c.bf16 %v3124_v14, %v3123_v2 }
0x10a5   :  { %v3090_v25 = vadd.f32 0.1, %v3082_v42  ;;  %v3126_v54 = vadd.f32 %v5089_v53, %v3114_v6  ;;  %v7719_v42 = vadd.f32 %v3123_v2, %v7629_v18 }
0x10a6   :  { %6162 = vrsqrt.f32 %v3089_v28  ;;  %5511 = vmatprep.mubr.bf16.mxu1 %v3139_v60 }
0x10a7   :  { %6164 = vrsqrt.f32 %v3090_v25  ;;  %v3140_v22 = vpack.c.bf16 %v3126_v54, %v3125_v4  ;;  %v7725_v60 = vadd.f32 %v3126_v54, %v7635_v56 }
0x10a9   :  { %5512 = vmatmul.mubr.bf16.vlgmr.msra.gmra.mrb[40].mxu1 %v3140_v22 }
0x10ab   :  { %v6159_v49 = vpop.eup %6158 }
0x10ac   :  { %v3103_v24 = vmul.f32 %v6159_v49, %v7681_v39 }
0x10ad   :  { %v6161_v16 = vpop.eup %6160 }
0x10ae   :  { %v3104_v1 = vmul.f32 %v6161_v16, %v7683_v43  ;;  %v3115_v37 = vmul.f32 %v5088_v32, %v3103_v24  ;;  %v5091_v43 = vld [vmem:[%s8563_s3 + $0xb] ss:$0 sm:$0xff] }
0x10b0   :  { %v6163_v7 = vpop.eup %6162  ;;  %v3116_v31 = vmul.f32 %v5088_v32, %v3104_v1  ;;  %v3127_v63 = vadd.f32 %v5089_v53, %v3115_v37 }
0x10b1   :  { %v6165_v50 = vpop.eup %6164  ;;  %v3105_v23 = vmul.f32 %v6163_v7, %v7687_v62  ;;  %v7716_v62 = vadd.f32 %v3125_v4, %v7626_v35  ;;  %v7729_v35 = vadd.f32 %v3124_v14, %v7639_v0 }
0x10b2   :  { %v3128_v8 = vadd.f32 %v5089_v53, %v3116_v31  ;;  %v3106_v5 = vmul.f32 %v6165_v50, %v7691_v19  ;;  %v7741_v50 = vadd.f32 %v3127_v63, %v7651_v36 }
0x10b3   :  { %v3117_v34 = vmul.f32 %v5088_v32, %v3105_v23 }
0x10b4   :  { %v3141_v40 = vpack.c.bf16 %v3128_v8, %v3127_v63  ;;  %v3118_v30 = vmul.f32 %v5088_v32, %v3106_v5 }
0x10b5   :  { %v3129_v17 = vadd.f32 %v5089_v53, %v3117_v34 }
0x10b6   :  { %5515 = vmatprep.mubr.bf16.mxu1 %v3141_v40  ;;  %v3130_v11 = vadd.f32 %v5089_v53, %v3118_v30 }
0x10b7   :  { %v7738_v7 = vadd.f32 %v3129_v17, %v7648_v9 }
0x10b8   :  { %v3142_v39 = vpack.c.bf16 %v3130_v11, %v3129_v17  ;;  %v7744_v30 = vadd.f32 %v3130_v11, %v7658_v3 }
0x10ba   :  { %5516 = vmatmul.mubr.bf16.gmra.mrb[44].mxu1 %v3142_v39 }
0x10bb   :  { %3927 = vmatprep.mubr.bf16.mxu1 %v8572_v44 }
0x117c   :  { %v5513_v45 = vpop.f32.mrb[40].mxu1 }
0x117d   :  { %v3256_v6 = vadd.f32 %v5513_v45, %v5091_v43  ;;  %v3247_v19 = vpop.f32.mrb[41].mxu1  ;;  %v7747_v45 = vadd.f32 %v3128_v8, %v7654_v46 }
0x117e   :  { %v3248_v32 = vadd.f32 %v5091_v43, %v3247_v19  ;;  %v5514_v28 = vpop.f32.mrb[42].mxu1 }
0x117f   :  { %v7722_v53 = vadd.f32 %v3256_v6, %v7716_v62  ;;  %v3259_v25 = vadd.f32 %v5514_v28, %v5091_v43  ;;  %v3250_v22 = vpop.f32.mrb[43].mxu1 }
0x1180   :  { %v3278_v49 = vadd.f32 %v3248_v32, %v7719_v42  ;;  %v3251_v4 = vadd.f32 %v5091_v43, %v3250_v22 }
0x1181   :  { %v5102_v24 = vmul.f32 -1.442695, %v7722_v53  ;;  %v7733_v18 = vadd.f32 %v3259_v25, %v7725_v60 }
0x1182   :  { %v5100_v2 = vmul.f32 -1.442695, %v3278_v49  ;;  %v3279_v16 = vadd.f32 %v3251_v4, %v7729_v35 }
0x1183   :  { %6166 = vpow2.f32 %v5102_v24  ;;  %v5103_v56 = vmul.f32 -1.442695, %v7733_v18 }
0x1184   :  { %6168 = vpow2.f32 %v5100_v2  ;;  %v5101_v54 = vmul.f32 -1.442695, %v3279_v16 }
0x1185   :  { %6170 = vpow2.f32 %v5103_v56 }
0x1186   :  { %6172 = vpow2.f32 %v5101_v54 }
0x118d   :  { %v6167_v1 = vpop.eup %6166  ;;  %v5517_v37 = vpop.f32.mrb[44].mxu1 }
0x118e   :  { %v6169_v0 = vpop.eup %6168  ;;  %v3312_v14 = vadd.f32 1.0, %v6167_v1  ;;  %v3272_v31 = vadd.f32 %v5517_v37, %v5091_v43  ;;  %v3263_v23 = vpop.f32.mrb[45].mxu1 }
0x118f   :  { %v6171_v5 = vpop.eup %6170  ;;  %v3310_v34 = vadd.f32 1.0, %v6169_v0  ;;  %v3264_v40 = vadd.f32 %v5091_v43, %v3263_v23  ;;  %v5518_v39 = vpop.f32.mrb[46].mxu1 }
0x1190   :  { %v6173_v6 = vpop.eup %6172  ;;  %6174 = vrcp.f32 %v3312_v14  ;;  %v3313_v19 = vadd.f32 1.0, %v6171_v5  ;;  %v3284_v9 = vadd.f32 %v3272_v31, %v7738_v7  ;;  %v3275_v17 = vadd.f32 %v5518_v39, %v5091_v43  ;;  %v3266_v32 = vpop.f32.mrb[47].mxu1 }
0x1191   :  { %6176 = vrcp.f32 %v3310_v34  ;;  %v3311_v36 = vadd.f32 1.0, %v6173_v6  ;;  %v3282_v63 = vadd.f32 %v3264_v40, %v7741_v50  ;;  %v3267_v28 = vadd.f32 %v5091_v43, %v3266_v32 }
0x1192   :  { %6178 = vrcp.f32 %v3313_v19  ;;  %v5106_v25 = vmul.f32 -1.442695, %v3284_v9  ;;  %v3285_v3 = vadd.f32 %v3275_v17, %v7744_v30 }
0x1193   :  { %6180 = vrcp.f32 %v3311_v36  ;;  %v5104_v11 = vmul.f32 -1.442695, %v3282_v63  ;;  %v3283_v46 = vadd.f32 %v3267_v28, %v7747_v45  ;;  %v5694_v28 = vld [vmem:[#allocation6 + $0x1c0] sm:$0xff]  }
0x1194   :  { %6182 = vpow2.f32 %v5106_v25  ;;  %v5107_v8 = vmul.f32 -1.442695, %v3285_v3  ;;  %5519 = vmatprep.subr.bf16.mxu0 %v5694_v28 }
0x1195   :  { %6184 = vpow2.f32 %v5104_v11  ;;  %v5105_v22 = vmul.f32 -1.442695, %v3283_v46  ;;  %5520 = vmatpush3.bf16.msra.mxu0 %v5694_v28 }
0x1196   :  { %6186 = vpow2.f32 %v5107_v8 }
0x1197   :  { %6188 = vpow2.f32 %v5105_v22 }
0x119a   :  { %v6175_v4 = vpop.eup %6174 }
0x119b   :  { %v6177_v24 = vpop.eup %6176  ;;  %v3336_v23 = vmul.f32 %v6175_v4, %v7722_v53 }
0x119c   :  { %v6179_v2 = vpop.eup %6178  ;;  %v3334_v56 = vmul.f32 %v6177_v24, %v3278_v49 }
0x119d   :  { %v6181_v54 = vpop.eup %6180  ;;  %v3337_v39 = vmul.f32 %v6179_v2, %v7733_v18 }
0x119e   :  { %v6183_v43 = vpop.eup %6182  ;;  %3344 = vadd.xlane.f32.xlu0 %v3334_v56  ;;  %v3335_v1 = vmul.f32 %v6181_v54, %v3279_v16 }
0x119f   :  { %v6185_v37 = vpop.eup %6184  ;;  %v3316_v0 = vadd.f32 1.0, %v6183_v43 }
0x11a0   :  { %v6187_v14 = vpop.eup %6186  ;;  %v3314_v31 = vadd.f32 1.0, %v6185_v37  ;;  %3346 = vadd.xlane.f32.xlu1 %v3335_v1 }
0x11a1   :  { %v6189_v5 = vpop.eup %6188  ;;  %v3317_v34 = vadd.f32 1.0, %v6187_v14 }
0x11a2   :  { %6190 = vrcp.f32 %v3314_v31  ;;  %v3315_v40 = vadd.f32 1.0, %v6189_v5  ;;  %3348 = vadd.xlane.f32.xlu0 %v3336_v23 }
0x11a3   :  { %6192 = vrcp.f32 %v3316_v0 }
0x11a4   :  { %6194 = vrcp.f32 %v3315_v40  ;;  %3350 = vadd.xlane.f32.xlu1 %v3337_v39 }
0x11a5   :  { %6196 = vrcp.f32 %v3317_v34  ;;  %v5695_v34 = vld [vmem:[#allocation6 + $0x1c8] sm:$0xff]  }
0x11a6   :  { %5521 = vmatprep.subr.bf16.mxu0 %v5695_v34 }
0x11a7   :  { %5522 = vmatpush3.bf16.msra.mxu0 %v5695_v34 }
0x11ac   :  { %v6191_v49 = vpop.eup %6190 }
0x11ad   :  { %v6193_v16 = vpop.eup %6192  ;;  %v3338_v6 = vmul.f32 %v6191_v49, %v3282_v63 }
0x11ae   :  { %v6195_v19 = vpop.eup %6194  ;;  %v3340_v53 = vmul.f32 %v6193_v16, %v3284_v9 }
0x11af   :  { %3352 = vadd.xlane.f32.xlu0 %v3338_v6  ;;  %v3339_v17 = vmul.f32 %v6195_v19, %v3283_v46  ;;  %v6197_v32 = vpop.eup %6196 }
0x11b0   :  { %v3341_v36 = vmul.f32 %v6197_v32, %v3285_v3 }
0x11b1   :  { %3354 = vadd.xlane.f32.xlu1 %v3339_v17 }
0x11b3   :  { %3356 = vadd.xlane.f32.xlu0 %v3340_v53 }
0x11b5   :  { %3358 = vadd.xlane.f32.xlu1 %v3341_v36 }
0x122b   :  { %v3345_v18 = vpop.xlane.xlu0 %3344 }
0x122c   :  { %v3360_v25 = vmul.f32 0.0078125, %v3345_v18 }
0x122d   :  { %v3347_v11 = vpop.xlane.xlu1 %3346 }
0x122e   :  { %v7755_v8 = vsub.f32 %v3334_v56, %v3360_v25  ;;  %v3361_v22 = vmul.f32 0.0078125, %v3347_v11  ;;  %v5698_v11 = vld [vmem:[#allocation6 + $0x1e0] sm:$0xff]  }
0x122f   :  { %v3349_v4 = vpop.xlane.xlu0 %3348 }
0x1230   :  { %v7757_v63 = vsub.f32 %v3335_v1, %v3361_v22  ;;  %v3362_v24 = vmul.f32 0.0078125, %v3349_v4  ;;  %v3376_v46 = vmul.f32 %v7755_v8, %v7755_v8  ;;  %v5699_v22 = vld [vmem:[#allocation6 + $0x1e8] sm:$0xff]   ;;  %v5701_v4 = vld [vmem:[#allocation6 + $0x1f8] sm:$0xff]  }
0x1231   :  { %v3351_v9 = vpop.xlane.xlu1 %3350 }
0x1232   :  { %v7761_v2 = vsub.f32 %v3336_v23, %v3362_v24  ;;  %v3363_v3 = vmul.f32 0.0078125, %v3351_v9  ;;  %3384 = vadd.xlane.f32.xlu0 %v3376_v46  ;;  %v3377_v54 = vmul.f32 %v7757_v63, %v7757_v63  ;;  %v7787_v24 = vld [vmem:[#allocation9 + $0x4] ss:$8 sps:$4 sm:$0xff]  }
0x1234   :  { %v7765_v43 = vsub.f32 %v3337_v39, %v3363_v3  ;;  %3386 = vadd.xlane.f32.xlu1 %v3377_v54  ;;  %v3378_v56 = vmul.f32 %v7761_v2, %v7761_v2 }
0x1236   :  { %3388 = vadd.xlane.f32.xlu0 %v3378_v56  ;;  %v3379_v1 = vmul.f32 %v7765_v43, %v7765_v43 }
0x1238   :  { %3390 = vadd.xlane.f32.xlu1 %v3379_v1 }
0x123c   :  { %v3353_v37 = vpop.xlane.xlu0 %3352 }
0x123d   :  { %v3364_v0 = vmul.f32 0.0078125, %v3353_v37 }
0x123e   :  { %v3355_v14 = vpop.xlane.xlu1 %3354 }
0x123f   :  { %v7771_v31 = vsub.f32 %v3338_v6, %v3364_v0  ;;  %v3365_v23 = vmul.f32 0.0078125, %v3355_v14  ;;  %v5696_v6 = vld [vmem:[#allocation6 + $0x1d0] sm:$0xff]  }
0x1240   :  { %v3357_v5 = vpop.xlane.xlu0 %3356  ;;  %5523 = vmatprep.subr.bf16.mxu0 %v5696_v6 }
0x1241   :  { %v7773_v40 = vsub.f32 %v3339_v17, %v3365_v23  ;;  %v3366_v39 = vmul.f32 0.0078125, %v3357_v5  ;;  %v3380_v49 = vmul.f32 %v7771_v31, %v7771_v31  ;;  %5524 = vmatpush3.bf16.msra.mxu0 %v5696_v6 }
0x1242   :  { %v3359_v16 = vpop.xlane.xlu1 %3358 }
0x1243   :  { %v7777_v19 = vsub.f32 %v3340_v53, %v3366_v39  ;;  %v3367_v32 = vmul.f32 0.0078125, %v3359_v16  ;;  %3392 = vadd.xlane.f32.xlu0 %v3380_v49  ;;  %v3381_v28 = vmul.f32 %v7773_v40, %v7773_v40  ;;  %v5697_v53 = vld [vmem:[#allocation6 + $0x1d8] sm:$0xff]   ;;  %v7793_v49 = vld [vmem:[%s8564_s4 + $0xb] ss:$0 sm:$0xff] }
0x1244   :  { %5525 = vmatprep.subr.bf16.mxu0 %v5697_v53 }
0x1245   :  { %v7781_v18 = vsub.f32 %v3341_v36, %v3367_v32  ;;  %3394 = vadd.xlane.f32.xlu1 %v3381_v28  ;;  %v3382_v17 = vmul.f32 %v7777_v19, %v7777_v19  ;;  %5526 = vmatpush3.bf16.msra.mxu0 %v5697_v53  ;;  %v5700_v36 = vld [vmem:[#allocation6 + $0x1f0] sm:$0xff]  }
0x1246   :  { %5527 = vmatprep.subr.bf16.mxu0 %v5698_v11 }
0x1247   :  { %3396 = vadd.xlane.f32.xlu0 %v3382_v17  ;;  %v3383_v25 = vmul.f32 %v7781_v18, %v7781_v18 }
0x1249   :  { %3398 = vadd.xlane.f32.xlu1 %v3383_v25  ;;  %5528 = vmatpush3.bf16.msra.mxu0 %v5698_v11 }
0x124a   :  { %5529 = vmatprep.subr.bf16.mxu0 %v5699_v22 }
0x124d   :  { %5530 = vmatpush3.bf16.msra.mxu0 %v5699_v22 }
0x124e   :  { %5531 = vmatprep.subr.bf16.mxu0 %v5700_v36 }
0x1251   :  { %5532 = vmatpush3.bf16.msra.mxu0 %v5700_v36 }
0x1252   :  { %5533 = vmatprep.subr.bf16.mxu0 %v5701_v4 }
0x1255   :  { %5534 = vmatpush3.bf16.msra.mxu0 %v5701_v4 }
0x1256   :  { %4096 = vmatprep.subr.bf16.mxu0 %v7787_v24 }
0x12bf   :  { %v3385_v46 = vpop.xlane.xlu0 %3384 }
0x12c0   :  { %v3400_v9 = vmul.f32 0.0078125, %v3385_v46  ;;  %v5111_v46 = vld [vmem:[%s8565_s5 + $0xb] ss:$0 sm:$0xff] }
0x12c1   :  { %v3387_v3 = vpop.xlane.xlu1 %3386 }
0x12c2   :  { %v3408_v54 = vadd.f32 0.1, %v3400_v9  ;;  %v3401_v56 = vmul.f32 0.0078125, %v3387_v3 }
0x12c3   :  { %v3389_v1 = vpop.xlane.xlu0 %3388 }
0x12c4   :  { %6198 = vrsqrt.f32 %v3408_v54  ;;  %v3409_v37 = vadd.f32 0.1, %v3401_v56  ;;  %v3402_v0 = vmul.f32 0.0078125, %v3389_v1 }
0x12c5   :  { %v3391_v14 = vpop.xlane.xlu1 %3390 }
0x12c6   :  { %6200 = vrsqrt.f32 %v3409_v37  ;;  %v3410_v23 = vadd.f32 0.1, %v3402_v0  ;;  %v3403_v5 = vmul.f32 0.0078125, %v3391_v14 }
0x12c8   :  { %6202 = vrsqrt.f32 %v3410_v23  ;;  %v3411_v34 = vadd.f32 0.1, %v3403_v5 }
0x12ca   :  { %6204 = vrsqrt.f32 %v3411_v34 }
0x12ce   :  { %v6199_v39 = vpop.eup %6198 }
0x12cf   :  { %v3424_v16 = vmul.f32 %v6199_v39, %v7755_v8 }
0x12d0   :  { %v6201_v32 = vpop.eup %6200  ;;  %v3393_v28 = vpop.xlane.xlu0 %3392 }
0x12d1   :  { %v3404_v6 = vmul.f32 0.0078125, %v3393_v28  ;;  %v3425_v17 = vmul.f32 %v6201_v32, %v7757_v63  ;;  %v3436_v11 = vmul.f32 %v7793_v49, %v3424_v16  ;;  %v7816_v32 = vld [vmem:[#allocation9] ss:$8 sps:$4 sm:$0xff]  }
0x12d2   :  { %v6203_v25 = vpop.eup %6202  ;;  %v3395_v53 = vpop.xlane.xlu1 %3394 }
0x12d3   :  { %v3426_v22 = vmul.f32 %v6203_v25, %v7761_v2  ;;  %v3412_v36 = vadd.f32 0.1, %v3404_v6  ;;  %v3405_v4 = vmul.f32 0.0078125, %v3395_v53  ;;  %v3437_v9 = vmul.f32 %v7793_v49, %v3425_v17  ;;  %v7820_v6 = vld [vmem:[#allocation9 + $0x14] ss:$8 sps:$4 sm:$0xff]  }
0x12d4   :  { %v6205_v8 = vpop.eup %6204  ;;  %v3397_v3 = vpop.xlane.xlu0 %3396  ;;  %v7805_v0 = vadd.f32 %v5111_v46, %v3436_v11  ;;  %v7823_v17 = vld [vmem:[#allocation9 + $0x10] ss:$8 sps:$4 sm:$0xff]   ;;  %v7826_v53 = vld [vmem:[#allocation9 + $0x24] ss:$8 sps:$4 sm:$0xff]  }
0x12d5   :  { %v3438_v54 = vmul.f32 %v7793_v49, %v3426_v22  ;;  %v3427_v63 = vmul.f32 %v6205_v8, %v7765_v43  ;;  %6206 = vrsqrt.f32 %v3412_v36  ;;  %v3413_v56 = vadd.f32 0.1, %v3405_v4  ;;  %v7830_v36 = vld [vmem:[#allocation9 + $0x20] ss:$8 sps:$4 sm:$0xff]   ;;  %v7835_v8 = vld [vmem:[#allocation9 + $0x34] ss:$8 sps:$4 sm:$0xff]  }
0x12d6   :  { %v3406_v1 = vmul.f32 0.0078125, %v3397_v3  ;;  %v3399_v37 = vpop.xlane.xlu1 %3398  ;;  %v7807_v2 = vadd.f32 %v5111_v46, %v3437_v9 }
0x12d7   :  { %v3439_v14 = vmul.f32 %v7793_v49, %v3427_v63  ;;  %6208 = vrsqrt.f32 %v3413_v56  ;;  %v3407_v23 = vmul.f32 0.0078125, %v3399_v37  ;;  %v7812_v16 = vadd.f32 %v5111_v46, %v3438_v54 }
0x12d8   :  { %v3414_v5 = vadd.f32 0.1, %v3406_v1  ;;  %v3464_v34 = vpack.c.bf16 %v7807_v2, %v7805_v0  ;;  %v3457_v27 = vadd.f32 %v7807_v2, %v7729_v35 }
0x12d9   :  { %v3415_v39 = vadd.f32 0.1, %v3407_v23  ;;  %v7814_v43 = vadd.f32 %v5111_v46, %v3439_v14  ;;  %v7848_v14 = vld [vmem:[#allocation9 + $0x44] ss:$8 sps:$4 sm:$0xff]  }
0x12da   :  { %6210 = vrsqrt.f32 %v3414_v5  ;;  %5535 = vmatprep.mubr.bf16.mxu0 %v3464_v34 }
0x12db   :  { %6212 = vrsqrt.f32 %v3415_v39  ;;  %v3465_v28 = vpack.c.bf16 %v7814_v43, %v7812_v16 }
0x12dd   :  { %5536 = vmatmul.mubr.bf16.vlgmr.msra.gmra.mrb[56].mxu0 %v3465_v28  ;;  %v7857_v28 = vld [vmem:[#allocation9 + $0x40] ss:$8 sps:$4 sm:$0xff]  }
0x12de   :  { %4097 = vmatpush1.bf16.msra.mxu0 %v7816_v32 }
0x12df   :  { %v6207_v25 = vpop.eup %6206  ;;  %4098 = vmatprep.subr.bf16.mxu0 %v7820_v6 }
0x12e0   :  { %v3428_v11 = vmul.f32 %v6207_v25, %v7771_v31  ;;  %v7840_v31 = vld [vmem:[#allocation9 + $0x30] ss:$8 sps:$4 sm:$0xff]   ;;  %v7861_v25 = vld [vmem:[#allocation9 + $0x54] ss:$8 sps:$4 sm:$0xff]  }
0x12e1   :  { %v6209_v22 = vpop.eup %6208 }
0x12e2   :  { %4099 = vmatpush1.bf16.msra.mxu0 %v7823_v17  ;;  %v3429_v4 = vmul.f32 %v6209_v22, %v7773_v40  ;;  %v3440_v9 = vmul.f32 %v7793_v49, %v3428_v11  ;;  %v7864_v11 = vld [vmem:[#allocation9 + $0x50] ss:$8 sps:$4 sm:$0xff]   ;;  %v7874_v22 = vld [vmem:[#allocation9 + $0x74] ss:$8 sps:$4 sm:$0xff]  }
0x12e3   :  { %4100 = vmatprep.subr.bf16.mxu0 %v7826_v53 }
0x12e4   :  { %v6211_v3 = vpop.eup %6210  ;;  %v3441_v54 = vmul.f32 %v7793_v49, %v3429_v4  ;;  %v7842_v1 = vadd.f32 %v5111_v46, %v3440_v9  ;;  %v7877_v4 = vld [vmem:[#allocation9 + $0x70] ss:$8 sps:$4 sm:$0xff]   ;;  %v7881_v9 = vadd.f32 %v7514_v52, %v7539_v12  ;;  %v7898_v52 = vadd.f32 %v7526_v58, %v7539_v12 }
0x12e5   :  { %v6213_v63 = vpop.eup %6212  ;;  %v3430_v56 = vmul.f32 %v6211_v3, %v7777_v19  ;;  %v7886_v3 = vadd.f32 %v7510_v38, %v7539_v12 }
0x12e6   :  { %4101 = vmatpush1.bf16.msra.mxu0 %v7830_v36  ;;  %v7844_v37 = vadd.f32 %v5111_v46, %v3441_v54  ;;  %v3431_v40 = vmul.f32 %v6213_v63, %v7781_v18  ;;  %v7894_v63 = vadd.f32 %v7531_v33, %v7539_v12  ;;  %v3456_v33 = vadd.f32 %v7805_v0, %v7719_v42 }
0x12e7   :  { %4102 = vmatprep.subr.bf16.mxu0 %v7835_v8  ;;  %v3442_v23 = vmul.f32 %v7793_v49, %v3430_v56  ;;  %v3984_v54 = vpack.c.bf16 %v7881_v9, %v7886_v3  ;;  %v5113_v56 = vld [vmem:[%s8563_s3 + $0xc] ss:$0 sm:$0xff]  ;;  %v3460_v2 = vadd.f32 %v7842_v1, %v7741_v50 }
0x12e8   :  { %v3466_v5 = vpack.c.bf16 %v7844_v37, %v7842_v1  ;;  %v3443_v19 = vmul.f32 %v7793_v49, %v3431_v40  ;;  %v7868_v49 = vld [vmem:[#allocation9 + $0x64] ss:$8 sps:$4 sm:$0xff]   ;;  %v3985_v38 = vpack.c.bf16 %v7894_v63, %v7898_v52 }
0x12e9   :  { %v3454_v34 = vadd.f32 %v5111_v46, %v3442_v23  ;;  %v3458_v23 = vadd.f32 %v7812_v16, %v7716_v62 }
0x12ea   :  { %5539 = vmatprep.mubr.bf16.mxu0 %v3466_v5  ;;  %4103 = vmatpush1.bf16.msra.mxu0 %v7840_v31  ;;  %v7855_v39 = vadd.f32 %v5111_v46, %v3443_v19  ;;  %v7871_v46 = vld [vmem:[#allocation9 + $0x60] ss:$8 sps:$4 sm:$0xff]  }
0x12eb   :  { %4104 = vmatprep.subr.bf16.mxu0 %v7848_v14  ;;  %v3462_v35 = vadd.f32 %v3454_v34, %v7738_v7 }
0x12ec   :  { %v3467_v18 = vpack.c.bf16 %v7855_v39, %v3454_v34 }
0x12ee   :  { %5540 = vmatmul.mubr.bf16.gmra.mrb[60].mxu0 %v3467_v18 }
0x12ef   :  { %4105 = vmatpush1.bf16.msra.mxu0 %v7857_v28  ;;  %4128 = vmatprep.mubr.bf16.mxu0 %v8572_v44 }
0x12f0   :  { %4106 = vmatprep.subr.bf16.mxu0 %v7861_v25 }
0x12f3   :  { %4107 = vmatpush1.bf16.msra.mxu0 %v7864_v11 }
0x12f4   :  { %4108 = vmatprep.subr.bf16.mxu0 %v7868_v49 }
0x12f7   :  { %4109 = vmatpush1.bf16.msra.mxu0 %v7871_v46 }
0x12f8   :  { %4110 = vmatprep.subr.bf16.mxu0 %v7874_v22 }
0x12fb   :  { %4111 = vmatpush1.bf16.msra.mxu0 %v7877_v4 }
0x12fe   :  { %4129 = vmatmul.mubr.bf16.vlgmr.msra.gmra.mrb[64].mxu0 %v3984_v54  ;;  %v3459_v54 = vadd.f32 %v7814_v43, %v7725_v60 }
0x12ff   :  { %4138 = vmatprep.mubr.bf16.mxu0 %v8572_v44 }
0x1306   :  { %4139 = vmatmul.mubr.bf16.gmra.mrb[68].mxu0 %v3985_v38 }
0x13b0   :  { %v5537_v40 = vpop.f32.mrb[56].mxu0 }
0x13b1   :  { %v3581_v5 = vadd.f32 %v5537_v40, %v5113_v56  ;;  %v3572_v19 = vpop.f32.mrb[57].mxu0 }
0x13b2   :  { %v3573_v18 = vadd.f32 %v5113_v56, %v3572_v19  ;;  %v5538_v58 = vpop.f32.mrb[58].mxu0 }
0x13b3   :  { %v7909_v12 = vadd.f32 %v3581_v5, %v3458_v23  ;;  %v3584_v38 = vadd.f32 %v5538_v58, %v5113_v56  ;;  %v3575_v41 = vpop.f32.mrb[59].mxu0  ;;  %v3463_v58 = vadd.f32 %v7855_v39, %v7744_v30 }
0x13b4   :  { %v3603_v44 = vadd.f32 %v3573_v18, %v3456_v33  ;;  %v3576_v61 = vadd.f32 %v5113_v56, %v3575_v41 }
0x13b5   :  { %v5124_v62 = vmul.f32 -1.442695, %v7909_v12  ;;  %v7916_v16 = vadd.f32 %v3584_v38, %v3459_v54  ;;  %v3461_v38 = vadd.f32 %v7844_v37, %v7747_v45 }
0x13b6   :  { %v5122_v40 = vmul.f32 -1.442695, %v3603_v44  ;;  %v3604_v42 = vadd.f32 %v3576_v61, %v3457_v27 }
0x13b7   :  { %6214 = vpow2.f32 %v5124_v62  ;;  %v5125_v0 = vmul.f32 -1.442695, %v7916_v16 }
0x13b8   :  { %6216 = vpow2.f32 %v5122_v40  ;;  %v5123_v23 = vmul.f32 -1.442695, %v3604_v42 }
0x13b9   :  { %6218 = vpow2.f32 %v5125_v0 }
0x13ba   :  { %6220 = vpow2.f32 %v5123_v23 }
0x13c1   :  { %v6215_v60 = vpop.eup %6214  ;;  %v5541_v43 = vpop.f32.mrb[60].mxu0 }
0x13c2   :  { %v6217_v5 = vpop.eup %6216  ;;  %v3637_v19 = vadd.f32 1.0, %v6215_v60  ;;  %v3597_v41 = vadd.f32 %v5541_v43, %v5113_v56  ;;  %v3588_v33 = vpop.f32.mrb[61].mxu0 }
0x13c3   :  { %v6219_v18 = vpop.eup %6218  ;;  %v3635_v61 = vadd.f32 1.0, %v6217_v5  ;;  %v3589_v27 = vadd.f32 %v5113_v56, %v3588_v33  ;;  %v5542_v54 = vpop.f32.mrb[62].mxu0 }
0x13c4   :  { %v6221_v62 = vpop.eup %6220  ;;  %6222 = vrcp.f32 %v3637_v19  ;;  %v3638_v40 = vadd.f32 1.0, %v6219_v18  ;;  %v3609_v0 = vadd.f32 %v3597_v41, %v3462_v35  ;;  %v3600_v7 = vadd.f32 %v5542_v54, %v5113_v56  ;;  %v3591_v34 = vpop.f32.mrb[63].mxu0 }
0x13c5   :  { %6224 = vrcp.f32 %v3635_v61  ;;  %v3636_v23 = vadd.f32 1.0, %v6221_v62  ;;  %v3607_v50 = vadd.f32 %v3589_v27, %v3460_v2  ;;  %v3592_v1 = vadd.f32 %v5113_v56, %v3591_v34 }
0x13c6   :  { %6226 = vrcp.f32 %v3638_v40  ;;  %v5128_v60 = vmul.f32 -1.442695, %v3609_v0  ;;  %v3610_v43 = vadd.f32 %v3600_v7, %v3463_v58 }
0x13c7   :  { %6228 = vrcp.f32 %v3636_v23  ;;  %v5126_v5 = vmul.f32 -1.442695, %v3607_v50  ;;  %v3608_v30 = vadd.f32 %v3592_v1, %v3461_v38 }
0x13c8   :  { %6230 = vpow2.f32 %v5128_v60  ;;  %v5129_v39 = vmul.f32 -1.442695, %v3610_v43 }
0x13c9   :  { %6232 = vpow2.f32 %v5126_v5  ;;  %v5127_v45 = vmul.f32 -1.442695, %v3608_v30 }
0x13ca   :  { %6234 = vpow2.f32 %v5129_v39 }
0x13cb   :  { %6236 = vpow2.f32 %v5127_v45 }
0x13ce   :  { %v6223_v37 = vpop.eup %6222 }
0x13cf   :  { %v6225_v19 = vpop.eup %6224  ;;  %v3661_v7 = vmul.f32 %v6223_v37, %v7909_v12 }
0x13d0   :  { %v6227_v35 = vpop.eup %6226  ;;  %v3659_v41 = vmul.f32 %v6225_v19, %v3603_v44 }
0x13d1   :  { %v6229_v33 = vpop.eup %6228  ;;  %v7926_v18 = vpop.f32.mrb[64].mxu0  ;;  %v3662_v1 = vmul.f32 %v6227_v35, %v7916_v16 }
0x13d2   :  { %v6231_v56 = vpop.eup %6230  ;;  %v7928_v2 = vpop.f32.mrb[65].mxu0  ;;  %3669 = vadd.xlane.f32.xlu0 %v3659_v41  ;;  %v3660_v61 = vmul.f32 %v6229_v33, %v3604_v42 }
0x13d3   :  { %v6233_v27 = vpop.eup %6232  ;;  %v3641_v58 = vadd.f32 1.0, %v6231_v56  ;;  %v7930_v54 = vpop.f32.mrb[66].mxu0 }
0x13d4   :  { %v6235_v38 = vpop.eup %6234  ;;  %v3639_v62 = vadd.f32 1.0, %v6233_v27  ;;  %v7932_v40 = vpop.f32.mrb[67].mxu0  ;;  %3671 = vadd.xlane.f32.xlu1 %v3660_v61  ;;  %v5726_v27 = vld [vmem:[#allocation7 + $0x80] ss:$8 sps:$4 sm:$0xff]  }
0x13d5   :  { %v6237_v44 = vpop.eup %6236  ;;  %v3642_v34 = vadd.f32 1.0, %v6235_v38  ;;  %v5731_v38 = vld [vmem:[#allocation7 + $0x94] ss:$8 sps:$4 sm:$0xff]  }
0x13d6   :  { %6238 = vrcp.f32 %v3639_v62  ;;  %v3640_v23 = vadd.f32 1.0, %v6237_v44  ;;  %3673 = vadd.xlane.f32.xlu0 %v3661_v7  ;;  %v5729_v62 = vld [vmem:[#allocation7 + $0x90] ss:$8 sps:$4 sm:$0xff]  }
0x13d7   :  { %6240 = vrcp.f32 %v3641_v58  ;;  %v5728_v58 = vld [vmem:[#allocation7 + $0x84] ss:$8 sps:$4 sm:$0xff]  }
0x13d8   :  { %6242 = vrcp.f32 %v3640_v23  ;;  %3675 = vadd.xlane.f32.xlu1 %v3662_v1  ;;  %3895 = vmatprep.subr.bf16.mxu1 %v5728_v58 }
0x13d9   :  { %v7936_v42 = vpop.f32.mrb[68].mxu0  ;;  %6244 = vrcp.f32 %v3642_v34  ;;  %3896 = vmatpush1.bf16.msra.mxu1 %v5726_v27 }
0x13da   :  { %v7938_v60 = vpop.f32.mrb[69].mxu0  ;;  %3897 = vmatprep.subr.bf16.mxu1 %v5731_v38 }
0x13db   :  { %v7940_v5 = vpop.f32.mrb[70].mxu0 }
0x13dc   :  { %v7942_v39 = vpop.f32.mrb[71].mxu0 }
0x13dd   :  { %3898 = vmatpush1.bf16.msra.mxu1 %v5729_v62 }
0x13e0   :  { %v6239_v12 = vpop.eup %6238 }
0x13e1   :  { %v6241_v45 = vpop.eup %6240  ;;  %v3663_v37 = vmul.f32 %v6239_v12, %v3607_v50 }
0x13e2   :  { %v6243_v19 = vpop.eup %6242  ;;  %v3665_v16 = vmul.f32 %v6241_v45, %v3609_v0 }
0x13e3   :  { %3677 = vadd.xlane.f32.xlu0 %v3663_v37  ;;  %v3664_v33 = vmul.f32 %v6243_v19, %v3608_v30  ;;  %v6245_v56 = vpop.eup %6244 }
0x13e4   :  { %v3666_v35 = vmul.f32 %v6245_v56, %v3610_v43 }
0x13e5   :  { %3679 = vadd.xlane.f32.xlu1 %v3664_v33 }
0x13e7   :  { %3681 = vadd.xlane.f32.xlu0 %v3665_v16 }
0x13e9   :  { %3683 = vadd.xlane.f32.xlu1 %v3666_v35 }
0x145f   :  { %v3670_v44 = vpop.xlane.xlu0 %3669 }
0x1460   :  { %v3685_v34 = vmul.f32 0.0078125, %v3670_v44 }
0x1461   :  { %v3672_v50 = vpop.xlane.xlu1 %3671 }
0x1462   :  { %v7944_v23 = vsub.f32 %v3659_v41, %v3685_v34  ;;  %v3686_v30 = vmul.f32 0.0078125, %v3672_v50 }
0x1463   :  { %v3674_v12 = vpop.xlane.xlu0 %3673 }
0x1464   :  { %v7946_v19 = vsub.f32 %v3660_v61, %v3686_v30  ;;  %v3687_v0 = vmul.f32 0.0078125, %v3674_v12  ;;  %v3701_v43 = vmul.f32 %v7944_v23, %v7944_v23 }
0x1465   :  { %v3676_v45 = vpop.xlane.xlu1 %3675 }
0x1466   :  { %v7950_v56 = vsub.f32 %v3661_v7, %v3687_v0  ;;  %v3688_v27 = vmul.f32 0.0078125, %v3676_v45  ;;  %3709 = vadd.xlane.f32.xlu0 %v3701_v43  ;;  %v3702_v58 = vmul.f32 %v7946_v19, %v7946_v19  ;;  %v4004_v7 = vld [vmem:[%s8569_s9] sm:$0x3] }
0x1467   :  { %v7966_v30 = vrot.slane %v4004_v7, %v7533_v51  ;;  %v7969_v0 = vrot.slane %v4004_v7, %v7518_v57 }
0x1468   :  { %v7954_v38 = vsub.f32 %v3662_v1, %v3688_v27  ;;  %3711 = vadd.xlane.f32.xlu1 %v3702_v58  ;;  %v3703_v41 = vmul.f32 %v7950_v56, %v7950_v56 }
0x1469   :  { %8610 = vst [vmem:[#allocation17_spill] sm:$0xff] %v7966_v30  ;;  %8611 = vst [vmem:[#allocation18_spill] sm:$0xff] %v7969_v0  ;;  %v7981_v7 = vadd.f32 %v7926_v18, %v7966_v30  ;;  %v7997_v18 = vadd.f32 %v7932_v40, %v7969_v0  ;;  %v5740_v40 = vld [vmem:[#allocation7 + $0xc4] ss:$8 sps:$4 sm:$0xff]  }
0x146a   :  { %3713 = vadd.xlane.f32.xlu0 %v3703_v41  ;;  %v3704_v61 = vmul.f32 %v7954_v38, %v7954_v38  ;;  %v5734_v41 = vld [vmem:[#allocation7 + $0xa4] ss:$8 sps:$4 sm:$0xff]  }
0x146b   :  { %8612 = vst [vmem:[#allocation19_spill] sm:$0xff] %v7981_v7  ;;  %3899 = vmatprep.subr.bf16.mxu1 %v5734_v41  ;;  %8615 = vst [vmem:[#allocation22_spill] sm:$0xff] %v7997_v18  ;;  %v8017_v41 = vadd.f32 %v7942_v39, %v7969_v0  ;;  %v5746_v39 = vld [vmem:[#allocation7 + $0xe4] ss:$8 sps:$4 sm:$0xff]  }
0x146c   :  { %3715 = vadd.xlane.f32.xlu1 %v3704_v61 }
0x146d   :  { %8619 = vst [vmem:[#allocation26_spill] sm:$0xff] %v8017_v41 }
0x1470   :  { %v3678_v62 = vpop.xlane.xlu0 %3677 }
0x1471   :  { %v3689_v44 = vmul.f32 0.0078125, %v3678_v62 }
0x1472   :  { %v3680_v34 = vpop.xlane.xlu1 %3679 }
0x1473   :  { %v7963_v50 = vsub.f32 %v3663_v37, %v3689_v44  ;;  %v3690_v1 = vmul.f32 0.0078125, %v3680_v34  ;;  %v5732_v44 = vld [vmem:[#allocation7 + $0xa0] ss:$8 sps:$4 sm:$0xff]  }
0x1474   :  { %v3682_v12 = vpop.xlane.xlu0 %3681  ;;  %3900 = vmatpush1.bf16.msra.mxu1 %v5732_v44  ;;  %v5741_v44 = vld [vmem:[#allocation7 + $0xd0] ss:$8 sps:$4 sm:$0xff]  }
0x1475   :  { %v7971_v43 = vsub.f32 %v3664_v33, %v3690_v1  ;;  %v3691_v45 = vmul.f32 0.0078125, %v3682_v12  ;;  %v3705_v27 = vmul.f32 %v7963_v50, %v7963_v50  ;;  %v7985_v33 = vadd.f32 %v7928_v2, %v7969_v0  ;;  %v5737_v1 = vld [vmem:[#allocation7 + $0xb4] ss:$8 sps:$4 sm:$0xff]  }
0x1476   :  { %v3684_v58 = vpop.xlane.xlu1 %3683  ;;  %v7993_v12 = vadd.f32 %v7930_v54, %v7966_v30  ;;  %3901 = vmatprep.subr.bf16.mxu1 %v5737_v1  ;;  %v5749_v1 = vld [vmem:[#allocation7 + $0xf4] ss:$8 sps:$4 sm:$0xff]  }
0x1477   :  { %v7975_v61 = vsub.f32 %v3665_v16, %v3691_v45  ;;  %v3692_v37 = vmul.f32 0.0078125, %v3684_v58  ;;  %3717 = vadd.xlane.f32.xlu0 %v3705_v27  ;;  %v3706_v62 = vmul.f32 %v7971_v43, %v7971_v43  ;;  %8613 = vst [vmem:[#allocation20_spill] sm:$0xff] %v7985_v33  ;;  %v8003_v45 = vadd.f32 %v7936_v42, %v7966_v30 }
0x1478   :  { %8614 = vst [vmem:[#allocation21_spill] sm:$0xff] %v7993_v12  ;;  %v8007_v27 = vadd.f32 %v7938_v60, %v7969_v0  ;;  %v4169_v54 = vmax.f32 %v7981_v7, %v7985_v33  ;;  %v8013_v58 = vadd.f32 %v7940_v5, %v7966_v30  ;;  %v4172_v42 = vmax.f32 %v7993_v12, %v7997_v18  ;;  %v5738_v60 = vld [vmem:[#allocation7 + $0xc0] ss:$8 sps:$4 sm:$0xff]  }
0x1479   :  { %v7987_v34 = vsub.f32 %v3666_v35, %v3692_v37  ;;  %3719 = vadd.xlane.f32.xlu1 %v3706_v62  ;;  %v3707_v16 = vmul.f32 %v7975_v61, %v7975_v61  ;;  %v5735_v35 = vld [vmem:[#allocation7 + $0xb0] ss:$8 sps:$4 sm:$0xff]   ;;  %8616 = vst [vmem:[#allocation23_spill] sm:$0xff] %v8003_v45  ;;  %v5743_v62 = vld [vmem:[#allocation7 + $0xd4] ss:$8 sps:$4 sm:$0xff]  }
0x147a   :  { %8617 = vst [vmem:[#allocation24_spill] sm:$0xff] %v8007_v27  ;;  %3902 = vmatpush1.bf16.msra.mxu1 %v5735_v35  ;;  %8618 = vst [vmem:[#allocation25_spill] sm:$0xff] %v8013_v58  ;;  %v4175_v37 = vmax.f32 %v8003_v45, %v8007_v27  ;;  %v4178_v5 = vmax.f32 %v8013_v58, %v8017_v41 }
0x147b   :  { %3721 = vadd.xlane.f32.xlu0 %v3707_v16  ;;  %v3708_v2 = vmul.f32 %v7987_v34, %v7987_v34  ;;  %3903 = vmatprep.subr.bf16.mxu1 %v5740_v40  ;;  %v5744_v16 = vld [vmem:[#allocation7 + $0xe0] ss:$8 sps:$4 sm:$0xff]  }
0x147d   :  { %3723 = vadd.xlane.f32.xlu1 %v3708_v2  ;;  %v5747_v2 = vld [vmem:[#allocation7 + $0xf0] ss:$8 sps:$4 sm:$0xff]  }
0x147e   :  { %3904 = vmatpush1.bf16.msra.mxu1 %v5738_v60 }
0x147f   :  { %4170 = vmax.xlane.f32.xlu0 %v4169_v54  ;;  %3905 = vmatprep.subr.bf16.mxu1 %v5743_v62 }
0x1481   :  { %4173 = vmax.xlane.f32.xlu1 %v4172_v42 }
0x1482   :  { %3906 = vmatpush1.bf16.msra.mxu1 %v5741_v44 }
0x1483   :  { %4176 = vmax.xlane.f32.xlu0 %v4175_v37  ;;  %3907 = vmatprep.subr.bf16.mxu1 %v5746_v39 }
0x1485   :  { %4179 = vmax.xlane.f32.xlu1 %v4178_v5 }
0x1486   :  { %3908 = vmatpush1.bf16.msra.mxu1 %v5744_v16 }
0x1487   :  { %3909 = vmatprep.subr.bf16.mxu1 %v5749_v1 }
0x148a   :  { %3910 = vmatpush1.bf16.msra.mxu1 %v5747_v2 }
0x148b   :  { %5543 = vmatprep.subr.bf16.mxu1 %v7787_v24  ;;  %v5132_v24 = vld [vmem:[%s8564_s4 + $0xc] ss:$0 sm:$0xff] }
0x14f3   :  { %v3710_v35 = vpop.xlane.xlu0 %3709 }
0x14f4   :  { %v3725_v54 = vmul.f32 0.0078125, %v3710_v35 }
0x14f5   :  { %v3712_v40 = vpop.xlane.xlu1 %3711 }
0x14f6   :  { %v3733_v42 = vadd.f32 0.1, %v3725_v54  ;;  %v3726_v60 = vmul.f32 0.0078125, %v3712_v40 }
0x14f7   :  { %v3714_v37 = vpop.xlane.xlu0 %3713 }
0x14f8   :  { %6246 = vrsqrt.f32 %v3733_v42  ;;  %v3734_v62 = vadd.f32 0.1, %v3726_v60  ;;  %v3727_v5 = vmul.f32 0.0078125, %v3714_v37  ;;  %v5133_v37 = vld [vmem:[%s8565_s5 + $0xc] ss:$0 sm:$0xff] }
0x14f9   :  { %v3716_v44 = vpop.xlane.xlu1 %3715 }
0x14fa   :  { %6248 = vrsqrt.f32 %v3734_v62  ;;  %v3735_v0 = vadd.f32 0.1, %v3727_v5  ;;  %v3728_v39 = vmul.f32 0.0078125, %v3716_v44 }
0x14fc   :  { %6250 = vrsqrt.f32 %v3735_v0  ;;  %v3736_v16 = vadd.f32 0.1, %v3728_v39 }
0x14fe   :  { %6252 = vrsqrt.f32 %v3736_v16 }
0x1502   :  { %v6247_v1 = vpop.eup %6246 }
0x1503   :  { %v3749_v2 = vmul.f32 %v6247_v1, %v7944_v23 }
0x1504   :  { %v6249_v35 = vpop.eup %6248  ;;  %v3718_v54 = vpop.xlane.xlu0 %3717 }
0x1505   :  { %v3761_v40 = vmul.f32 %v5132_v24, %v3749_v2  ;;  %v3750_v42 = vmul.f32 %v6249_v35, %v7946_v19  ;;  %v3729_v60 = vmul.f32 0.0078125, %v3718_v54 }
0x1506   :  { %v6251_v0 = vpop.eup %6250  ;;  %v3720_v62 = vpop.xlane.xlu1 %3719 }
0x1507   :  { %v3762_v5 = vmul.f32 %v5132_v24, %v3750_v42  ;;  %v3737_v44 = vadd.f32 0.1, %v3729_v60  ;;  %v3730_v39 = vmul.f32 0.0078125, %v3720_v62  ;;  %v3773_v41 = vadd.f32 %v5133_v37, %v3761_v40 }
0x1508   :  { %v6253_v16 = vpop.eup %6252  ;;  %v3722_v30 = vpop.xlane.xlu0 %3721  ;;  %v3751_v23 = vmul.f32 %v6251_v0, %v7950_v56  ;;  %v8620_v40 = vmov 0  }
0x1509   :  { %6254 = vrsqrt.f32 %v3737_v44  ;;  %v3738_v1 = vadd.f32 0.1, %v3730_v39  ;;  %v3731_v2 = vmul.f32 0.0078125, %v3722_v30  ;;  %v3774_v58 = vadd.f32 %v5133_v37, %v3762_v5 }
0x150a   :  { %v3724_v19 = vpop.xlane.xlu1 %3723  ;;  %v3752_v35 = vmul.f32 %v6253_v16, %v7954_v38  ;;  %v3763_v60 = vmul.f32 %v5132_v24, %v3751_v23  ;;  %v5012_v39 = vclamps-f32 %v7545_v10, 6.0  ;;  %v4389_v10 = vmul.f32 %v7898_v52, %v7898_v52 }
0x150b   :  { %6256 = vrsqrt.f32 %v3738_v1  ;;  %v3739_v54 = vadd.f32 0.1, %v3731_v2  ;;  %v3732_v51 = vmul.f32 0.0078125, %v3724_v19  ;;  %v3781_v27 = vpack.c.bf16 %v3774_v58, %v3773_v41 }
0x150c   :  { %v3764_v45 = vmul.f32 %v5132_v24, %v3752_v35  ;;  %v3775_v30 = vadd.f32 %v5133_v37, %v3763_v60  ;;  %v4723_v19 = vsub.f32 %v7886_v3, %v7886_v3 }
0x150d   :  { %6258 = vrsqrt.f32 %v3739_v54  ;;  %v3740_v42 = vadd.f32 0.1, %v3732_v51  ;;  %3928 = vmatmul.mubr.bf16.vlgmr.msra.gmra.mrb[48].mxu1 %v3781_v27 }
0x150e   :  { %5551 = vmatpush1.bf16.msra.mxu1 %v7816_v32  ;;  %3937 = vmatprep.mubr.bf16.mxu1 %v8620_v40  ;;  %v3776_v56 = vadd.f32 %v5133_v37, %v3764_v45 }
0x150f   :  { %6260 = vrsqrt.f32 %v3740_v42  ;;  %5544 = vmatprep.subr.bf16.mxu1 %v7820_v6 }
0x1510   :  { %v3782_v58 = vpack.c.bf16 %v3776_v56, %v3775_v30  ;;  %v5013_v56 = vclamps-f32 %v7551_v48, 6.0  ;;  %v4413_v48 = vmul.f32 -2.2699965e-05, %v4389_v10 }
0x1512   :  { %5552 = vmatpush1.bf16.msra.mxu1 %v7823_v17 }
0x1513   :  { %v6255_v38 = vpop.eup %6254  ;;  %5545 = vmatprep.subr.bf16.mxu1 %v7826_v53 }
0x1514   :  { %v3753_v41 = vmul.f32 %v6255_v38, %v7963_v50 }
0x1515   :  { %v6257_v51 = vpop.eup %6256  ;;  %3938 = vmatmul.mubr.bf16.gmra.mrb[52].mxu1 %v3782_v58 }
0x1516   :  { %5553 = vmatpush1.bf16.msra.mxu1 %v7830_v36  ;;  %3947 = vmatprep.mubr.bf16.mxu1 %v8620_v40  ;;  %v3754_v32 = vmul.f32 %v6257_v51, %v7971_v43  ;;  %v3765_v27 = vmul.f32 %v5132_v24, %v3753_v41  ;;  %v4390_v41 = vmul.f32 %v7894_v63, %v7894_v63 }
0x1517   :  { %v6259_v6 = vpop.eup %6258  ;;  %5546 = vmatprep.subr.bf16.mxu1 %v7835_v8  ;;  %v8086_v51 = vmul.f32 %v4723_v19, %v4723_v19 }
0x1518   :  { %v3766_v45 = vmul.f32 %v5132_v24, %v3754_v32  ;;  %v3777_v53 = vadd.f32 %v5133_v37, %v3765_v27  ;;  %v3755_v50 = vmul.f32 %v6259_v6, %v7975_v61  ;;  %v4397_v27 = vmul.f32 -0.5, %v4389_v10  ;;  %v5134_v6 = vld [vmem:[%s8567_s7 + $0x1] ss:$2 sm:$0x3] }
0x1519   :  { %v6261_v17 = vpop.eup %6260 }
0x151a   :  { %5554 = vmatpush1.bf16.msra.mxu1 %v7840_v31  ;;  %v3778_v0 = vadd.f32 %v5133_v37, %v3766_v45  ;;  %v3756_v62 = vmul.f32 %v6261_v17, %v7987_v34  ;;  %v3767_v43 = vmul.f32 %v5132_v24, %v3755_v50  ;;  %v8621_v50 = vld [vmem:[#allocation15_spill] sm:$0xff] }
0x151b   :  { %5547 = vmatprep.subr.bf16.mxu1 %v7848_v14  ;;  %v3986_v14 = vpack.c.bf16 %v7548_v15, %v7542_v29 }
0x151c   :  { %v3783_v36 = vpack.c.bf16 %v3778_v0, %v3777_v53  ;;  %v3768_v5 = vmul.f32 %v5132_v24, %v3756_v62  ;;  %v3779_v31 = vadd.f32 %v5133_v37, %v3767_v43  ;;  %v5011_v24 = vclamps-f32 %v7536_v47, 6.0 }
0x151d   :  { %v4677_v0 = vmul.f32 1.442695, %v5013_v56  ;;  %v5014_v62 = vclamps-f32 %v8621_v50, 6.0  ;;  %v4398_v43 = vmul.f32 -0.5, %v4390_v41 }
0x151e   :  { %3948 = vmatmul.mubr.bf16.gmra.mrb[56].mxu1 %v3783_v36  ;;  %v3780_v8 = vadd.f32 %v5133_v37, %v3768_v5  ;;  %v4673_v44 = vmul.f32 1.442695, %v5011_v24  ;;  %v8096_v36 = vpop.xlane.xlu0 %4170 }
0x151f   :  { %5555 = vmatpush1.bf16.msra.mxu1 %v7857_v28  ;;  %3957 = vmatprep.mubr.bf16.mxu1 %v8620_v40  ;;  %v3987_v28 = vpack.c.bf16 %v7560_v20, %v7554_v13  ;;  %8622 = vst [vmem:[#allocation15_spill] sm:$0xff] %v8096_v36  ;;  %v4193_v24 = vsub.f32 %v7981_v7, %v8096_v36 }
0x1520   :  { %5548 = vmatprep.subr.bf16.mxu1 %v7861_v25  ;;  %v3784_v61 = vpack.c.bf16 %v3780_v8, %v3779_v31  ;;  %v2065_v25 = vadd.f32 %v7512_v55, %v7524_v21  ;;  %v4675_v55 = vmul.f32 1.442695, %v5012_v39  ;;  %v8099_v8 = vrot.slane %v5134_v6, %v7518_v57 }
0x1521   :  { %v4391_v57 = vmul.f32 %v7542_v29, %v7542_v29  ;;  %v4209_v10 = vmul.f32 1.442695, %v4193_v24 }
0x1523   :  { %5556 = vmatpush1.bf16.msra.mxu1 %v7864_v11  ;;  %v2069_v11 = vadd.f32 %v7516_v59, %v7524_v21  ;;  %v4387_v59 = vmul.f32 %v7886_v3, %v7886_v3 }
0x1524   :  { %5549 = vmatprep.subr.bf16.mxu1 %v7868_v49  ;;  %v5008_v49 = vclamps-f32 %v2065_v25, 6.0 }
0x1525   :  { %v4395_v47 = vmul.f32 -0.5, %v4387_v59  ;;  %v4411_v1 = vmul.f32 -2.2699965e-05, %v4387_v59 }
0x1526   :  { %3958 = vmatmul.mubr.bf16.gmra.mrb[60].mxu1 %v3784_v61  ;;  %v8101_v61 = vadd.f32 -2.8160586, %v4397_v27 }
0x1527   :  { %5557 = vmatpush1.bf16.msra.mxu1 %v7871_v46  ;;  %4148 = vmatprep.mubr.bf16.mxu1 %v8620_v40  ;;  %v5009_v46 = vclamps-f32 %v2069_v11, 6.0  ;;  %v8080_v30 = vadd.f32 -2.8160586, %v4395_v47  ;;  %v8082_v38 = vadd.f32 -8.221523, %v4411_v1  ;;  %v8106_v11 = vsub.f32 %v7881_v9, %v7881_v9 }
0x1528   :  { %5550 = vmatprep.subr.bf16.mxu1 %v7874_v22  ;;  %v4667_v22 = vmul.f32 1.442695, %v5008_v49  ;;  %v8108_v49 = vadd.f32 -8.221523, %v4413_v48  ;;  %v8629_v48 = vld [vmem:[#allocation24_spill] sm:$0xff] }
0x1529   :  { %v4669_v34 = vmul.f32 1.442695, %v5009_v46 }
0x152a   :  { %6262 = vpow2.f32 %v4667_v22  ;;  %v8110_v22 = vpop.xlane.xlu1 %4173 }
0x152b   :  { %5558 = vmatpush1.bf16.msra.mxu1 %v7877_v4  ;;  %v5010_v4 = vclamps-f32 %v7529_v26, 6.0  ;;  %6264 = vpow2.f32 %v4669_v34  ;;  %v4388_v26 = vmul.f32 %v7881_v9, %v7881_v9  ;;  %v4679_v34 = vmul.f32 1.442695, %v5014_v62 }
0x152c   :  { %v4195_v1 = vsub.f32 %v7993_v12, %v8110_v22 }
0x152d   :  { %v4671_v37 = vmul.f32 1.442695, %v5010_v4  ;;  %v4396_v54 = vmul.f32 -0.5, %v4388_v26 }
0x152e   :  { %4149 = vmatmul.mubr.bf16.vlgmr.msra.gmra.mrb[64].mxu1 %v3986_v14  ;;  %v4414_v14 = vmul.f32 -2.2699965e-05, %v4390_v41  ;;  %v8141_v56 = vpop.xlane.xlu1 %4179 }
0x152f   :  { %4158 = vmatprep.mubr.bf16.mxu1 %v8620_v40  ;;  %6266 = vpow2.f32 %v4671_v37  ;;  %v4412_v40 = vmul.f32 -2.2699965e-05, %v4388_v26  ;;  %v8091_v45 = vadd.f32 -2.8160586, %v4396_v54  ;;  %v4194_v26 = vsub.f32 %v7985_v33, %v8096_v36  ;;  %8628 = vst [vmem:[#allocation29_spill] sm:$0xff] %v8141_v56 }
0x1530   :  { %6268 = vpow2.f32 %v4673_v44  ;;  %v8118_v44 = vadd.f32 -2.8160586, %v4398_v43  ;;  %v8125_v59 = vadd.f32 -8.221523, %v4414_v14  ;;  %v4196_v54 = vsub.f32 %v7997_v18, %v8110_v22 }
0x1531   :  { %6270 = vpow2.f32 %v4675_v55  ;;  %v8093_v53 = vadd.f32 -8.221523, %v4412_v40  ;;  %v4211_v27 = vmul.f32 1.442695, %v4194_v26  ;;  %v4213_v43 = vmul.f32 1.442695, %v4195_v1 }
0x1534   :  { %v6263_v16 = vpop.eup %6262 }
0x1535   :  { %v6265_v21 = vpop.eup %6264  ;;  %v4683_v23 = vadd.f32 1e-08, %v6263_v16 }
0x1536   :  { %4159 = vmatmul.mubr.bf16.gmra.mrb[68].mxu1 %v3987_v28  ;;  %v4684_v35 = vadd.f32 1e-08, %v6265_v21  ;;  %v8623_v28 = vld [vmem:[#allocation16_spill] sm:$0xff] }
0x1537   :  { %v4691_v60 = vmul.f32 6.2831855, %v4683_v23  ;;  %6272 = vrcp.f32 %v4683_v23  ;;  %v5015_v25 = vclamps-f32 %v8623_v28, 6.0  ;;  %8624 = vst [vmem:[#allocation16_spill] sm:$0xff] %v8110_v22  ;;  %v8129_v23 = vpop.xlane.xlu0 %4176 }
0x1538   :  { %v4692_v32 = vmul.f32 6.2831855, %v4684_v35  ;;  %8625 = vst [vmem:[#allocation27_spill] sm:$0xff] %v8129_v23 }
0x1539   :  { %v6267_v2 = vpop.eup %6266  ;;  %6274 = vlog2.f32 %v4691_v60  ;;  %v4681_v21 = vmul.f32 1.442695, %v5015_v25  ;;  %v8627_v60 = vld [vmem:[#allocation23_spill] sm:$0xff]  ;;  %v4215_v25 = vmul.f32 1.442695, %v4196_v54 }
0x153a   :  { %v6269_v42 = vpop.eup %6268  ;;  %v4685_v58 = vadd.f32 1e-08, %v6267_v2  ;;  %6276 = vrcp.f32 %v4684_v35  ;;  %v4399_v35 = vmul.f32 -0.5, %v4391_v57  ;;  %v4197_v40 = vsub.f32 %v8627_v60, %v8129_v23 }
0x153b   :  { %v4686_v17 = vadd.f32 1e-08, %v6269_v42  ;;  %v6271_v31 = vpop.eup %6270  ;;  %6278 = vlog2.f32 %v4692_v32 }
0x153c   :  { %v4693_v5 = vmul.f32 6.2831855, %v4685_v58  ;;  %6280 = vrcp.f32 %v4685_v58  ;;  %v8120_v39 = vadd.f32 1e-08, %v6271_v31 }
0x153d   :  { %v4694_v46 = vmul.f32 6.2831855, %v4686_v17  ;;  %6282 = vpow2.f32 %v4677_v0  ;;  %v8630_v0 = vld [vmem:[#allocation13_spill] sm:$0xff] }
0x153e   :  { %6284 = vlog2.f32 %v4693_v5  ;;  %v8148_v50 = vrot.slane %v5134_v6, %v8630_v0  ;;  %v4392_v5 = vmul.f32 %v7548_v15, %v7548_v15 }
0x153f   :  { %6286 = vrcp.f32 %v4686_v17  ;;  %v4198_v17 = vsub.f32 %v8629_v48, %v8129_v23 }
0x1540   :  { %6288 = vlog2.f32 %v4694_v46  ;;  %v8633_v46 = vld [vmem:[#allocation25_spill] sm:$0xff]  ;;  %v4400_v0 = vmul.f32 -0.5, %v4392_v5 }
0x1541   :  { %6290 = vpow2.f32 %v4679_v34  ;;  %v8136_v42 = vpop.eup %6272  ;;  %v4199_v34 = vsub.f32 %v8633_v46, %v8141_v56 }
0x1542   :  { %8626 = vst [vmem:[#allocation28_spill] sm:$0xff] %v8136_v42  ;;  %6292 = vrcp.f32 %v8120_v39 }
0x1543   :  { %v8143_v32 = vpop.eup %6274  ;;  %6294 = vpow2.f32 %v4681_v21  ;;  %v4217_v21 = vmul.f32 1.442695, %v4197_v40 }
0x1544   :  { %v8150_v62 = vpop.eup %6276 }
0x1545   :  { %8631 = vst [vmem:[#allocation13_spill] sm:$0xff] %v8150_v62  ;;  %v8154_v28 = vpop.eup %6278 }
0x1546   :  { %8632 = vst [vmem:[#allocation30_spill] sm:$0xff] %v8154_v28 }
0x15e0   :  { %v8112_v4 = vpop.f32.mrb[48].mxu1 }
0x15e1   :  { %v3931_v37 = vpop.f32.mrb[49].mxu1 }
0x15e2   :  { %v3932_v55 = vadd.f32 %v3931_v37, %v8099_v8  ;;  %v8123_v16 = vpop.f32.mrb[50].mxu1  ;;  %v8161_v37 = vpop.eup %6280 }
0x15e3   :  { %v3935_v47 = vpop.f32.mrb[51].mxu1  ;;  %8634 = vst [vmem:[#allocation31_spill] sm:$0xff] %v8161_v37  ;;  %v6283_v1 = vpop.eup %6282 }
0x15e4   :  { %v5151_v2 = vclamps-f32 %v3932_v55, 6.0  ;;  %v3936_v19 = vadd.f32 %v3935_v47, %v8099_v8  ;;  %v4415_v55 = vmul.f32 -2.2699965e-05, %v4391_v57  ;;  %v4688_v46 = vadd.f32 1e-08, %v6283_v1 }
0x15e5   :  { %v3934_v1 = vadd.f32 %v8123_v16, %v8148_v50 }
0x15e6   :  { %v4427_v58 = vmul.f32 1.442695, %v5151_v2  ;;  %v5152_v41 = vclamps-f32 %v3936_v19, 6.0  ;;  %v4219_v2 = vmul.f32 1.442695, %v4198_v17  ;;  %v8635_v19 = vld [vmem:[#allocation26_spill] sm:$0xff] }
0x15e7   :  { %v4221_v17 = vmul.f32 1.442695, %v4199_v34  ;;  %v8189_v34 = vadd.f32 -2.8160586, %v4400_v0  ;;  %v4696_v33 = vmul.f32 6.2831855, %v4688_v46 }
0x15e8   :  { %6296 = vpow2.f32 %v4427_v58  ;;  %v4429_v31 = vmul.f32 1.442695, %v5152_v41  ;;  %v3939_v14 = vpop.f32.mrb[52].mxu1  ;;  %v8169_v41 = vpop.eup %6284 }
0x15e9   :  { %6298 = vpow2.f32 %v4209_v10  ;;  %v8159_v24 = vadd.f32 %v3939_v14, %v8148_v50  ;;  %v3941_v6 = vpop.f32.mrb[53].mxu1  ;;  %v4200_v10 = vsub.f32 %v8635_v19, %v8141_v56  ;;  %8636 = vst [vmem:[#allocation32_spill] sm:$0xff] %v8169_v41  ;;  %v4416_v14 = vmul.f32 -2.2699965e-05, %v4392_v5 }
0x15ea   :  { %6300 = vpow2.f32 %v4429_v31  ;;  %v3942_v26 = vadd.f32 %v3941_v6, %v8099_v8  ;;  %v3943_v47 = vpop.f32.mrb[54].mxu1  ;;  %v8172_v31 = vpop.eup %6286 }
0x15eb   :  { %6302 = vpow2.f32 %v4211_v27  ;;  %v8167_v54 = vadd.f32 %v3943_v47, %v8148_v50  ;;  %v3945_v58 = vpop.f32.mrb[55].mxu1  ;;  %8637 = vst [vmem:[#allocation33_spill] sm:$0xff] %v8172_v31  ;;  %v4393_v27 = vmul.f32 %v7554_v13, %v7554_v13  ;;  %v8176_v6 = vpop.eup %6288  ;;  %v8178_v47 = vadd.f32 -2.8160586, %v4399_v35 }
0x15ec   :  { %6304 = vpow2.f32 %v4213_v43  ;;  %v5153_v57 = vclamps-f32 %v3942_v26, 6.0  ;;  %v3946_v40 = vadd.f32 %v3945_v58, %v8099_v8  ;;  %8638 = vst [vmem:[#allocation34_spill] sm:$0xff] %v8176_v6  ;;  %v8180_v36 = vpop.eup %6290  ;;  %v8182_v43 = vadd.f32 -8.221523, %v4415_v55 }
0x15ed   :  { %6306 = vpow2.f32 %v4215_v25  ;;  %v4394_v26 = vmul.f32 %v7560_v20, %v7560_v20  ;;  %v4223_v5 = vmul.f32 1.442695, %v4200_v10  ;;  %v8186_v58 = vpop.eup %6292  ;;  %v4695_v25 = vmul.f32 6.2831855, %v8120_v39 }
0x15ee   :  { %6308 = vpow2.f32 %v4217_v21  ;;  %v4431_v56 = vmul.f32 1.442695, %v5153_v57  ;;  %v5154_v23 = vclamps-f32 %v3946_v40, 6.0  ;;  %8639 = vst [vmem:[#allocation35_spill] sm:$0xff] %v8186_v58  ;;  %v8191_v21 = vpop.eup %6294  ;;  %v8193_v57 = vadd.f32 -8.221523, %v4416_v14 }
0x15ef   :  { %6310 = vpow2.f32 %v4219_v2  ;;  %8640 = vst [vmem:[#allocation36_spill] sm:$0xff] %v8191_v21  ;;  %v4401_v40 = vmul.f32 -0.5, %v4393_v27  ;;  %v4417_v55 = vmul.f32 -2.2699965e-05, %v4393_v27  ;;  %v3930_v2 = vadd.f32 %v8112_v4, %v8148_v50 }
0x15f0   :  { %6312 = vpow2.f32 %v4431_v56  ;;  %v4433_v35 = vmul.f32 1.442695, %v5154_v23  ;;  %v4402_v23 = vmul.f32 -0.5, %v4394_v26 }
0x15f1   :  { %6314 = vpow2.f32 %v4221_v17  ;;  %v3949_v22 = vpop.f32.mrb[56].mxu1  ;;  %v4418_v17 = vmul.f32 -2.2699965e-05, %v4394_v26  ;;  %v8210_v58 = vadd.f32 -8.221523, %v4417_v55 }
0x15f2   :  { %v6297_v19 = vpop.eup %6296  ;;  %6316 = vpow2.f32 %v4433_v35  ;;  %v8198_v39 = vadd.f32 %v3949_v22, %v8148_v50  ;;  %v3951_v10 = vpop.f32.mrb[57].mxu1 }
0x15f3   :  { %v6299_v56 = vpop.eup %6298  ;;  %6318 = vpow2.f32 %v4223_v5  ;;  %v4443_v0 = vadd.f32 1e-08, %v6297_v19  ;;  %v3952_v14 = vadd.f32 %v3951_v10, %v8099_v8  ;;  %v3953_v48 = vpop.f32.mrb[58].mxu1  ;;  %v8206_v19 = vadd.f32 -2.8160586, %v4401_v40 }
0x15f4   :  { %v6301_v27 = vpop.eup %6300  ;;  %6320 = vlog2.f32 %v4695_v25  ;;  %v8204_v4 = vadd.f32 %v3953_v48, %v8148_v50  ;;  %v3955_v35 = vpop.f32.mrb[59].mxu1  ;;  %v4483_v10 = vsub.f32 %v7886_v3, %v3930_v2  ;;  %v8215_v40 = vsub.f32 %v7898_v52, %v7898_v52 }
0x15f5   :  { %v6303_v22 = vpop.eup %6302  ;;  %v4451_v60 = vmul.f32 6.2831855, %v4443_v0  ;;  %6322 = vrcp.f32 %v4443_v0  ;;  %v4444_v18 = vadd.f32 1e-08, %v6301_v27  ;;  %v5155_v12 = vclamps-f32 %v3952_v14, 6.0 }
0x15f6   :  { %v6305_v5 = vpop.eup %6304  ;;  %6324 = vrcp.f32 %v4688_v46  ;;  %v3956_v26 = vadd.f32 %v3955_v35, %v8099_v8  ;;  %v4484_v0 = vsub.f32 %v7881_v9, %v3934_v1  ;;  %v8217_v3 = vadd.f32 -2.8160586, %v4402_v23 }
0x15f7   :  { %v6307_v25 = vpop.eup %6306  ;;  %6326 = vlog2.f32 %v4451_v60  ;;  %v4452_v16 = vmul.f32 6.2831855, %v4444_v18  ;;  %v4435_v48 = vmul.f32 1.442695, %v5155_v12  ;;  %v8219_v2 = vadd.f32 -8.221523, %v4418_v17 }
0x15f8   :  { %v6309_v7 = vpop.eup %6308  ;;  %6328 = vrcp.f32 %v4444_v18  ;;  %v5156_v14 = vclamps-f32 %v3956_v26, 6.0  ;;  %v4491_v12 = vmul.f32 %v4483_v10, %v4483_v10  ;;  %v8225_v23 = vadd.f32 %v6303_v22, %v6299_v56 }
0x15f9   :  { %v6311_v27 = vpop.eup %6310  ;;  %6330 = vlog2.f32 %v4452_v16  ;;  %v3959_v60 = vpop.f32.mrb[60].mxu1  ;;  %v4492_v37 = vmul.f32 %v4484_v0, %v4484_v0  ;;  %v4485_v56 = vsub.f32 %v7898_v52, %v8159_v24  ;;  %v8249_v52 = vld [vmem:[#allocation2 + $0x8] sm:$0xff] }
0x15fa   :  { %v6313_v46 = vpop.eup %6312  ;;  %6332 = vpow2.f32 %v4435_v48  ;;  %v4437_v55 = vmul.f32 1.442695, %v5156_v14  ;;  %v8222_v35 = vadd.f32 %v3959_v60, %v8148_v50  ;;  %v3961_v9 = vpop.f32.mrb[61].mxu1  ;;  %v8230_v48 = vadd.f32 %v6307_v25, %v6305_v5  ;;  %8644 = vst [vmem:[#allocation40_spill] sm:$0xff] %v8249_v52 }
0x15fb   :  { %v6315_v18 = vpop.eup %6314  ;;  %6334 = vlog2.f32 %v4696_v33  ;;  %v4445_v1 = vadd.f32 1e-08, %v6313_v46  ;;  %v3962_v26 = vadd.f32 %v3961_v9, %v8099_v8  ;;  %v3963_v31 = vpop.f32.mrb[62].mxu1  ;;  %v4499_v9 = vmul.f32 -0.5, %v4491_v12 }
0x15fc   :  { %v6317_v17 = vpop.eup %6316  ;;  %6336 = vpow2.f32 %v4437_v55  ;;  %v8228_v16 = vadd.f32 %v3963_v31, %v8148_v50  ;;  %v3965_v10 = vpop.f32.mrb[63].mxu1  ;;  %v8237_v0 = vadd.f32 %v6311_v27, %v6309_v7  ;;  %v4486_v31 = vsub.f32 %v7894_v63, %v8167_v54 }
0x15fd   :  { %v6319_v14 = vpop.eup %6318  ;;  %v4453_v60 = vmul.f32 6.2831855, %v4445_v1  ;;  %6338 = vrcp.f32 %v4445_v1  ;;  %v4446_v6 = vadd.f32 1e-08, %v6317_v17  ;;  %v5157_v33 = vclamps-f32 %v3962_v26, 6.0  ;;  %v8247_v26 = vld [vmem:[#allocation2] sm:$0xff] }
0x15fe   :  { %v8232_v46 = vpop.eup %6320  ;;  %v3966_v22 = vadd.f32 %v3965_v10, %v8099_v8  ;;  %v8245_v12 = vadd.f32 %v6319_v14, %v6315_v18  ;;  %8643 = vst [vmem:[#allocation39_spill] sm:$0xff] %v8247_v26  ;;  %v8253_v7 = vadd.f32 %v8249_v52, %v8247_v26  ;;  %v4500_v24 = vmul.f32 -0.5, %v4492_v37  ;;  %v8255_v17 = vld [vmem:[#allocation2 + $0x10] sm:$0xff]  ;;  %v8257_v10 = vld [vmem:[#allocation2 + $0x18] sm:$0xff]  ;;  %v8265_v26 = vld [vmem:[#allocation2 + $0x20] sm:$0xff] }
0x15ff   :  { %8641 = vst [vmem:[#allocation37_spill] sm:$0xff] %v8232_v46  ;;  %v6323_v50 = vpop.eup %6322  ;;  %6340 = vlog2.f32 %v4453_v60  ;;  %v4454_v5 = vmul.f32 6.2831855, %v4446_v6  ;;  %v4439_v25 = vmul.f32 1.442695, %v5157_v33  ;;  %8645 = vst [vmem:[#allocation41_spill] sm:$0xff] %v8255_v17  ;;  %v4493_v60 = vmul.f32 %v4485_v56, %v4485_v56 }
0x1600   :  { %v8241_v55 = vpop.eup %6324  ;;  %v8243_v1 = vmul.f32 %v6323_v50, %v4499_v9  ;;  %6342 = vrcp.f32 %v4446_v6  ;;  %v5158_v54 = vclamps-f32 %v3966_v22, 6.0  ;;  %8646 = vst [vmem:[#allocation42_spill] sm:$0xff] %v8257_v10  ;;  %v8261_v6 = vadd.f32 %v8257_v10, %v8255_v17  ;;  %8647 = vst [vmem:[#allocation43_spill] sm:$0xff] %v8265_v26  ;;  %v8649_v46 = vld [vmem:[#allocation17_spill] sm:$0xff] }
0x1601   :  { %8642 = vst [vmem:[#allocation38_spill] sm:$0xff] %v8241_v55  ;;  %v6327_v8 = vpop.eup %6326  ;;  %6344 = vlog2.f32 %v4454_v5  ;;  %v4150_v27 = vpop.f32.mrb[64].mxu1  ;;  %v4487_v33 = vsub.f32 %v7542_v29, %v8198_v39  ;;  %v4494_v22 = vmul.f32 %v4486_v31, %v4486_v31  ;;  %v8267_v55 = vld [vmem:[#allocation2 + $0x28] sm:$0xff] }
0x1602   :  { %v6329_v18 = vpop.eup %6328  ;;  %v4460_v14 = vmul.f32 0.6931472, %v6327_v8  ;;  %6346 = vpow2.f32 %v4439_v25  ;;  %v4152_v9 = vpop.f32.mrb[65].mxu1  ;;  %v4441_v5 = vmul.f32 1.442695, %v5158_v54  ;;  %8648 = vst [vmem:[#allocation44_spill] sm:$0xff] %v8267_v55  ;;  %v8271_v10 = vadd.f32 %v8267_v55, %v8265_v26 }
0x1603   :  { %v6331_v37 = vpop.eup %6330  ;;  %v4510_v50 = vmul.f32 %v6329_v18, %v4500_v24  ;;  %v4154_v52 = vpop.f32.mrb[66].mxu1  ;;  %v8274_v39 = vadd.f32 %v4150_v27, %v8649_v46  ;;  %v8650_v25 = vld [vmem:[#allocation18_spill] sm:$0xff]  ;;  %v4501_v27 = vmul.f32 -0.5, %v4493_v60  ;;  %v4495_v29 = vmul.f32 %v4487_v33, %v4487_v33 }
0x1604   :  { %v6333_v8 = vpop.eup %6332  ;;  %v4475_v56 = vmul.f32 0.5, %v4460_v14  ;;  %v4462_v17 = vmul.f32 0.6931472, %v6331_v37  ;;  %v8277_v62 = vadd.f32 %v4152_v9, %v8650_v25  ;;  %v4156_v31 = vpop.f32.mrb[67].mxu1  ;;  %6348 = vpow2.f32 %v4441_v5 }
0x1605   :  { %v8279_v24 = vpop.eup %6334  ;;  %v4447_v54 = vadd.f32 1e-08, %v6333_v8  ;;  %v8282_v18 = vadd.f32 %v4154_v52, %v8649_v46  ;;  %v8285_v55 = vadd.f32 %v4156_v31, %v8650_v25  ;;  %v4502_v9 = vmul.f32 -0.5, %v4494_v22 }
0x1606   :  { %8651 = vst [vmem:[#allocation17_spill] sm:$0xff] %v8279_v24  ;;  %v6337_v26 = vpop.eup %6336  ;;  %v4523_v14 = vsub.f32 %v8243_v1, %v4475_v56  ;;  %v4476_v37 = vmul.f32 0.5, %v4462_v17  ;;  %v4488_v52 = vsub.f32 %v7548_v15, %v8204_v4  ;;  %v4489_v5 = vsub.f32 %v7554_v13, %v8222_v35 }
0x1607   :  { %8652 = vst [vmem:[#allocation18_spill] sm:$0xff] %v8282_v18  ;;  %8653 = vst [vmem:[#allocation45_spill] sm:$0xff] %v8285_v55  ;;  %v6339_v41 = vpop.eup %6338  ;;  %v4455_v42 = vmul.f32 6.2831855, %v4447_v54  ;;  %6350 = vrcp.f32 %v4447_v54  ;;  %v4448_v21 = vadd.f32 1e-08, %v6337_v26  ;;  %v4181_v1 = vmax.f32 %v8274_v39, %v8277_v62 }
0x1608   :  { %v4524_v24 = vsub.f32 %v4510_v50, %v4476_v37  ;;  %v4512_v8 = vmul.f32 %v6339_v41, %v4501_v27  ;;  %v4184_v60 = vmax.f32 %v8282_v18, %v8285_v55  ;;  %v4503_v50 = vmul.f32 -0.5, %v4495_v29 }
0x1609   :  { %v6341_v31 = vpop.eup %6340  ;;  %6352 = vlog2.f32 %v4455_v42  ;;  %v4456_v28 = vmul.f32 6.2831855, %v4448_v21  ;;  %v4160_v17 = vpop.f32.mrb[68].mxu1  ;;  %v4490_v41 = vsub.f32 %v7560_v20, %v8228_v16  ;;  %v8298_v35 = vadd.f32 -0.2876821, %v4523_v14  ;;  %4182 = vmax.xlane.f32.xlu0 %v4181_v1 }
0x160a   :  { %v6343_v33 = vpop.eup %6342  ;;  %v4464_v26 = vmul.f32 0.6931472, %v6341_v31  ;;  %6354 = vrcp.f32 %v4448_v21  ;;  %v4162_v4 = vpop.f32.mrb[69].mxu1  ;;  %v8300_v42 = vadd.f32 -0.2876821, %v4524_v24  ;;  %4185 = vmax.xlane.f32.xlu1 %v4184_v60  ;;  %v4496_v31 = vmul.f32 %v4488_v52, %v4488_v52 }
0x160b   :  { %v6345_v22 = vpop.eup %6344  ;;  %v4514_v56 = vmul.f32 %v6343_v33, %v4502_v9  ;;  %6356 = vlog2.f32 %v4456_v28  ;;  %v4164_v54 = vpop.f32.mrb[70].mxu1  ;;  %v4497_v29 = vmul.f32 %v4489_v5, %v4489_v5  ;;  %v8303_v16 = vadd.f32 %v4160_v17, %v8649_v46 }
0x160c   :  { %v6347_v37 = vpop.eup %6346  ;;  %v4477_v27 = vmul.f32 0.5, %v4464_v26  ;;  %v4466_v55 = vmul.f32 0.6931472, %v6345_v22  ;;  %v4166_v21 = vpop.f32.mrb[71].mxu1  ;;  %v8306_v14 = vadd.f32 %v4162_v4, %v8650_v25  ;;  %v8309_v24 = vadd.f32 %v4164_v54, %v8649_v46 }
0x160d   :  { %v4449_v18 = vadd.f32 1e-08, %v6347_v37  ;;  %v4498_v1 = vmul.f32 %v4490_v41, %v4490_v41  ;;  %v8312_v60 = vadd.f32 %v4166_v21, %v8650_v25  ;;  %v4539_v52 = vmax.f32 %v8080_v30, %v8298_v35 }
0x160e   :  { %v4525_v28 = vsub.f32 %v4512_v8, %v4477_v27  ;;  %v4478_v9 = vmul.f32 0.5, %v4466_v55  ;;  %v6349_v33 = vpop.eup %6348  ;;  %v4540_v5 = vmax.f32 %v8091_v45, %v8300_v42  ;;  %v4504_v22 = vmul.f32 -0.5, %v4496_v31 }
0x160f   :  { %v4457_v17 = vmul.f32 6.2831855, %v4449_v18  ;;  %6358 = vrcp.f32 %v4449_v18  ;;  %v4450_v46 = vadd.f32 1e-08, %v6349_v33  ;;  %v4505_v8 = vmul.f32 -0.5, %v4497_v29 }
0x1610   :  { %v4533_v26 = vadd.f32 -0.2876821, %v4525_v28  ;;  %v4526_v4 = vsub.f32 %v4514_v56, %v4478_v9  ;;  %v4187_v55 = vmax.f32 %v8303_v16, %v8306_v14  ;;  %v4190_v25 = vmax.f32 %v8309_v24, %v8312_v60 }
0x1611   :  { %v6351_v54 = vpop.eup %6350  ;;  %6360 = vlog2.f32 %v4457_v17  ;;  %v4458_v21 = vmul.f32 6.2831855, %v4450_v46  ;;  %v4506_v28 = vmul.f32 -0.5, %v4498_v1  ;;  %v8326_v56 = vmax.f32 %v4539_v52, %v8082_v38 }
0x1612   :  { %v4541_v41 = vmax.f32 %v8101_v61, %v4533_v26  ;;  %v8323_v37 = vadd.f32 -0.2876821, %v4526_v4  ;;  %v4516_v27 = vmul.f32 %v6351_v54, %v4503_v50  ;;  %6362 = vrcp.f32 %v4450_v46  ;;  %4188 = vmax.xlane.f32.xlu0 %v4187_v55  ;;  %4191 = vmax.xlane.f32.xlu1 %v4190_v25 }
0x1613   :  { %v6353_v18 = vpop.eup %6352  ;;  %v8329_v31 = vmax.f32 %v4540_v5, %v8093_v53  ;;  %6364 = vlog2.f32 %v4458_v21  ;;  %v4555_v4 = vsub.f32 %v8080_v30, %v8326_v56  ;;  %v4579_v52 = vsub.f32 %v8298_v35, %v8326_v56 }
0x1614   :  { %v6355_v29 = vpop.eup %6354  ;;  %v4542_v9 = vmax.f32 %v8118_v44, %v8323_v37  ;;  %v4468_v33 = vmul.f32 0.6931472, %v6353_v18  ;;  %v8334_v50 = vmax.f32 %v4541_v41, %v8108_v49  ;;  %v4611_v5 = vsub.f32 %v8082_v38, %v8326_v56 }
0x1615   :  { %v6357_v17 = vpop.eup %6356  ;;  %v4518_v1 = vmul.f32 %v6355_v29, %v4504_v22  ;;  %v4556_v55 = vsub.f32 %v8091_v45, %v8329_v31  ;;  %v4580_v25 = vsub.f32 %v8300_v42, %v8329_v31  ;;  %v4563_v22 = vmul.f32 1.442695, %v4555_v4 }
0x1616   :  { %v4479_v46 = vmul.f32 0.5, %v4468_v33  ;;  %v4470_v54 = vmul.f32 0.6931472, %v6357_v17  ;;  %4242 = vadd.xlane.f32.xlu0 %v8225_v23  ;;  %4245 = vadd.xlane.f32.xlu1 %v8230_v48  ;;  %v4587_v30 = vmul.f32 1.442695, %v4579_v52  ;;  %v4612_v35 = vsub.f32 %v8093_v53, %v8329_v31 }
0x1617   :  { %v4619_v41 = vmul.f32 1.442695, %v4611_v5  ;;  %v4565_v18 = vmul.f32 1.442695, %v4556_v55  ;;  %v4589_v29 = vmul.f32 1.442695, %v4580_v25  ;;  %6366 = vpow2.f32 %v4563_v22 }
0x1618   :  { %v4527_v21 = vsub.f32 %v4516_v27, %v4479_v46  ;;  %v4480_v38 = vmul.f32 0.5, %v4470_v54  ;;  %v4621_v45 = vmul.f32 1.442695, %v4612_v35  ;;  %v4557_v42 = vsub.f32 %v8101_v61, %v8334_v50  ;;  %v8362_v54 = vld [vmem:[#allocation2 + $0x38] sm:$0xff] }
0x1619   :  { %v6359_v33 = vpop.eup %6358  ;;  %v4581_v23 = vsub.f32 %v4533_v26, %v8334_v50  ;;  %6368 = vpow2.f32 %v4587_v30  ;;  %v4613_v5 = vsub.f32 %v8108_v49, %v8334_v50  ;;  %v8367_v55 = vmax.f32 %v4542_v9, %v8125_v59 }
0x161a   :  { %v4535_v17 = vadd.f32 -0.2876821, %v4527_v21  ;;  %v4528_v48 = vsub.f32 %v4518_v1, %v4480_v38  ;;  %v4520_v4 = vmul.f32 %v6359_v33, %v4505_v8  ;;  %4248 = vadd.xlane.f32.xlu0 %v8237_v0  ;;  %4251 = vadd.xlane.f32.xlu1 %v8245_v12  ;;  %6370 = vpow2.f32 %v4619_v41  ;;  %v8360_v8 = vld [vmem:[#allocation2 + $0x30] sm:$0xff] }
0x161b   :  { %v6361_v52 = vpop.eup %6360  ;;  %v4567_v53 = vmul.f32 1.442695, %v4557_v42  ;;  %v4591_v27 = vmul.f32 1.442695, %v4581_v23  ;;  %6372 = vpow2.f32 %v4565_v18  ;;  %v4298_v0 = vadd.f32 %v8362_v54, %v8360_v8 }
0x161c   :  { %v4543_v46 = vmax.f32 %v8178_v47, %v4535_v17  ;;  %v8358_v61 = vadd.f32 -0.2876821, %v4528_v48  ;;  %v4472_v26 = vmul.f32 0.6931472, %v6361_v52  ;;  %v6363_v1 = vpop.eup %6362  ;;  %6374 = vpow2.f32 %v4589_v29 }
0x161d   :  { %v4623_v12 = vmul.f32 1.442695, %v4613_v5  ;;  %v6365_v49 = vpop.eup %6364  ;;  %v4522_v30 = vmul.f32 %v6363_v1, %v4506_v28  ;;  %6376 = vpow2.f32 %v4621_v45  ;;  %v4558_v35 = vsub.f32 %v8118_v44, %v8367_v55 }
0x161e   :  { %v4544_v25 = vmax.f32 %v8189_v34, %v8358_v61  ;;  %v4481_v22 = vmul.f32 0.5, %v4472_v26  ;;  %v4474_v41 = vmul.f32 0.6931472, %v6365_v49  ;;  %4290 = vadd.xlane.f32.xlu0 %v8253_v7  ;;  %4293 = vadd.xlane.f32.xlu1 %v8261_v6  ;;  %6378 = vpow2.f32 %v4567_v53 }
0x161f   :  { %v4582_v9 = vsub.f32 %v8323_v37, %v8367_v55  ;;  %6380 = vpow2.f32 %v4591_v27  ;;  %v4614_v38 = vsub.f32 %v8125_v59, %v8367_v55  ;;  %v8380_v28 = vmax.f32 %v4543_v46, %v8182_v43 }
0x1620   :  { %v4529_v21 = vsub.f32 %v4520_v4, %v4481_v22  ;;  %v4482_v18 = vmul.f32 0.5, %v4474_v41  ;;  %6382 = vpow2.f32 %v4623_v12  ;;  %v4569_v7 = vmul.f32 1.442695, %v4558_v35 }
0x1621   :  { %v4593_v29 = vmul.f32 1.442695, %v4582_v9  ;;  %v4625_v33 = vmul.f32 1.442695, %v4614_v38  ;;  %v4559_v44 = vsub.f32 %v8178_v47, %v8380_v28  ;;  %v4583_v45 = vsub.f32 %v4535_v17, %v8380_v28  ;;  %v6367_v37 = vpop.eup %6366 }
0x1622   :  { %v4537_v6 = vadd.f32 -0.2876821, %v4529_v21  ;;  %v4530_v42 = vsub.f32 %v4522_v30, %v4482_v18  ;;  %4296 = vadd.xlane.f32.xlu0 %v8271_v10  ;;  %4299 = vadd.xlane.f32.xlu1 %v4298_v0  ;;  %6384 = vpow2.f32 %v4569_v7  ;;  %v4615_v59 = vsub.f32 %v8182_v43, %v8380_v28 }
0x1623   :  { %v8389_v23 = vmax.f32 %v4544_v25, %v8193_v57  ;;  %v6369_v48 = vpop.eup %6368  ;;  %6386 = vpow2.f32 %v4593_v29  ;;  %v4571_v52 = vmul.f32 1.442695, %v4559_v44  ;;  %v4595_v47 = vmul.f32 1.442695, %v4583_v45 }
0x1624   :  { %v4545_v4 = vmax.f32 %v8206_v19, %v4537_v6  ;;  %v6371_v53 = vpop.eup %6370  ;;  %v4538_v17 = vadd.f32 -0.2876821, %v4530_v42  ;;  %v4603_v27 = vadd.f32 %v6369_v48, %v6367_v37  ;;  %6388 = vpow2.f32 %v4625_v33 }
0x1625   :  { %v4627_v5 = vmul.f32 1.442695, %v4615_v59  ;;  %v6373_v10 = vpop.eup %6372  ;;  %6390 = vpow2.f32 %v4571_v52  ;;  %v4560_v46 = vsub.f32 %v8189_v34, %v8389_v23  ;;  %v4584_v43 = vsub.f32 %v8358_v61, %v8389_v23 }
0x1626   :  { %v4616_v26 = vsub.f32 %v8193_v57, %v8389_v23  ;;  %v6375_v1 = vpop.eup %6374  ;;  %v4546_v0 = vmax.f32 %v8217_v3, %v4538_v17  ;;  %v4635_v12 = vadd.f32 %v6371_v53, %v4603_v27  ;;  %6392 = vpow2.f32 %v4595_v47 }
0x1627   :  { %v8400_v49 = vmax.f32 %v4545_v4, %v8210_v58  ;;  %v6377_v25 = vpop.eup %6376  ;;  %v4604_v22 = vadd.f32 %v6375_v1, %v6373_v10  ;;  %6394 = vpow2.f32 %v4627_v5  ;;  %v4573_v30 = vmul.f32 1.442695, %v4560_v46  ;;  %v8654_v46 = vld [vmem:[#allocation30_spill] sm:$0xff] }
0x1628   :  { %v4597_v41 = vmul.f32 1.442695, %v4584_v43  ;;  %v6379_v34 = vpop.eup %6378  ;;  %6396 = vlog2.f32 %v4635_v12  ;;  %v4629_v35 = vmul.f32 1.442695, %v4616_v26  ;;  %v8408_v18 = vmax.f32 %v4546_v0, %v8219_v2 }
0x1629   :  { %v4561_v61 = vsub.f32 %v8206_v19, %v8400_v49  ;;  %v4585_v57 = vsub.f32 %v4537_v6, %v8400_v49  ;;  %v6381_v9 = vpop.eup %6380  ;;  %v4636_v21 = vadd.f32 %v6377_v25, %v4604_v22  ;;  %6398 = vpow2.f32 %v4573_v30  ;;  %v8655_v22 = vld [vmem:[#allocation36_spill] sm:$0xff] }
0x162a   :  { %v4617_v38 = vsub.f32 %v8210_v58, %v8400_v49  ;;  %v6383_v7 = vpop.eup %6382  ;;  %v4732_v29 = vmul.f32 %v8106_v11, %v8106_v11  ;;  %v4605_v33 = vadd.f32 %v6381_v9, %v6379_v34  ;;  %6400 = vpow2.f32 %v4597_v41 }
0x162b   :  { %v4575_v44 = vmul.f32 1.442695, %v4561_v61  ;;  %6402 = vlog2.f32 %v4636_v21  ;;  %v4599_v19 = vmul.f32 1.442695, %v4585_v57  ;;  %v4562_v6 = vsub.f32 %v8217_v3, %v8408_v18  ;;  %v8657_v61 = vld [vmem:[#allocation32_spill] sm:$0xff] }
0x162c   :  { %v4586_v45 = vsub.f32 %v4538_v17, %v8408_v18  ;;  %v6385_v37 = vpop.eup %6384  ;;  %v4637_v42 = vadd.f32 %v6383_v7, %v4605_v33  ;;  %6404 = vpow2.f32 %v4629_v35  ;;  %v4631_v58 = vmul.f32 1.442695, %v4617_v38  ;;  %v8658_v7 = vld [vmem:[#allocation14_spill] sm:$0xff] }
0x162d   :  { %v4618_v59 = vsub.f32 %v8219_v2, %v8408_v18  ;;  %v6387_v48 = vpop.eup %6386  ;;  %v4733_v11 = vmul.f32 %v8215_v40, %v8215_v40  ;;  %v4700_v4 = vmul.f32 0.6931472, %v8143_v32  ;;  %6406 = vpow2.f32 %v4575_v44 }
0x162e   :  { %v4577_v52 = vmul.f32 1.442695, %v4562_v6  ;;  %v6389_v47 = vpop.eup %6388  ;;  %v4739_v3 = vmul.f32 -0.5, %v8086_v51  ;;  %v8422_v53 = vadd.f32 1e-08, %v8180_v36  ;;  %6408 = vlog2.f32 %v4637_v42 }
0x162f   :  { %v4606_v17 = vadd.f32 %v6387_v48, %v6385_v37  ;;  %v6391_v27 = vpop.eup %6390  ;;  %v4740_v5 = vmul.f32 -0.5, %v4732_v29  ;;  %v4726_v2 = vsub.f32 %v7894_v63, %v7894_v63  ;;  %6410 = vpow2.f32 %v4599_v19  ;;  %v8656_v63 = vld [vmem:[#allocation28_spill] sm:$0xff] }
0x1630   :  { %v4601_v10 = vmul.f32 1.442695, %v4586_v45  ;;  %v6393_v40 = vpop.eup %6392  ;;  %v4702_v32 = vmul.f32 0.6931472, %v8654_v46  ;;  %6412 = vpow2.f32 %v4631_v58  ;;  %v4633_v26 = vmul.f32 1.442695, %v4618_v59 }
0x1631   :  { %v4638_v43 = vadd.f32 %v6389_v47, %v4606_v17  ;;  %v6395_v1 = vpop.eup %6394  ;;  %v4741_v51 = vmul.f32 -0.5, %v4733_v11  ;;  %v4715_v0 = vmul.f32 0.5, %v4700_v4  ;;  %v4607_v36 = vadd.f32 %v6393_v40, %v6391_v27  ;;  %v8659_v59 = vld [vmem:[#allocation13_spill] sm:$0xff]  ;;  %v8660_v47 = vld [vmem:[#allocation34_spill] sm:$0xff] }
0x1632   :  { %6414 = vpow2.f32 %v4577_v52  ;;  %v6397_v12 = vpop.eup %6396  ;;  %v4697_v25 = vmul.f32 6.2831855, %v8422_v53  ;;  %v8429_v30 = vadd.f32 1e-08, %v8655_v22  ;;  %v4748_v41 = vmul.f32 %v8656_v63, %v4739_v3 }
0x1633   :  { %6416 = vlog2.f32 %v4638_v43  ;;  %v6399_v34 = vpop.eup %6398  ;;  %v4644_v35 = vmul.f32 0.6931472, %v6397_v12  ;;  %v4704_v57 = vmul.f32 0.6931472, %v8657_v61  ;;  %v4639_v9 = vadd.f32 %v6395_v1, %v4607_v36  ;;  %v8661_v43 = vld [vmem:[#allocation31_spill] sm:$0xff] }
0x1634   :  { %6418 = vpow2.f32 %v4601_v10  ;;  %v6401_v21 = vpop.eup %6400  ;;  %v4734_v38 = vmul.f32 %v4726_v2, %v4726_v2  ;;  %v4727_v29 = vsub.f32 %v8658_v7, %v8658_v7  ;;  %v4716_v33 = vmul.f32 0.5, %v4702_v32 }
0x1635   :  { %6420 = vpow2.f32 %v4633_v26  ;;  %v6403_v44 = vpop.eup %6402  ;;  %v4659_v19 = vadd.f32 %v4644_v35, %v8326_v56  ;;  %v4763_v6 = vsub.f32 %v4748_v41, %v4715_v0  ;;  %v4608_v45 = vadd.f32 %v6401_v21, %v6399_v34  ;;  %v8662_v0 = vld [vmem:[#allocation37_spill] sm:$0xff] }
0x1636   :  { %6422 = vlog2.f32 %v4639_v9  ;;  %v6405_v37 = vpop.eup %6404  ;;  %v4698_v42 = vmul.f32 6.2831855, %v8429_v30  ;;  %v4646_v58 = vmul.f32 0.6931472, %v6403_v44  ;;  %v4750_v48 = vmul.f32 %v8659_v59, %v4740_v5  ;;  %v8663_v21 = vld [vmem:[#allocation33_spill] sm:$0xff] }
0x1637   :  { %6424 = vlog2.f32 %v4697_v25  ;;  %v6407_v11 = vpop.eup %6406  ;;  %v4771_v4 = vsub.f32 %v4763_v6, %v4659_v19  ;;  %v4717_v52 = vmul.f32 0.5, %v4704_v57  ;;  %v4706_v3 = vmul.f32 0.6931472, %v8660_v47 }
0x1638   :  { %v4640_v17 = vadd.f32 %v6405_v37, %v4608_v45  ;;  %v6409_v27 = vpop.eup %6408  ;;  %v4735_v2 = vmul.f32 %v4727_v29, %v4727_v29  ;;  %v4660_v56 = vadd.f32 %v4646_v58, %v8329_v31  ;;  %v4764_v10 = vsub.f32 %v4750_v48, %v4716_v33  ;;  %v8665_v58 = vld [vmem:[#allocation35_spill] sm:$0xff] }
0x1639   :  { %v6411_v40 = vpop.eup %6410  ;;  %v4728_v46 = vsub.f32 %v7548_v15, %v7548_v15  ;;  %4779 = vadd.xlane.f32.xlu1 %v4771_v4  ;;  %v4648_v32 = vmul.f32 0.6931472, %v6409_v27  ;;  %v4752_v26 = vmul.f32 %v8661_v43, %v4741_v51  ;;  %v4708_v36 = vmul.f32 0.6931472, %v8662_v0 }
0x163a   :  { %6426 = vlog2.f32 %v4640_v17  ;;  %v6413_v5 = vpop.eup %6412  ;;  %v4772_v1 = vsub.f32 %v4764_v10, %v4660_v56  ;;  %v4609_v12 = vadd.f32 %v6411_v40, %v6407_v11  ;;  %v4742_v22 = vmul.f32 -0.5, %v4734_v38  ;;  %v8664_v38 = vld [vmem:[#allocation17_spill] sm:$0xff]  ;;  %v8666_v10 = vld [vmem:[#allocation38_spill] sm:$0xff] }
0x163b   :  { %6428 = vlog2.f32 %v4698_v42  ;;  %v4661_v31 = vadd.f32 %v4648_v32, %v8334_v50  ;;  %v4765_v63 = vsub.f32 %v4752_v26, %v4717_v52  ;;  %v4718_v41 = vmul.f32 0.5, %v4706_v3 }
0x163c   :  { %v6415_v25 = vpop.eup %6414  ;;  %v4743_v35 = vmul.f32 -0.5, %v4735_v2  ;;  %6430 = vrcp.f32 %v8422_v53  ;;  %4781 = vadd.xlane.f32.xlu0 %v4772_v1  ;;  %v4641_v15 = vadd.f32 %v6413_v5, %v4609_v12  ;;  %v4736_v61 = vmul.f32 %v4728_v46, %v4728_v46 }
0x163d   :  { %v6417_v34 = vpop.eup %6416  ;;  %v8446_v57 = vsub.f32 %v4765_v63, %v4661_v31  ;;  %v4754_v7 = vmul.f32 %v8663_v21, %v4742_v22  ;;  %v4719_v33 = vmul.f32 0.5, %v4708_v36  ;;  %v4710_v44 = vmul.f32 0.6931472, %v8664_v38  ;;  %v8667_v21 = vld [vmem:[#allocation19_spill] sm:$0xff]  ;;  %v8670_v38 = vld [vmem:[#allocation40_spill] sm:$0xff] }
0x163e   :  { %v6419_v51 = vpop.eup %6418  ;;  %v4650_v9 = vmul.f32 0.6931472, %v6417_v34  ;;  %6432 = vlog2.f32 %v4641_v15  ;;  %v4729_v6 = vsub.f32 %v7554_v13, %v7554_v13  ;;  %v4756_v59 = vmul.f32 %v8665_v58, %v4743_v35 }
0x163f   :  { %v6421_v29 = vpop.eup %6420  ;;  %v4610_v50 = vadd.f32 %v6419_v51, %v6415_v25  ;;  %v4766_v45 = vsub.f32 %v4754_v7, %v4718_v41  ;;  %6434 = vrcp.f32 %v8429_v30  ;;  %v4744_v11 = vmul.f32 -0.5, %v4736_v61  ;;  %v8668_v7 = vld [vmem:[#allocation39_spill] sm:$0xff] }
0x1640   :  { %v6423_v19 = vpop.eup %6422  ;;  %v4662_v53 = vadd.f32 %v4650_v9, %v8367_v55  ;;  %v4767_v47 = vsub.f32 %v4756_v59, %v4719_v33  ;;  %v4720_v3 = vmul.f32 0.5, %v4710_v44  ;;  %v4737_v13 = vmul.f32 %v4729_v6, %v4729_v6  ;;  %v8669_v33 = vld [vmem:[#allocation20_spill] sm:$0xff] }
0x1641   :  { %v6425_v37 = vpop.eup %6424  ;;  %v4652_v42 = vmul.f32 0.6931472, %v6423_v19  ;;  %v4642_v48 = vadd.f32 %v6421_v29, %v4610_v50  ;;  %v4730_v55 = vsub.f32 %v7560_v20, %v7560_v20  ;;  %v4758_v40 = vmul.f32 %v8666_v10, %v4744_v11  ;;  %v8672_v19 = vld [vmem:[#allocation41_spill] sm:$0xff]  ;;  %v8675_v11 = vld [vmem:[#allocation18_spill] sm:$0xff] }
0x1642   :  { %v8455_v4 = vsub.f32 %v4766_v45, %v4662_v53  ;;  %v4712_v27 = vmul.f32 0.6931472, %v6425_v37  ;;  %v4313_v29 = vmul.f32 %v8668_v7, %v8667_v21  ;;  %v4314_v44 = vmul.f32 %v8670_v38, %v8669_v33  ;;  %v8673_v45 = vld [vmem:[#allocation22_spill] sm:$0xff]  ;;  %v6478_v33 = vld [vmem:[#allocation2 + $0x40] sm:$0xff] }
0x1643   :  { %v4663_v52 = vadd.f32 %v4652_v42, %v8380_v28  ;;  %6436 = vlog2.f32 %v4642_v48  ;;  %v4768_v43 = vsub.f32 %v4758_v40, %v4720_v3  ;;  %v4745_v28 = vmul.f32 -0.5, %v4737_v13  ;;  %v8674_v37 = vld [vmem:[#allocation42_spill] sm:$0xff]  ;;  %v8677_v13 = vld [vmem:[#allocation23_spill] sm:$0xff] }
0x1644   :  { %v6427_v17 = vpop.eup %6426  ;;  %v4738_v26 = vmul.f32 %v4730_v55, %v4730_v55  ;;  %v4721_v5 = vmul.f32 0.5, %v4712_v27  ;;  %v4329_v50 = vadd.f32 %v4314_v44, %v4313_v29  ;;  %v4316_v42 = vmul.f32 %v8674_v37, %v8673_v45  ;;  %v8678_v55 = vld [vmem:[#allocation43_spill] sm:$0xff]  ;;  %v8682_v7 = vld [vmem:[#allocation26_spill] sm:$0xff] }
0x1645   :  { %v6429_v2 = vpop.eup %6428  ;;  %v8460_v30 = vsub.f32 %v4767_v47, %v4663_v52  ;;  %v4654_v56 = vmul.f32 0.6931472, %v6427_v17  ;;  %v8676_v47 = vld [vmem:[#allocation45_spill] sm:$0xff]  ;;  %v4317_v27 = vmul.f32 %v8678_v55, %v8677_v13  ;;  %v4320_v29 = vmul.f32 %v8362_v54, %v8682_v7  ;;  %v6480_v54 = vld [vmem:[#allocation2 + $0x50] sm:$0xff]  ;;  %v6481_v55 = vld [vmem:[#allocation2 + $0x58] sm:$0xff] }
0x1646   :  { %v6431_v46 = vpop.eup %6430  ;;  %v4714_v1 = vmul.f32 0.6931472, %v6429_v2  ;;  %v4746_v22 = vmul.f32 -0.5, %v4738_v26  ;;  %v4321_v38 = vmul.f32 %v6478_v33, %v8274_v39  ;;  %v8684_v7 = vld [vmem:[#allocation15_spill] sm:$0xff] }
0x1647   :  { %v4664_v32 = vadd.f32 %v4654_v56, %v8389_v23  ;;  %v4760_v20 = vmul.f32 %v6431_v46, %v4745_v28 }
0x1648   :  { %v6433_v0 = vpop.eup %6432  ;;  %v4722_v41 = vmul.f32 0.5, %v4714_v1 }
0x1649   :  { %v8464_v36 = vsub.f32 %v4768_v43, %v4664_v32  ;;  %v4656_v12 = vmul.f32 0.6931472, %v6433_v0  ;;  %v6435_v25 = vpop.eup %6434  ;;  %v4769_v63 = vsub.f32 %v4760_v20, %v4721_v5  ;;  %v8679_v32 = vld [vmem:[#allocation24_spill] sm:$0xff] }
0x164a   :  { %v4762_v15 = vmul.f32 %v6435_v25, %v4746_v22  ;;  %v8680_v43 = vld [vmem:[#allocation44_spill] sm:$0xff] }
0x164b   :  { %v4665_v31 = vadd.f32 %v4656_v12, %v8400_v49  ;;  %v8671_v49 = vld [vmem:[#allocation21_spill] sm:$0xff]  ;;  %v4318_v28 = vmul.f32 %v8680_v43, %v8679_v32 }
0x164c   :  { %v4770_v61 = vsub.f32 %v4762_v15, %v4722_v41  ;;  %v4315_v6 = vmul.f32 %v8672_v19, %v8671_v49 }
0x164d   :  { %v6437_v34 = vpop.eup %6436  ;;  %v8467_v35 = vsub.f32 %v4769_v63, %v4665_v31 }
0x164e   :  { %v4658_v23 = vmul.f32 0.6931472, %v6437_v34  ;;  %v4330_v53 = vadd.f32 %v4329_v50, %v4315_v6  ;;  %v8681_v34 = vld [vmem:[#allocation25_spill] sm:$0xff]  ;;  %v6479_v6 = vld [vmem:[#allocation2 + $0x48] sm:$0xff] }
0x164f   :  { %v4301_v13 = vadd.f32 %v6479_v6, %v6478_v33 }
0x1650   :  { %v4666_v51 = vadd.f32 %v4658_v23, %v8408_v18  ;;  %v4331_v17 = vadd.f32 %v4330_v53, %v4316_v42  ;;  %v4319_v23 = vmul.f32 %v8360_v8, %v8681_v34  ;;  %v4322_v53 = vmul.f32 %v6479_v6, %v8277_v62 }
0x1652   :  { %v8470_v9 = vsub.f32 %v4770_v61, %v4666_v51  ;;  %v4332_v46 = vadd.f32 %v4331_v17, %v4317_v27  ;;  %v4324_v27 = vmul.f32 %v6481_v55, %v8676_v47 }
0x1654   :  { %v4333_v25 = vadd.f32 %v4332_v46, %v4318_v28 }
0x1656   :  { %v4334_v51 = vadd.f32 %v4333_v25, %v4319_v23 }
0x1658   :  { %v4335_v49 = vadd.f32 %v4334_v51, %v4320_v29 }
0x165a   :  { %v4336_v8 = vadd.f32 %v4335_v49, %v4321_v38 }
0x1696   :  { %v8480_v58 = vpop.xlane.xlu0 %4182 }
0x1697   :  { %v8482_v18 = vpop.xlane.xlu1 %4185  ;;  %v4201_v59 = vsub.f32 %v8274_v39, %v8480_v58  ;;  %v4202_v48 = vsub.f32 %v8277_v62, %v8480_v58 }
0x1698   :  { %v4203_v52 = vsub.f32 %v8675_v11, %v8482_v18  ;;  %v4204_v3 = vsub.f32 %v8676_v47, %v8482_v18  ;;  %v6484_v47 = vld [vmem:[#allocation2 + $0x70] sm:$0xff] }
0x1699   :  { %v4225_v2 = vmul.f32 1.442695, %v4201_v59  ;;  %v4227_v56 = vmul.f32 1.442695, %v4202_v48  ;;  %v4337_v59 = vadd.f32 %v4336_v8, %v4322_v53  ;;  %v8686_v53 = vld [vmem:[#allocation29_spill] sm:$0xff] }
0x169a   :  { %v4229_v10 = vmul.f32 1.442695, %v4203_v52  ;;  %v4231_v40 = vmul.f32 1.442695, %v4204_v3  ;;  %v4323_v3 = vmul.f32 %v6480_v54, %v8675_v11  ;;  %v6483_v11 = vld [vmem:[#allocation2 + $0x68] sm:$0xff] }
0x169b   :  { %6438 = vpow2.f32 %v4225_v2  ;;  %v6482_v2 = vld [vmem:[#allocation2 + $0x60] sm:$0xff]  ;;  %v4326_v46 = vmul.f32 %v6483_v11, %v8306_v14 }
0x169c   :  { %6440 = vpow2.f32 %v4227_v56  ;;  %v4338_v17 = vadd.f32 %v4337_v59, %v4323_v3  ;;  %v4325_v56 = vmul.f32 %v6482_v2, %v8303_v16  ;;  %v4307_v32 = vadd.f32 %v6483_v11, %v6482_v2 }
0x169d   :  { %6442 = vpow2.f32 %v4229_v10  ;;  %v4304_v10 = vadd.f32 %v6481_v55, %v6480_v54 }
0x169e   :  { %6444 = vpow2.f32 %v4231_v40  ;;  %v4339_v62 = vadd.f32 %v4338_v17, %v4324_v27 }
0x169f   :  { %v8496_v26 = vpop.xlane.xlu0 %4188  ;;  %v8498_v5 = vpop.xlane.xlu1 %4191 }
0x16a0   :  { %v4205_v1 = vsub.f32 %v8303_v16, %v8496_v26  ;;  %v4206_v0 = vsub.f32 %v8306_v14, %v8496_v26  ;;  %v4207_v12 = vsub.f32 %v8309_v24, %v8498_v5  ;;  %v4208_v20 = vsub.f32 %v8312_v60, %v8498_v5 }
0x16a1   :  { %v4340_v40 = vadd.f32 %v4339_v62, %v4325_v56 }
0x16a2   :  { %v4233_v22 = vmul.f32 1.442695, %v4205_v1  ;;  %v4235_v31 = vmul.f32 1.442695, %v4206_v0  ;;  %v4237_v63 = vmul.f32 1.442695, %v4207_v12  ;;  %v4327_v1 = vmul.f32 %v6484_v47, %v8309_v24 }
0x16a3   :  { %v4239_v41 = vmul.f32 1.442695, %v4208_v20  ;;  %v4341_v43 = vadd.f32 %v4340_v40, %v4326_v46  ;;  %v4246_v0 = vpop.xlane.xlu1 %4245 }
0x16a4   :  { %6446 = vpow2.f32 %v4233_v22 }
0x16a5   :  { %6448 = vpow2.f32 %v4235_v31  ;;  %v6439_v15 = vpop.eup %6438  ;;  %v4342_v16 = vadd.f32 %v4341_v43, %v4327_v1 }
0x16a6   :  { %6450 = vpow2.f32 %v4237_v63  ;;  %v6441_v61 = vpop.eup %6440 }
0x16a7   :  { %6452 = vpow2.f32 %v4239_v41  ;;  %v6443_v21 = vpop.eup %6442  ;;  %v4253_v44 = vadd.f32 %v6441_v61, %v6439_v15  ;;  %v4252_v20 = vpop.xlane.xlu1 %4251  ;;  %v8683_v15 = vld [vmem:[#allocation16_spill] sm:$0xff] }
0x16a8   :  { %v6445_v50 = vpop.eup %6444  ;;  %6454 = vlog2.f32 %v4246_v0 }
0x16a9   :  { %4254 = vadd.xlane.f32.xlu0 %v4253_v44  ;;  %v4256_v19 = vadd.f32 %v6445_v50, %v6443_v21  ;;  %v8685_v50 = vld [vmem:[#allocation27_spill] sm:$0xff] }
0x16ab   :  { %4257 = vadd.xlane.f32.xlu1 %v4256_v19  ;;  %v4294_v24 = vpop.xlane.xlu1 %4293 }
0x16ae   :  { %v6447_v45 = vpop.eup %6446 }
0x16af   :  { %v6449_v37 = vpop.eup %6448  ;;  %v4300_v31 = vpop.xlane.xlu1 %4299 }
0x16b0   :  { %v6451_v42 = vpop.eup %6450  ;;  %v4259_v48 = vadd.f32 %v6449_v37, %v6447_v45 }
0x16b1   :  { %v6453_v52 = vpop.eup %6452 }
0x16b2   :  { %4260 = vadd.xlane.f32.xlu0 %v4259_v48  ;;  %v4262_v39 = vadd.f32 %v6453_v52, %v6451_v42  ;;  %v6455_v22 = vpop.eup %6454 }
0x16b3   :  { %v4268_v63 = vmul.f32 0.6931472, %v6455_v22 }
0x16b4   :  { %4263 = vadd.xlane.f32.xlu1 %v4262_v39 }
0x16b5   :  { %v4282_v51 = vadd.f32 %v4268_v63, %v8683_v15 }
0x16b6   :  { %4783 = vadd.xlane.f32.xlu0 %v8446_v57  ;;  %v6485_v57 = vld [vmem:[#allocation2 + $0x78] sm:$0xff] }
0x16b7   :  { %v4310_v28 = vadd.f32 %v6485_v57, %v6484_v47  ;;  %v4354_v44 = vmul.f32 %v4294_v24, %v4282_v51 }
0x16b8   :  { %4302 = vadd.xlane.f32.xlu1 %v4301_v13 }
0x16b9   :  { %v4363_v8 = vsel %vm4361_vm0, %v4354_v44, 0.0 }
0x16ba   :  { %4785 = vadd.xlane.f32.xlu0 %v8455_v4  ;;  %v4328_v4 = vmul.f32 %v6485_v57, %v8312_v60 }
0x16bc   :  { %4305 = vadd.xlane.f32.xlu1 %v4304_v10  ;;  %v4343_v14 = vadd.f32 %v4342_v16, %v4328_v4 }
0x16be   :  { %4787 = vadd.xlane.f32.xlu0 %v8460_v30  ;;  %v4243_v30 = vpop.xlane.xlu0 %4242 }
0x16bf   :  { %6456 = vlog2.f32 %v4243_v30 }
0x16c0   :  { %4308 = vadd.xlane.f32.xlu1 %v4307_v32 }
0x16c2   :  { %4789 = vadd.xlane.f32.xlu0 %v8464_v36  ;;  %v4249_v12 = vpop.xlane.xlu0 %4248 }
0x16c3   :  { %6458 = vlog2.f32 %v4249_v12 }
0x16c4   :  { %4311 = vadd.xlane.f32.xlu1 %v4310_v28  ;;  %6460 = vlog2.f32 %v4252_v20 }
0x16c6   :  { %4791 = vadd.xlane.f32.xlu0 %v8467_v35  ;;  %v4291_v25 = vpop.xlane.xlu0 %4290  ;;  %v4780_v34 = vpop.xlane.xlu1 %4779 }
0x16c7   :  { %v4795_v32 = vmul.f32 %v4780_v34, %v4291_v25 }
0x16c8   :  { %4793 = vadd.xlane.f32.xlu1 %v8470_v9 }
0x16c9   :  { %v6457_v60 = vpop.eup %6456  ;;  %v4803_v12 = vsel %vm4361_vm0, %v4795_v32, 0.0 }
0x16ca   :  { %4344 = vadd.xlane.f32.xlu0 %v4343_v14  ;;  %v4297_v36 = vpop.xlane.xlu0 %4296  ;;  %v4266_v9 = vmul.f32 0.6931472, %v6457_v60 }
0x16cc   :  { %v4281_v29 = vadd.f32 %v4266_v9, %v8684_v7 }
0x16cd   :  { %v6459_v41 = vpop.eup %6458 }
0x16ce   :  { %v4782_v35 = vpop.xlane.xlu0 %4781  ;;  %v4270_v23 = vmul.f32 0.6931472, %v6459_v41  ;;  %v6461_v21 = vpop.eup %6460  ;;  %v4353_v19 = vmul.f32 %v4291_v25, %v4281_v29 }
0x16cf   :  { %v4272_v38 = vmul.f32 0.6931472, %v6461_v21  ;;  %v4796_v56 = vmul.f32 %v4782_v35, %v4294_v24 }
0x16d0   :  { %v4283_v49 = vadd.f32 %v4270_v23, %v8685_v50  ;;  %v4362_v42 = vsel %vm4361_vm0, %v4353_v19, 0.0 }
0x16d1   :  { %v4284_v45 = vadd.f32 %v4272_v38, %v8686_v53  ;;  %v4364_v52 = vadd.f32 %v4363_v8, %v4362_v42  ;;  %v4804_v16 = vsel %vm4361_vm0, %v4796_v56, 0.0 }
0x16d2   :  { %v4355_v6 = vmul.f32 %v4297_v36, %v4283_v49  ;;  %v4805_v25 = vadd.f32 %v4804_v16, %v4803_v12 }
0x16d3   :  { %v4356_v3 = vmul.f32 %v4300_v31, %v4284_v45 }
0x16d4   :  { %v4365_v54 = vsel %vm4361_vm0, %v4355_v6, 0.0 }
0x16d5   :  { %v4366_v2 = vadd.f32 %v4365_v54, %v4364_v52  ;;  %v4367_v10 = vsel %vm4361_vm0, %v4356_v3, 0.0 }
0x16d7   :  { %v4368_v1 = vadd.f32 %v4367_v10, %v4366_v2 }
0x1736   :  { %v4255_v61 = vpop.xlane.xlu0 %4254 }
0x1737   :  { %6462 = vlog2.f32 %v4255_v61 }
0x1738   :  { %v4258_v33 = vpop.xlane.xlu1 %4257 }
0x1739   :  { %6464 = vlog2.f32 %v4258_v33 }
0x173f   :  { %v4261_v37 = vpop.xlane.xlu0 %4260 }
0x1740   :  { %6466 = vlog2.f32 %v4261_v37 }
0x1741   :  { %v4264_v59 = vpop.xlane.xlu1 %4263  ;;  %v6463_v48 = vpop.eup %6462 }
0x1742   :  { %6468 = vlog2.f32 %v4264_v59  ;;  %v4274_v39 = vmul.f32 0.6931472, %v6463_v48 }
0x1743   :  { %v4784_v17 = vpop.xlane.xlu0 %4783  ;;  %v6465_v13 = vpop.eup %6464 }
0x1744   :  { %v4276_v55 = vmul.f32 0.6931472, %v6465_v13  ;;  %v4285_v62 = vadd.f32 %v4274_v39, %v8480_v58  ;;  %v4797_v43 = vmul.f32 %v4784_v17, %v4297_v36 }
0x1745   :  { %v4303_v27 = vpop.xlane.xlu1 %4302 }
0x1746   :  { %v4357_v40 = vmul.f32 %v4303_v27, %v4285_v62  ;;  %v4286_v46 = vadd.f32 %v4276_v55, %v8482_v18  ;;  %v4806_v20 = vsel %vm4361_vm0, %v4797_v43, 0.0 }
0x1747   :  { %v4786_v11 = vpop.xlane.xlu0 %4785 }
0x1748   :  { %v4369_v47 = vsel %vm4361_vm0, %v4357_v40, 0.0  ;;  %v4798_v4 = vmul.f32 %v4786_v11, %v4300_v31  ;;  %v4807_v31 = vadd.f32 %v4806_v20, %v4805_v25 }
0x1749   :  { %v4306_v57 = vpop.xlane.xlu1 %4305  ;;  %v4370_v24 = vadd.f32 %v4369_v47, %v4368_v1 }
0x174a   :  { %v6467_v28 = vpop.eup %6466  ;;  %v4358_v14 = vmul.f32 %v4306_v57, %v4286_v46  ;;  %v4808_v35 = vsel %vm4361_vm0, %v4798_v4, 0.0 }
0x174b   :  { %v4278_v58 = vmul.f32 0.6931472, %v6467_v28  ;;  %v4788_v30 = vpop.xlane.xlu0 %4787  ;;  %v4809_v61 = vadd.f32 %v4808_v35, %v4807_v31  ;;  %v8687_v28 = vlaneseq }
0x174c   :  { %v6469_v0 = vpop.eup %6468  ;;  %v4799_v18 = vmul.f32 %v4788_v30, %v4303_v27  ;;  %v4371_v22 = vsel %vm4361_vm0, %v4358_v14, 0.0 }
0x174d   :  { %v4280_v36 = vmul.f32 0.6931472, %v6469_v0  ;;  %v4309_v60 = vpop.xlane.xlu1 %4308  ;;  %v4287_v63 = vadd.f32 %v4278_v58, %v8496_v26  ;;  %v4372_v23 = vadd.f32 %v4371_v22, %v4370_v24  ;;  %v4828_v1 = vand.u32 127, %v8687_v28 }
0x174e   :  { %v4810_v15 = vsel %vm4361_vm0, %v4799_v18, 0.0 }
0x174f   :  { %v4359_v41 = vmul.f32 %v4309_v60, %v4287_v63  ;;  %v4790_v9 = vpop.xlane.xlu0 %4789  ;;  %v4288_v34 = vadd.f32 %v4280_v36, %v8498_v5  ;;  %v4811_v26 = vadd.f32 %v4810_v15, %v4809_v61  ;;  %vm4835_vm1 = vcmp.eq.s32.totalorder %v4828_v1, 0 }
0x1750   :  { %v4800_v51 = vmul.f32 %v4790_v9, %v4306_v57  ;;  %vm4838_vm2 = vcmp.eq.s32.totalorder %v4828_v1, 1  ;;  %vm4875_vm3 = vcmp.eq.s32.totalorder %v4828_v1, 2 }
0x1751   :  { %v4373_v21 = vsel %vm4361_vm0, %v4359_v41, 0.0  ;;  %v4312_v7 = vpop.xlane.xlu1 %4311 }
0x1752   :  { %v4374_v29 = vadd.f32 %v4373_v21, %v4372_v23  ;;  %v4812_v33 = vsel %vm4361_vm0, %v4800_v51, 0.0  ;;  %v4360_v38 = vmul.f32 %v4312_v7, %v4288_v34 }
0x1753   :  { %v4792_v44 = vpop.xlane.xlu0 %4791  ;;  %v4813_v19 = vadd.f32 %v4812_v33, %v4811_v26 }
0x1754   :  { %v4375_v50 = vsel %vm4361_vm0, %v4360_v38, 0.0  ;;  %v4801_v49 = vmul.f32 %v4792_v44, %v4309_v60 }
0x1755   :  { %v4794_v8 = vpop.xlane.xlu1 %4793  ;;  %v4376_v5 = vadd.f32 %v4375_v50, %v4374_v29 }
0x1756   :  { %v4814_v6 = vsel %vm4361_vm0, %v4801_v49, 0.0  ;;  %v4802_v53 = vmul.f32 %v4794_v8, %v4312_v7 }
0x1757   :  { %v4815_v45 = vadd.f32 %v4814_v6, %v4813_v19  ;;  %4377 = vadd.xlane.f32.xlu1 %v4376_v5  ;;  %v4345_v37 = vpop.xlane.xlu0 %4344 }
0x1758   :  { %v4816_v42 = vsel %vm4361_vm0, %v4802_v53, 0.0  ;;  %v4346_v59 = vrot.slane %v4345_v37, 4 }
0x1759   :  { %v4817_v48 = vadd.f32 %v4816_v42, %v4815_v45 }
0x175a   :  { %v4347_v52 = vadd.f32 %v4346_v59, %v4345_v37 }
0x175b   :  { %4818 = vadd.xlane.f32.xlu0 %v4817_v48 }
0x175c   :  { %v4348_v54 = vrot.slane %v4347_v52, 2 }
0x175e   :  { %v4349_v3 = vadd.f32 %v4348_v54, %v4347_v52 }
0x1760   :  { %v4350_v39 = vrot.slane %v4349_v3, 1 }
0x1762   :  { %v4351_v17 = vadd.f32 %v4350_v39, %v4349_v3 }
0x1764   :  { %5559 = vpush %v4351_v17 }
0x1795   :  { %s5560_s7 = spop %5559 }
0x17e4   :  { %v4378_v13 = vpop.xlane.xlu1 %4377 }
0x17e5   :  { %v4379_v55 = vrot.slane %v4378_v13, 4 }
0x17e7   :  { %v4380_v27 = vadd.f32 %v4379_v55, %v4378_v13 }
0x17e8   :  { %v4819_v62 = vpop.xlane.xlu0 %4818 }
0x17e9   :  { %v4381_v2 = vrot.slane %v4380_v27, 2  ;;  %v4820_v56 = vrot.slane %v4819_v62, 4 }
0x17eb   :  { %v4821_v10 = vadd.f32 %v4820_v56, %v4819_v62  ;;  %v4382_v40 = vadd.f32 %v4381_v2, %v4380_v27 }
0x17ed   :  { %v4822_v11 = vrot.slane %v4821_v10, 2  ;;  %v4383_v46 = vrot.slane %v4382_v40, 1 }
0x17ef   :  { %v4384_v32 = vadd.f32 %v4383_v46, %v4382_v40  ;;  %v4823_v43 = vadd.f32 %v4822_v11, %v4821_v10 }
0x17f1   :  { %5561 = vpush %v4384_v32  ;;  %v4824_v47 = vrot.slane %v4823_v43, 1 }
0x17f3   :  { %v4825_v57 = vadd.f32 %v4824_v47, %v4823_v43 }
0x17f5   :  { %5563 = vpush %v4825_v57 }
0x1822   :  { %s5562_s0 = spop %5561 }
0x1823   :  { %s4386_s21 = ssub.f32 %s5560_s7, %s5562_s0 }
0x1825   :  { %v4836_v16 = vstv %s4386_s21 }
0x1826   :  { %s5564_s11 = spop %5563  ;;  %v4837_v14 = vsel %vm4835_vm1, %v4836_v16, 0.0 }
0x1827   :  { %v4839_v4 = vstv %s5564_s11 }
0x1828   :  { %v4840_v58 = vsel %vm4838_vm2, %v4839_v4, 0.0 }
0x1829   :  { %v4841_v30 = vadd.f32 %v4840_v58, %v4837_v14 }
0x182b   :  { %v4859_v0 = vsel %vm4838_vm2, %v4841_v30, 0.0  ;;  %v4848_v12 = vsel %vm4835_vm1, %v4841_v30, 0.0 }
0x182c   :  { %4860 = vadd.xlane.f32.xlu0 %v4859_v0  ;;  %4849 = vadd.xlane.f32.xlu1 %v4848_v12 }
0x18b9   :  { %v4861_v20 = vpop.xlane.xlu0 %4860  ;;  %v4850_v24 = vpop.xlane.xlu1 %4849 }
0x18ba   :  { %v4862_v18 = vrot.slane %v4861_v20, 4  ;;  %v4851_v25 = vrot.slane %v4850_v24, 4 }
0x18bc   :  { %v4863_v36 = vadd.f32 %v4862_v18, %v4861_v20  ;;  %v4852_v22 = vadd.f32 %v4851_v25, %v4850_v24 }
0x18be   :  { %v4864_v60 = vrot.slane %v4863_v36, 2  ;;  %v4853_v63 = vrot.slane %v4852_v22, 2 }
0x18c0   :  { %v4865_v35 = vadd.f32 %v4864_v60, %v4863_v36  ;;  %v4854_v31 = vadd.f32 %v4853_v63, %v4852_v22 }
0x18c2   :  { %v4855_v41 = vrot.slane %v4854_v31, 1  ;;  %v4866_v9 = vrot.slane %v4865_v35, 1 }
0x18c4   :  { %v4856_v34 = vadd.f32 %v4855_v41, %v4854_v31  ;;  %v4867_v23 = vadd.f32 %v4866_v9, %v4865_v35 }
0x18c6   :  { %5565 = vpush %v4856_v34 }
0x18c7   :  { %5567 = vpush %v4867_v23 }
0x18f7   :  { %s5566_s12 = spop %5565 }
0x18f8   :  { %s4858_s6 = smul.f32 0.001953125, %s5566_s12  ;;  %s5568_s28 = spop %5567 }
0x18f9   :  { %s4869_s13 = smul.f32 0.001953125, %s5568_s28 }
0x18fa   :  { %v4870_v15 = vstv %s4858_s6 }
0x18fb   :  { %v4872_v51 = vstv %s4869_s13  ;;  %s4876_s15 = ssub.f32 %s4858_s6, %s4869_s13  ;;  %v4871_v61 = vsel %vm4835_vm1, %v4870_v15, 0.0 }
0x18fc   :  { %v4873_v21 = vsel %vm4838_vm2, %v4872_v51, 0.0 }
0x18fd   :  { %s4877_s16 = ssub.f32 0.0, %s4876_s15  ;;  %v4874_v7 = vadd.f32 %v4873_v21, %v4871_v61 }
0x18ff   :  { %v4878_v29 = vstv %s4877_s16 }
0x1900   :  { %v4879_v33 = vsel %vm4875_vm3, %v4878_v29, 0.0 }
0x1901   :  { %v4880_v38 = vadd.f32 %v4879_v33, %v4874_v7 }
0x1903   :  { %4881 = vst [vmem:[%s8570_s10] sm:$0xff] %v4880_v38 }
0x1904   :  { %4886 = vsyncpa [#allocation3], 1 }
0x1905   :  { %4887 = vsyncpa [#allocation5], 1 }
0x1906   :  { %4888 = vsyncpa [#allocation8], 1 }

</bundles_post_ra>
